<compile_context>
chip_gen: v7x
topology: tpu7x:2x2x1
jax: 0.10.0
libtpu: 0.0.40
codegen_flags: <defaults>
</compile_context>

<pallas_src>
import math
import jax
import jax.numpy as jnp
from jax.experimental import pallas as pl
from jax.experimental.pallas import tpu as pltpu

GN_GROUPS = 32
GN_EPS = 1e-6
LN_EPS = 1e-5
_NEG_INF = -1e30


# --------------------------------------------------------------------------------------
# Stage 1: GroupNorm + conv_input + LayerNorm_1 + q/k/v projections (row-coupled work).
# --------------------------------------------------------------------------------------
def _make_stage1_kernel(n_groups):
    def kernel(x_ref, ctx_ref,
               m_ref, mt_ref, gng_ref, gnb_ref,
               cinw_ref, cinb_ref, ln1g_ref, ln1b_ref,
               wq1_ref, wk1_ref, wv1_ref, wk2_ref, wv2_ref,
               xt_ref, q1_ref, k1_ref, v1_ref, k2_ref, v2_ref):
        f32 = jnp.float32
        bf16 = jnp.bfloat16

        x_cm = x_ref[0]                                   # (C, HW) f32, channel-major
        C, HW = x_cm.shape
        gs = C // n_groups

        def mm(a, b):                                     # bf16 operands, f32 accumulate
            return jnp.dot(a, b, preferred_element_type=f32)

        def mm_stat(a, b):                                # tiny GroupNorm stat matmuls
            return jnp.dot(a, b, precision=jax.lax.Precision.HIGHEST,
                           preferred_element_type=f32)

        # ---- GroupNorm(32, C, eps=1e-6): centred two-pass stats, channel-major ----
        M = m_ref[...]                                    # (C, G) one-hot channel->group
        MT = mt_ref[...]                                  # (G, C)
        inv_n = 1.0 / float(HW * gs)
        ch_sum = jnp.sum(x_cm, axis=1, keepdims=True)                        # (C, 1)
        mean_c = mm_stat(M, mm_stat(MT, ch_sum) * inv_n)                     # (C, 1)
        d = x_cm - mean_c
        ch_ss = jnp.sum(d * d, axis=1, keepdims=True)                        # (C, 1)
        inv_c = mm_stat(M, jax.lax.rsqrt(mm_stat(MT, ch_ss) * inv_n + GN_EPS))
        xn_bf = (d * (inv_c * gng_ref[...]) + gnb_ref[...]).astype(bf16)     # (C, HW)

        # ---- conv_input (1x1 == channel matmul); channel-major -> token-major
        #      transpose folded into the matmul (contract dim 0 of both operands) ----
        xt = jax.lax.dot_general(xn_bf, cinw_ref[...],
                                 (((0,), (0,)), ((), ())),
                                 preferred_element_type=f32) + cinb_ref[...]  # (HW, C)
        xt_ref[0] = xt

        # ---- LayerNorm_1 + self-attention projections (1/sqrt(d) folded into Wq) ----
        mu = jnp.mean(xt, axis=-1, keepdims=True)
        dv = xt - mu
        var = jnp.mean(dv * dv, axis=-1, keepdims=True)
        h1_bf = (dv * jax.lax.rsqrt(var + LN_EPS) * ln1g_ref[...]
                 + ln1b_ref[...]).astype(bf16)
        q1_ref[0] = mm(h1_bf, wq1_ref[...]).astype(bf16)
        k1_ref[0] = mm(h1_bf, wk1_ref[...]).astype(bf16)
        v1_ref[0] = mm(h1_bf, wv1_ref[...]).astype(bf16)

        # ---- cross-attention k/v from the (padded) context ----
        ctx = ctx_ref[0]                                   # (Sc_pad, Dc) bf16
        k2_ref[0] = mm(ctx, wk2_ref[...]).astype(bf16)
        v2_ref[0] = mm(ctx, wv2_ref[...]).astype(bf16)

    return kernel


# --------------------------------------------------------------------------------------
# Stage 2: per q-row tile: self-attn, cross-attn, GeGLU, conv_output + residuals.
# --------------------------------------------------------------------------------------
def _make_stage2_kernel(n_heads):
    def kernel(xcm_ref, xt_ref, q1_ref, k1_ref, v1_ref, k2_ref, v2_ref, cbias_ref,
               a1ow_ref, a1ob_ref,
               ln2g_ref, ln2b_ref, wq2_ref, a2ow_ref, a2ob_ref,
               ln3g_ref, ln3b_ref,
               gaw_ref, gab_ref, ggw_ref, ggb_ref, g2w_ref, g2b_ref,
               cow_ref, cob_ref,
               out_ref, att_o_ref):
        f32 = jnp.float32
        bf16 = jnp.bfloat16

        x = xt_ref[0]                                      # (T, C) f32  residue_short
        T, C = x.shape
        d_head = C // n_heads

        def mm(a, b):
            return jnp.dot(a, b, preferred_element_type=f32)

        def mm_nt(a, b):                                   # (M,K) x (N,K) -> (M,N)
            return jax.lax.dot_general(a, b, (((1,), (1,)), ((), ())),
                                       preferred_element_type=f32)

        def ln(v, g, b):
            mu = jnp.mean(v, axis=-1, keepdims=True)
            dv = v - mu
            var = jnp.mean(dv * dv, axis=-1, keepdims=True)
            return dv * jax.lax.rsqrt(var + LN_EPS) * g + b

        def mha(q_bf, k_bf, v_bf, bias):
            # Per-head softmax(QK^T)V; each head's output lands in its column slice of
            # the (T, C) VMEM scratch so a SINGLE K=C matmul applies the out-projection.
            for h in range(n_heads):
                sl = slice(h * d_head, (h + 1) * d_head)
                s = mm_nt(q_bf[:, sl], k_bf[:, sl])                 # (T, Sk) f32
                if bias is not None:
                    s = s + bias                                    # mask padded keys
                s = s - jnp.max(s, axis=-1, keepdims=True)
                p = jnp.exp(s)
                p = p * pl.reciprocal(jnp.sum(p, axis=-1, keepdims=True), approx=True)
                o_h = mm(p.astype(bf16), v_bf[:, sl])               # (T, d_head) f32
                att_o_ref[:, sl] = o_h.astype(bf16)
            return att_o_ref[...]                                   # (T, C) bf16

        # ---- self attention (q already layer-normed & scaled in stage 1) ----
        o = mha(q1_ref[0], k1_ref[0], v1_ref[0], None)
        x = x + mm(o, a1ow_ref[...]) + a1ob_ref[...]

        # ---- cross attention against the (padded, masked) context ----
        h2_bf = ln(x, ln2g_ref[...], ln2b_ref[...]).astype(bf16)
        q2 = mm(h2_bf, wq2_ref[...]).astype(bf16)
        o = mha(q2, k2_ref[0], v2_ref[0], cbias_ref[...])
        x = x + mm(o, a2ow_ref[...]) + a2ob_ref[...]

        # ---- GeGLU feed-forward (the (T, 8C) slab never exists) ----
        h3_bf = ln(x, ln3g_ref[...], ln3b_ref[...]).astype(bf16)
        a_part = mm(h3_bf, gaw_ref[...]) + gab_ref[...]             # (T, 4C) f32
        gate = mm(h3_bf, ggw_ref[...]) + ggb_ref[...]               # (T, 4C) f32
        # TODO(synk): PyTorch F.gelu is the exact erf form; the tanh approximation is
        # used so the activation runs on the EUP instead of a long VALU erf polynomial.
        gelu = 0.5 * gate * (1.0 + jnp.tanh(0.7978845608028654
                                            * (gate + 0.044715 * gate * gate * gate)))
        x = x + mm((a_part * gelu).astype(bf16), g2w_ref[...]) + g2b_ref[...]

        # ---- conv_output (1x1) channel-major + long residual: store last dim is the
        #      row tile (lane dense), no output transpose needed ----
        y_cm = mm_nt(cow_ref[...], x.astype(bf16))                  # (C, T) f32
        out_ref[0] = (y_cm + cob_ref[...] + xcm_ref[0]).astype(out_ref.dtype)

    return kernel


# --------------------------------------------------------------------------------------
# Wrapper
# --------------------------------------------------------------------------------------
def _vmem_limit_bytes():
    """Scoped VMEM limit: physical capacity minus ~1/8 headroom for Mosaic scratch/IO."""
    try:
        cap = int(pltpu.get_tpu_info().vmem_capacity_bytes)
    except Exception:
        cap = 64 * 1024 * 1024            # conservative fallback (safe on every chip)
    return cap - cap // 8


def _forward(x, context, p, n_heads, row_tile, single_buffer_weights):
    B, C, H, W = x.shape
    HW = H * W
    _, Sc, Dc = context.shape
    G = GN_GROUPS
    if C % G != 0:
        raise ValueError(f"channels ({C}) must be divisible by {G} GroupNorm groups")
    if C % n_heads != 0:
        raise ValueError(f"channels ({C}) must be divisible by n_heads ({n_heads})")
    d_head = C // n_heads
    scale = 1.0 / math.sqrt(d_head)

    if row_tile is None:
        row_tile = HW
        for cand in (1024, 512, 256, 128):
            if HW % cand == 0:
                row_tile = cand
                break
    if HW % row_tile != 0 or row_tile % 8 != 0:
        raise ValueError(f"row_tile ({row_tile}) must divide HW ({HW}) and be a multiple of 8")
    n_tiles = HW // row_tile

    # Lane-dense cross-attention keys: pad context length to a multiple of 128 and mask
    # the padded key columns with an additive -inf bias.
    Sc_pad = ((Sc + 127) // 128) * 128
    ctx_bf = context.astype(jnp.bfloat16)
    if Sc_pad != Sc:
        ctx_bf = jnp.pad(ctx_bf, ((0, 0), (0, Sc_pad - Sc), (0, 0)))
    ctx_bias = jnp.where(jnp.arange(Sc_pad) < Sc, 0.0, _NEG_INF)
    ctx_bias = ctx_bias.astype(jnp.float32).reshape(1, Sc_pad)

    # NCHW -> (B, C, HW): free reshape, no HBM transpose pass.
    x_cm = x.reshape(B, C, HW).astype(jnp.float32)

    group_ids = jnp.arange(C) // (C // G)
    M = (group_ids[:, None] == jnp.arange(G)[None, :]).astype(jnp.float32)   # (C, G)

    f32row = lambda v: v.reshape(1, -1).astype(jnp.float32)
    f32col = lambda v: v.reshape(-1, 1).astype(jnp.float32)
    bf = lambda w: w.astype(jnp.bfloat16)

    def const_spec(shape):
        idx = lambda *_: (0,) * len(shape)        # constant across the grid: fetch once
        if single_buffer_weights:
            try:
                return pl.BlockSpec(shape, idx, pipeline_mode=pl.Buffered(1))
            except (TypeError, AttributeError):
                pass
        return pl.BlockSpec(shape, idx)

    vmem_limit = _vmem_limit_bytes()

    # ---------------------------------- stage 1 ----------------------------------
    a1w = p['a1_in_w']                                    # (3C, C) torch fused qkv
    s1_consts = [
        M, M.T,
        f32col(p['gn_g']), f32col(p['gn_b']),
        bf(p['cin_w'].T), f32row(p['cin_b']),
        f32row(p['ln1_g']), f32row(p['ln1_b']),
        bf(a1w[:C].T * scale), bf(a1w[C:2 * C].T), bf(a1w[2 * C:].T),
        bf(p['a2_k_w'].T), bf(p['a2_v_w'].T),
    ]
    s1_in_specs = [pl.BlockSpec((1, C, HW), lambda b: (b, 0, 0)),
                   pl.BlockSpec((1, Sc_pad, Dc), lambda b: (b, 0, 0))]
    s1_in_specs += [const_spec(w.shape) for w in s1_consts]

    s1_flops = 2 * B * (4 * HW * C * C + 2 * Sc_pad * Dc * C)
    s1_bytes = B * (4 * C * HW + 2 * Sc_pad * Dc
                    + 4 * HW * C + 3 * 2 * HW * C + 2 * 2 * Sc_pad * C)

    xt, q1, k1, v1, k2, v2 = pl.pallas_call(
        _make_stage1_kernel(G),
        grid=(B,),
        in_specs=s1_in_specs,
        out_shape=(jax.ShapeDtypeStruct((B, HW, C), jnp.float32),
                   jax.ShapeDtypeStruct((B, HW, C), jnp.bfloat16),
                   jax.ShapeDtypeStruct((B, HW, C), jnp.bfloat16),
                   jax.ShapeDtypeStruct((B, HW, C), jnp.bfloat16),
                   jax.ShapeDtypeStruct((B, Sc_pad, C), jnp.bfloat16),
                   jax.ShapeDtypeStruct((B, Sc_pad, C), jnp.bfloat16)),
        out_specs=(pl.BlockSpec((1, HW, C), lambda b: (b, 0, 0)),
                   pl.BlockSpec((1, HW, C), lambda b: (b, 0, 0)),
                   pl.BlockSpec((1, HW, C), lambda b: (b, 0, 0)),
                   pl.BlockSpec((1, HW, C), lambda b: (b, 0, 0)),
                   pl.BlockSpec((1, Sc_pad, C), lambda b: (b, 0, 0)),
                   pl.BlockSpec((1, Sc_pad, C), lambda b: (b, 0, 0))),
        compiler_params=pltpu.CompilerParams(
            dimension_semantics=("parallel",),
            vmem_limit_bytes=vmem_limit),
        cost_estimate=pl.CostEstimate(flops=int(s1_flops),
                                      transcendentals=int(B * HW),
                                      bytes_accessed=int(s1_bytes)),
    )(x_cm, ctx_bf, *s1_consts)

    # ---------------------------------- stage 2 ----------------------------------
    s2_consts = [
        ctx_bias,
        bf(p['a1_out_w'].T), f32row(p['a1_out_b']),
        f32row(p['ln2_g']), f32row(p['ln2_b']),
        bf(p['a2_q_w'].T * scale),
        bf(p['a2_out_w'].T), f32row(p['a2_out_b']),
        f32row(p['ln3_g']), f32row(p['ln3_b']),
        bf(p['g1_w'][:4 * C].T), f32row(p['g1_b'][:4 * C]),
        bf(p['g1_w'][4 * C:].T), f32row(p['g1_b'][4 * C:]),
        bf(p['g2_w'].T), f32row(p['g2_b']),
        bf(p['cout_w']),                                  # torch (out, in): used trans-B
        f32col(p['cout_b']),                              # column bias for (C, tile) store
    ]
    s2_in_specs = [
        pl.BlockSpec((1, C, row_tile), lambda b, t: (b, 0, t)),   # long residual columns
        pl.BlockSpec((1, row_tile, C), lambda b, t: (b, t, 0)),   # residue_short rows
        pl.BlockSpec((1, row_tile, C), lambda b, t: (b, t, 0)),   # q1 rows (scaled)
        pl.BlockSpec((1, HW, C), lambda b, t: (b, 0, 0)),         # k1 (full, per batch)
        pl.BlockSpec((1, HW, C), lambda b, t: (b, 0, 0)),         # v1 (full, per batch)
        pl.BlockSpec((1, Sc_pad, C), lambda b, t: (b, 0, 0)),     # k2
        pl.BlockSpec((1, Sc_pad, C), lambda b, t: (b, 0, 0)),     # v2
    ]
    s2_in_specs += [const_spec(w.shape) for w in s2_consts]

    s2_flops = 2 * B * HW * (2 * HW * C + 2 * Sc_pad * C + 16 * C * C)
    s2_trans = B * HW * (HW + Sc_pad + 4 * C)
    s2_bytes = B * (8 * C * HW + 4 * HW * C + 3 * 2 * HW * C + 2 * 2 * Sc_pad * C)

    out = pl.pallas_call(
        _make_stage2_kernel(n_heads),
        grid=(B, n_tiles),
        in_specs=s2_in_specs,
        out_shape=jax.ShapeDtypeStruct((B, C, HW), jnp.float32),
        out_specs=pl.BlockSpec((1, C, row_tile), lambda b, t: (b, 0, t)),
        scratch_shapes=[pltpu.VMEM((row_tile, C), jnp.bfloat16)],   # per-head concat buf
        compiler_params=pltpu.CompilerParams(
            dimension_semantics=("parallel", "parallel"),
            vmem_limit_bytes=vmem_limit),
        cost_estimate=pl.CostEstimate(flops=int(s2_flops),
                                      transcendentals=int(s2_trans),
                                      bytes_accessed=int(s2_bytes)),
    )(x_cm, xt, q1, k1, v1, k2, v2, *s2_consts)

    # (B, C, HW) -> NCHW: free reshape.
    return out.reshape(B, C, H, W)


def unet_attention_block(x, context, p, n_heads, row_tile=None):
    """x: (B, C, H, W) NCHW like PyTorch; context: (B, S_ctx, D_ctx)."""
    try:
        return _forward(x, context, p, n_heads, row_tile, single_buffer_weights=True)
    except Exception:
        # pl.Buffered(1) single-buffering of the constant weight blocks is an optional
        # VMEM optimisation; retry with default double-buffering if it is rejected.
        return _forward(x, context, p, n_heads, row_tile, single_buffer_weights=False)


# ----------------------------- deterministic parameters -----------------------------
def init_params(key, n_heads, d_emb, d_context):
    C = n_heads * d_emb
    keys = iter(jax.random.split(key, 32))

    def w(shape, scale=0.1):
        return scale * jax.random.normal(next(keys), shape, dtype=jnp.float32)

    return {
        'gn_g': 1.0 + w((C,), 0.1), 'gn_b': w((C,), 0.05),
        'cin_w': w((C, C)), 'cin_b': w((C,), 0.05),          # Conv2d(C,C,1) squeezed
        'ln1_g': 1.0 + w((C,), 0.1), 'ln1_b': w((C,), 0.05),
        'a1_in_w': w((3 * C, C)),                            # SelfAttention in_proj (no bias)
        'a1_out_w': w((C, C)), 'a1_out_b': w((C,), 0.05),
        'ln2_g': 1.0 + w((C,), 0.1), 'ln2_b': w((C,), 0.05),
        'a2_q_w': w((C, C)), 'a2_k_w': w((C, d_context)), 'a2_v_w': w((C, d_context)),
        'a2_out_w': w((C, C)), 'a2_out_b': w((C,), 0.05),
        'ln3_g': 1.0 + w((C,), 0.1), 'ln3_b': w((C,), 0.05),
        'g1_w': w((8 * C, C)), 'g1_b': w((8 * C,), 0.05),    # linear_geglu_1: C -> 8C
        'g2_w': w((C, 4 * C)), 'g2_b': w((C,), 0.05),        # linear_geglu_2: 4C -> C
        'cout_w': w((C, C)), 'cout_b': w((C,), 0.05),        # Conv2d(C,C,1) squeezed
    }


# ----------------------- pure-JAX reference (PyTorch semantics) -----------------------
def reference(x, context, p, n_heads):
    B, C, H, W = x.shape
    G = GN_GROUPS
    res_long = x
    xg = x.reshape(B, G, C // G, H, W)
    mean = xg.mean(axis=(2, 3, 4), keepdims=True)
    var = ((xg - mean) ** 2).mean(axis=(2, 3, 4), keepdims=True)
    xn = ((xg - mean) / jnp.sqrt(var + GN_EPS)).reshape(B, C, H, W)
    xn = xn * p['gn_g'][None, :, None, None] + p['gn_b'][None, :, None, None]
    h = jnp.einsum('bchw,oc->bohw', xn, p['cin_w']) + p['cin_b'][None, :, None, None]
    t = jnp.transpose(h.reshape(B, C, H * W), (0, 2, 1))

    def ln(v, g, b):
        m = v.mean(-1, keepdims=True)
        va = ((v - m) ** 2).mean(-1, keepdims=True)
        return (v - m) / jnp.sqrt(va + LN_EPS) * g + b

    def mha(q, k, v):
        Bq, Sq, Cq = q.shape
        Sk = k.shape[1]
        dh = Cq // n_heads
        qh = q.reshape(Bq, Sq, n_heads, dh).transpose(0, 2, 1, 3)
        kh = k.reshape(Bq, Sk, n_heads, dh).transpose(0, 2, 1, 3)
        vh = v.reshape(Bq, Sk, n_heads, dh).transpose(0, 2, 1, 3)
        s = jnp.einsum('bhqd,bhkd->bhqk', qh, kh) * (1.0 / math.sqrt(dh))
        a = jax.nn.softmax(s, axis=-1)
        o = jnp.einsum('bhqk,bhkd->bhqd', a, vh)
        return o.transpose(0, 2, 1, 3).reshape(Bq, Sq, Cq)

    y = ln(t, p['ln1_g'], p['ln1_b'])
    qkv = y @ p['a1_in_w'].T
    q, k, v = jnp.split(qkv, 3, axis=-1)
    t = t + (mha(q, k, v) @ p['a1_out_w'].T + p['a1_out_b'])

    y = ln(t, p['ln2_g'], p['ln2_b'])
    q = y @ p['a2_q_w'].T
    k = context @ p['a2_k_w'].T
    v = context @ p['a2_v_w'].T
    t = t + (mha(q, k, v) @ p['a2_out_w'].T + p['a2_out_b'])

    y = ln(t, p['ln3_g'], p['ln3_b'])
    gg = y @ p['g1_w'].T + p['g1_b']
    a_part, gate = jnp.split(gg, 2, axis=-1)
    y = a_part * (0.5 * gate * (1.0 + jax.lax.erf(gate / math.sqrt(2.0))))
    t = t + (y @ p['g2_w'].T + p['g2_b'])

    h2 = jnp.transpose(t, (0, 2, 1)).reshape(B, C, H, W)
    out = jnp.einsum('bchw,oc->bohw', h2, p['cout_w']) + p['cout_b'][None, :, None, None]
    return out + res_long


if __name__ == "__main__":
    n_heads, d_emb, d_context = 2, 16, 64        # channels = 32 (divisible by 32 groups)
    B, H, W, S_ctx = 2, 16, 16, 8                # HW = 256; row_tile = 128 -> 2 row tiles
    C = n_heads * d_emb

    key = jax.random.PRNGKey(0)
    kx, kc, kp = jax.random.split(key, 3)
    x = jax.random.normal(kx, (B, C, H, W), dtype=jnp.float32)
    context = jax.random.normal(kc, (B, S_ctx, d_context), dtype=jnp.float32)
    params = init_params(kp, n_heads, d_emb, d_context)

    out = jax.block_until_ready(
        unet_attention_block(x, context, params, n_heads, row_tile=128))

    with jax.default_matmul_precision("highest"):
        ref = jax.block_until_ready(reference(x, context, params, n_heads))

    max_err = float(jnp.max(jnp.abs(out - ref)))
    mean_err = float(jnp.mean(jnp.abs(out - ref)))
    assert out.shape == x.shape, (out.shape, x.shape)
    # Kernel feeds bf16 operands to the MXU (f32 accumulation), uses the EUP approx
    # reciprocal in softmax and the tanh-approx GELU; compare to a full-f32 reference.
    assert max_err < 1e-1, f"max abs error {max_err}"
    assert mean_err < 2e-2, f"mean abs error {mean_err}"
    print("KERNEL_OK")
</pallas_src>

<mosaic_0001>
module attributes {stable_mosaic.version = 11 : i64} {
  func.func @kernel(%arg0: i32, %arg1: memref<1x32x256xf32, #tpu.memory_space<vmem>>, %arg2: memref<1x128x64xbf16, #tpu.memory_space<vmem>>, %arg3: memref<32x32xf32, #tpu.memory_space<vmem>>, %arg4: memref<32x32xf32, #tpu.memory_space<vmem>>, %arg5: memref<32x1xf32, #tpu.memory_space<vmem>>, %arg6: memref<32x1xf32, #tpu.memory_space<vmem>>, %arg7: memref<32x32xbf16, #tpu.memory_space<vmem>>, %arg8: memref<1x32xf32, #tpu.memory_space<vmem>>, %arg9: memref<1x32xf32, #tpu.memory_space<vmem>>, %arg10: memref<1x32xf32, #tpu.memory_space<vmem>>, %arg11: memref<32x32xbf16, #tpu.memory_space<vmem>>, %arg12: memref<32x32xbf16, #tpu.memory_space<vmem>>, %arg13: memref<32x32xbf16, #tpu.memory_space<vmem>>, %arg14: memref<64x32xbf16, #tpu.memory_space<vmem>>, %arg15: memref<64x32xbf16, #tpu.memory_space<vmem>>, %arg16: memref<1x256x32xf32, #tpu.memory_space<vmem>>, %arg17: memref<1x256x32xbf16, #tpu.memory_space<vmem>>, %arg18: memref<1x256x32xbf16, #tpu.memory_space<vmem>>, %arg19: memref<1x256x32xbf16, #tpu.memory_space<vmem>>, %arg20: memref<1x128x32xbf16, #tpu.memory_space<vmem>>, %arg21: memref<1x128x32xbf16, #tpu.memory_space<vmem>>) attributes {dimension_semantics = [#tpu.dimension_semantics<parallel>], iteration_bounds = array<i64: 2>, scalar_prefetch = 0 : i64, scratch_operands = 0 : i64, tpu.core_type = #tpu.core_type<tc>, window_params = [{transform_indices = @transform_0, window_bounds = array<i64: 1, 32, 256>}, {transform_indices = @transform_1, window_bounds = array<i64: 1, 128, 64>}, {pipeline_mode = #tpu.pipeline_mode<synchronous>, transform_indices = @transform_2, window_bounds = array<i64: 32, 32>}, {pipeline_mode = #tpu.pipeline_mode<synchronous>, transform_indices = @transform_3, window_bounds = array<i64: 32, 32>}, {pipeline_mode = #tpu.pipeline_mode<synchronous>, transform_indices = @transform_4, window_bounds = array<i64: 32, 1>}, {pipeline_mode = #tpu.pipeline_mode<synchronous>, transform_indices = @transform_5, window_bounds = array<i64: 32, 1>}, {pipeline_mode = #tpu.pipeline_mode<synchronous>, transform_indices = @transform_6, window_bounds = array<i64: 32, 32>}, {pipeline_mode = #tpu.pipeline_mode<synchronous>, transform_indices = @transform_7, window_bounds = array<i64: 1, 32>}, {pipeline_mode = #tpu.pipeline_mode<synchronous>, transform_indices = @transform_8, window_bounds = array<i64: 1, 32>}, {pipeline_mode = #tpu.pipeline_mode<synchronous>, transform_indices = @transform_9, window_bounds = array<i64: 1, 32>}, {pipeline_mode = #tpu.pipeline_mode<synchronous>, transform_indices = @transform_10, window_bounds = array<i64: 32, 32>}, {pipeline_mode = #tpu.pipeline_mode<synchronous>, transform_indices = @transform_11, window_bounds = array<i64: 32, 32>}, {pipeline_mode = #tpu.pipeline_mode<synchronous>, transform_indices = @transform_12, window_bounds = array<i64: 32, 32>}, {pipeline_mode = #tpu.pipeline_mode<synchronous>, transform_indices = @transform_13, window_bounds = array<i64: 64, 32>}, {pipeline_mode = #tpu.pipeline_mode<synchronous>, transform_indices = @transform_14, window_bounds = array<i64: 64, 32>}, {transform_indices = @transform_15, window_bounds = array<i64: 1, 256, 32>}, {transform_indices = @transform_16, window_bounds = array<i64: 1, 256, 32>}, {transform_indices = @transform_17, window_bounds = array<i64: 1, 256, 32>}, {transform_indices = @transform_18, window_bounds = array<i64: 1, 256, 32>}, {transform_indices = @transform_19, window_bounds = array<i64: 1, 128, 32>}, {transform_indices = @transform_20, window_bounds = array<i64: 1, 128, 32>}]} {
    %c0 = arith.constant 0 : index
    %c0_0 = arith.constant 0 : index
    %c0_1 = arith.constant 0 : index
    %0 = vector.load %arg1[%c0, %c0_0, %c0_1] : memref<1x32x256xf32, #tpu.memory_space<vmem>>, vector<1x32x256xf32>
    %1 = vector.shape_cast %0 : vector<1x32x256xf32> to vector<32x256xf32>
    %c0_2 = arith.constant 0 : index
    %c0_3 = arith.constant 0 : index
    %2 = vector.load %arg3[%c0_2, %c0_3] : memref<32x32xf32, #tpu.memory_space<vmem>>, vector<32x32xf32>
    %c0_4 = arith.constant 0 : index
    %c0_5 = arith.constant 0 : index
    %3 = vector.load %arg4[%c0_4, %c0_5] : memref<32x32xf32, #tpu.memory_space<vmem>>, vector<32x32xf32>
    %cst = arith.constant dense<0.000000e+00> : vector<32xf32>
    %4 = vector.multi_reduction <add>, %1, %cst [1] : vector<32x256xf32> to vector<32xf32>
    %5 = vector.shape_cast %4 : vector<32xf32> to vector<32x1xf32>
    %cst_6 = arith.constant dense<0.000000e+00> : vector<32x1xf32>
    %6 = tpu.matmul %3, %5, %cst_6 {dimension_numbers = #tpu.dot_dimension_numbers<[1], [0], [0], [1], [0, 0, 1, 1], [], []>, precision = #tpu.contract_precision<fp32>} : vector<32x32xf32>, vector<32x1xf32>, vector<32x1xf32> -> vector<32x1xf32>
    %cst_7 = arith.constant 3.906250e-03 : f32
    %7 = vector.broadcast %cst_7 : f32 to vector<32x1xf32>
    %8 = arith.mulf %6, %7 : vector<32x1xf32>
    %cst_8 = arith.constant dense<0.000000e+00> : vector<32x1xf32>
    %9 = tpu.matmul %2, %8, %cst_8 {dimension_numbers = #tpu.dot_dimension_numbers<[1], [0], [0], [1], [0, 0, 1, 1], [], []>, precision = #tpu.contract_precision<fp32>} : vector<32x32xf32>, vector<32x1xf32>, vector<32x1xf32> -> vector<32x1xf32>
    %10 = vector.broadcast %9 : vector<32x1xf32> to vector<32x256xf32>
    %11 = arith.subf %1, %10 : vector<32x256xf32>
    %12 = arith.mulf %11, %11 : vector<32x256xf32>
    %cst_9 = arith.constant dense<0.000000e+00> : vector<32xf32>
    %13 = vector.multi_reduction <add>, %12, %cst_9 [1] : vector<32x256xf32> to vector<32xf32>
    %14 = vector.shape_cast %13 : vector<32xf32> to vector<32x1xf32>
    %cst_10 = arith.constant dense<0.000000e+00> : vector<32x1xf32>
    %15 = tpu.matmul %3, %14, %cst_10 {dimension_numbers = #tpu.dot_dimension_numbers<[1], [0], [0], [1], [0, 0, 1, 1], [], []>, precision = #tpu.contract_precision<fp32>} : vector<32x32xf32>, vector<32x1xf32>, vector<32x1xf32> -> vector<32x1xf32>
    %cst_11 = arith.constant 3.906250e-03 : f32
    %16 = vector.broadcast %cst_11 : f32 to vector<32x1xf32>
    %17 = arith.mulf %15, %16 : vector<32x1xf32>
    %cst_12 = arith.constant 9.99999997E-7 : f32
    %18 = vector.broadcast %cst_12 : f32 to vector<32x1xf32>
    %19 = arith.addf %17, %18 : vector<32x1xf32>
    %20 = math.rsqrt %19 : vector<32x1xf32>
    %cst_13 = arith.constant dense<0.000000e+00> : vector<32x1xf32>
    %21 = tpu.matmul %2, %20, %cst_13 {dimension_numbers = #tpu.dot_dimension_numbers<[1], [0], [0], [1], [0, 0, 1, 1], [], []>, precision = #tpu.contract_precision<fp32>} : vector<32x32xf32>, vector<32x1xf32>, vector<32x1xf32> -> vector<32x1xf32>
    %c0_14 = arith.constant 0 : index
    %c0_15 = arith.constant 0 : index
    %22 = vector.load %arg5[%c0_14, %c0_15] : memref<32x1xf32, #tpu.memory_space<vmem>>, vector<32x1xf32>
    %23 = arith.mulf %21, %22 : vector<32x1xf32>
    %24 = vector.broadcast %23 : vector<32x1xf32> to vector<32x256xf32>
    %25 = arith.mulf %11, %24 : vector<32x256xf32>
    %c0_16 = arith.constant 0 : index
    %c0_17 = arith.constant 0 : index
    %26 = vector.load %arg6[%c0_16, %c0_17] : memref<32x1xf32, #tpu.memory_space<vmem>>, vector<32x1xf32>
    %27 = vector.broadcast %26 : vector<32x1xf32> to vector<32x256xf32>
    %28 = arith.addf %25, %27 : vector<32x256xf32>
    %29 = arith.truncf %28 : vector<32x256xf32> to vector<32x256xbf16>
    %c0_18 = arith.constant 0 : index
    %c0_19 = arith.constant 0 : index
    %30 = vector.load %arg7[%c0_18, %c0_19] : memref<32x32xbf16, #tpu.memory_space<vmem>>, vector<32x32xbf16>
    %cst_20 = arith.constant dense<0.000000e+00> : vector<256x32xf32>
    %31 = tpu.matmul %29, %30, %cst_20 {dimension_numbers = #tpu.dot_dimension_numbers<[0], [0], [1], [1], [0, 1, 1, 1], [], []>} : vector<32x256xbf16>, vector<32x32xbf16>, vector<256x32xf32> -> vector<256x32xf32>
    %c0_21 = arith.constant 0 : index
    %c0_22 = arith.constant 0 : index
    %32 = vector.load %arg8[%c0_21, %c0_22] : memref<1x32xf32, #tpu.memory_space<vmem>>, vector<1x32xf32>
    %33 = vector.broadcast %32 : vector<1x32xf32> to vector<256x32xf32>
    %34 = arith.addf %31, %33 : vector<256x32xf32>
    %c0_23 = arith.constant 0 : index
    %c0_24 = arith.constant 0 : index
    %c0_25 = arith.constant 0 : index
    %35 = vector.load %arg16[%c0_23, %c0_24, %c0_25] : memref<1x256x32xf32, #tpu.memory_space<vmem>>, vector<1x256x32xf32>
    %36 = vector.shape_cast %35 : vector<1x256x32xf32> to vector<256x32xf32>
    %37 = vector.shape_cast %34 : vector<256x32xf32> to vector<1x256x32xf32>
    tpu.vector_store %arg16[%c0_23, %c0_24, %c0_25], %37 {strides = array<i32>} : memref<1x256x32xf32, #tpu.memory_space<vmem>>, vector<1x256x32xf32>,
    %cst_26 = arith.constant dense<0.000000e+00> : vector<256xf32>
    %38 = vector.multi_reduction <add>, %34, %cst_26 [1] : vector<256x32xf32> to vector<256xf32>
    %39 = vector.shape_cast %38 : vector<256xf32> to vector<256x1xf32>
    %cst_27 = arith.constant 3.200000e+01 : f32
    %40 = vector.broadcast %cst_27 : f32 to vector<256x1xf32>
    %41 = arith.divf %39, %40 : vector<256x1xf32>
    %42 = vector.broadcast %41 : vector<256x1xf32> to vector<256x32xf32>
    %43 = arith.subf %34, %42 : vector<256x32xf32>
    %44 = arith.mulf %43, %43 : vector<256x32xf32>
    %cst_28 = arith.constant dense<0.000000e+00> : vector<256xf32>
    %45 = vector.multi_reduction <add>, %44, %cst_28 [1] : vector<256x32xf32> to vector<256xf32>
    %46 = vector.shape_cast %45 : vector<256xf32> to vector<256x1xf32>
    %cst_29 = arith.constant 3.200000e+01 : f32
    %47 = vector.broadcast %cst_29 : f32 to vector<256x1xf32>
    %48 = arith.divf %46, %47 : vector<256x1xf32>
    %cst_30 = arith.constant 9.99999974E-6 : f32
    %49 = vector.broadcast %cst_30 : f32 to vector<256x1xf32>
    %50 = arith.addf %48, %49 : vector<256x1xf32>
    %51 = math.rsqrt %50 : vector<256x1xf32>
    %52 = vector.broadcast %51 : vector<256x1xf32> to vector<256x32xf32>
    %53 = arith.mulf %43, %52 : vector<256x32xf32>
    %c0_31 = arith.constant 0 : index
    %c0_32 = arith.constant 0 : index
    %54 = vector.load %arg9[%c0_31, %c0_32] : memref<1x32xf32, #tpu.memory_space<vmem>>, vector<1x32xf32>
    %55 = vector.broadcast %54 : vector<1x32xf32> to vector<256x32xf32>
    %56 = arith.mulf %53, %55 : vector<256x32xf32>
    %c0_33 = arith.constant 0 : index
    %c0_34 = arith.constant 0 : index
    %57 = vector.load %arg10[%c0_33, %c0_34] : memref<1x32xf32, #tpu.memory_space<vmem>>, vector<1x32xf32>
    %58 = vector.broadcast %57 : vector<1x32xf32> to vector<256x32xf32>
    %59 = arith.addf %56, %58 : vector<256x32xf32>
    %60 = arith.truncf %59 : vector<256x32xf32> to vector<256x32xbf16>
    %c0_35 = arith.constant 0 : index
    %c0_36 = arith.constant 0 : index
    %61 = vector.load %arg11[%c0_35, %c0_36] : memref<32x32xbf16, #tpu.memory_space<vmem>>, vector<32x32xbf16>
    %cst_37 = arith.constant dense<0.000000e+00> : vector<256x32xf32>
    %62 = tpu.matmul %60, %61, %cst_37 {dimension_numbers = #tpu.dot_dimension_numbers<[1], [0], [0], [1], [0, 0, 1, 1], [], []>} : vector<256x32xbf16>, vector<32x32xbf16>, vector<256x32xf32> -> vector<256x32xf32>
    %63 = arith.truncf %62 : vector<256x32xf32> to vector<256x32xbf16>
    %c0_38 = arith.constant 0 : index
    %c0_39 = arith.constant 0 : index
    %c0_40 = arith.constant 0 : index
    %64 = vector.load %arg17[%c0_38, %c0_39, %c0_40] : memref<1x256x32xbf16, #tpu.memory_space<vmem>>, vector<1x256x32xbf16>
    %65 = vector.shape_cast %64 : vector<1x256x32xbf16> to vector<256x32xbf16>
    %66 = vector.shape_cast %63 : vector<256x32xbf16> to vector<1x256x32xbf16>
    tpu.vector_store %arg17[%c0_38, %c0_39, %c0_40], %66 {strides = array<i32>} : memref<1x256x32xbf16, #tpu.memory_space<vmem>>, vector<1x256x32xbf16>,
    %c0_41 = arith.constant 0 : index
    %c0_42 = arith.constant 0 : index
    %67 = vector.load %arg12[%c0_41, %c0_42] : memref<32x32xbf16, #tpu.memory_space<vmem>>, vector<32x32xbf16>
    %cst_43 = arith.constant dense<0.000000e+00> : vector<256x32xf32>
    %68 = tpu.matmul %60, %67, %cst_43 {dimension_numbers = #tpu.dot_dimension_numbers<[1], [0], [0], [1], [0, 0, 1, 1], [], []>} : vector<256x32xbf16>, vector<32x32xbf16>, vector<256x32xf32> -> vector<256x32xf32>
    %69 = arith.truncf %68 : vector<256x32xf32> to vector<256x32xbf16>
    %c0_44 = arith.constant 0 : index
    %c0_45 = arith.constant 0 : index
    %c0_46 = arith.constant 0 : index
    %70 = vector.load %arg18[%c0_44, %c0_45, %c0_46] : memref<1x256x32xbf16, #tpu.memory_space<vmem>>, vector<1x256x32xbf16>
    %71 = vector.shape_cast %70 : vector<1x256x32xbf16> to vector<256x32xbf16>
    %72 = vector.shape_cast %69 : vector<256x32xbf16> to vector<1x256x32xbf16>
    tpu.vector_store %arg18[%c0_44, %c0_45, %c0_46], %72 {strides = array<i32>} : memref<1x256x32xbf16, #tpu.memory_space<vmem>>, vector<1x256x32xbf16>,
    %c0_47 = arith.constant 0 : index
    %c0_48 = arith.constant 0 : index
    %73 = vector.load %arg13[%c0_47, %c0_48] : memref<32x32xbf16, #tpu.memory_space<vmem>>, vector<32x32xbf16>
    %cst_49 = arith.constant dense<0.000000e+00> : vector<256x32xf32>
    %74 = tpu.matmul %60, %73, %cst_49 {dimension_numbers = #tpu.dot_dimension_numbers<[1], [0], [0], [1], [0, 0, 1, 1], [], []>} : vector<256x32xbf16>, vector<32x32xbf16>, vector<256x32xf32> -> vector<256x32xf32>
    %75 = arith.truncf %74 : vector<256x32xf32> to vector<256x32xbf16>
    %c0_50 = arith.constant 0 : index
    %c0_51 = arith.constant 0 : index
    %c0_52 = arith.constant 0 : index
    %76 = vector.load %arg19[%c0_50, %c0_51, %c0_52] : memref<1x256x32xbf16, #tpu.memory_space<vmem>>, vector<1x256x32xbf16>
    %77 = vector.shape_cast %76 : vector<1x256x32xbf16> to vector<256x32xbf16>
    %78 = vector.shape_cast %75 : vector<256x32xbf16> to vector<1x256x32xbf16>
    tpu.vector_store %arg19[%c0_50, %c0_51, %c0_52], %78 {strides = array<i32>} : memref<1x256x32xbf16, #tpu.memory_space<vmem>>, vector<1x256x32xbf16>,
    %c0_53 = arith.constant 0 : index
    %c0_54 = arith.constant 0 : index
    %c0_55 = arith.constant 0 : index
    %79 = vector.load %arg2[%c0_53, %c0_54, %c0_55] : memref<1x128x64xbf16, #tpu.memory_space<vmem>>, vector<1x128x64xbf16>
    %80 = vector.shape_cast %79 : vector<1x128x64xbf16> to vector<128x64xbf16>
    %c0_56 = arith.constant 0 : index
    %c0_57 = arith.constant 0 : index
    %81 = vector.load %arg14[%c0_56, %c0_57] : memref<64x32xbf16, #tpu.memory_space<vmem>>, vector<64x32xbf16>
    %cst_58 = arith.constant dense<0.000000e+00> : vector<128x32xf32>
    %82 = tpu.matmul %80, %81, %cst_58 {dimension_numbers = #tpu.dot_dimension_numbers<[1], [0], [0], [1], [0, 0, 1, 1], [], []>} : vector<128x64xbf16>, vector<64x32xbf16>, vector<128x32xf32> -> vector<128x32xf32>
    %83 = arith.truncf %82 : vector<128x32xf32> to vector<128x32xbf16>
    %c0_59 = arith.constant 0 : index
    %c0_60 = arith.constant 0 : index
    %c0_61 = arith.constant 0 : index
    %84 = vector.load %arg20[%c0_59, %c0_60, %c0_61] : memref<1x128x32xbf16, #tpu.memory_space<vmem>>, vector<1x128x32xbf16>
    %85 = vector.shape_cast %84 : vector<1x128x32xbf16> to vector<128x32xbf16>
    %86 = vector.shape_cast %83 : vector<128x32xbf16> to vector<1x128x32xbf16>
    tpu.vector_store %arg20[%c0_59, %c0_60, %c0_61], %86 {strides = array<i32>} : memref<1x128x32xbf16, #tpu.memory_space<vmem>>, vector<1x128x32xbf16>,
    %c0_62 = arith.constant 0 : index
    %c0_63 = arith.constant 0 : index
    %87 = vector.load %arg15[%c0_62, %c0_63] : memref<64x32xbf16, #tpu.memory_space<vmem>>, vector<64x32xbf16>
    %cst_64 = arith.constant dense<0.000000e+00> : vector<128x32xf32>
    %88 = tpu.matmul %80, %87, %cst_64 {dimension_numbers = #tpu.dot_dimension_numbers<[1], [0], [0], [1], [0, 0, 1, 1], [], []>} : vector<128x64xbf16>, vector<64x32xbf16>, vector<128x32xf32> -> vector<128x32xf32>
    %89 = arith.truncf %88 : vector<128x32xf32> to vector<128x32xbf16>
    %c0_65 = arith.constant 0 : index
    %c0_66 = arith.constant 0 : index
    %c0_67 = arith.constant 0 : index
    %90 = vector.load %arg21[%c0_65, %c0_66, %c0_67] : memref<1x128x32xbf16, #tpu.memory_space<vmem>>, vector<1x128x32xbf16>
    %91 = vector.shape_cast %90 : vector<1x128x32xbf16> to vector<128x32xbf16>
    %92 = vector.shape_cast %89 : vector<128x32xbf16> to vector<1x128x32xbf16>
    tpu.vector_store %arg21[%c0_65, %c0_66, %c0_67], %92 {strides = array<i32>} : memref<1x128x32xbf16, #tpu.memory_space<vmem>>, vector<1x128x32xbf16>,
    return
  }
  func.func @transform_0(%arg0: i32) -> (i32, i32, i32) {
    %c0_i32 = arith.constant 0 : i32
    %c0_i32_0 = arith.constant 0 : i32
    %c0_i32_1 = arith.constant 0 : i32
    return %arg0, %c0_i32, %c0_i32_0 : i32, i32, i32
  }
  func.func @transform_1(%arg0: i32) -> (i32, i32, i32) {
    %c0_i32 = arith.constant 0 : i32
    %c0_i32_0 = arith.constant 0 : i32
    %c0_i32_1 = arith.constant 0 : i32
    return %arg0, %c0_i32, %c0_i32_0 : i32, i32, i32
  }
  func.func @transform_2(%arg0: i32) -> (i32, i32) {
    %c0_i32 = arith.constant 0 : i32
    %c0_i32_0 = arith.constant 0 : i32
    %c0_i32_1 = arith.constant 0 : i32
    return %c0_i32, %c0_i32_0 : i32, i32
  }
  func.func @transform_3(%arg0: i32) -> (i32, i32) {
    %c0_i32 = arith.constant 0 : i32
    %c0_i32_0 = arith.constant 0 : i32
    %c0_i32_1 = arith.constant 0 : i32
    return %c0_i32, %c0_i32_0 : i32, i32
  }
  func.func @transform_4(%arg0: i32) -> (i32, i32) {
    %c0_i32 = arith.constant 0 : i32
    %c0_i32_0 = arith.constant 0 : i32
    %c0_i32_1 = arith.constant 0 : i32
    return %c0_i32, %c0_i32_0 : i32, i32
  }
  func.func @transform_5(%arg0: i32) -> (i32, i32) {
    %c0_i32 = arith.constant 0 : i32
    %c0_i32_0 = arith.constant 0 : i32
    %c0_i32_1 = arith.constant 0 : i32
    return %c0_i32, %c0_i32_0 : i32, i32
  }
  func.func @transform_6(%arg0: i32) -> (i32, i32) {
    %c0_i32 = arith.constant 0 : i32
    %c0_i32_0 = arith.constant 0 : i32
    %c0_i32_1 = arith.constant 0 : i32
    return %c0_i32, %c0_i32_0 : i32, i32
  }
  func.func @transform_7(%arg0: i32) -> (i32, i32) {
    %c0_i32 = arith.constant 0 : i32
    %c0_i32_0 = arith.constant 0 : i32
    %c0_i32_1 = arith.constant 0 : i32
    return %c0_i32, %c0_i32_0 : i32, i32
  }
  func.func @transform_8(%arg0: i32) -> (i32, i32) {
    %c0_i32 = arith.constant 0 : i32
    %c0_i32_0 = arith.constant 0 : i32
    %c0_i32_1 = arith.constant 0 : i32
    return %c0_i32, %c0_i32_0 : i32, i32
  }
  func.func @transform_9(%arg0: i32) -> (i32, i32) {
    %c0_i32 = arith.constant 0 : i32
    %c0_i32_0 = arith.constant 0 : i32
    %c0_i32_1 = arith.constant 0 : i32
    return %c0_i32, %c0_i32_0 : i32, i32
  }
  func.func @transform_10(%arg0: i32) -> (i32, i32) {
    %c0_i32 = arith.constant 0 : i32
    %c0_i32_0 = arith.constant 0 : i32
    %c0_i32_1 = arith.constant 0 : i32
    return %c0_i32, %c0_i32_0 : i32, i32
  }
  func.func @transform_11(%arg0: i32) -> (i32, i32) {
    %c0_i32 = arith.constant 0 : i32
    %c0_i32_0 = arith.constant 0 : i32
    %c0_i32_1 = arith.constant 0 : i32
    return %c0_i32, %c0_i32_0 : i32, i32
  }
  func.func @transform_12(%arg0: i32) -> (i32, i32) {
    %c0_i32 = arith.constant 0 : i32
    %c0_i32_0 = arith.constant 0 : i32
    %c0_i32_1 = arith.constant 0 : i32
    return %c0_i32, %c0_i32_0 : i32, i32
  }
  func.func @transform_13(%arg0: i32) -> (i32, i32) {
    %c0_i32 = arith.constant 0 : i32
    %c0_i32_0 = arith.constant 0 : i32
    %c0_i32_1 = arith.constant 0 : i32
    return %c0_i32, %c0_i32_0 : i32, i32
  }
  func.func @transform_14(%arg0: i32) -> (i32, i32) {
    %c0_i32 = arith.constant 0 : i32
    %c0_i32_0 = arith.constant 0 : i32
    %c0_i32_1 = arith.constant 0 : i32
    return %c0_i32, %c0_i32_0 : i32, i32
  }
  func.func @transform_15(%arg0: i32) -> (i32, i32, i32) {
    %c0_i32 = arith.constant 0 : i32
    %c0_i32_0 = arith.constant 0 : i32
    %c0_i32_1 = arith.constant 0 : i32
    return %arg0, %c0_i32, %c0_i32_0 : i32, i32, i32
  }
  func.func @transform_16(%arg0: i32) -> (i32, i32, i32) {
    %c0_i32 = arith.constant 0 : i32
    %c0_i32_0 = arith.constant 0 : i32
    %c0_i32_1 = arith.constant 0 : i32
    return %arg0, %c0_i32, %c0_i32_0 : i32, i32, i32
  }
  func.func @transform_17(%arg0: i32) -> (i32, i32, i32) {
    %c0_i32 = arith.constant 0 : i32
    %c0_i32_0 = arith.constant 0 : i32
    %c0_i32_1 = arith.constant 0 : i32
    return %arg0, %c0_i32, %c0_i32_0 : i32, i32, i32
  }
  func.func @transform_18(%arg0: i32) -> (i32, i32, i32) {
    %c0_i32 = arith.constant 0 : i32
    %c0_i32_0 = arith.constant 0 : i32
    %c0_i32_1 = arith.constant 0 : i32
    return %arg0, %c0_i32, %c0_i32_0 : i32, i32, i32
  }
  func.func @transform_19(%arg0: i32) -> (i32, i32, i32) {
    %c0_i32 = arith.constant 0 : i32
    %c0_i32_0 = arith.constant 0 : i32
    %c0_i32_1 = arith.constant 0 : i32
    return %arg0, %c0_i32, %c0_i32_0 : i32, i32, i32
  }
  func.func @transform_20(%arg0: i32) -> (i32, i32, i32) {
    %c0_i32 = arith.constant 0 : i32
    %c0_i32_0 = arith.constant 0 : i32
    %c0_i32_1 = arith.constant 0 : i32
    return %arg0, %c0_i32, %c0_i32_0 : i32, i32, i32
  }
}

module attributes {stable_mosaic.version = 11 : i64} {
  func.func @kernel(%arg0: i32, %arg1: memref<1x32x256xf32, #tpu.memory_space<vmem>>, %arg2: memref<1x128x64xbf16, #tpu.memory_space<vmem>>, %arg3: memref<32x32xf32, #tpu.memory_space<vmem>>, %arg4: memref<32x32xf32, #tpu.memory_space<vmem>>, %arg5: memref<32x1xf32, #tpu.memory_space<vmem>>, %arg6: memref<32x1xf32, #tpu.memory_space<vmem>>, %arg7: memref<32x32xbf16, #tpu.memory_space<vmem>>, %arg8: memref<1x32xf32, #tpu.memory_space<vmem>>, %arg9: memref<1x32xf32, #tpu.memory_space<vmem>>, %arg10: memref<1x32xf32, #tpu.memory_space<vmem>>, %arg11: memref<32x32xbf16, #tpu.memory_space<vmem>>, %arg12: memref<32x32xbf16, #tpu.memory_space<vmem>>, %arg13: memref<32x32xbf16, #tpu.memory_space<vmem>>, %arg14: memref<64x32xbf16, #tpu.memory_space<vmem>>, %arg15: memref<64x32xbf16, #tpu.memory_space<vmem>>, %arg16: memref<1x256x32xf32, #tpu.memory_space<vmem>>, %arg17: memref<1x256x32xbf16, #tpu.memory_space<vmem>>, %arg18: memref<1x256x32xbf16, #tpu.memory_space<vmem>>, %arg19: memref<1x256x32xbf16, #tpu.memory_space<vmem>>, %arg20: memref<1x128x32xbf16, #tpu.memory_space<vmem>>, %arg21: memref<1x128x32xbf16, #tpu.memory_space<vmem>>) attributes {dimension_semantics = [#tpu.dimension_semantics<parallel>], iteration_bounds = array<i64: 2>, scalar_prefetch = 0 : i64, scratch_operands = 0 : i64, tpu.core_type = #tpu.core_type<tc>, window_params = [{transform_indices = @transform_0, window_bounds = array<i64: 1, 32, 256>}, {transform_indices = @transform_1, window_bounds = array<i64: 1, 128, 64>}, {pipeline_mode = #tpu.pipeline_mode<synchronous>, transform_indices = @transform_2, window_bounds = array<i64: 32, 32>}, {pipeline_mode = #tpu.pipeline_mode<synchronous>, transform_indices = @transform_3, window_bounds = array<i64: 32, 32>}, {pipeline_mode = #tpu.pipeline_mode<synchronous>, transform_indices = @transform_4, window_bounds = array<i64: 32, 1>}, {pipeline_mode = #tpu.pipeline_mode<synchronous>, transform_indices = @transform_5, window_bounds = array<i64: 32, 1>}, {pipeline_mode = #tpu.pipeline_mode<synchronous>, transform_indices = @transform_6, window_bounds = array<i64: 32, 32>}, {pipeline_mode = #tpu.pipeline_mode<synchronous>, transform_indices = @transform_7, window_bounds = array<i64: 1, 32>}, {pipeline_mode = #tpu.pipeline_mode<synchronous>, transform_indices = @transform_8, window_bounds = array<i64: 1, 32>}, {pipeline_mode = #tpu.pipeline_mode<synchronous>, transform_indices = @transform_9, window_bounds = array<i64: 1, 32>}, {pipeline_mode = #tpu.pipeline_mode<synchronous>, transform_indices = @transform_10, window_bounds = array<i64: 32, 32>}, {pipeline_mode = #tpu.pipeline_mode<synchronous>, transform_indices = @transform_11, window_bounds = array<i64: 32, 32>}, {pipeline_mode = #tpu.pipeline_mode<synchronous>, transform_indices = @transform_12, window_bounds = array<i64: 32, 32>}, {pipeline_mode = #tpu.pipeline_mode<synchronous>, transform_indices = @transform_13, window_bounds = array<i64: 64, 32>}, {pipeline_mode = #tpu.pipeline_mode<synchronous>, transform_indices = @transform_14, window_bounds = array<i64: 64, 32>}, {transform_indices = @transform_15, window_bounds = array<i64: 1, 256, 32>}, {transform_indices = @transform_16, window_bounds = array<i64: 1, 256, 32>}, {transform_indices = @transform_17, window_bounds = array<i64: 1, 256, 32>}, {transform_indices = @transform_18, window_bounds = array<i64: 1, 256, 32>}, {transform_indices = @transform_19, window_bounds = array<i64: 1, 128, 32>}, {transform_indices = @transform_20, window_bounds = array<i64: 1, 128, 32>}]} {
    %c0 = arith.constant 0 : index
    %c0_0 = arith.constant 0 : index
    %c0_1 = arith.constant 0 : index
    %0 = vector.load %arg1[%c0, %c0_0, %c0_1] : memref<1x32x256xf32, #tpu.memory_space<vmem>>, vector<1x32x256xf32>
    %1 = vector.shape_cast %0 : vector<1x32x256xf32> to vector<32x256xf32>
    %c0_2 = arith.constant 0 : index
    %c0_3 = arith.constant 0 : index
    %2 = vector.load %arg3[%c0_2, %c0_3] : memref<32x32xf32, #tpu.memory_space<vmem>>, vector<32x32xf32>
    %c0_4 = arith.constant 0 : index
    %c0_5 = arith.constant 0 : index
    %3 = vector.load %arg4[%c0_4, %c0_5] : memref<32x32xf32, #tpu.memory_space<vmem>>, vector<32x32xf32>
    %cst = arith.constant dense<0.000000e+00> : vector<32xf32>
    %4 = vector.multi_reduction <add>, %1, %cst [1] : vector<32x256xf32> to vector<32xf32>
    %5 = vector.shape_cast %4 : vector<32xf32> to vector<32x1xf32>
    %cst_6 = arith.constant dense<0.000000e+00> : vector<32x1xf32>
    %6 = tpu.matmul %3, %5, %cst_6 {dimension_numbers = #tpu.dot_dimension_numbers<[1], [0], [0], [1], [0, 0, 1, 1], [], []>, precision = #tpu.contract_precision<fp32>} : vector<32x32xf32>, vector<32x1xf32>, vector<32x1xf32> -> vector<32x1xf32>
    %cst_7 = arith.constant 3.906250e-03 : f32
    %7 = vector.broadcast %cst_7 : f32 to vector<32x1xf32>
    %8 = arith.mulf %6, %7 : vector<32x1xf32>
    %cst_8 = arith.constant dense<0.000000e+00> : vector<32x1xf32>
    %9 = tpu.matmul %2, %8, %cst_8 {dimension_numbers = #tpu.dot_dimension_numbers<[1], [0], [0], [1], [0, 0, 1, 1], [], []>, precision = #tpu.contract_precision<fp32>} : vector<32x32xf32>, vector<32x1xf32>, vector<32x1xf32> -> vector<32x1xf32>
    %10 = vector.broadcast %9 : vector<32x1xf32> to vector<32x256xf32>
    %11 = arith.subf %1, %10 : vector<32x256xf32>
    %12 = arith.mulf %11, %11 : vector<32x256xf32>
    %cst_9 = arith.constant dense<0.000000e+00> : vector<32xf32>
    %13 = vector.multi_reduction <add>, %12, %cst_9 [1] : vector<32x256xf32> to vector<32xf32>
    %14 = vector.shape_cast %13 : vector<32xf32> to vector<32x1xf32>
    %cst_10 = arith.constant dense<0.000000e+00> : vector<32x1xf32>
    %15 = tpu.matmul %3, %14, %cst_10 {dimension_numbers = #tpu.dot_dimension_numbers<[1], [0], [0], [1], [0, 0, 1, 1], [], []>, precision = #tpu.contract_precision<fp32>} : vector<32x32xf32>, vector<32x1xf32>, vector<32x1xf32> -> vector<32x1xf32>
    %cst_11 = arith.constant 3.906250e-03 : f32
    %16 = vector.broadcast %cst_11 : f32 to vector<32x1xf32>
    %17 = arith.mulf %15, %16 : vector<32x1xf32>
    %cst_12 = arith.constant 9.99999997E-7 : f32
    %18 = vector.broadcast %cst_12 : f32 to vector<32x1xf32>
    %19 = arith.addf %17, %18 : vector<32x1xf32>
    %20 = math.rsqrt %19 : vector<32x1xf32>
    %cst_13 = arith.constant dense<0.000000e+00> : vector<32x1xf32>
    %21 = tpu.matmul %2, %20, %cst_13 {dimension_numbers = #tpu.dot_dimension_numbers<[1], [0], [0], [1], [0, 0, 1, 1], [], []>, precision = #tpu.contract_precision<fp32>} : vector<32x32xf32>, vector<32x1xf32>, vector<32x1xf32> -> vector<32x1xf32>
    %c0_14 = arith.constant 0 : index
    %c0_15 = arith.constant 0 : index
    %22 = vector.load %arg5[%c0_14, %c0_15] : memref<32x1xf32, #tpu.memory_space<vmem>>, vector<32x1xf32>
    %23 = arith.mulf %21, %22 : vector<32x1xf32>
    %24 = vector.broadcast %23 : vector<32x1xf32> to vector<32x256xf32>
    %25 = arith.mulf %11, %24 : vector<32x256xf32>
    %c0_16 = arith.constant 0 : index
    %c0_17 = arith.constant 0 : index
    %26 = vector.load %arg6[%c0_16, %c0_17] : memref<32x1xf32, #tpu.memory_space<vmem>>, vector<32x1xf32>
    %27 = vector.broadcast %26 : vector<32x1xf32> to vector<32x256xf32>
    %28 = arith.addf %25, %27 : vector<32x256xf32>
    %29 = arith.truncf %28 : vector<32x256xf32> to vector<32x256xbf16>
    %c0_18 = arith.constant 0 : index
    %c0_19 = arith.constant 0 : index
    %30 = vector.load %arg7[%c0_18, %c0_19] : memref<32x32xbf16, #tpu.memory_space<vmem>>, vector<32x32xbf16>
    %cst_20 = arith.constant dense<0.000000e+00> : vector<256x32xf32>
    %31 = tpu.matmul %29, %30, %cst_20 {dimension_numbers = #tpu.dot_dimension_numbers<[0], [0], [1], [1], [0, 1, 1, 1], [], []>} : vector<32x256xbf16>, vector<32x32xbf16>, vector<256x32xf32> -> vector<256x32xf32>
    %c0_21 = arith.constant 0 : index
    %c0_22 = arith.constant 0 : index
    %32 = vector.load %arg8[%c0_21, %c0_22] : memref<1x32xf32, #tpu.memory_space<vmem>>, vector<1x32xf32>
    %33 = vector.broadcast %32 : vector<1x32xf32> to vector<256x32xf32>
    %34 = arith.addf %31, %33 : vector<256x32xf32>
    %c0_23 = arith.constant 0 : index
    %c0_24 = arith.constant 0 : index
    %c0_25 = arith.constant 0 : index
    %35 = vector.load %arg16[%c0_23, %c0_24, %c0_25] : memref<1x256x32xf32, #tpu.memory_space<vmem>>, vector<1x256x32xf32>
    %36 = vector.shape_cast %35 : vector<1x256x32xf32> to vector<256x32xf32>
    %37 = vector.shape_cast %34 : vector<256x32xf32> to vector<1x256x32xf32>
    tpu.vector_store %arg16[%c0_23, %c0_24, %c0_25], %37 {strides = array<i32>} : memref<1x256x32xf32, #tpu.memory_space<vmem>>, vector<1x256x32xf32>,
    %cst_26 = arith.constant dense<0.000000e+00> : vector<256xf32>
    %38 = vector.multi_reduction <add>, %34, %cst_26 [1] : vector<256x32xf32> to vector<256xf32>
    %39 = vector.shape_cast %38 : vector<256xf32> to vector<256x1xf32>
    %cst_27 = arith.constant 3.200000e+01 : f32
    %40 = vector.broadcast %cst_27 : f32 to vector<256x1xf32>
    %41 = arith.divf %39, %40 : vector<256x1xf32>
    %42 = vector.broadcast %41 : vector<256x1xf32> to vector<256x32xf32>
    %43 = arith.subf %34, %42 : vector<256x32xf32>
    %44 = arith.mulf %43, %43 : vector<256x32xf32>
    %cst_28 = arith.constant dense<0.000000e+00> : vector<256xf32>
    %45 = vector.multi_reduction <add>, %44, %cst_28 [1] : vector<256x32xf32> to vector<256xf32>
    %46 = vector.shape_cast %45 : vector<256xf32> to vector<256x1xf32>
    %cst_29 = arith.constant 3.200000e+01 : f32
    %47 = vector.broadcast %cst_29 : f32 to vector<256x1xf32>
    %48 = arith.divf %46, %47 : vector<256x1xf32>
    %cst_30 = arith.constant 9.99999974E-6 : f32
    %49 = vector.broadcast %cst_30 : f32 to vector<256x1xf32>
    %50 = arith.addf %48, %49 : vector<256x1xf32>
    %51 = math.rsqrt %50 : vector<256x1xf32>
    %52 = vector.broadcast %51 : vector<256x1xf32> to vector<256x32xf32>
    %53 = arith.mulf %43, %52 : vector<256x32xf32>
    %c0_31 = arith.constant 0 : index
    %c0_32 = arith.constant 0 : index
    %54 = vector.load %arg9[%c0_31, %c0_32] : memref<1x32xf32, #tpu.memory_space<vmem>>, vector<1x32xf32>
    %55 = vector.broadcast %54 : vector<1x32xf32> to vector<256x32xf32>
    %56 = arith.mulf %53, %55 : vector<256x32xf32>
    %c0_33 = arith.constant 0 : index
    %c0_34 = arith.constant 0 : index
    %57 = vector.load %arg10[%c0_33, %c0_34] : memref<1x32xf32, #tpu.memory_space<vmem>>, vector<1x32xf32>
    %58 = vector.broadcast %57 : vector<1x32xf32> to vector<256x32xf32>
    %59 = arith.addf %56, %58 : vector<256x32xf32>
    %60 = arith.truncf %59 : vector<256x32xf32> to vector<256x32xbf16>
    %c0_35 = arith.constant 0 : index
    %c0_36 = arith.constant 0 : index
    %61 = vector.load %arg11[%c0_35, %c0_36] : memref<32x32xbf16, #tpu.memory_space<vmem>>, vector<32x32xbf16>
    %cst_37 = arith.constant dense<0.000000e+00> : vector<256x32xf32>
    %62 = tpu.matmul %60, %61, %cst_37 {dimension_numbers = #tpu.dot_dimension_numbers<[1], [0], [0], [1], [0, 0, 1, 1], [], []>} : vector<256x32xbf16>, vector<32x32xbf16>, vector<256x32xf32> -> vector<256x32xf32>
    %63 = arith.truncf %62 : vector<256x32xf32> to vector<256x32xbf16>
    %c0_38 = arith.constant 0 : index
    %c0_39 = arith.constant 0 : index
    %c0_40 = arith.constant 0 : index
    %64 = vector.load %arg17[%c0_38, %c0_39, %c0_40] : memref<1x256x32xbf16, #tpu.memory_space<vmem>>, vector<1x256x32xbf16>
    %65 = vector.shape_cast %64 : vector<1x256x32xbf16> to vector<256x32xbf16>
    %66 = vector.shape_cast %63 : vector<256x32xbf16> to vector<1x256x32xbf16>
    tpu.vector_store %arg17[%c0_38, %c0_39, %c0_40], %66 {strides = array<i32>} : memref<1x256x32xbf16, #tpu.memory_space<vmem>>, vector<1x256x32xbf16>,
    %c0_41 = arith.constant 0 : index
    %c0_42 = arith.constant 0 : index
    %67 = vector.load %arg12[%c0_41, %c0_42] : memref<32x32xbf16, #tpu.memory_space<vmem>>, vector<32x32xbf16>
    %cst_43 = arith.constant dense<0.000000e+00> : vector<256x32xf32>
    %68 = tpu.matmul %60, %67, %cst_43 {dimension_numbers = #tpu.dot_dimension_numbers<[1], [0], [0], [1], [0, 0, 1, 1], [], []>} : vector<256x32xbf16>, vector<32x32xbf16>, vector<256x32xf32> -> vector<256x32xf32>
    %69 = arith.truncf %68 : vector<256x32xf32> to vector<256x32xbf16>
    %c0_44 = arith.constant 0 : index
    %c0_45 = arith.constant 0 : index
    %c0_46 = arith.constant 0 : index
    %70 = vector.load %arg18[%c0_44, %c0_45, %c0_46] : memref<1x256x32xbf16, #tpu.memory_space<vmem>>, vector<1x256x32xbf16>
    %71 = vector.shape_cast %70 : vector<1x256x32xbf16> to vector<256x32xbf16>
    %72 = vector.shape_cast %69 : vector<256x32xbf16> to vector<1x256x32xbf16>
    tpu.vector_store %arg18[%c0_44, %c0_45, %c0_46], %72 {strides = array<i32>} : memref<1x256x32xbf16, #tpu.memory_space<vmem>>, vector<1x256x32xbf16>,
    %c0_47 = arith.constant 0 : index
    %c0_48 = arith.constant 0 : index
    %73 = vector.load %arg13[%c0_47, %c0_48] : memref<32x32xbf16, #tpu.memory_space<vmem>>, vector<32x32xbf16>
    %cst_49 = arith.constant dense<0.000000e+00> : vector<256x32xf32>
    %74 = tpu.matmul %60, %73, %cst_49 {dimension_numbers = #tpu.dot_dimension_numbers<[1], [0], [0], [1], [0, 0, 1, 1], [], []>} : vector<256x32xbf16>, vector<32x32xbf16>, vector<256x32xf32> -> vector<256x32xf32>
    %75 = arith.truncf %74 : vector<256x32xf32> to vector<256x32xbf16>
    %c0_50 = arith.constant 0 : index
    %c0_51 = arith.constant 0 : index
    %c0_52 = arith.constant 0 : index
    %76 = vector.load %arg19[%c0_50, %c0_51, %c0_52] : memref<1x256x32xbf16, #tpu.memory_space<vmem>>, vector<1x256x32xbf16>
    %77 = vector.shape_cast %76 : vector<1x256x32xbf16> to vector<256x32xbf16>
    %78 = vector.shape_cast %75 : vector<256x32xbf16> to vector<1x256x32xbf16>
    tpu.vector_store %arg19[%c0_50, %c0_51, %c0_52], %78 {strides = array<i32>} : memref<1x256x32xbf16, #tpu.memory_space<vmem>>, vector<1x256x32xbf16>,
    %c0_53 = arith.constant 0 : index
    %c0_54 = arith.constant 0 : index
    %c0_55 = arith.constant 0 : index
    %79 = vector.load %arg2[%c0_53, %c0_54, %c0_55] : memref<1x128x64xbf16, #tpu.memory_space<vmem>>, vector<1x128x64xbf16>
    %80 = vector.shape_cast %79 : vector<1x128x64xbf16> to vector<128x64xbf16>
    %c0_56 = arith.constant 0 : index
    %c0_57 = arith.constant 0 : index
    %81 = vector.load %arg14[%c0_56, %c0_57] : memref<64x32xbf16, #tpu.memory_space<vmem>>, vector<64x32xbf16>
    %cst_58 = arith.constant dense<0.000000e+00> : vector<128x32xf32>
    %82 = tpu.matmul %80, %81, %cst_58 {dimension_numbers = #tpu.dot_dimension_numbers<[1], [0], [0], [1], [0, 0, 1, 1], [], []>} : vector<128x64xbf16>, vector<64x32xbf16>, vector<128x32xf32> -> vector<128x32xf32>
    %83 = arith.truncf %82 : vector<128x32xf32> to vector<128x32xbf16>
    %c0_59 = arith.constant 0 : index
    %c0_60 = arith.constant 0 : index
    %c0_61 = arith.constant 0 : index
    %84 = vector.load %arg20[%c0_59, %c0_60, %c0_61] : memref<1x128x32xbf16, #tpu.memory_space<vmem>>, vector<1x128x32xbf16>
    %85 = vector.shape_cast %84 : vector<1x128x32xbf16> to vector<128x32xbf16>
    %86 = vector.shape_cast %83 : vector<128x32xbf16> to vector<1x128x32xbf16>
    tpu.vector_store %arg20[%c0_59, %c0_60, %c0_61], %86 {strides = array<i32>} : memref<1x128x32xbf16, #tpu.memory_space<vmem>>, vector<1x128x32xbf16>,
    %c0_62 = arith.constant 0 : index
    %c0_63 = arith.constant 0 : index
    %87 = vector.load %arg15[%c0_62, %c0_63] : memref<64x32xbf16, #tpu.memory_space<vmem>>, vector<64x32xbf16>
    %cst_64 = arith.constant dense<0.000000e+00> : vector<128x32xf32>
    %88 = tpu.matmul %80, %87, %cst_64 {dimension_numbers = #tpu.dot_dimension_numbers<[1], [0], [0], [1], [0, 0, 1, 1], [], []>} : vector<128x64xbf16>, vector<64x32xbf16>, vector<128x32xf32> -> vector<128x32xf32>
    %89 = arith.truncf %88 : vector<128x32xf32> to vector<128x32xbf16>
    %c0_65 = arith.constant 0 : index
    %c0_66 = arith.constant 0 : index
    %c0_67 = arith.constant 0 : index
    %90 = vector.load %arg21[%c0_65, %c0_66, %c0_67] : memref<1x128x32xbf16, #tpu.memory_space<vmem>>, vector<1x128x32xbf16>
    %91 = vector.shape_cast %90 : vector<1x128x32xbf16> to vector<128x32xbf16>
    %92 = vector.shape_cast %89 : vector<128x32xbf16> to vector<1x128x32xbf16>
    tpu.vector_store %arg21[%c0_65, %c0_66, %c0_67], %92 {strides = array<i32>} : memref<1x128x32xbf16, #tpu.memory_space<vmem>>, vector<1x128x32xbf16>,
    return
  }
  func.func @transform_0(%arg0: i32) -> (i32, i32, i32) {
    %c0_i32 = arith.constant 0 : i32
    %c0_i32_0 = arith.constant 0 : i32
    %c0_i32_1 = arith.constant 0 : i32
    return %arg0, %c0_i32, %c0_i32_0 : i32, i32, i32
  }
  func.func @transform_1(%arg0: i32) -> (i32, i32, i32) {
    %c0_i32 = arith.constant 0 : i32
    %c0_i32_0 = arith.constant 0 : i32
    %c0_i32_1 = arith.constant 0 : i32
    return %arg0, %c0_i32, %c0_i32_0 : i32, i32, i32
  }
  func.func @transform_2(%arg0: i32) -> (i32, i32) {
    %c0_i32 = arith.constant 0 : i32
    %c0_i32_0 = arith.constant 0 : i32
    %c0_i32_1 = arith.constant 0 : i32
    return %c0_i32, %c0_i32_0 : i32, i32
  }
  func.func @transform_3(%arg0: i32) -> (i32, i32) {
    %c0_i32 = arith.constant 0 : i32
    %c0_i32_0 = arith.constant 0 : i32
    %c0_i32_1 = arith.constant 0 : i32
    return %c0_i32, %c0_i32_0 : i32, i32
  }
  func.func @transform_4(%arg0: i32) -> (i32, i32) {
    %c0_i32 = arith.constant 0 : i32
    %c0_i32_0 = arith.constant 0 : i32
    %c0_i32_1 = arith.constant 0 : i32
    return %c0_i32, %c0_i32_0 : i32, i32
  }
  func.func @transform_5(%arg0: i32) -> (i32, i32) {
    %c0_i32 = arith.constant 0 : i32
    %c0_i32_0 = arith.constant 0 : i32
    %c0_i32_1 = arith.constant 0 : i32
    return %c0_i32, %c0_i32_0 : i32, i32
  }
  func.func @transform_6(%arg0: i32) -> (i32, i32) {
    %c0_i32 = arith.constant 0 : i32
    %c0_i32_0 = arith.constant 0 : i32
    %c0_i32_1 = arith.constant 0 : i32
    return %c0_i32, %c0_i32_0 : i32, i32
  }
  func.func @transform_7(%arg0: i32) -> (i32, i32) {
    %c0_i32 = arith.constant 0 : i32
    %c0_i32_0 = arith.constant 0 : i32
    %c0_i32_1 = arith.constant 0 : i32
    return %c0_i32, %c0_i32_0 : i32, i32
  }
  func.func @transform_8(%arg0: i32) -> (i32, i32) {
    %c0_i32 = arith.constant 0 : i32
    %c0_i32_0 = arith.constant 0 : i32
    %c0_i32_1 = arith.constant 0 : i32
    return %c0_i32, %c0_i32_0 : i32, i32
  }
  func.func @transform_9(%arg0: i32) -> (i32, i32) {
    %c0_i32 = arith.constant 0 : i32
    %c0_i32_0 = arith.constant 0 : i32
    %c0_i32_1 = arith.constant 0 : i32
    return %c0_i32, %c0_i32_0 : i32, i32
  }
  func.func @transform_10(%arg0: i32) -> (i32, i32) {
    %c0_i32 = arith.constant 0 : i32
    %c0_i32_0 = arith.constant 0 : i32
    %c0_i32_1 = arith.constant 0 : i32
    return %c0_i32, %c0_i32_0 : i32, i32
  }
  func.func @transform_11(%arg0: i32) -> (i32, i32) {
    %c0_i32 = arith.constant 0 : i32
    %c0_i32_0 = arith.constant 0 : i32
    %c0_i32_1 = arith.constant 0 : i32
    return %c0_i32, %c0_i32_0 : i32, i32
  }
  func.func @transform_12(%arg0: i32) -> (i32, i32) {
    %c0_i32 = arith.constant 0 : i32
    %c0_i32_0 = arith.constant 0 : i32
    %c0_i32_1 = arith.constant 0 : i32
    return %c0_i32, %c0_i32_0 : i32, i32
  }
  func.func @transform_13(%arg0: i32) -> (i32, i32) {
    %c0_i32 = arith.constant 0 : i32
    %c0_i32_0 = arith.constant 0 : i32
    %c0_i32_1 = arith.constant 0 : i32
    return %c0_i32, %c0_i32_0 : i32, i32
  }
  func.func @transform_14(%arg0: i32) -> (i32, i32) {
    %c0_i32 = arith.constant 0 : i32
    %c0_i32_0 = arith.constant 0 : i32
    %c0_i32_1 = arith.constant 0 : i32
    return %c0_i32, %c0_i32_0 : i32, i32
  }
  func.func @transform_15(%arg0: i32) -> (i32, i32, i32) {
    %c0_i32 = arith.constant 0 : i32
    %c0_i32_0 = arith.constant 0 : i32
    %c0_i32_1 = arith.constant 0 : i32
    return %arg0, %c0_i32, %c0_i32_0 : i32, i32, i32
  }
  func.func @transform_16(%arg0: i32) -> (i32, i32, i32) {
    %c0_i32 = arith.constant 0 : i32
    %c0_i32_0 = arith.constant 0 : i32
    %c0_i32_1 = arith.constant 0 : i32
    return %arg0, %c0_i32, %c0_i32_0 : i32, i32, i32
  }
  func.func @transform_17(%arg0: i32) -> (i32, i32, i32) {
    %c0_i32 = arith.constant 0 : i32
    %c0_i32_0 = arith.constant 0 : i32
    %c0_i32_1 = arith.constant 0 : i32
    return %arg0, %c0_i32, %c0_i32_0 : i32, i32, i32
  }
  func.func @transform_18(%arg0: i32) -> (i32, i32, i32) {
    %c0_i32 = arith.constant 0 : i32
    %c0_i32_0 = arith.constant 0 : i32
    %c0_i32_1 = arith.constant 0 : i32
    return %arg0, %c0_i32, %c0_i32_0 : i32, i32, i32
  }
  func.func @transform_19(%arg0: i32) -> (i32, i32, i32) {
    %c0_i32 = arith.constant 0 : i32
    %c0_i32_0 = arith.constant 0 : i32
    %c0_i32_1 = arith.constant 0 : i32
    return %arg0, %c0_i32, %c0_i32_0 : i32, i32, i32
  }
  func.func @transform_20(%arg0: i32) -> (i32, i32, i32) {
    %c0_i32 = arith.constant 0 : i32
    %c0_i32_0 = arith.constant 0 : i32
    %c0_i32_1 = arith.constant 0 : i32
    return %arg0, %c0_i32, %c0_i32_0 : i32, i32, i32
  }
}

</mosaic_0001>

<bundles_post_ra>
// kernel: tpu_custom_call.1
= control target key start
LH: loop header
LB: loop body
LE: loop exit
PB: predicated region body
PF: predicated region fallthrough
CT: control target
= control target key end

     0   :  { %s9108_s0 = inlined_call_operand.vmem [shape: f32[2,32,256], index: 0, kind: input, shape index: {}]   ;;  %s9109_s1 = inlined_call_operand.vmem [shape: bf16[2,128,64], index: 1, kind: input, shape index: {}]   ;;  %s9110_s2 = inlined_call_operand.vmem [shape: f32[32,32], index: 2, kind: input, shape index: {}]   ;;  %s9111_s3 = inlined_call_operand.vmem [shape: f32[32,32], index: 3, kind: input, shape index: {}]   ;;  %s9112_s4 = inlined_call_operand.vmem [shape: f32[32,1], index: 4, kind: input, shape index: {}]   ;;  %s9113_s5 = inlined_call_operand.vmem [shape: f32[32,1], index: 5, kind: input, shape index: {}]   ;;  %s9114_s6 = inlined_call_operand.vmem [shape: bf16[32,32], index: 6, kind: input, shape index: {}]   ;;  %s9115_s7 = inlined_call_operand.vmem [shape: f32[1,32], index: 7, kind: input, shape index: {}]   ;;  %s9116_s8 = inlined_call_operand.vmem [shape: f32[1,32], index: 8, kind: input, shape index: {}]   ;;  %s9117_s9 = inlined_call_operand.vmem [shape: f32[1,32], index: 9, kind: input, shape index: {}]   ;;  %s9118_s10 = inlined_call_operand.vmem [shape: bf16[32,32], index: 10, kind: input, shape index: {}]   ;;  %s9119_s11 = inlined_call_operand.vmem [shape: bf16[32,32], index: 11, kind: input, shape index: {}]   ;;  %s9120_s12 = inlined_call_operand.vmem [shape: bf16[32,32], index: 12, kind: input, shape index: {}]   ;;  %s9121_s13 = inlined_call_operand.vmem [shape: bf16[64,32], index: 13, kind: input, shape index: {}]   ;;  %s9122_s14 = inlined_call_operand.vmem [shape: bf16[64,32], index: 14, kind: input, shape index: {}]   ;;  %s9123_s15 = inlined_call_operand.vmem [shape: f32[2,256,32], index: 15, kind: output, shape index: {0}]   ;;  %s9124_s16 = inlined_call_operand.vmem [shape: bf16[2,256,32], index: 16, kind: output, shape index: {1}]   ;;  %s9125_s17 = inlined_call_operand.vmem [shape: bf16[2,256,32], index: 17, kind: output, shape index: {2}]   ;;  %s9126_s18 = inlined_call_operand.vmem [shape: bf16[2,256,32], index: 18, kind: output, shape index: {3}]   ;;  %s9127_s19 = inlined_call_operand.vmem [shape: bf16[2,128,32], index: 19, kind: output, shape index: {4}]   ;;  %s9128_s20 = inlined_call_operand.vmem [shape: bf16[2,128,32], index: 20, kind: output, shape index: {5}]  }
   0x1   :  { %9132 = sst [smem:[#allocation2_spill]] %s9108_s0 }
   0x2   :  { %9133 = sst [smem:[#allocation3_spill]] %s9109_s1  ;;  %s7658_s1 = smov 0  }
   0x3   :  { %9134 = sst [smem:[#allocation4_spill]] %s9110_s2 }
   0x4   :  { %9135 = sst [smem:[#allocation5_spill]] %s9111_s3 }
   0x5   :  { %9136 = sst [smem:[#allocation6_spill]] %s9112_s4 }
   0x6 LB: > { %s5955_s22 = sadd.s32 4294967295, %s7550_s1   ;;  %p5959_p0 = scmp.ge.s32.totalorder %s7550_s1, 1  ;;  %s7550_s1 = sphi %s7658_s1, %s31_s1  }
   0x7   : > { %p583_p1 = scmp.lt.s32.totalorder %s7550_s1, 3 }
   0x9   : > { %p584_p2 = pnand %p5959_p0, %p583_p1 }
   0xa   : > { %p671_p3 = scmp.lt.s32.totalorder (!%p584_p2), %s5955_s22, 1  ;;  %s9137_s25 = sld [smem:[#allocation2_spill]] (!%p584_p2)  ;;  %vm740_vm0 = vcmask (!%p584_p2), 261120   ;;  %vm5312_vm1 = vcmask (!%p584_p2), 523264   ;;  %vm4517_vm2 = vcmask (!%p584_p2), 257024  }
   0xb   : > { %587 = sbr.rel (%p584_p2) target bundleno = 2683 (0xa7b), region = 80  ;;  %s9138_s28 = sld [smem:[#allocation3_spill]] (!%p584_p2) }
   0xc   : > { %s9139_s0 = sld [smem:[#allocation5_spill]] (!%p584_p2)  ;;  %s9140_s29 = sld [smem:[#allocation4_spill]] (!%p584_p2) }
   0xd   : > { %s9141_s2 = sld [smem:[#allocation6_spill]] (!%p584_p2) }
  0x12   : > { %s9143_s22 = smov (!%p671_p3, %s5955_s22), 1  ;;  %v724_v12 = vld [vmem:[%s9139_s0] sm:$0xff]  ;;  %v725_v19 = vld [vmem:[%s9139_s0 + $0x8] sm:$0xff]  ;;  %v726_v20 = vld [vmem:[%s9139_s0 + $0x10] sm:$0xff] }
  0x13   : > { %s7669_s23 = sshll.u32 %s9143_s22, 6  ;;  %v742_v13 = vsel %vm740_vm0, %v724_v12, 0  ;;  %v745_v21 = vsel %vm740_vm0, %v725_v19, 0  ;;  %v748_v22 = vsel %vm740_vm0, %v726_v20, 0  ;;  %v727_v23 = vld [vmem:[%s9139_s0 + $0x18] sm:$0xff]  ;;  %v720_v20 = vld [vmem:[%s9140_s29] sm:$0xff] }
  0x14   : > { %s675_s3 = scalar_lea.vmem %s9137_s25, %s7669_s23  ;;  %s7703_s4 = scalar_lea.vmem %s9138_s28, %s7669_s23  ;;  %v7709_v14 = vand.u32 4294901760, %v742_v13  ;;  %v7733_v24 = vand.u32 4294901760, %v745_v21  ;;  %v7735_v25 = vand.u32 4294901760, %v748_v22  ;;  %v751_v26 = vsel %vm740_vm0, %v727_v23, 0 }
  0x15   : > { %v7675_v0 = vld [vmem:[%s675_s3 + $0x20] sm:$0xff]  ;;  %v7677_v1 = vld [vmem:[%s675_s3 + $0x28] sm:$0xff]  ;;  %v7685_v5 = vld [vmem:[%s675_s3 + $0x30] sm:$0xff]  ;;  %v7741_v32 = vand.u32 4294901760, %v751_v26  ;;  %s6215_s21 = sshll.u32 %s9143_s22, 8  ;;  %s9071_s25 = scalar_lea.vmem %s9128_s20, %s7669_s23 }
  0x16   : > { %v7679_v2 = vld [vmem:[%s675_s3] sm:$0xff]  ;;  %v734_v3 = vadd.f32 %v7677_v1, %v7675_v0  ;;  %v7683_v4 = vld [vmem:[%s675_s3 + $0x8] sm:$0xff]  ;;  %v7687_v6 = vld [vmem:[%s675_s3 + $0x38] sm:$0xff]  ;;  %v7712_v15 = vsub.f32 %v742_v13, %v7709_v14  ;;  %v7739_v30 = vsub.f32 %v745_v21, %v7733_v24  ;;  %v7744_v33 = vsub.f32 %v748_v22, %v7735_v25  ;;  %s8069_s27 = scalar_lea.vmem %s9123_s15, %s6215_s21 }
  0x17   : > { %v728_v7 = vadd.f32 %v7683_v4, %v7679_v2  ;;  %v7691_v8 = vld [vmem:[%s675_s3 + $0x10] sm:$0xff]  ;;  %v7693_v9 = vld [vmem:[%s675_s3 + $0x18] sm:$0xff]  ;;  %v737_v10 = vadd.f32 %v7687_v6, %v7685_v5  ;;  %v7752_v42 = vsub.f32 %v751_v26, %v7741_v32  ;;  %v1372_v21 = vsel %vm740_vm0, %v720_v20, 0 }
  0x18   : > { %735 = vadd.xlane.f32.xlu1 %v734_v3  ;;  %v731_v11 = vadd.f32 %v7693_v9, %v7691_v8  ;;  %v7715_v16 = vand.u32 4294901760, %v7712_v15  ;;  %v7749_v39 = vand.u32 4294901760, %v7739_v30  ;;  %v7755_v44 = vand.u32 4294901760, %v7744_v33 }
  0x19   : > { %729 = vadd.xlane.f32.xlu0 %v728_v7  ;;  %v7764_v53 = vand.u32 4294901760, %v7752_v42  ;;  %v7811_v22 = vand.u32 4294901760, %v1372_v21 }
  0x1a   : > { %v825_v17 = vsub.f32 %v7712_v15, %v7715_v16  ;;  %v835_v49 = vsub.f32 %v7739_v30, %v7749_v39  ;;  %v845_v55 = vsub.f32 %v7744_v33, %v7755_v44 }
  0x1b   : > { %v855_v62 = vsub.f32 %v7752_v42, %v7764_v53  ;;  %v7814_v23 = vsub.f32 %v1372_v21, %v7811_v22 }
  0x1c   : > { %738 = vadd.xlane.f32.xlu1 %v737_v10  ;;  %v7719_v18 = vand.u32 4294901760, %v825_v17  ;;  %v7770_v58 = vand.u32 4294901760, %v835_v49  ;;  %v7774_v63 = vand.u32 4294901760, %v845_v55 }
  0x1d   : > { %732 = vadd.xlane.f32.xlu0 %v731_v11  ;;  %v7777_v11 = vand.u32 4294901760, %v855_v62  ;;  %v7817_v26 = vand.u32 4294901760, %v7814_v23 }
  0x1e   : > { %6645 = vmatprep.mubr.f32.mxu0 %v7719_v18 }
  0xa5   : > { %v736_v27 = vpop.xlane.xlu1 %735 }
  0xa6   : > { %v760_v28 = vand.u32 4294901760, %v736_v27  ;;  %v730_v29 = vpop.xlane.xlu0 %729 }
  0xa7   : > { %v754_v31 = vand.u32 4294901760, %v730_v29 }
  0xa8   : > { %v7746_v34 = vsub.f32 %v736_v27, %v760_v28  ;;  %v1455_v27 = vsub.f32 %v7814_v23, %v7817_v26 }
  0xa9   : > { %v864_v35 = vsub.f32 %v730_v29, %v754_v31  ;;  %v739_v36 = vpop.xlane.xlu1 %738  ;;  %v721_v29 = vld [vmem:[%s9140_s29 + $0x8] sm:$0xff] }
  0xaa   : > { %v763_v37 = vand.u32 4294901760, %v739_v36  ;;  %v733_v38 = vpop.xlane.xlu0 %732  ;;  %v879_v45 = vand.u32 4294901760, %v7746_v34 }
  0xab   : > { %v865_v40 = vand.u32 4294901760, %v864_v35  ;;  %v757_v41 = vand.u32 4294901760, %v733_v38 }
  0xac   : > { %v885_v43 = vsub.f32 %v739_v36, %v763_v37  ;;  %v7169_v51 = vpack.c.bf16 %v763_v37, %v760_v28  ;;  %v880_v57 = vsub.f32 %v7746_v34, %v879_v45  ;;  %v7821_v28 = vand.u32 4294901760, %v1455_v27  ;;  %v723_v36 = vld [vmem:[%s9140_s29 + $0x18] sm:$0xff] }
  0xad   : > { %v7758_v46 = vpack.c.bf16 %v757_v41, %v754_v31  ;;  %v871_v47 = vsub.f32 %v733_v38, %v757_v41  ;;  %v866_v50 = vsub.f32 %v864_v35, %v865_v40  ;;  %v722_v31 = vld [vmem:[%s9140_s29 + $0x10] sm:$0xff] }
  0xae   : > { %v886_v48 = vand.u32 4294901760, %v885_v43  ;;  %v881_v7 = vand.u32 4294901760, %v880_v57  ;;  %v7185_v13 = vpack.c.bf16 %v885_v43, %v7746_v34  ;;  %6729 = vmatprep.mubr.f32.mxu1 %v7821_v28  ;;  %v1375_v34 = vsel %vm740_vm0, %v721_v29, 0 }
  0xaf   : > { %v872_v52 = vand.u32 4294901760, %v871_v47  ;;  %7166 = vmatprep.subr.bf16.mxu0 %v7758_v46  ;;  %v867_v59 = vand.u32 4294901760, %v866_v50  ;;  %v7181_v12 = vpack.c.bf16 %v871_v47, %v864_v35  ;;  %v1378_v35 = vsel %vm740_vm0, %v722_v31, 0 }
  0xb0   : > { %7168 = vmatpush3.bf16.msra.mxu0 %v7758_v46  ;;  %v887_v54 = vsub.f32 %v885_v43, %v886_v48  ;;  %v7201_v19 = vpack.c.bf16 %v886_v48, %v879_v45  ;;  %v7835_v37 = vand.u32 4294901760, %v1375_v34  ;;  %v7837_v38 = vand.u32 4294901760, %v1378_v35 }
  0xb1   : > { %v873_v56 = vsub.f32 %v871_v47, %v872_v52  ;;  %7170 = vmatprep.subr.bf16.mxu0 %v7169_v51  ;;  %v7197_v17 = vpack.c.bf16 %v872_v52, %v865_v40  ;;  %v1381_v40 = vsel %vm740_vm0, %v723_v36, 0 }
  0xb2   : > { %v888_v61 = vand.u32 4294901760, %v887_v54  ;;  %v7841_v41 = vsub.f32 %v1375_v34, %v7835_v37  ;;  %v7843_v45 = vand.u32 4294901760, %v1381_v40  ;;  %v7846_v48 = vsub.f32 %v1378_v35, %v7837_v38 }
  0xb3   : > { %v874_v60 = vand.u32 4294901760, %v873_v56 }
  0xb4   : > { %7172 = vmatpush3.bf16.msra.mxu0 %v7169_v51  ;;  %v7177_v10 = vpack.c.bf16 %v888_v61, %v881_v7  ;;  %v7852_v55 = vsub.f32 %v1381_v40, %v7843_v45 }
  0xb5   : > { %v7173_v3 = vpack.c.bf16 %v874_v60, %v867_v59  ;;  %v7855_v60 = vand.u32 4294901760, %v7846_v48 }
  0xb7   : > { %6646 = vmatmul.mubr.f32.vlgmr.msra.gmra.mrb[0].mxu0 %v7770_v58  ;;  %7174 = vmatprep.subr.bf16.mxu0 %v7173_v3 }
  0xb8   : > { %7176 = vmatpush3.bf16.msra.mxu0 %v7173_v3  ;;  %6648 = vmatprep.mubr.f32.mxu0 %v7774_v63 }
  0xb9   : > { %7178 = vmatprep.subr.bf16.mxu0 %v7177_v10 }
  0xbb   : > { %6649 = vmatmul.mubr.f32.gmra.mrb[2].mxu0 %v7777_v11 }
  0xbc   : > { %7180 = vmatpush3.bf16.msra.mxu0 %v7177_v10  ;;  %6659 = vmatprep.mubr.f32.mxu0 %v7709_v14 }
  0xbd   : > { %7182 = vmatprep.subr.bf16.mxu0 %v7181_v12 }
  0xbf   : > { %6660 = vmatmul.mubr.f32.vlgmr.msra.gmra.mrb[0].mxu0 %v7733_v24 }
  0xc0   : > { %7184 = vmatpush3.bf16.msra.mxu0 %v7181_v12  ;;  %6662 = vmatprep.mubr.f32.mxu0 %v7735_v25 }
  0xc1   : > { %7186 = vmatprep.subr.bf16.mxu0 %v7185_v13 }
  0xc3   : > { %6663 = vmatmul.mubr.f32.gmra.mrb[2].mxu0 %v7741_v32 }
  0xc4   : > { %7188 = vmatpush3.bf16.msra.mxu0 %v7185_v13  ;;  %6673 = vmatprep.mubr.f32.mxu0 %v7712_v15 }
  0xc5   : > { %7190 = vmatprep.subr.bf16.mxu0 %v7758_v46 }
  0xc7   : > { %6674 = vmatmul.mubr.f32.vlgmr.msra.gmra.mrb[0].mxu0 %v7739_v30 }
  0xc8   : > { %7192 = vmatpush3.bf16.msra.mxu0 %v7758_v46  ;;  %6676 = vmatprep.mubr.f32.mxu0 %v7744_v33 }
  0xc9   : > { %7194 = vmatprep.subr.bf16.mxu0 %v7169_v51 }
  0xcb   : > { %6677 = vmatmul.mubr.f32.gmra.mrb[2].mxu0 %v7752_v42 }
  0xcc   : > { %7196 = vmatpush3.bf16.msra.mxu0 %v7169_v51  ;;  %6687 = vmatprep.mubr.f32.mxu0 %v7715_v16 }
  0xcd   : > { %7198 = vmatprep.subr.bf16.mxu0 %v7197_v17 }
  0xcf   : > { %6688 = vmatmul.mubr.f32.vlgmr.msra.gmra.mrb[0].mxu0 %v7749_v39 }
  0xd0   : > { %7200 = vmatpush3.bf16.msra.mxu0 %v7197_v17  ;;  %6690 = vmatprep.mubr.f32.mxu0 %v7755_v44 }
  0xd1   : > { %7202 = vmatprep.subr.bf16.mxu0 %v7201_v19 }
  0xd3   : > { %6691 = vmatmul.mubr.f32.gmra.mrb[2].mxu0 %v7764_v53 }
  0xd4   : > { %7204 = vmatpush3.bf16.msra.mxu0 %v7201_v19  ;;  %6701 = vmatprep.mubr.f32.mxu0 %v7709_v14  ;;  %v7863_v19 = vand.u32 4294901760, %v7852_v55 }
  0xd5   : > { %7206 = vmatprep.subr.bf16.mxu0 %v7758_v46 }
  0xd7   : > { %6702 = vmatmul.mubr.f32.vlgmr.msra.gmra.mrb[0].mxu0 %v7733_v24 }
  0xd8   : > { %7208 = vmatpush3.bf16.msra.mxu0 %v7758_v46  ;;  %6704 = vmatprep.mubr.f32.mxu0 %v7735_v25 }
  0xd9   : > { %7210 = vmatprep.subr.bf16.mxu0 %v7169_v51 }
  0xdb   : > { %6705 = vmatmul.mubr.f32.gmra.mrb[2].mxu0 %v7741_v32 }
  0xdc   : > { %7212 = vmatpush3.bf16.msra.mxu0 %v7169_v51  ;;  %6715 = vmatprep.mubr.f32.mxu0 %v7709_v14  ;;  %v7849_v51 = vand.u32 4294901760, %v7841_v41 }
  0xde   : > { %v1465_v12 = vsub.f32 %v7841_v41, %v7849_v51 }
  0xdf   : > { %6716 = vmatmul.mubr.f32.vlgmr.msra.gmra.mrb[0].mxu0 %v7733_v24 }
  0xe0   : > { %6718 = vmatprep.mubr.f32.mxu0 %v7735_v25  ;;  %v7868_v40 = vand.u32 4294901760, %v1465_v12 }
  0xe3   : > { %6719 = vmatmul.mubr.f32.gmra.mrb[2].mxu0 %v7741_v32 }
  0xe4   : > { %6813 = vmatprep.mubr.f32.mxu0 %v7719_v18  ;;  %v7552_v18 = vmov 0  }
  0xe5   : > { %7447 = vset.pattern.permute.xlu1 %v7552_v18  ;;  %7446 = vset.pattern.permute.xlu0 %v7552_v18  ;;  %v1475_v18 = vsub.f32 %v7846_v48, %v7855_v60 }
 0x1b2   : > { %v6717_v43 = vpop.f32.mrb[0].mxu0 }
 0x1b3   : > { %v1368_v46 = vmul.f32 0.00390625, %v6717_v43  ;;  %v1345_v47 = vpop.f32.mrb[1].mxu0 }
 0x1b4   : > { %v1367_v49 = vmul.f32 0.00390625, %v1345_v47 }
 0x1b5   : > { %v1387_v50 = vand.u32 4294901760, %v1368_v46 }
 0x1b6   : > { %v1384_v52 = vand.u32 4294901760, %v1367_v49  ;;  %v6720_v54 = vpop.f32.mrb[2].mxu0 }
 0x1b7   : > { %v1501_v56 = vsub.f32 %v1368_v46, %v1387_v50  ;;  %v1370_v57 = vmul.f32 0.00390625, %v6720_v54  ;;  %v1357_v59 = vpop.f32.mrb[3].mxu0 }
 0x1b8   : > { %v7857_v61 = vpack.c.bf16 %v1387_v50, %v1384_v52  ;;  %v1494_v62 = vsub.f32 %v1367_v49, %v1384_v52  ;;  %v1369_v3 = vmul.f32 0.00390625, %v1357_v59  ;;  %v1485_v49 = vsub.f32 %v7852_v55, %v7863_v19 }
 0x1b9   : > { %v1502_v7 = vand.u32 4294901760, %v1501_v56  ;;  %v1393_v10 = vand.u32 4294901760, %v1370_v57  ;;  %v7872_v52 = vand.u32 4294901760, %v1475_v18 }
 0x1ba   : > { %v1495_v13 = vand.u32 4294901760, %v1494_v62  ;;  %v1390_v17 = vand.u32 4294901760, %v1369_v3  ;;  %7214 = vmatprep.subr.bf16.mxu1 %v7857_v61  ;;  %v7229_v20 = vpack.c.bf16 %v1501_v56, %v1494_v62 }
 0x1bb   : > { %v1515_v21 = vsub.f32 %v1370_v57, %v1393_v10  ;;  %7216 = vmatpush3.bf16.msra.mxu1 %v7857_v61  ;;  %v1503_v27 = vsub.f32 %v1501_v56, %v1502_v7 }
 0x1bc   : > { %v7217_v29 = vpack.c.bf16 %v1393_v10, %v1390_v17  ;;  %v1508_v31 = vsub.f32 %v1369_v3, %v1390_v17  ;;  %v1496_v34 = vsub.f32 %v1494_v62, %v1495_v13  ;;  %v7245_v35 = vpack.c.bf16 %v1502_v7, %v1495_v13 }
 0x1bd   : > { %v1516_v36 = vand.u32 4294901760, %v1515_v21  ;;  %v1504_v43 = vand.u32 4294901760, %v1503_v27  ;;  %v7875_v3 = vand.u32 4294901760, %v1485_v49 }
 0x1be   : > { %v1509_v46 = vand.u32 4294901760, %v1508_v31  ;;  %7218 = vmatprep.subr.bf16.mxu1 %v7217_v29  ;;  %v1497_v47 = vand.u32 4294901760, %v1496_v34  ;;  %v7233_v50 = vpack.c.bf16 %v1515_v21, %v1508_v31 }
 0x1bf   : > { %7220 = vmatpush3.bf16.msra.mxu1 %v7217_v29  ;;  %v1517_v54 = vsub.f32 %v1515_v21, %v1516_v36 }
 0x1c0   : > { %v7221_v56 = vpack.c.bf16 %v1504_v43, %v1497_v47  ;;  %v1510_v57 = vsub.f32 %v1508_v31, %v1509_v46  ;;  %v7249_v59 = vpack.c.bf16 %v1516_v36, %v1509_v46 }
 0x1c1   : > { %v1518_v62 = vand.u32 4294901760, %v1517_v54 }
 0x1c2   : > { %6730 = vmatmul.mubr.f32.vlgmr.msra.gmra.mrb[0].mxu1 %v7868_v40  ;;  %7222 = vmatprep.subr.bf16.mxu1 %v7221_v56  ;;  %v1511_v7 = vand.u32 4294901760, %v1510_v57 }
 0x1c3   : > { %7224 = vmatpush3.bf16.msra.mxu1 %v7221_v56  ;;  %6732 = vmatprep.mubr.f32.mxu1 %v7872_v52 }
 0x1c4   : > { %v7225_v10 = vpack.c.bf16 %v1518_v62, %v1511_v7 }
 0x1c6   : > { %6733 = vmatmul.mubr.f32.gmra.mrb[2].mxu1 %v7875_v3  ;;  %7226 = vmatprep.subr.bf16.mxu1 %v7225_v10 }
 0x1c7   : > { %7228 = vmatpush3.bf16.msra.mxu1 %v7225_v10  ;;  %6743 = vmatprep.mubr.f32.mxu1 %v7811_v22 }
 0x1c8   : > { %7230 = vmatprep.subr.bf16.mxu1 %v7229_v20 }
 0x1ca   : > { %6744 = vmatmul.mubr.f32.vlgmr.msra.gmra.mrb[0].mxu1 %v7835_v37 }
 0x1cb   : > { %7232 = vmatpush3.bf16.msra.mxu1 %v7229_v20  ;;  %6746 = vmatprep.mubr.f32.mxu1 %v7837_v38 }
 0x1cc   : > { %7234 = vmatprep.subr.bf16.mxu1 %v7233_v50 }
 0x1ce   : > { %6747 = vmatmul.mubr.f32.gmra.mrb[2].mxu1 %v7843_v45 }
 0x1cf   : > { %7236 = vmatpush3.bf16.msra.mxu1 %v7233_v50  ;;  %6757 = vmatprep.mubr.f32.mxu1 %v7814_v23 }
 0x1d0   : > { %7238 = vmatprep.subr.bf16.mxu1 %v7857_v61 }
 0x1d2   : > { %6758 = vmatmul.mubr.f32.vlgmr.msra.gmra.mrb[0].mxu1 %v7841_v41 }
 0x1d3   : > { %7240 = vmatpush3.bf16.msra.mxu1 %v7857_v61  ;;  %6760 = vmatprep.mubr.f32.mxu1 %v7846_v48 }
 0x1d4   : > { %7242 = vmatprep.subr.bf16.mxu1 %v7217_v29 }
 0x1d6   : > { %6761 = vmatmul.mubr.f32.gmra.mrb[2].mxu1 %v7852_v55 }
 0x1d7   : > { %7244 = vmatpush3.bf16.msra.mxu1 %v7217_v29  ;;  %6771 = vmatprep.mubr.f32.mxu1 %v7817_v26 }
 0x1d8   : > { %7246 = vmatprep.subr.bf16.mxu1 %v7245_v35 }
 0x1da   : > { %6772 = vmatmul.mubr.f32.vlgmr.msra.gmra.mrb[0].mxu1 %v7849_v51 }
 0x1db   : > { %7248 = vmatpush3.bf16.msra.mxu1 %v7245_v35  ;;  %6774 = vmatprep.mubr.f32.mxu1 %v7855_v60 }
 0x1dc   : > { %7250 = vmatprep.subr.bf16.mxu1 %v7249_v59 }
 0x1de   : > { %6775 = vmatmul.mubr.f32.gmra.mrb[2].mxu1 %v7863_v19 }
 0x1df   : > { %7252 = vmatpush3.bf16.msra.mxu1 %v7249_v59  ;;  %6785 = vmatprep.mubr.f32.mxu1 %v7811_v22  ;;  %v3322_v59 = vld [vmem:[%s9113_s5 + $0x8] sm:$0xff] }
 0x1e0   : > { %7254 = vmatprep.subr.bf16.mxu1 %v7857_v61 }
 0x1e2   : > { %6786 = vmatmul.mubr.f32.vlgmr.msra.gmra.mrb[0].mxu1 %v7835_v37 }
 0x1e3   : > { %7256 = vmatpush3.bf16.msra.mxu1 %v7857_v61  ;;  %6788 = vmatprep.mubr.f32.mxu1 %v7837_v38 }
 0x1e4   : > { %7258 = vmatprep.subr.bf16.mxu1 %v7217_v29 }
 0x1e6   : > { %6789 = vmatmul.mubr.f32.gmra.mrb[2].mxu1 %v7843_v45 }
 0x1e7   : > { %7260 = vmatpush3.bf16.msra.mxu1 %v7217_v29  ;;  %6799 = vmatprep.mubr.f32.mxu1 %v7811_v22 }
 0x1ea   : > { %6800 = vmatmul.mubr.f32.vlgmr.msra.gmra.mrb[0].mxu1 %v7835_v37 }
 0x1eb   : > { %6802 = vmatprep.mubr.f32.mxu1 %v7837_v38 }
 0x1ee   : > { %6803 = vmatmul.mubr.f32.gmra.mrb[2].mxu1 %v7843_v45 }
 0x1ef   : > { %6897 = vmatprep.mubr.f32.mxu1 %v7821_v28 }
 0x2bd   : > { %v6801_v12 = vpop.f32.mrb[0].mxu1 }
 0x2be   : > { %2004 = vperm.xlu1 %7447, %v6801_v12   ;;  %v1975_v13 = vpop.f32.mrb[1].mxu1 }
 0x2bf   : > { %1999 = vperm.xlu0 %7446, %v1975_v13  }
 0x2c1   : > { %v6804_v61 = vpop.f32.mrb[2].mxu1 }
 0x2c2   : > { %v1987_v17 = vpop.f32.mrb[3].mxu1 }
 0x2c3   : > { %2009 = vperm.xlu1 %7447, %v1987_v17  }
 0x2c7   : > { %2014 = vperm.xlu1 %7447, %v6804_v61  }
 0x33d   : > { %v2005_v20 = vpop.permute.xlu1 %2004 }
 0x33e   : > { %v7905_v21 = vsub.f32 %v7691_v8, %v2005_v20  ;;  %v7908_v27 = vsub.f32 %v7693_v9, %v2005_v20  ;;  %v2000_v18 = vpop.permute.xlu0 %1999 }
 0x33f   : > { %v7911_v29 = vsub.f32 %v7679_v2, %v2000_v18  ;;  %v7914_v28 = vsub.f32 %v7683_v4, %v2000_v18 }
 0x340   : > { %v2027_v31 = vmul.f32 %v7905_v21, %v7905_v21  ;;  %v2028_v34 = vmul.f32 %v7908_v27, %v7908_v27 }
 0x341   : > { %v2025_v8 = vmul.f32 %v7911_v29, %v7911_v29  ;;  %v2026_v9 = vmul.f32 %v7914_v28, %v7914_v28 }
 0x342   : > { %v2010_v35 = vpop.permute.xlu1 %2009  ;;  %v2036_v36 = vadd.f32 %v2028_v34, %v2027_v31 }
 0x343   : > { %v7925_v2 = vsub.f32 %v7675_v0, %v2010_v35  ;;  %v7928_v4 = vsub.f32 %v7677_v1, %v2010_v35  ;;  %v2033_v43 = vadd.f32 %v2026_v9, %v2025_v8 }
 0x344   : > { %2037 = vadd.xlane.f32.xlu0 %v2036_v36 }
 0x345   : > { %2034 = vadd.xlane.f32.xlu1 %v2033_v43  ;;  %v2029_v46 = vmul.f32 %v7925_v2, %v7925_v2  ;;  %v2030_v47 = vmul.f32 %v7928_v4, %v7928_v4 }
 0x346   : > { %v2015_v49 = vpop.permute.xlu1 %2014 }
 0x347   : > { %v7935_v50 = vsub.f32 %v7685_v5, %v2015_v49  ;;  %v7938_v54 = vsub.f32 %v7687_v6, %v2015_v49  ;;  %v2039_v0 = vadd.f32 %v2030_v47, %v2029_v46  ;;  %v3321_v5 = vld [vmem:[%s9113_s5] sm:$0xff] }
 0x349   : > { %2040 = vadd.xlane.f32.xlu1 %v2039_v0  ;;  %v2031_v1 = vmul.f32 %v7935_v50, %v7935_v50  ;;  %v2032_v56 = vmul.f32 %v7938_v54, %v7938_v54 }
 0x34b   : > { %v2042_v57 = vadd.f32 %v2032_v56, %v2031_v1 }
 0x34d   : > { %2043 = vadd.xlane.f32.xlu1 %v2042_v57 }
 0x35a   : > { %3332 = vperm.xlu0 %7446, %v3322_v59  }
 0x35e   : > { %3327 = vperm.xlu1 %7447, %v3321_v5  }
 0x3d1   : > { %v2038_v6 = vpop.xlane.xlu0 %2037 }
 0x3d2   : > { %v2049_v62 = vand.u32 4294901760, %v2038_v6  ;;  %v2035_v7 = vpop.xlane.xlu1 %2034 }
 0x3d3   : > { %v2046_v10 = vand.u32 4294901760, %v2035_v7 }
 0x3d4   : > { %v2163_v12 = vsub.f32 %v2038_v6, %v2049_v62 }
 0x3d5   : > { %v7950_v13 = vpack.c.bf16 %v2049_v62, %v2046_v10  ;;  %v2156_v61 = vsub.f32 %v2035_v7, %v2046_v10 }
 0x3d6   : > { %v2164_v17 = vand.u32 4294901760, %v2163_v12  ;;  %v2041_v20 = vpop.xlane.xlu1 %2040 }
 0x3d7   : > { %v2157_v18 = vand.u32 4294901760, %v2156_v61  ;;  %v2052_v31 = vand.u32 4294901760, %v2041_v20  ;;  %7262 = vmatprep.subr.bf16.mxu0 %v7950_v13  ;;  %v7277_v7 = vpack.c.bf16 %v2163_v12, %v2156_v61 }
 0x3d8   : > { %v2165_v34 = vsub.f32 %v2163_v12, %v2164_v17  ;;  %7264 = vmatpush3.bf16.msra.mxu0 %v7950_v13 }
 0x3d9   : > { %v2158_v8 = vsub.f32 %v2156_v61, %v2157_v18  ;;  %v2170_v9 = vsub.f32 %v2041_v20, %v2052_v31 }
 0x3da   : > { %v2044_v35 = vpop.xlane.xlu1 %2043  ;;  %v2166_v47 = vand.u32 4294901760, %v2165_v34 }
 0x3db   : > { %v2171_v36 = vand.u32 4294901760, %v2170_v9  ;;  %v2055_v43 = vand.u32 4294901760, %v2044_v35  ;;  %v2159_v46 = vand.u32 4294901760, %v2158_v8 }
 0x3dd   : > { %v7265_v49 = vpack.c.bf16 %v2055_v43, %v2052_v31  ;;  %v2177_v0 = vsub.f32 %v2044_v35, %v2055_v43  ;;  %v2172_v1 = vsub.f32 %v2170_v9, %v2171_v36  ;;  %v7269_v57 = vpack.c.bf16 %v2166_v47, %v2159_v46 }
 0x3df   : > { %v2178_v56 = vand.u32 4294901760, %v2177_v0  ;;  %7266 = vmatprep.subr.bf16.mxu0 %v7265_v49  ;;  %v2173_v5 = vand.u32 4294901760, %v2172_v1  ;;  %v7281_v10 = vpack.c.bf16 %v2177_v0, %v2170_v9 }
 0x3e0   : > { %7268 = vmatpush3.bf16.msra.mxu0 %v7265_v49 }
 0x3e1   : > { %v2179_v59 = vsub.f32 %v2177_v0, %v2178_v56  ;;  %7270 = vmatprep.subr.bf16.mxu0 %v7269_v57 }
 0x3e3   : > { %6814 = vmatmul.mubr.f32.vlgmr.msra.gmra.mrb[4].mxu0 %v7770_v58  ;;  %v2180_v6 = vand.u32 4294901760, %v2179_v59  ;;  %v7293_v58 = vpack.c.bf16 %v2164_v17, %v2157_v18 }
 0x3e4   : > { %7272 = vmatpush3.bf16.msra.mxu0 %v7269_v57  ;;  %6816 = vmatprep.mubr.f32.mxu0 %v7774_v63  ;;  %v7297_v63 = vpack.c.bf16 %v2178_v56, %v2171_v36 }
 0x3e5   : > { %v7273_v62 = vpack.c.bf16 %v2180_v6, %v2173_v5 }
 0x3e7   : > { %6817 = vmatmul.mubr.f32.gmra.mrb[6].mxu0 %v7777_v11  ;;  %7274 = vmatprep.subr.bf16.mxu0 %v7273_v62 }
 0x3e8   : > { %7276 = vmatpush3.bf16.msra.mxu0 %v7273_v62  ;;  %6827 = vmatprep.mubr.f32.mxu0 %v7709_v14 }
 0x3e9   : > { %7278 = vmatprep.subr.bf16.mxu0 %v7277_v7 }
 0x3eb   : > { %6828 = vmatmul.mubr.f32.vlgmr.msra.gmra.mrb[4].mxu0 %v7733_v24 }
 0x3ec   : > { %7280 = vmatpush3.bf16.msra.mxu0 %v7277_v7  ;;  %6830 = vmatprep.mubr.f32.mxu0 %v7735_v25 }
 0x3ed   : > { %7282 = vmatprep.subr.bf16.mxu0 %v7281_v10 }
 0x3ef   : > { %6831 = vmatmul.mubr.f32.gmra.mrb[6].mxu0 %v7741_v32 }
 0x3f0   : > { %7284 = vmatpush3.bf16.msra.mxu0 %v7281_v10  ;;  %6841 = vmatprep.mubr.f32.mxu0 %v7712_v15 }
 0x3f1   : > { %7286 = vmatprep.subr.bf16.mxu0 %v7950_v13 }
 0x3f3   : > { %6842 = vmatmul.mubr.f32.vlgmr.msra.gmra.mrb[4].mxu0 %v7739_v30 }
 0x3f4   : > { %7288 = vmatpush3.bf16.msra.mxu0 %v7950_v13  ;;  %6844 = vmatprep.mubr.f32.mxu0 %v7744_v33 }
 0x3f5   : > { %7290 = vmatprep.subr.bf16.mxu0 %v7265_v49 }
 0x3f7   : > { %6845 = vmatmul.mubr.f32.gmra.mrb[6].mxu0 %v7752_v42 }
 0x3f8   : > { %7292 = vmatpush3.bf16.msra.mxu0 %v7265_v49  ;;  %6855 = vmatprep.mubr.f32.mxu0 %v7715_v16 }
 0x3f9   : > { %7294 = vmatprep.subr.bf16.mxu0 %v7293_v58 }
 0x3fb   : > { %6856 = vmatmul.mubr.f32.vlgmr.msra.gmra.mrb[4].mxu0 %v7749_v39 }
 0x3fc   : > { %7296 = vmatpush3.bf16.msra.mxu0 %v7293_v58  ;;  %6858 = vmatprep.mubr.f32.mxu0 %v7755_v44 }
 0x3fd   : > { %7298 = vmatprep.subr.bf16.mxu0 %v7297_v63 }
 0x3ff   : > { %6859 = vmatmul.mubr.f32.gmra.mrb[6].mxu0 %v7764_v53 }
 0x400   : > { %7300 = vmatpush3.bf16.msra.mxu0 %v7297_v63  ;;  %6869 = vmatprep.mubr.f32.mxu0 %v7709_v14 }
 0x401   : > { %7302 = vmatprep.subr.bf16.mxu0 %v7950_v13 }
 0x403   : > { %6870 = vmatmul.mubr.f32.vlgmr.msra.gmra.mrb[4].mxu0 %v7733_v24 }
 0x404   : > { %7304 = vmatpush3.bf16.msra.mxu0 %v7950_v13  ;;  %6872 = vmatprep.mubr.f32.mxu0 %v7735_v25 }
 0x405   : > { %7306 = vmatprep.subr.bf16.mxu0 %v7265_v49 }
 0x407   : > { %6873 = vmatmul.mubr.f32.gmra.mrb[6].mxu0 %v7741_v32 }
 0x408   : > { %7308 = vmatpush3.bf16.msra.mxu0 %v7265_v49  ;;  %6883 = vmatprep.mubr.f32.mxu0 %v7709_v14 }
 0x40b   : > { %6884 = vmatmul.mubr.f32.vlgmr.msra.gmra.mrb[4].mxu0 %v7733_v24 }
 0x40c   : > { %6886 = vmatprep.mubr.f32.mxu0 %v7735_v25 }
 0x40f   : > { %6887 = vmatmul.mubr.f32.gmra.mrb[6].mxu0 %v7741_v32 }
 0x4de   : > { %v6885_v15 = vpop.f32.mrb[4].mxu0 }
 0x4df   : > { %v2660_v16 = vmul.f32 0.00390625, %v6885_v15  ;;  %v2637_v30 = vpop.f32.mrb[5].mxu0 }
 0x4e0   : > { %v2659_v33 = vmul.f32 0.00390625, %v2637_v30 }
 0x4e1   : > { %v2664_v39 = vadd.f32 1e-06, %v2660_v16 }
 0x4e2   : > { %v2663_v42 = vadd.f32 1e-06, %v2659_v33  ;;  %v6888_v44 = vpop.f32.mrb[6].mxu0  ;;  %v7449_v33 = vld [vmem:[%s9114_s6 + $0x8] sm:$0xff]  }
 0x4e3   : > { %7472 = vrsqrt.f32 %v2664_v39  ;;  %v2662_v53 = vmul.f32 0.00390625, %v6888_v44  ;;  %v2649_v11 = vpop.f32.mrb[7].mxu0  ;;  %v3333_v39 = vpop.permute.xlu0 %3332 }
 0x4e4   : > { %7474 = vrsqrt.f32 %v2663_v42  ;;  %v2661_v12 = vmul.f32 0.00390625, %v2649_v11  ;;  %v3328_v42 = vpop.permute.xlu1 %3327 }
 0x4e5   : > { %v2666_v13 = vadd.f32 1e-06, %v2662_v53 }
 0x4e6   : > { %v2665_v14 = vadd.f32 1e-06, %v2661_v12 }
 0x4e7   : > { %7476 = vrsqrt.f32 %v2666_v13 }
 0x4e8   : > { %7478 = vrsqrt.f32 %v2665_v14 }
 0x4ed   : > { %v7473_v24 = vpop.eup %7472 }
 0x4ee   : > { %v7475_v25 = vpop.eup %7474  ;;  %v2675_v61 = vand.u32 4294901760, %v7473_v24 }
 0x4ef   : > { %v2672_v32 = vand.u32 4294901760, %v7475_v25 }
 0x4f0   : > { %v2789_v17 = vsub.f32 %v7473_v24, %v2675_v61 }
 0x4f1   : > { %v7477_v20 = vpop.eup %7476  ;;  %v7981_v18 = vpack.c.bf16 %v2675_v61, %v2672_v32  ;;  %v2782_v31 = vsub.f32 %v7475_v25, %v2672_v32 }
 0x4f2   : > { %v7479_v34 = vpop.eup %7478  ;;  %v2681_v8 = vand.u32 4294901760, %v7477_v20  ;;  %v2790_v9 = vand.u32 4294901760, %v2789_v17 }
 0x4f3   : > { %v2678_v35 = vand.u32 4294901760, %v7479_v34  ;;  %7310 = vmatprep.subr.bf16.mxu1 %v7981_v18  ;;  %v2783_v36 = vand.u32 4294901760, %v2782_v31  ;;  %v7325_v43 = vpack.c.bf16 %v2789_v17, %v2782_v31 }
 0x4f4   : > { %7312 = vmatpush3.bf16.msra.mxu1 %v7981_v18  ;;  %v2791_v46 = vsub.f32 %v2789_v17, %v2790_v9  ;;  %v2803_v47 = vsub.f32 %v7477_v20, %v2681_v8 }
 0x4f5   : > { %v7313_v49 = vpack.c.bf16 %v2681_v8, %v2678_v35  ;;  %v2784_v0 = vsub.f32 %v2782_v31, %v2783_v36  ;;  %v2796_v1 = vsub.f32 %v7479_v34, %v2678_v35  ;;  %v7341_v56 = vpack.c.bf16 %v2790_v9, %v2783_v36 }
 0x4f6   : > { %v2792_v57 = vand.u32 4294901760, %v2791_v46  ;;  %v2804_v59 = vand.u32 4294901760, %v2803_v47 }
 0x4f7   : > { %7314 = vmatprep.subr.bf16.mxu1 %v7313_v49  ;;  %v2785_v5 = vand.u32 4294901760, %v2784_v0  ;;  %v2797_v6 = vand.u32 4294901760, %v2796_v1  ;;  %v7329_v62 = vpack.c.bf16 %v2803_v47, %v2796_v1 }
 0x4f8   : > { %7316 = vmatpush3.bf16.msra.mxu1 %v7313_v49  ;;  %v2805_v7 = vsub.f32 %v2803_v47, %v2804_v59 }
 0x4f9   : > { %v7317_v10 = vpack.c.bf16 %v2792_v57, %v2785_v5  ;;  %v2798_v58 = vsub.f32 %v2796_v1, %v2797_v6  ;;  %v7345_v63 = vpack.c.bf16 %v2804_v59, %v2797_v6 }
 0x4fa   : > { %v2806_v15 = vand.u32 4294901760, %v2805_v7 }
 0x4fb   : > { %6898 = vmatmul.mubr.f32.vlgmr.msra.gmra.mrb[4].mxu1 %v7868_v40  ;;  %7318 = vmatprep.subr.bf16.mxu1 %v7317_v10  ;;  %v2799_v16 = vand.u32 4294901760, %v2798_v58 }
 0x4fc   : > { %7320 = vmatpush3.bf16.msra.mxu1 %v7317_v10  ;;  %6900 = vmatprep.mubr.f32.mxu1 %v7872_v52  ;;  %v3323_v52 = vld [vmem:[%s9113_s5 + $0x10] sm:$0xff] }
 0x4fd   : > { %v7321_v30 = vpack.c.bf16 %v2806_v15, %v2799_v16 }
 0x4ff   : > { %6901 = vmatmul.mubr.f32.gmra.mrb[6].mxu1 %v7875_v3  ;;  %7322 = vmatprep.subr.bf16.mxu1 %v7321_v30  ;;  %v7448_v3 = vld [vmem:[%s9114_s6] sm:$0xff]  }
 0x500   : > { %7324 = vmatpush3.bf16.msra.mxu1 %v7321_v30  ;;  %6911 = vmatprep.mubr.f32.mxu1 %v7811_v22 }
 0x501   : > { %7326 = vmatprep.subr.bf16.mxu1 %v7325_v43  ;;  %6973 = vmatprep.subr.bf16.mxu0 %v7448_v3 }
 0x502   : > { %6974 = vmatpush3.bf16.msra.mxu0 %v7448_v3 }
 0x503   : > { %6912 = vmatmul.mubr.f32.vlgmr.msra.gmra.mrb[4].mxu1 %v7835_v37  ;;  %6975 = vmatprep.subr.bf16.mxu0 %v7449_v33 }
 0x504   : > { %7328 = vmatpush3.bf16.msra.mxu1 %v7325_v43  ;;  %6914 = vmatprep.mubr.f32.mxu1 %v7837_v38 }
 0x505   : > { %7330 = vmatprep.subr.bf16.mxu1 %v7329_v62 }
 0x506   : > { %6976 = vmatpush3.bf16.msra.mxu0 %v7449_v33 }
 0x507   : > { %6915 = vmatmul.mubr.f32.gmra.mrb[6].mxu1 %v7843_v45 }
 0x508   : > { %7332 = vmatpush3.bf16.msra.mxu1 %v7329_v62  ;;  %6925 = vmatprep.mubr.f32.mxu1 %v7814_v23  ;;  %v3286_v23 = vld [vmem:[%s9141_s2 + $0x8] sm:$0xff] }
 0x509   : > { %7334 = vmatprep.subr.bf16.mxu1 %v7981_v18 }
 0x50b   : > { %6926 = vmatmul.mubr.f32.vlgmr.msra.gmra.mrb[4].mxu1 %v7841_v41 }
 0x50c   : > { %7336 = vmatpush3.bf16.msra.mxu1 %v7981_v18  ;;  %6928 = vmatprep.mubr.f32.mxu1 %v7846_v48 }
 0x50d   : > { %7338 = vmatprep.subr.bf16.mxu1 %v7313_v49 }
 0x50f   : > { %6929 = vmatmul.mubr.f32.gmra.mrb[6].mxu1 %v7852_v55 }
 0x510   : > { %7340 = vmatpush3.bf16.msra.mxu1 %v7313_v49  ;;  %6939 = vmatprep.mubr.f32.mxu1 %v7817_v26  ;;  %v3285_v26 = vld [vmem:[%s9141_s2] sm:$0xff] }
 0x511   : > { %7342 = vmatprep.subr.bf16.mxu1 %v7341_v56 }
 0x513   : > { %6940 = vmatmul.mubr.f32.vlgmr.msra.gmra.mrb[4].mxu1 %v7849_v51 }
 0x514   : > { %7344 = vmatpush3.bf16.msra.mxu1 %v7341_v56  ;;  %6942 = vmatprep.mubr.f32.mxu1 %v7855_v60 }
 0x515   : > { %7346 = vmatprep.subr.bf16.mxu1 %v7345_v63 }
 0x517   : > { %6943 = vmatmul.mubr.f32.gmra.mrb[6].mxu1 %v7863_v19  ;;  %v3287_v19 = vld [vmem:[%s9141_s2 + $0x10] sm:$0xff] }
 0x518   : > { %7348 = vmatpush3.bf16.msra.mxu1 %v7345_v63  ;;  %6953 = vmatprep.mubr.f32.mxu1 %v7811_v22  ;;  %v8064_v63 = vld [vmem:[%s9115_s7] ss:$0 sm:$0xff] }
 0x519   : > { %7350 = vmatprep.subr.bf16.mxu1 %v7981_v18 }
 0x51b   : > { %6954 = vmatmul.mubr.f32.vlgmr.msra.gmra.mrb[4].mxu1 %v7835_v37 }
 0x51c   : > { %7352 = vmatpush3.bf16.msra.mxu1 %v7981_v18  ;;  %6956 = vmatprep.mubr.f32.mxu1 %v7837_v38 }
 0x51d   : > { %7354 = vmatprep.subr.bf16.mxu1 %v7313_v49 }
 0x51f   : > { %6957 = vmatmul.mubr.f32.gmra.mrb[6].mxu1 %v7843_v45 }
 0x520   : > { %7356 = vmatpush3.bf16.msra.mxu1 %v7313_v49  ;;  %6967 = vmatprep.mubr.f32.mxu1 %v7811_v22  ;;  %v3288_v22 = vld [vmem:[%s9141_s2 + $0x18] sm:$0xff] }
 0x523   : > { %6968 = vmatmul.mubr.f32.vlgmr.msra.gmra.mrb[4].mxu1 %v7835_v37 }
 0x524   : > { %6970 = vmatprep.mubr.f32.mxu1 %v7837_v38  ;;  %v3324_v38 = vld [vmem:[%s9113_s5 + $0x18] sm:$0xff] }
 0x527   : > { %6971 = vmatmul.mubr.f32.gmra.mrb[6].mxu1 %v7843_v45 }
 0x5f6   : > { %v6969_v41 = vpop.f32.mrb[4].mxu1 }
 0x5f7   : > { %v3290_v48 = vmul.f32 %v6969_v41, %v3286_v23  ;;  %v3263_v51 = vpop.f32.mrb[5].mxu1 }
 0x5f8   : > { %v3289_v55 = vmul.f32 %v3285_v26, %v3263_v51 }
 0x5f9   : > { %3300 = vperm.xlu0 %7446, %v3290_v48  }
 0x5fa   : > { %3295 = vperm.xlu1 %7447, %v3289_v55   ;;  %v6972_v37 = vpop.f32.mrb[6].mxu1 }
 0x5fb   : > { %v3292_v45 = vmul.f32 %v6972_v37, %v3288_v22  ;;  %v3275_v60 = vpop.f32.mrb[7].mxu1 }
 0x5fc   : > { %v3291_v40 = vmul.f32 %v3287_v19, %v3275_v60 }
 0x5fd   : > { %3342 = vperm.xlu0 %7446, %v3324_v38  }
 0x5fe   : > { %3310 = vperm.xlu1 %7447, %v3292_v45  }
 0x602   : > { %3305 = vperm.xlu1 %7447, %v3291_v40  }
 0x606   : > { %3337 = vperm.xlu1 %7447, %v3323_v52  }
 0x678   : > { %v3301_v44 = vpop.permute.xlu0 %3300 }
 0x679   : > { %v3315_v53 = vmul.f32 %v3301_v44, %v7905_v21  ;;  %v3316_v11 = vmul.f32 %v3301_v44, %v7908_v27  ;;  %v3296_v12 = vpop.permute.xlu1 %3295 }
 0x67a   : > { %v3313_v13 = vmul.f32 %v3296_v12, %v7911_v29  ;;  %v3314_v14 = vmul.f32 %v3296_v12, %v7914_v28 }
 0x67b   : > { %v3347_v24 = vadd.f32 %v3333_v39, %v3315_v53  ;;  %v3348_v25 = vadd.f32 %v3333_v39, %v3316_v11 }
 0x67c   : > { %v3345_v61 = vadd.f32 %v3328_v42, %v3313_v13  ;;  %v3346_v32 = vadd.f32 %v3328_v42, %v3314_v14  ;;  %v3343_v8 = vpop.permute.xlu0 %3342 }
 0x67d   : > { %v3311_v17 = vpop.permute.xlu1 %3310 }
 0x67e   : > { %v3354_v20 = vpack.c.bf16 %v3348_v25, %v3346_v32  ;;  %v3353_v18 = vpack.c.bf16 %v3347_v24, %v3345_v61  ;;  %v3319_v34 = vmul.f32 %v3311_v17, %v7935_v50  ;;  %v3320_v21 = vmul.f32 %v3311_v17, %v7938_v54 }
 0x680   : > { %3384 = vxpose.xlu0.c.b16.start [1/2] (short) %v3354_v20, 128  ;;  %3368 = vxpose.xlu1.c.b16.start [1/2] (short) %v3353_v18, 128  ;;  %v3351_v9 = vadd.f32 %v3343_v8, %v3319_v34  ;;  %v3352_v35 = vadd.f32 %v3343_v8, %v3320_v21 }
 0x681   : > { %v3306_v31 = vpop.permute.xlu1 %3305 }
 0x682   : > { %v3317_v27 = vmul.f32 %v3306_v31, %v7925_v2  ;;  %v3318_v29 = vmul.f32 %v3306_v31, %v7928_v4 }
 0x685   : > { %v3338_v28 = vpop.permute.xlu1 %3337 }
 0x686   : > { %v3349_v36 = vadd.f32 %v3338_v28, %v3317_v27  ;;  %v3350_v43 = vadd.f32 %v3338_v28, %v3318_v29 }
 0x688   : > { %v3355_v46 = vpack.c.bf16 %v3351_v9, %v3349_v36  ;;  %v3356_v47 = vpack.c.bf16 %v3352_v35, %v3350_v43 }
 0x68a   : > { %3385 = vxpose.xlu0.c.b16.end [2/2] (short) %v3356_v47, 128  ;;  %3369 = vxpose.xlu1.c.b16.end [2/2] (short) %v3355_v46, 128 }
 0x6ec   : > { %v3376_v49 = vpop.trf.xlu1  ;;  %v3392_v4 = vpop.trf.xlu0 }
 0x6ed   : > { %6977 = vmatprep.mubr.msk.bf16.mxu0 %vm740_vm0, %v3376_v49 }
 0x6f0   : > { %v3377_v50 = vpop.trf.xlu1  ;;  %v3393_v56 = vpop.trf.xlu0 }
 0x6f1   : > { %6978 = vmatmul.mubr.msk.bf16.vlgmr.msra.gmra.mrb[8].mxu0 %vm740_vm0, %v3377_v50 }
 0x6f4   : > { %v3378_v54 = vpop.trf.xlu1  ;;  %v3394_v59 = vpop.trf.xlu0 }
 0x6f5   : > { %6981 = vmatprep.mubr.msk.bf16.mxu0 %vm740_vm0, %v3378_v54 }
 0x6f8   : > { %v3379_v2 = vpop.trf.xlu1  ;;  %v3395_v6 = vpop.trf.xlu0 }
 0x6f9   : > { %6982 = vmatmul.mubr.msk.bf16.gmra.mrb[12].mxu0 %vm740_vm0, %v3379_v2 }
 0x6fc   : > { %v3380_v0 = vpop.trf.xlu1  ;;  %v3396_v62 = vpop.trf.xlu0 }
 0x6fd   : > { %6985 = vmatprep.mubr.msk.bf16.mxu0 %vm740_vm0, %v3380_v0 }
 0x700   : > { %v3381_v1 = vpop.trf.xlu1  ;;  %v3397_v7 = vpop.trf.xlu0 }
 0x701   : > { %6986 = vmatmul.mubr.msk.bf16.gmra.mrb[16].mxu0 %vm740_vm0, %v3381_v1 }
 0x704   : > { %v3382_v57 = vpop.trf.xlu1  ;;  %v3398_v10 = vpop.trf.xlu0 }
 0x705   : > { %6989 = vmatprep.mubr.msk.bf16.mxu0 %vm740_vm0, %v3382_v57 }
 0x708   : > { %v3383_v5 = vpop.trf.xlu1  ;;  %v3399_v58 = vpop.trf.xlu0 }
 0x709   : > { %6990 = vmatmul.mubr.msk.bf16.gmra.mrb[20].mxu0 %vm740_vm0, %v3383_v5 }
 0x70a   : > { %6993 = vmatprep.mubr.msk.bf16.mxu0 %vm740_vm0, %v3392_v4 }
 0x711   : > { %6994 = vmatmul.mubr.msk.bf16.gmra.mrb[24].mxu0 %vm740_vm0, %v3393_v56 }
 0x712   : > { %6997 = vmatprep.mubr.msk.bf16.mxu0 %vm740_vm0, %v3394_v59 }
 0x719   : > { %6998 = vmatmul.mubr.msk.bf16.gmra.mrb[28].mxu0 %vm740_vm0, %v3395_v6 }
 0x71a   : > { %7001 = vmatprep.mubr.msk.bf16.mxu0 %vm740_vm0, %v3396_v62 }
 0x721   : > { %7002 = vmatmul.mubr.msk.bf16.gmra.mrb[32].mxu0 %vm740_vm0, %v3397_v7 }
 0x722   : > { %7005 = vmatprep.mubr.msk.bf16.mxu0 %vm740_vm0, %v3398_v10 }
 0x729   : > { %7006 = vmatmul.mubr.msk.bf16.gmra.mrb[36].mxu0 %vm740_vm0, %v3399_v58 }
 0x7c4   : > { %v6979_v15 = vpop.f32.mrb[8].mxu0 }
 0x7c5   : > { %v8072_v16 = vadd.f32 %v6979_v15, %v8064_v63  ;;  %v3494_v30 = vpop.f32.mrb[9].mxu0 }
 0x7c6   : > { %v8075_v23 = vadd.f32 %v8064_v63, %v3494_v30  ;;  %v6980_v26 = vpop.f32.mrb[10].mxu0 }
 0x7c7   : > { %3623 = vst.msk [vmem:[%s8069_s27 + $0x10] sm:$0xff] %vm740_vm0, %v8072_v16  ;;  %v8081_v41 = vadd.f32 %v6980_v26, %v8064_v63  ;;  %v3497_v48 = vpop.f32.mrb[11].mxu0  ;;  %v3659_v38 = vsel %vm740_vm0, %v8072_v16, 0.0 }
 0x7c8   : > { %3621 = vst.msk [vmem:[%s8069_s27] sm:$0xff] %vm740_vm0, %v8075_v23  ;;  %v8087_v51 = vadd.f32 %v8064_v63, %v3497_v48  ;;  %v3653_v55 = vsel %vm740_vm0, %v8075_v23, 0.0 }
 0x7c9   : > { %3624 = vst.msk [vmem:[%s8069_s27 + $0x18] sm:$0xff] %vm740_vm0, %v8081_v41  ;;  %3654 = vadd.xlane.f32.xlu0 %v3653_v55  ;;  %v3662_v52 = vsel %vm740_vm0, %v8081_v41, 0.0 }
 0x7ca   : > { %3622 = vst.msk [vmem:[%s8069_s27 + $0x8] sm:$0xff] %vm740_vm0, %v8087_v51  ;;  %v3656_v22 = vsel %vm740_vm0, %v8087_v51, 0.0 }
 0x7cb   : > { %3657 = vadd.xlane.f32.xlu1 %v3656_v22 }
 0x7cc   : > { %v6983_v37 = vpop.f32.mrb[12].mxu0 }
 0x7cd   : > { %v8102_v45 = vadd.f32 %v6983_v37, %v8064_v63  ;;  %3660 = vadd.xlane.f32.xlu0 %v3659_v38  ;;  %v3510_v60 = vpop.f32.mrb[13].mxu0 }
 0x7ce   : > { %v8105_v19 = vadd.f32 %v8064_v63, %v3510_v60  ;;  %v6984_v40 = vpop.f32.mrb[14].mxu0 }
 0x7cf   : > { %3627 = vst.msk [vmem:[%s8069_s27 + $0x30] sm:$0xff] %vm740_vm0, %v8102_v45  ;;  %v8113_v3 = vadd.f32 %v6984_v40, %v8064_v63  ;;  %3663 = vadd.xlane.f32.xlu1 %v3662_v52  ;;  %v3513_v33 = vpop.f32.mrb[15].mxu0  ;;  %v3671_v11 = vsel %vm740_vm0, %v8102_v45, 0.0 }
 0x7d0   : > { %3625 = vst.msk [vmem:[%s8069_s27 + $0x20] sm:$0xff] %vm740_vm0, %v8105_v19  ;;  %v8119_v39 = vadd.f32 %v8064_v63, %v3513_v33  ;;  %v3665_v42 = vsel %vm740_vm0, %v8105_v19, 0.0 }
 0x7d1   : > { %3628 = vst.msk [vmem:[%s8069_s27 + $0x38] sm:$0xff] %vm740_vm0, %v8113_v3  ;;  %3666 = vadd.xlane.f32.xlu0 %v3665_v42  ;;  %v3674_v25 = vsel %vm740_vm0, %v8113_v3, 0.0 }
 0x7d2   : > { %3626 = vst.msk [vmem:[%s8069_s27 + $0x28] sm:$0xff] %vm740_vm0, %v8119_v39  ;;  %v3668_v44 = vsel %vm740_vm0, %v8119_v39, 0.0 }
 0x7d3   : > { %3669 = vadd.xlane.f32.xlu1 %v3668_v44 }
 0x7d4   : > { %v6987_v53 = vpop.f32.mrb[16].mxu0 }
 0x7d5   : > { %v8134_v12 = vadd.f32 %v6987_v53, %v8064_v63  ;;  %3672 = vadd.xlane.f32.xlu0 %v3671_v11  ;;  %v3526_v13 = vpop.f32.mrb[17].mxu0 }
 0x7d6   : > { %v8137_v14 = vadd.f32 %v8064_v63, %v3526_v13  ;;  %v6988_v24 = vpop.f32.mrb[18].mxu0 }
 0x7d7   : > { %3631 = vst.msk [vmem:[%s8069_s27 + $0x50] sm:$0xff] %vm740_vm0, %v8134_v12  ;;  %v8145_v61 = vadd.f32 %v6988_v24, %v8064_v63  ;;  %3675 = vadd.xlane.f32.xlu1 %v3674_v25  ;;  %v3529_v32 = vpop.f32.mrb[19].mxu0  ;;  %v3683_v34 = vsel %vm740_vm0, %v8134_v12, 0.0 }
 0x7d8   : > { %3629 = vst.msk [vmem:[%s8069_s27 + $0x40] sm:$0xff] %vm740_vm0, %v8137_v14  ;;  %v8151_v17 = vadd.f32 %v8064_v63, %v3529_v32  ;;  %v3677_v20 = vsel %vm740_vm0, %v8137_v14, 0.0 }
 0x7d9   : > { %3632 = vst.msk [vmem:[%s8069_s27 + $0x58] sm:$0xff] %vm740_vm0, %v8145_v61  ;;  %3678 = vadd.xlane.f32.xlu0 %v3677_v20  ;;  %v3686_v28 = vsel %vm740_vm0, %v8145_v61, 0.0 }
 0x7da   : > { %3630 = vst.msk [vmem:[%s8069_s27 + $0x48] sm:$0xff] %vm740_vm0, %v8151_v17  ;;  %v3680_v18 = vsel %vm740_vm0, %v8151_v17, 0.0 }
 0x7db   : > { %3681 = vadd.xlane.f32.xlu1 %v3680_v18 }
 0x7dc   : > { %v6991_v31 = vpop.f32.mrb[20].mxu0 }
 0x7dd   : > { %v8166_v21 = vadd.f32 %v6991_v31, %v8064_v63  ;;  %3684 = vadd.xlane.f32.xlu0 %v3683_v34  ;;  %v3542_v27 = vpop.f32.mrb[21].mxu0 }
 0x7de   : > { %v8169_v29 = vadd.f32 %v8064_v63, %v3542_v27  ;;  %v6992_v8 = vpop.f32.mrb[22].mxu0 }
 0x7df   : > { %3635 = vst.msk [vmem:[%s8069_s27 + $0x70] sm:$0xff] %vm740_vm0, %v8166_v21  ;;  %v8177_v9 = vadd.f32 %v6992_v8, %v8064_v63  ;;  %3687 = vadd.xlane.f32.xlu1 %v3686_v28  ;;  %v3545_v35 = vpop.f32.mrb[23].mxu0  ;;  %v3695_v49 = vsel %vm740_vm0, %v8166_v21, 0.0 }
 0x7e0   : > { %3633 = vst.msk [vmem:[%s8069_s27 + $0x60] sm:$0xff] %vm740_vm0, %v8169_v29  ;;  %v8183_v36 = vadd.f32 %v8064_v63, %v3545_v35  ;;  %v3689_v43 = vsel %vm740_vm0, %v8169_v29, 0.0 }
 0x7e1   : > { %3636 = vst.msk [vmem:[%s8069_s27 + $0x78] sm:$0xff] %vm740_vm0, %v8177_v9  ;;  %3690 = vadd.xlane.f32.xlu0 %v3689_v43  ;;  %v3698_v0 = vsel %vm740_vm0, %v8177_v9, 0.0 }
 0x7e2   : > { %3634 = vst.msk [vmem:[%s8069_s27 + $0x68] sm:$0xff] %vm740_vm0, %v8183_v36  ;;  %v3692_v46 = vsel %vm740_vm0, %v8183_v36, 0.0 }
 0x7e3   : > { %3693 = vadd.xlane.f32.xlu1 %v3692_v46 }
 0x7e4   : > { %v6995_v47 = vpop.f32.mrb[24].mxu0 }
 0x7e5   : > { %v8198_v50 = vadd.f32 %v6995_v47, %v8064_v63  ;;  %v3558_v54 = vpop.f32.mrb[25].mxu0  ;;  %3696 = vadd.xlane.f32.xlu0 %v3695_v49 }
 0x7e6   : > { %v8201_v2 = vadd.f32 %v8064_v63, %v3558_v54  ;;  %v6996_v4 = vpop.f32.mrb[26].mxu0 }
 0x7e7   : > { %3639 = vst.msk [vmem:[%s8069_s27 + $0x90] sm:$0xff] %vm740_vm0, %v8198_v50  ;;  %v8209_v1 = vadd.f32 %v6996_v4, %v8064_v63  ;;  %v3561_v56 = vpop.f32.mrb[27].mxu0  ;;  %3699 = vadd.xlane.f32.xlu1 %v3698_v0  ;;  %v3707_v62 = vsel %vm740_vm0, %v8198_v50, 0.0 }
 0x7e8   : > { %3637 = vst.msk [vmem:[%s8069_s27 + $0x80] sm:$0xff] %vm740_vm0, %v8201_v2  ;;  %v8215_v57 = vadd.f32 %v8064_v63, %v3561_v56  ;;  %v3701_v59 = vsel %vm740_vm0, %v8201_v2, 0.0 }
 0x7e9   : > { %3640 = vst.msk [vmem:[%s8069_s27 + $0x98] sm:$0xff] %vm740_vm0, %v8209_v1  ;;  %3702 = vadd.xlane.f32.xlu0 %v3701_v59  ;;  %v3710_v30 = vsel %vm740_vm0, %v8209_v1, 0.0 }
 0x7ea   : > { %3638 = vst.msk [vmem:[%s8069_s27 + $0x88] sm:$0xff] %vm740_vm0, %v8215_v57  ;;  %v3704_v5 = vsel %vm740_vm0, %v8215_v57, 0.0 }
 0x7eb   : > { %3705 = vadd.xlane.f32.xlu1 %v3704_v5 }
 0x7ec   : > { %v6999_v6 = vpop.f32.mrb[28].mxu0 }
 0x7ed   : > { %v8230_v7 = vadd.f32 %v6999_v6, %v8064_v63  ;;  %v3574_v10 = vpop.f32.mrb[29].mxu0  ;;  %3708 = vadd.xlane.f32.xlu0 %v3707_v62 }
 0x7ee   : > { %v8233_v58 = vadd.f32 %v8064_v63, %v3574_v10  ;;  %v7000_v15 = vpop.f32.mrb[30].mxu0 }
 0x7ef   : > { %3643 = vst.msk [vmem:[%s8069_s27 + $0xb0] sm:$0xff] %vm740_vm0, %v8230_v7  ;;  %v8241_v26 = vadd.f32 %v7000_v15, %v8064_v63  ;;  %v3577_v48 = vpop.f32.mrb[31].mxu0  ;;  %3711 = vadd.xlane.f32.xlu1 %v3710_v30  ;;  %v3719_v60 = vsel %vm740_vm0, %v8230_v7, 0.0 }
 0x7f0   : > { %3641 = vst.msk [vmem:[%s8069_s27 + $0xa0] sm:$0xff] %vm740_vm0, %v8233_v58  ;;  %v8247_v55 = vadd.f32 %v8064_v63, %v3577_v48  ;;  %v3713_v22 = vsel %vm740_vm0, %v8233_v58, 0.0 }
 0x7f1   : > { %3644 = vst.msk [vmem:[%s8069_s27 + $0xb8] sm:$0xff] %vm740_vm0, %v8241_v26  ;;  %3714 = vadd.xlane.f32.xlu0 %v3713_v22  ;;  %v3722_v44 = vsel %vm740_vm0, %v8241_v26, 0.0 }
 0x7f2   : > { %3642 = vst.msk [vmem:[%s8069_s27 + $0xa8] sm:$0xff] %vm740_vm0, %v8247_v55  ;;  %v3716_v37 = vsel %vm740_vm0, %v8247_v55, 0.0 }
 0x7f3   : > { %3717 = vadd.xlane.f32.xlu1 %v3716_v37 }
 0x7f4   : > { %v7003_v38 = vpop.f32.mrb[32].mxu0 }
 0x7f5   : > { %v8262_v40 = vadd.f32 %v7003_v38, %v8064_v63  ;;  %v3590_v52 = vpop.f32.mrb[33].mxu0  ;;  %3720 = vadd.xlane.f32.xlu0 %v3719_v60 }
 0x7f6   : > { %v8265_v33 = vadd.f32 %v8064_v63, %v3590_v52  ;;  %v7004_v42 = vpop.f32.mrb[34].mxu0 }
 0x7f7   : > { %3647 = vst.msk [vmem:[%s8069_s27 + $0xd0] sm:$0xff] %vm740_vm0, %v8262_v40  ;;  %v8273_v53 = vadd.f32 %v7004_v42, %v8064_v63  ;;  %v3593_v11 = vpop.f32.mrb[35].mxu0  ;;  %3723 = vadd.xlane.f32.xlu1 %v3722_v44  ;;  %v3731_v20 = vsel %vm740_vm0, %v8262_v40, 0.0 }
 0x7f8   : > { %3645 = vst.msk [vmem:[%s8069_s27 + $0xc0] sm:$0xff] %vm740_vm0, %v8265_v33  ;;  %v8279_v13 = vadd.f32 %v8064_v63, %v3593_v11  ;;  %v3725_v24 = vsel %vm740_vm0, %v8265_v33, 0.0 }
 0x7f9   : > { %3648 = vst.msk [vmem:[%s8069_s27 + $0xd8] sm:$0xff] %vm740_vm0, %v8273_v53  ;;  %3726 = vadd.xlane.f32.xlu0 %v3725_v24  ;;  %v3734_v8 = vsel %vm740_vm0, %v8273_v53, 0.0 }
 0x7fa   : > { %3646 = vst.msk [vmem:[%s8069_s27 + $0xc8] sm:$0xff] %vm740_vm0, %v8279_v13  ;;  %v3728_v25 = vsel %vm740_vm0, %v8279_v13, 0.0 }
 0x7fb   : > { %3729 = vadd.xlane.f32.xlu1 %v3728_v25 }
 0x7fc   : > { %v7007_v32 = vpop.f32.mrb[36].mxu0 }
 0x7fd   : > { %v8294_v18 = vadd.f32 %v7007_v32, %v8064_v63  ;;  %v3606_v31 = vpop.f32.mrb[37].mxu0  ;;  %3732 = vadd.xlane.f32.xlu0 %v3731_v20 }
 0x7fe   : > { %v8297_v34 = vadd.f32 %v8064_v63, %v3606_v31  ;;  %v7008_v27 = vpop.f32.mrb[38].mxu0 }
 0x7ff   : > { %3651 = vst.msk [vmem:[%s8069_s27 + $0xf0] sm:$0xff] %vm740_vm0, %v8294_v18  ;;  %v8305_v28 = vadd.f32 %v7008_v27, %v8064_v63  ;;  %v3609_v35 = vpop.f32.mrb[39].mxu0  ;;  %3735 = vadd.xlane.f32.xlu1 %v3734_v8  ;;  %v3743_v49 = vsel %vm740_vm0, %v8294_v18, 0.0 }
 0x800   : > { %3649 = vst.msk [vmem:[%s8069_s27 + $0xe0] sm:$0xff] %vm740_vm0, %v8297_v34  ;;  %v8311_v43 = vadd.f32 %v8064_v63, %v3609_v35  ;;  %v3737_v46 = vsel %vm740_vm0, %v8297_v34, 0.0 }
 0x801   : > { %3652 = vst.msk [vmem:[%s8069_s27 + $0xf8] sm:$0xff] %vm740_vm0, %v8305_v28  ;;  %3738 = vadd.xlane.f32.xlu0 %v3737_v46  ;;  %v3746_v63 = vsel %vm740_vm0, %v8305_v28, 0.0 }
 0x802   : > { %3650 = vst.msk [vmem:[%s8069_s27 + $0xe8] sm:$0xff] %vm740_vm0, %v8311_v43  ;;  %v3740_v47 = vsel %vm740_vm0, %v8311_v43, 0.0  ;;  %s8963_s27 = scalar_lea.vmem %s9127_s19, %s7669_s23 }
 0x803   : > { %3741 = vadd.xlane.f32.xlu1 %v3740_v47 }
 0x805   : > { %3744 = vadd.xlane.f32.xlu0 %v3743_v49 }
 0x807   : > { %3747 = vadd.xlane.f32.xlu1 %v3746_v63 }
 0x856   : > { %v3655_v54 = vpop.xlane.xlu0 %3654 }
 0x857   : > { %v3750_v4 = vmul.f32 0.03125, %v3655_v54 }
 0x858   : > { %v3658_v0 = vpop.xlane.xlu1 %3657 }
 0x859   : > { %v8328_v56 = vsub.f32 %v8075_v23, %v3750_v4  ;;  %v3751_v59 = vmul.f32 0.03125, %v3658_v0 }
 0x85a   : > { %v3661_v5 = vpop.xlane.xlu0 %3660 }
 0x85b   : > { %v8331_v6 = vsub.f32 %v8087_v51, %v3751_v59  ;;  %v3752_v62 = vmul.f32 0.03125, %v3661_v5  ;;  %v3814_v10 = vmul.f32 %v8328_v56, %v8328_v56 }
 0x85c   : > { %v3664_v15 = vpop.xlane.xlu1 %3663 }
 0x85d   : > { %v8336_v30 = vsub.f32 %v8072_v16, %v3752_v62  ;;  %v3753_v48 = vmul.f32 0.03125, %v3664_v15  ;;  %v3846_v22 = vsel %vm740_vm0, %v3814_v10, 0.0  ;;  %v3815_v23 = vmul.f32 %v8331_v6, %v8331_v6 }
 0x85e   : > { %v3667_v37 = vpop.xlane.xlu0 %3666  ;;  %3847 = vadd.xlane.f32.xlu0 %v3846_v22 }
 0x85f   : > { %v8342_v38 = vsub.f32 %v8081_v41, %v3753_v48  ;;  %v3754_v51 = vmul.f32 0.03125, %v3667_v37  ;;  %v3849_v60 = vsel %vm740_vm0, %v3815_v23, 0.0  ;;  %v3816_v52 = vmul.f32 %v8336_v30, %v8336_v30 }
 0x860   : > { %3850 = vadd.xlane.f32.xlu1 %v3849_v60  ;;  %v3670_v16 = vpop.xlane.xlu1 %3669 }
 0x861   : > { %v8348_v42 = vsub.f32 %v8105_v19, %v3754_v51  ;;  %v3755_v44 = vmul.f32 0.03125, %v3670_v16  ;;  %v3852_v11 = vsel %vm740_vm0, %v3816_v52, 0.0  ;;  %v3817_v24 = vmul.f32 %v8342_v38, %v8342_v38 }
 0x862   : > { %v3673_v25 = vpop.xlane.xlu0 %3672  ;;  %3853 = vadd.xlane.f32.xlu0 %v3852_v11 }
 0x863   : > { %v8354_v41 = vsub.f32 %v8119_v39, %v3755_v44  ;;  %v3756_v32 = vmul.f32 0.03125, %v3673_v25  ;;  %v3855_v20 = vsel %vm740_vm0, %v3817_v24, 0.0  ;;  %v3818_v31 = vmul.f32 %v8348_v42, %v8348_v42 }
 0x864   : > { %3856 = vadd.xlane.f32.xlu1 %v3855_v20  ;;  %v3676_v19 = vpop.xlane.xlu1 %3675 }
 0x865   : > { %v8360_v27 = vsub.f32 %v8102_v45, %v3756_v32  ;;  %v3757_v8 = vmul.f32 0.03125, %v3676_v19  ;;  %v3858_v35 = vsel %vm740_vm0, %v3818_v31, 0.0  ;;  %v3819_v46 = vmul.f32 %v8354_v41, %v8354_v41 }
 0x866   : > { %v3679_v47 = vpop.xlane.xlu0 %3678  ;;  %3859 = vadd.xlane.f32.xlu0 %v3858_v35 }
 0x867   : > { %v8366_v39 = vsub.f32 %v8113_v3, %v3757_v8  ;;  %v3758_v49 = vmul.f32 0.03125, %v3679_v47  ;;  %v3861_v63 = vsel %vm740_vm0, %v3819_v46, 0.0  ;;  %v3820_v54 = vmul.f32 %v8360_v27, %v8360_v27 }
 0x868   : > { %3862 = vadd.xlane.f32.xlu1 %v3861_v63  ;;  %v3682_v45 = vpop.xlane.xlu1 %3681 }
 0x869   : > { %v8372_v4 = vsub.f32 %v8137_v14, %v3758_v49  ;;  %v3759_v0 = vmul.f32 0.03125, %v3682_v45  ;;  %v3864_v59 = vsel %vm740_vm0, %v3820_v54, 0.0  ;;  %v3821_v5 = vmul.f32 %v8366_v39, %v8366_v39 }
 0x86a   : > { %v3685_v62 = vpop.xlane.xlu0 %3684  ;;  %3865 = vadd.xlane.f32.xlu0 %v3864_v59 }
 0x86b   : > { %v8378_v3 = vsub.f32 %v8151_v17, %v3759_v0  ;;  %v3760_v10 = vmul.f32 0.03125, %v3685_v62  ;;  %v3867_v15 = vsel %vm740_vm0, %v3821_v5, 0.0  ;;  %v3822_v48 = vmul.f32 %v8372_v4, %v8372_v4 }
 0x86c   : > { %3868 = vadd.xlane.f32.xlu1 %v3867_v15  ;;  %v3688_v14 = vpop.xlane.xlu1 %3687 }
 0x86d   : > { %v8384_v22 = vsub.f32 %v8134_v12, %v3760_v10  ;;  %v3761_v23 = vmul.f32 0.03125, %v3688_v14  ;;  %v3870_v37 = vsel %vm740_vm0, %v3822_v48, 0.0  ;;  %v3823_v51 = vmul.f32 %v8378_v3, %v8378_v3 }
 0x86e   : > { %3871 = vadd.xlane.f32.xlu0 %v3870_v37  ;;  %v3691_v17 = vpop.xlane.xlu0 %3690 }
 0x86f   : > { %v8390_v60 = vsub.f32 %v8145_v61, %v3761_v23  ;;  %v3762_v52 = vmul.f32 0.03125, %v3691_v17  ;;  %v3873_v16 = vsel %vm740_vm0, %v3823_v51, 0.0  ;;  %v3824_v44 = vmul.f32 %v8384_v22, %v8384_v22 }
 0x870   : > { %3874 = vadd.xlane.f32.xlu1 %v3873_v16  ;;  %v3694_v12 = vpop.xlane.xlu1 %3693 }
 0x871   : > { %v8396_v11 = vsub.f32 %v8169_v29, %v3762_v52  ;;  %v3763_v24 = vmul.f32 0.03125, %v3694_v12  ;;  %v3876_v25 = vsel %vm740_vm0, %v3824_v44, 0.0  ;;  %v3825_v32 = vmul.f32 %v8390_v60, %v8390_v60 }
 0x872   : > { %3877 = vadd.xlane.f32.xlu0 %v3876_v25  ;;  %v3697_v61 = vpop.xlane.xlu0 %3696  ;;  %v7451_v25 = vld [vmem:[%s9119_s11] sm:$0xff]  }
 0x873   : > { %v8402_v20 = vsub.f32 %v8183_v36, %v3763_v24  ;;  %v3764_v31 = vmul.f32 0.03125, %v3697_v61  ;;  %v3879_v19 = vsel %vm740_vm0, %v3825_v32, 0.0  ;;  %v3826_v8 = vmul.f32 %v8396_v11, %v8396_v11  ;;  %7045 = vmatprep.subr.bf16.mxu0 %v7451_v25 }
 0x874   : > { %3880 = vadd.xlane.f32.xlu1 %v3879_v19  ;;  %v3700_v29 = vpop.xlane.xlu1 %3699  ;;  %7046 = vmatpush3.bf16.msra.mxu0 %v7451_v25 }
 0x875   : > { %v8408_v35 = vsub.f32 %v8166_v21, %v3764_v31  ;;  %v3765_v46 = vmul.f32 0.03125, %v3700_v29  ;;  %v3882_v47 = vsel %vm740_vm0, %v3826_v8, 0.0  ;;  %v3827_v49 = vmul.f32 %v8402_v20, %v8402_v20 }
 0x876   : > { %3883 = vadd.xlane.f32.xlu0 %v3882_v47  ;;  %v3703_v36 = vpop.xlane.xlu0 %3702 }
 0x877   : > { %v8414_v63 = vsub.f32 %v8177_v9, %v3765_v46  ;;  %v3766_v54 = vmul.f32 0.03125, %v3703_v36  ;;  %v3885_v45 = vsel %vm740_vm0, %v3827_v49, 0.0  ;;  %v3828_v0 = vmul.f32 %v8408_v35, %v8408_v35  ;;  %v7452_v49 = vld [vmem:[%s9118_s10 + $0x8] sm:$0xff]  }
 0x878   : > { %3886 = vadd.xlane.f32.xlu1 %v3885_v45  ;;  %v3706_v21 = vpop.xlane.xlu1 %3705  ;;  %v7453_v36 = vld [vmem:[%s9119_s11 + $0x8] sm:$0xff]  }
 0x879   : > { %v8420_v59 = vsub.f32 %v8201_v2, %v3766_v54  ;;  %v3767_v5 = vmul.f32 0.03125, %v3706_v21  ;;  %v3888_v62 = vsel %vm740_vm0, %v3828_v0, 0.0  ;;  %v3829_v10 = vmul.f32 %v8414_v63, %v8414_v63  ;;  %7047 = vmatprep.subr.bf16.mxu0 %v7453_v36 }
 0x87a   : > { %3889 = vadd.xlane.f32.xlu0 %v3888_v62  ;;  %v3709_v9 = vpop.xlane.xlu0 %3708  ;;  %7048 = vmatpush3.bf16.msra.mxu0 %v7453_v36 }
 0x87b   : > { %v8426_v15 = vsub.f32 %v8215_v57, %v3767_v5  ;;  %v3768_v48 = vmul.f32 0.03125, %v3709_v9  ;;  %v3891_v14 = vsel %vm740_vm0, %v3829_v10, 0.0  ;;  %v3830_v23 = vmul.f32 %v8420_v59, %v8420_v59 }
 0x87c   : > { %3892 = vadd.xlane.f32.xlu1 %v3891_v14  ;;  %v3712_v2 = vpop.xlane.xlu1 %3711 }
 0x87d   : > { %v8432_v37 = vsub.f32 %v8198_v50, %v3768_v48  ;;  %v3769_v51 = vmul.f32 0.03125, %v3712_v2  ;;  %v3894_v17 = vsel %vm740_vm0, %v3830_v23, 0.0  ;;  %v3831_v52 = vmul.f32 %v8426_v15, %v8426_v15  ;;  %v7450_v50 = vld [vmem:[%s9118_s10] sm:$0xff]  }
 0x87e   : > { %3895 = vadd.xlane.f32.xlu0 %v3894_v17  ;;  %v3715_v57 = vpop.xlane.xlu0 %3714  ;;  %7009 = vmatprep.subr.bf16.mxu1 %v7450_v50 }
 0x87f   : > { %v8438_v16 = vsub.f32 %v8209_v1, %v3769_v51  ;;  %v3770_v44 = vmul.f32 0.03125, %v3715_v57  ;;  %v3897_v12 = vsel %vm740_vm0, %v3831_v52, 0.0  ;;  %v3832_v24 = vmul.f32 %v8432_v37, %v8432_v37  ;;  %7010 = vmatpush3.bf16.msra.mxu1 %v7450_v50 }
 0x880   : > { %3898 = vadd.xlane.f32.xlu1 %v3897_v12  ;;  %v3718_v32 = vpop.xlane.xlu1 %3717  ;;  %7011 = vmatprep.subr.bf16.mxu1 %v7452_v49 }
 0x881   : > { %v8450_v61 = vsub.f32 %v8233_v58, %v3770_v44  ;;  %v3771_v1 = vmul.f32 0.03125, %v3718_v32  ;;  %v3900_v31 = vsel %vm740_vm0, %v3832_v24, 0.0  ;;  %v3833_v19 = vmul.f32 %v8438_v16, %v8438_v16 }
 0x882   : > { %3901 = vadd.xlane.f32.xlu0 %v3900_v31  ;;  %v3721_v8 = vpop.xlane.xlu0 %3720 }
 0x883   : > { %v8456_v29 = vsub.f32 %v8247_v55, %v3771_v1  ;;  %v3772_v46 = vmul.f32 0.03125, %v3721_v8  ;;  %v3903_v47 = vsel %vm740_vm0, %v3833_v19, 0.0  ;;  %v3834_v58 = vmul.f32 %v8450_v61, %v8450_v61  ;;  %7012 = vmatpush3.bf16.msra.mxu1 %v7452_v49 }
 0x884   : > { %3904 = vadd.xlane.f32.xlu1 %v3903_v47  ;;  %v3724_v54 = vpop.xlane.xlu1 %3723 }
 0x885   : > { %v8468_v55 = vsub.f32 %v8230_v7, %v3772_v46  ;;  %v3773_v45 = vmul.f32 0.03125, %v3724_v54  ;;  %v3906_v0 = vsel %vm740_vm0, %v3834_v58, 0.0  ;;  %v3835_v21 = vmul.f32 %v8456_v29, %v8456_v29 }
 0x886   : > { %3907 = vadd.xlane.f32.xlu0 %v3906_v0  ;;  %v3727_v5 = vpop.xlane.xlu0 %3726 }
 0x887   : > { %v8474_v62 = vsub.f32 %v8241_v26, %v3773_v45  ;;  %v3774_v10 = vmul.f32 0.03125, %v3727_v5  ;;  %v3909_v9 = vsel %vm740_vm0, %v3835_v21, 0.0  ;;  %v3836_v7 = vmul.f32 %v8468_v55, %v8468_v55 }
 0x888   : > { %3910 = vadd.xlane.f32.xlu1 %v3909_v9  ;;  %v3730_v48 = vpop.xlane.xlu1 %3729 }
 0x889   : > { %v8480_v14 = vsub.f32 %v8265_v33, %v3774_v10  ;;  %v3775_v23 = vmul.f32 0.03125, %v3730_v48  ;;  %v3912_v2 = vsel %vm740_vm0, %v3836_v7, 0.0  ;;  %v3837_v51 = vmul.f32 %v8474_v62, %v8474_v62 }
 0x88a   : > { %3913 = vadd.xlane.f32.xlu0 %v3912_v2  ;;  %v3733_v26 = vpop.xlane.xlu0 %3732  ;;  %v8540_v2 = vld [vmem:[%s9121_s13] sm:$0xff]  }
 0x88b   : > { %v8486_v17 = vsub.f32 %v8279_v13, %v3775_v23  ;;  %v3776_v52 = vmul.f32 0.03125, %v3733_v26  ;;  %v3915_v57 = vsel %vm740_vm0, %v3837_v51, 0.0  ;;  %v3838_v44 = vmul.f32 %v8480_v14, %v8480_v14  ;;  %7117 = vmatprep.subr.bf16.mxu0 %v8540_v2 }
 0x88c   : > { %3916 = vadd.xlane.f32.xlu1 %v3915_v57  ;;  %v3736_v33 = vpop.xlane.xlu1 %3735 }
 0x88d   : > { %v8492_v12 = vsub.f32 %v8262_v40, %v3776_v52  ;;  %v3777_v24 = vmul.f32 0.03125, %v3736_v33  ;;  %v3918_v50 = vsel %vm740_vm0, %v3838_v44, 0.0  ;;  %v3839_v25 = vmul.f32 %v8486_v17, %v8486_v17 }
 0x88e   : > { %3919 = vadd.xlane.f32.xlu0 %v3918_v50  ;;  %v3739_v13 = vpop.xlane.xlu0 %3738 }
 0x88f   : > { %v8498_v32 = vsub.f32 %v8273_v53, %v3777_v24  ;;  %v3778_v1 = vmul.f32 0.03125, %v3739_v13  ;;  %v3921_v31 = vsel %vm740_vm0, %v3839_v25, 0.0  ;;  %v3840_v19 = vmul.f32 %v8492_v12, %v8492_v12 }
 0x890   : > { %3922 = vadd.xlane.f32.xlu1 %v3921_v31  ;;  %v3742_v40 = vpop.xlane.xlu1 %3741 }
 0x891   : > { %v8504_v8 = vsub.f32 %v8297_v34, %v3778_v1  ;;  %v3779_v46 = vmul.f32 0.03125, %v3742_v40  ;;  %v3924_v47 = vsel %vm740_vm0, %v3840_v19, 0.0  ;;  %v3841_v58 = vmul.f32 %v8498_v32, %v8498_v32 }
 0x892   : > { %3925 = vadd.xlane.f32.xlu0 %v3924_v47  ;;  %v3745_v53 = vpop.xlane.xlu0 %3744 }
 0x893   : > { %v8510_v49 = vsub.f32 %v8311_v43, %v3779_v46  ;;  %v3780_v36 = vmul.f32 0.03125, %v3745_v53  ;;  %v3927_v54 = vsel %vm740_vm0, %v3841_v58, 0.0  ;;  %v3842_v45 = vmul.f32 %v8504_v8, %v8504_v8 }
 0x894   : > { %3928 = vadd.xlane.f32.xlu1 %v3927_v54  ;;  %v3748_v34 = vpop.xlane.xlu1 %3747 }
 0x895   : > { %v8516_v0 = vsub.f32 %v8294_v18, %v3780_v36  ;;  %v3781_v21 = vmul.f32 0.03125, %v3748_v34  ;;  %v3930_v5 = vsel %vm740_vm0, %v3842_v45, 0.0  ;;  %v3843_v10 = vmul.f32 %v8510_v49, %v8510_v49  ;;  %v8530_v18 = vld [vmem:[%s9120_s12] sm:$0xff]  }
 0x896   : > { %3931 = vadd.xlane.f32.xlu0 %v3930_v5  ;;  %7081 = vmatprep.subr.bf16.mxu1 %v8530_v18 }
 0x897   : > { %v8522_v43 = vsub.f32 %v8305_v28, %v3781_v21  ;;  %v3933_v9 = vsel %vm740_vm0, %v3843_v10, 0.0  ;;  %v3844_v7 = vmul.f32 %v8516_v0, %v8516_v0  ;;  %v8546_v21 = vld [vmem:[%s9116_s8] ss:$0 sm:$0xff] }
 0x898   : > { %3934 = vadd.xlane.f32.xlu1 %v3933_v9 }
 0x899   : > { %v3936_v48 = vsel %vm740_vm0, %v3844_v7, 0.0  ;;  %v3845_v23 = vmul.f32 %v8522_v43, %v8522_v43 }
 0x89a   : > { %3937 = vadd.xlane.f32.xlu0 %v3936_v48 }
 0x89b   : > { %v3939_v28 = vsel %vm740_vm0, %v3845_v23, 0.0 }
 0x89c   : > { %3940 = vadd.xlane.f32.xlu1 %v3939_v28 }
 0x8eb   : > { %v3848_v51 = vpop.xlane.xlu0 %3847 }
 0x8ec   : > { %v3942_v26 = vmul.f32 0.03125, %v3848_v51 }
 0x8ed   : > { %v3851_v52 = vpop.xlane.xlu1 %3850 }
 0x8ee   : > { %v3974_v57 = vadd.f32 1e-05, %v3942_v26  ;;  %v3943_v44 = vmul.f32 0.03125, %v3851_v52 }
 0x8ef   : > { %v3854_v33 = vpop.xlane.xlu0 %3853 }
 0x8f0   : > { %7480 = vrsqrt.f32 %v3974_v57  ;;  %v3975_v24 = vadd.f32 1e-05, %v3943_v44  ;;  %v3944_v50 = vmul.f32 0.03125, %v3854_v33  ;;  %v8554_v44 = vld [vmem:[%s9117_s9] ss:$0 sm:$0xff] }
 0x8f1   : > { %v3857_v25 = vpop.xlane.xlu1 %3856 }
 0x8f2   : > { %7482 = vrsqrt.f32 %v3975_v24  ;;  %v3976_v13 = vadd.f32 1e-05, %v3944_v50  ;;  %v3945_v1 = vmul.f32 0.03125, %v3857_v25 }
 0x8f3   : > { %v3860_v31 = vpop.xlane.xlu0 %3859 }
 0x8f4   : > { %7484 = vrsqrt.f32 %v3976_v13  ;;  %v3977_v19 = vadd.f32 1e-05, %v3945_v1  ;;  %v3946_v40 = vmul.f32 0.03125, %v3860_v31 }
 0x8f5   : > { %v3863_v46 = vpop.xlane.xlu1 %3862 }
 0x8f6   : > { %7486 = vrsqrt.f32 %v3977_v19  ;;  %v3978_v47 = vadd.f32 1e-05, %v3946_v40  ;;  %v3947_v58 = vmul.f32 0.03125, %v3863_v46 }
 0x8f7   : > { %v3866_v53 = vpop.xlane.xlu0 %3865 }
 0x8f8   : > { %7488 = vrsqrt.f32 %v3978_v47  ;;  %v3979_v36 = vadd.f32 1e-05, %v3947_v58  ;;  %v3948_v54 = vmul.f32 0.03125, %v3866_v53 }
 0x8f9   : > { %v3869_v45 = vpop.xlane.xlu1 %3868 }
 0x8fa   : > { %v7481_v34 = vpop.eup %7480  ;;  %7490 = vrsqrt.f32 %v3979_v36  ;;  %v3980_v5 = vadd.f32 1e-05, %v3948_v54  ;;  %v3949_v10 = vmul.f32 0.03125, %v3869_v45 }
 0x8fb   : > { %v4038_v9 = vmul.f32 %v7481_v34, %v8328_v56  ;;  %v3872_v7 = vpop.xlane.xlu0 %3871 }
 0x8fc   : > { %v7483_v48 = vpop.eup %7482  ;;  %7492 = vrsqrt.f32 %v3980_v5  ;;  %v3981_v23 = vadd.f32 1e-05, %v3949_v10  ;;  %v3950_v28 = vmul.f32 0.03125, %v3872_v7 }
 0x8fd   : > { %v4039_v51 = vmul.f32 %v7483_v48, %v8331_v6  ;;  %v3875_v26 = vpop.xlane.xlu1 %3874  ;;  %v4077_v52 = vmul.f32 %v8546_v21, %v4038_v9 }
 0x8fe   : > { %v7485_v57 = vpop.eup %7484  ;;  %7494 = vrsqrt.f32 %v3981_v23  ;;  %v3982_v33 = vadd.f32 1e-05, %v3950_v28  ;;  %v3951_v24 = vmul.f32 0.03125, %v3875_v26 }
 0x8ff   : > { %v4040_v56 = vmul.f32 %v7485_v57, %v8336_v30  ;;  %v3878_v50 = vpop.xlane.xlu0 %3877  ;;  %v4078_v25 = vmul.f32 %v8546_v21, %v4039_v51  ;;  %v4116_v46 = vadd.f32 %v8554_v44, %v4077_v52 }
 0x900   : > { %v7487_v13 = vpop.eup %7486  ;;  %7496 = vrsqrt.f32 %v3982_v33  ;;  %v3983_v6 = vadd.f32 1e-05, %v3951_v24  ;;  %v3952_v1 = vmul.f32 0.03125, %v3878_v50  ;;  %v7455_v24 = vld [vmem:[%s9120_s12 + $0x8] sm:$0xff]  }
 0x901   : > { %v4079_v31 = vmul.f32 %v8546_v21, %v4040_v56  ;;  %v4041_v19 = vmul.f32 %v7487_v13, %v8342_v38  ;;  %v3881_v40 = vpop.xlane.xlu1 %3880  ;;  %v4117_v47 = vadd.f32 %v8554_v44, %v4078_v25 }
 0x902   : > { %v7489_v58 = vpop.eup %7488  ;;  %7498 = vrsqrt.f32 %v3983_v6  ;;  %v3984_v53 = vadd.f32 1e-05, %v3952_v1  ;;  %v3953_v30 = vmul.f32 0.03125, %v3881_v40  ;;  %v7458_v6 = vld [vmem:[%s9121_s13 + $0x8] sm:$0xff]  }
 0x903   : > { %v4080_v36 = vmul.f32 %v8546_v21, %v4041_v19  ;;  %v4042_v54 = vmul.f32 %v7489_v58, %v8348_v42  ;;  %v3884_v45 = vpop.xlane.xlu0 %3883  ;;  %v8564_v34 = vpack.c.bf16 %v4117_v47, %v4116_v46  ;;  %v4118_v10 = vadd.f32 %v8554_v44, %v4079_v31 }
 0x904   : > { %v7491_v5 = vpop.eup %7490  ;;  %7500 = vrsqrt.f32 %v3984_v53  ;;  %v3985_v38 = vadd.f32 1e-05, %v3953_v30  ;;  %v3954_v9 = vmul.f32 0.03125, %v3884_v45 }
 0x905   : > { %v4119_v7 = vadd.f32 %v8554_v44, %v4080_v36  ;;  %v4043_v48 = vmul.f32 %v7491_v5, %v8354_v41  ;;  %7013 = vmatprep.mubr.msk.bf16.mxu1 %vm740_vm0, %v8564_v34  ;;  %7049 = vmatprep.mubr.msk.bf16.mxu0 %vm740_vm0, %v8564_v34  ;;  %v3887_v42 = vpop.xlane.xlu1 %3886  ;;  %v4081_v23 = vmul.f32 %v8546_v21, %v4042_v54  ;;  %v8601_v36 = vld [vmem:[%s9122_s14] sm:$0xff]  }
 0x906   : > { %v7493_v28 = vpop.eup %7492  ;;  %7502 = vrsqrt.f32 %v3985_v38  ;;  %v3986_v51 = vadd.f32 1e-05, %v3954_v9  ;;  %v3955_v26 = vmul.f32 0.03125, %v3887_v42 }
 0x907   : > { %v4044_v52 = vmul.f32 %v7493_v28, %v8360_v27  ;;  %v3890_v57 = vpop.xlane.xlu0 %3889  ;;  %v8575_v33 = vpack.c.bf16 %v4119_v7, %v4118_v10  ;;  %v4082_v41 = vmul.f32 %v8546_v21, %v4043_v48  ;;  %v4120_v13 = vadd.f32 %v8554_v44, %v4081_v23 }
 0x908   : > { %v7495_v56 = vpop.eup %7494  ;;  %7504 = vrsqrt.f32 %v3986_v51  ;;  %v3987_v50 = vadd.f32 1e-05, %v3955_v26  ;;  %v3956_v25 = vmul.f32 0.03125, %v3890_v57  ;;  %v7462_v26 = vld [vmem:[%s9121_s13 + $0x18] sm:$0xff]  }
 0x909   : > { %v4045_v27 = vmul.f32 %v7495_v56, %v8366_v39  ;;  %7014 = vmatmul.mubr.msk.bf16.vlgmr.msra.gmra.mrb[8].mxu1 %vm740_vm0, %v8575_v33  ;;  %7050 = vmatmul.mubr.msk.bf16.vlgmr.msra.gmra.mrb[40].mxu0 %vm740_vm0, %v8575_v33  ;;  %v3893_v1 = vpop.xlane.xlu1 %3892  ;;  %v4121_v31 = vadd.f32 %v8554_v44, %v4082_v41  ;;  %v4083_v19 = vmul.f32 %v8546_v21, %v4044_v52 }
 0x90a   : > { %v7497_v40 = vpop.eup %7496  ;;  %7506 = vrsqrt.f32 %v3987_v50  ;;  %v3988_v46 = vadd.f32 1e-05, %v3956_v25  ;;  %v3957_v47 = vmul.f32 0.03125, %v3893_v1  ;;  %7082 = vmatpush3.bf16.msra.mxu1 %v8530_v18  ;;  %7118 = vmatpush3.bf16.msra.mxu0 %v8540_v2 }
 0x90b   : > { %v4046_v39 = vmul.f32 %v7497_v40, %v8372_v4  ;;  %v3896_v58 = vpop.xlane.xlu0 %3895  ;;  %v8595_v53 = vpack.c.bf16 %v4121_v31, %v4120_v13  ;;  %v4084_v30 = vmul.f32 %v8546_v21, %v4045_v27  ;;  %7083 = vmatprep.subr.bf16.mxu1 %v7455_v24  ;;  %v4122_v18 = vadd.f32 %v8554_v44, %v4083_v19  ;;  %v7460_v4 = vld [vmem:[%s9121_s13 + $0x10] sm:$0xff]  }
 0x90c   : > { %v7499_v54 = vpop.eup %7498  ;;  %7508 = vrsqrt.f32 %v3988_v46  ;;  %v3989_v45 = vadd.f32 1e-05, %v3957_v47  ;;  %v3958_v5 = vmul.f32 0.03125, %v3896_v58  ;;  %7119 = vmatprep.subr.bf16.mxu0 %v7458_v6 }
 0x90d   : > { %v4047_v2 = vmul.f32 %v7499_v54, %v8378_v3  ;;  %7017 = vmatprep.mubr.msk.bf16.mxu1 %vm740_vm0, %v8595_v53  ;;  %7053 = vmatprep.mubr.msk.bf16.mxu0 %vm740_vm0, %v8595_v53  ;;  %v3899_v10 = vpop.xlane.xlu1 %3898  ;;  %v4123_v38 = vadd.f32 %v8554_v44, %v4084_v30  ;;  %v4085_v9 = vmul.f32 %v8546_v21, %v4046_v39 }
 0x90e   : > { %v7501_v7 = vpop.eup %7500  ;;  %7510 = vrsqrt.f32 %v3989_v45  ;;  %v3990_v48 = vadd.f32 1e-05, %v3958_v5  ;;  %v3959_v42 = vmul.f32 0.03125, %v3899_v10  ;;  %7084 = vmatpush3.bf16.msra.mxu1 %v7455_v24  ;;  %7120 = vmatpush3.bf16.msra.mxu0 %v7458_v6 }
 0x90f   : > { %v4048_v23 = vmul.f32 %v7501_v7, %v8384_v22  ;;  %v3902_v3 = vpop.xlane.xlu0 %3901  ;;  %v8615_v28 = vpack.c.bf16 %v4123_v38, %v4122_v18  ;;  %v4086_v51 = vmul.f32 %v8546_v21, %v4047_v2  ;;  %7141 = vmatprep.subr.bf16.mxu1 %v8601_v36  ;;  %v4124_v24 = vadd.f32 %v8554_v44, %v4085_v9 }
 0x910   : > { %v7503_v52 = vpop.eup %7502  ;;  %7512 = vrsqrt.f32 %v3990_v48  ;;  %v3991_v57 = vadd.f32 1e-05, %v3959_v42  ;;  %v3960_v41 = vmul.f32 0.03125, %v3902_v3  ;;  %7121 = vmatprep.subr.bf16.mxu0 %v7460_v4 }
 0x911   : > { %v4049_v22 = vmul.f32 %v7503_v52, %v8390_v60  ;;  %7018 = vmatmul.mubr.msk.bf16.gmra.mrb[12].mxu1 %vm740_vm0, %v8615_v28  ;;  %7054 = vmatmul.mubr.msk.bf16.gmra.mrb[44].mxu0 %vm740_vm0, %v8615_v28  ;;  %v3905_v56 = vpop.xlane.xlu1 %3904  ;;  %v4125_v50 = vadd.f32 %v8554_v44, %v4086_v51  ;;  %v4087_v25 = vmul.f32 %v8546_v21, %v4048_v23 }
 0x912   : > { %v7505_v13 = vpop.eup %7504  ;;  %7514 = vrsqrt.f32 %v3991_v57  ;;  %v3992_v6 = vadd.f32 1e-05, %v3960_v41  ;;  %v3961_v27 = vmul.f32 0.03125, %v3905_v56  ;;  %7122 = vmatpush3.bf16.msra.mxu0 %v7460_v4 }
 0x913   : > { %v4050_v1 = vmul.f32 %v7505_v13, %v8396_v11  ;;  %v3908_v31 = vpop.xlane.xlu0 %3907  ;;  %v8631_v60 = vpack.c.bf16 %v4125_v50, %v4124_v24  ;;  %v4088_v19 = vmul.f32 %v8546_v21, %v4049_v22  ;;  %7123 = vmatprep.subr.bf16.mxu0 %v7462_v26  ;;  %v4126_v39 = vadd.f32 %v8554_v44, %v4087_v25 }
 0x914   : > { %v7507_v40 = vpop.eup %7506  ;;  %7516 = vrsqrt.f32 %v3992_v6  ;;  %v3993_v46 = vadd.f32 1e-05, %v3961_v27  ;;  %v3962_v47 = vmul.f32 0.03125, %v3908_v31 }
 0x915   : > { %v4051_v58 = vmul.f32 %v7507_v40, %v8402_v20  ;;  %7021 = vmatprep.mubr.msk.bf16.mxu1 %vm740_vm0, %v8631_v60  ;;  %7057 = vmatprep.mubr.msk.bf16.mxu0 %vm740_vm0, %v8631_v60  ;;  %v3911_v11 = vpop.xlane.xlu1 %3910  ;;  %v4127_v30 = vadd.f32 %v8554_v44, %v4088_v19  ;;  %v4089_v54 = vmul.f32 %v8546_v21, %v4050_v1 }
 0x916   : > { %v7509_v45 = vpop.eup %7508  ;;  %7518 = vrsqrt.f32 %v3993_v46  ;;  %v3994_v5 = vadd.f32 1e-05, %v3962_v47  ;;  %v3963_v18 = vmul.f32 0.03125, %v3911_v11  ;;  %7124 = vmatpush3.bf16.msra.mxu0 %v7462_v26 }
 0x917   : > { %v4052_v4 = vmul.f32 %v7509_v45, %v8408_v35  ;;  %v3914_v2 = vpop.xlane.xlu0 %3913  ;;  %v8643_v20 = vpack.c.bf16 %v4127_v30, %v4126_v39  ;;  %v4090_v10 = vmul.f32 %v8546_v21, %v4051_v58  ;;  %v4128_v48 = vadd.f32 %v8554_v44, %v4089_v54 }
 0x918   : > { %v7511_v38 = vpop.eup %7510  ;;  %7520 = vrsqrt.f32 %v3994_v5  ;;  %v3995_v9 = vadd.f32 1e-05, %v3963_v18  ;;  %v3964_v7 = vmul.f32 0.03125, %v3914_v2 }
 0x919   : > { %v4053_v42 = vmul.f32 %v7511_v38, %v8414_v63  ;;  %7022 = vmatmul.mubr.msk.bf16.gmra.mrb[16].mxu1 %vm740_vm0, %v8643_v20  ;;  %7058 = vmatmul.mubr.msk.bf16.gmra.mrb[48].mxu0 %vm740_vm0, %v8643_v20  ;;  %v3917_v35 = vpop.xlane.xlu1 %3916  ;;  %v4129_v23 = vadd.f32 %v8554_v44, %v4090_v10  ;;  %v4091_v3 = vmul.f32 %v8546_v21, %v4052_v4 }
 0x91a   : > { %v7513_v51 = vpop.eup %7512  ;;  %7522 = vrsqrt.f32 %v3995_v9  ;;  %v3996_v26 = vadd.f32 1e-05, %v3964_v7  ;;  %v3965_v52 = vmul.f32 0.03125, %v3917_v35 }
 0x91b   : > { %v4054_v57 = vmul.f32 %v7513_v51, %v8420_v59  ;;  %v3920_v41 = vpop.xlane.xlu0 %3919  ;;  %v8655_v24 = vpack.c.bf16 %v4129_v23, %v4128_v48  ;;  %v4092_v63 = vmul.f32 %v8546_v21, %v4053_v42  ;;  %v4130_v25 = vadd.f32 %v8554_v44, %v4091_v3 }
 0x91c   : > { %v7515_v22 = vpop.eup %7514  ;;  %7524 = vrsqrt.f32 %v3996_v26  ;;  %v3997_v56 = vadd.f32 1e-05, %v3965_v52  ;;  %v3966_v50 = vmul.f32 0.03125, %v3920_v41 }
 0x91d   : > { %v4055_v13 = vmul.f32 %v7515_v22, %v8426_v15  ;;  %7025 = vmatprep.mubr.msk.bf16.mxu1 %vm740_vm0, %v8655_v24  ;;  %7061 = vmatprep.mubr.msk.bf16.mxu0 %vm740_vm0, %v8655_v24  ;;  %v3923_v59 = vpop.xlane.xlu1 %3922  ;;  %v4131_v6 = vadd.f32 %v8554_v44, %v4092_v63  ;;  %v4093_v27 = vmul.f32 %v8546_v21, %v4054_v57 }
 0x91e   : > { %v7517_v1 = vpop.eup %7516  ;;  %7526 = vrsqrt.f32 %v3997_v56  ;;  %v3998_v31 = vadd.f32 1e-05, %v3966_v50  ;;  %v3967_v19 = vmul.f32 0.03125, %v3923_v59 }
 0x91f   : > { %v4056_v40 = vmul.f32 %v7517_v1, %v8432_v37  ;;  %v3926_v46 = vpop.xlane.xlu0 %3925  ;;  %v8667_v47 = vpack.c.bf16 %v4131_v6, %v4130_v25  ;;  %v4094_v15 = vmul.f32 %v8546_v21, %v4055_v13  ;;  %v4132_v30 = vadd.f32 %v8554_v44, %v4093_v27 }
 0x920   : > { %v7519_v39 = vpop.eup %7518  ;;  %7528 = vrsqrt.f32 %v3998_v31  ;;  %v3999_v58 = vadd.f32 1e-05, %v3967_v19  ;;  %v3968_v11 = vmul.f32 0.03125, %v3926_v46 }
 0x921   : > { %v4057_v54 = vmul.f32 %v7519_v39, %v8438_v16  ;;  %7026 = vmatmul.mubr.msk.bf16.gmra.mrb[20].mxu1 %vm740_vm0, %v8667_v47  ;;  %7062 = vmatmul.mubr.msk.bf16.gmra.mrb[52].mxu0 %vm740_vm0, %v8667_v47  ;;  %v3929_v37 = vpop.xlane.xlu1 %3928  ;;  %v4133_v45 = vadd.f32 %v8554_v44, %v4094_v15  ;;  %v4095_v5 = vmul.f32 %v8546_v21, %v4056_v40 }
 0x922   : > { %v7521_v18 = vpop.eup %7520  ;;  %7530 = vrsqrt.f32 %v3999_v58  ;;  %v4000_v4 = vadd.f32 1e-05, %v3968_v11  ;;  %v3969_v2 = vmul.f32 0.03125, %v3929_v37 }
 0x923   : > { %v4058_v10 = vmul.f32 %v7521_v18, %v8450_v61  ;;  %v3932_v38 = vpop.xlane.xlu0 %3931  ;;  %v8679_v9 = vpack.c.bf16 %v4133_v45, %v4132_v30  ;;  %v4096_v16 = vmul.f32 %v8546_v21, %v4057_v54  ;;  %v4134_v35 = vadd.f32 %v8554_v44, %v4095_v5 }
 0x924   : > { %v7523_v7 = vpop.eup %7522  ;;  %7532 = vrsqrt.f32 %v4000_v4  ;;  %v4001_v48 = vadd.f32 1e-05, %v3969_v2  ;;  %v3970_v42 = vmul.f32 0.03125, %v3932_v38 }
 0x925   : > { %v4059_v23 = vmul.f32 %v7523_v7, %v8456_v29  ;;  %7029 = vmatprep.mubr.msk.bf16.mxu1 %vm740_vm0, %v8679_v9  ;;  %7065 = vmatprep.mubr.msk.bf16.mxu0 %vm740_vm0, %v8679_v9  ;;  %v3935_v61 = vpop.xlane.xlu1 %3934  ;;  %v4135_v3 = vadd.f32 %v8554_v44, %v4096_v16  ;;  %v4097_v51 = vmul.f32 %v8546_v21, %v4058_v10 }
 0x926   : > { %v7525_v26 = vpop.eup %7524  ;;  %7534 = vrsqrt.f32 %v4001_v48  ;;  %v4002_v52 = vadd.f32 1e-05, %v3970_v42  ;;  %v3971_v57 = vmul.f32 0.03125, %v3935_v61 }
 0x927   : > { %v4060_v41 = vmul.f32 %v7525_v26, %v8468_v55  ;;  %v3938_v63 = vpop.xlane.xlu0 %3937  ;;  %v8691_v22 = vpack.c.bf16 %v4135_v3, %v4134_v35  ;;  %v4098_v29 = vmul.f32 %v8546_v21, %v4059_v23  ;;  %v4136_v13 = vadd.f32 %v8554_v44, %v4097_v51 }
 0x928   : > { %v7527_v56 = vpop.eup %7526  ;;  %7536 = vrsqrt.f32 %v4002_v52  ;;  %v4003_v50 = vadd.f32 1e-05, %v3971_v57  ;;  %v3972_v25 = vmul.f32 0.03125, %v3938_v63 }
 0x929   : > { %v4061_v59 = vmul.f32 %v7527_v56, %v8474_v62  ;;  %7030 = vmatmul.mubr.msk.bf16.gmra.mrb[24].mxu1 %vm740_vm0, %v8691_v22  ;;  %7066 = vmatmul.mubr.msk.bf16.gmra.mrb[56].mxu0 %vm740_vm0, %v8691_v22  ;;  %v3941_v55 = vpop.xlane.xlu1 %3940  ;;  %v4137_v6 = vadd.f32 %v8554_v44, %v4098_v29  ;;  %v4099_v27 = vmul.f32 %v8546_v21, %v4060_v41  ;;  %v7464_v56 = vld [vmem:[%s7703_s4] sm:$0xff]  }
 0x92a   : > { %v7529_v1 = vpop.eup %7528  ;;  %7538 = vrsqrt.f32 %v4003_v50  ;;  %v4004_v31 = vadd.f32 1e-05, %v3972_v25  ;;  %v3973_v19 = vmul.f32 0.03125, %v3941_v55  ;;  %v7459_v25 = vld [vmem:[%s9122_s14 + $0x8] sm:$0xff]  }
 0x92b   : > { %v4062_v40 = vmul.f32 %v7529_v1, %v8480_v14  ;;  %v8703_v46 = vpack.c.bf16 %v4137_v6, %v4136_v13  ;;  %v4100_v62 = vmul.f32 %v8546_v21, %v4061_v59  ;;  %v4138_v58 = vadd.f32 %v8554_v44, %v4099_v27  ;;  %v7467_v13 = vld [vmem:[%s7703_s4 + $0x18] sm:$0xff]   ;;  %v7470_v59 = vld [vmem:[%s7703_s4 + $0x30] sm:$0xff]  }
 0x92c   : > { %v7531_v15 = vpop.eup %7530  ;;  %7540 = vrsqrt.f32 %v4004_v31  ;;  %v4005_v39 = vadd.f32 1e-05, %v3973_v19 }
 0x92d   : > { %v4063_v11 = vmul.f32 %v7531_v15, %v8486_v17  ;;  %7033 = vmatprep.mubr.msk.bf16.mxu1 %vm740_vm0, %v8703_v46  ;;  %7069 = vmatprep.mubr.msk.bf16.mxu0 %vm740_vm0, %v8703_v46  ;;  %v4139_v30 = vadd.f32 %v8554_v44, %v4100_v62  ;;  %v4101_v14 = vmul.f32 %v8546_v21, %v4062_v40 }
 0x92e   : > { %v7533_v54 = vpop.eup %7532  ;;  %7542 = vrsqrt.f32 %v4005_v39 }
 0x92f   : > { %v4064_v37 = vmul.f32 %v7533_v54, %v8492_v12  ;;  %v8715_v45 = vpack.c.bf16 %v4139_v30, %v4138_v58  ;;  %v4102_v5 = vmul.f32 %v8546_v21, %v4063_v11  ;;  %v4140_v17 = vadd.f32 %v8554_v44, %v4101_v14 }
 0x930   : > { %v7535_v18 = vpop.eup %7534 }
 0x931   : > { %v4065_v4 = vmul.f32 %v7535_v18, %v8498_v32  ;;  %7034 = vmatmul.mubr.msk.bf16.gmra.mrb[28].mxu1 %vm740_vm0, %v8715_v45  ;;  %7070 = vmatmul.mubr.msk.bf16.gmra.mrb[60].mxu0 %vm740_vm0, %v8715_v45  ;;  %v4141_v2 = vadd.f32 %v8554_v44, %v4102_v5  ;;  %v4103_v10 = vmul.f32 %v8546_v21, %v4064_v37 }
 0x932   : > { %v7537_v12 = vpop.eup %7536 }
 0x933   : > { %v4066_v38 = vmul.f32 %v7537_v12, %v8504_v8  ;;  %v8727_v16 = vpack.c.bf16 %v4141_v2, %v4140_v17  ;;  %v4104_v7 = vmul.f32 %v8546_v21, %v4065_v4  ;;  %v4142_v32 = vadd.f32 %v8554_v44, %v4103_v10 }
 0x934   : > { %v7539_v48 = vpop.eup %7538 }
 0x935   : > { %v4067_v42 = vmul.f32 %v7539_v48, %v8510_v49  ;;  %7037 = vmatprep.mubr.msk.bf16.mxu1 %vm740_vm0, %v8727_v16  ;;  %7073 = vmatprep.mubr.msk.bf16.mxu0 %vm740_vm0, %v8727_v16  ;;  %v4143_v35 = vadd.f32 %v8554_v44, %v4104_v7  ;;  %v4105_v23 = vmul.f32 %v8546_v21, %v4066_v38 }
 0x936   : > { %v7541_v8 = vpop.eup %7540 }
 0x937   : > { %v4068_v61 = vmul.f32 %v7541_v8, %v8516_v0  ;;  %v4161_v3 = vpack.c.bf16 %v4143_v35, %v4142_v32  ;;  %v4106_v51 = vmul.f32 %v8546_v21, %v4067_v42  ;;  %v4144_v49 = vadd.f32 %v8554_v44, %v4105_v23 }
 0x938   : > { %v7543_v26 = vpop.eup %7542 }
 0x939   : > { %v4069_v52 = vmul.f32 %v7543_v26, %v8522_v43  ;;  %7038 = vmatmul.mubr.msk.bf16.gmra.mrb[32].mxu1 %vm740_vm0, %v4161_v3  ;;  %7074 = vmatmul.mubr.msk.bf16.gmra.mrb[64].mxu0 %vm740_vm0, %v4161_v3  ;;  %v4145_v57 = vadd.f32 %v8554_v44, %v4106_v51  ;;  %v4107_v41 = vmul.f32 %v8546_v21, %v4068_v61 }
 0x93b   : > { %v4162_v0 = vpack.c.bf16 %v4145_v57, %v4144_v49  ;;  %v4108_v63 = vmul.f32 %v8546_v21, %v4069_v52  ;;  %v4146_v29 = vadd.f32 %v8554_v44, %v4107_v41  ;;  %v7465_v21 = vld [vmem:[%s7703_s4 + $0x8] sm:$0xff]  }
 0x93d   : > { %7041 = vmatprep.mubr.msk.bf16.mxu1 %vm740_vm0, %v4162_v0  ;;  %7077 = vmatprep.mubr.msk.bf16.mxu0 %vm740_vm0, %v4162_v0  ;;  %v4147_v43 = vadd.f32 %v8554_v44, %v4108_v63  ;;  %v7466_v44 = vld [vmem:[%s7703_s4 + $0x10] sm:$0xff]  }
 0x93f   : > { %v4163_v50 = vpack.c.bf16 %v4147_v43, %v4146_v29 }
 0x941   : > { %7042 = vmatmul.mubr.msk.bf16.gmra.mrb[36].mxu1 %vm740_vm0, %v4163_v50  ;;  %7078 = vmatmul.mubr.msk.bf16.gmra.mrb[68].mxu0 %vm740_vm0, %v4163_v50 }
 0x942   : > { %7085 = vmatprep.mubr.msk.bf16.mxu1 %vm740_vm0, %v8564_v34  ;;  %7125 = vmatprep.mubr.msk.bf16.mxu0 %vm5312_vm1, %v7464_v56  ;;  %v7461_v34 = vld [vmem:[%s9122_s14 + $0x10] sm:$0xff]  }
 0x949   : > { %7086 = vmatmul.mubr.msk.bf16.vlgmr.msra.gmra.mrb[40].mxu1 %vm740_vm0, %v8575_v33  ;;  %7126 = vmatmul.mubr.msk.bf16.vlgmr.msra.gmra.mrb[72].mxu0 %vm5312_vm1, %v7465_v21  ;;  %v7463_v33 = vld [vmem:[%s9122_s14 + $0x18] sm:$0xff]  }
 0x94a   : > { %7089 = vmatprep.mubr.msk.bf16.mxu1 %vm740_vm0, %v8595_v53  ;;  %7142 = vmatpush3.bf16.msra.mxu1 %v8601_v36  ;;  %v7468_v53 = vld [vmem:[%s7703_s4 + $0x20] sm:$0xff]   ;;  %v7469_v36 = vld [vmem:[%s7703_s4 + $0x28] sm:$0xff]  }
 0x94b   : > { %7143 = vmatprep.subr.bf16.mxu1 %v7459_v25  ;;  %7129 = vmatprep.mubr.msk.bf16.mxu0 %vm5312_vm1, %v7466_v44 }
 0x94e   : > { %7144 = vmatpush3.bf16.msra.mxu1 %v7459_v25 }
 0x94f   : > { %7145 = vmatprep.subr.bf16.mxu1 %v7461_v34 }
 0x951   : > { %7090 = vmatmul.mubr.msk.bf16.gmra.mrb[44].mxu1 %vm740_vm0, %v8615_v28  ;;  %7130 = vmatmul.mubr.msk.bf16.gmra.mrb[76].mxu0 %vm5312_vm1, %v7467_v13  ;;  %v7471_v28 = vld [vmem:[%s7703_s4 + $0x38] sm:$0xff]   ;;  %s8817_s4 = sshll.u32 %s9143_s22, 7 }
 0x952   : > { %7093 = vmatprep.mubr.msk.bf16.mxu1 %vm740_vm0, %v8631_v60  ;;  %7146 = vmatpush3.bf16.msra.mxu1 %v7461_v34  ;;  %s8823_s21 = scalar_lea.vmem %s9124_s16, %s8817_s4  ;;  %s8829_s3 = scalar_lea.vmem %s9125_s17, %s8817_s4 }
 0x953   : > { %7147 = vmatprep.subr.bf16.mxu1 %v7463_v33  ;;  %7133 = vmatprep.mubr.msk.bf16.mxu0 %vm5312_vm1, %v7468_v53  ;;  %s8969_s24 = scalar_lea.vmem %s9126_s18, %s8817_s4 }
 0x956   : > { %7148 = vmatpush3.bf16.msra.mxu1 %v7463_v33 }
 0x959   : > { %7094 = vmatmul.mubr.msk.bf16.gmra.mrb[48].mxu1 %vm740_vm0, %v8643_v20  ;;  %7134 = vmatmul.mubr.msk.bf16.gmra.mrb[80].mxu0 %vm5312_vm1, %v7469_v36 }
 0x95a   : > { %7097 = vmatprep.mubr.msk.bf16.mxu1 %vm740_vm0, %v8655_v24  ;;  %7137 = vmatprep.mubr.msk.bf16.mxu0 %vm5312_vm1, %v7470_v59 }
 0x961   : > { %7098 = vmatmul.mubr.msk.bf16.gmra.mrb[52].mxu1 %vm740_vm0, %v8667_v47  ;;  %7138 = vmatmul.mubr.msk.bf16.gmra.mrb[84].mxu0 %vm5312_vm1, %v7471_v28 }
 0x962   : > { %7101 = vmatprep.mubr.msk.bf16.mxu1 %vm740_vm0, %v8679_v9 }
 0x969   : > { %7102 = vmatmul.mubr.msk.bf16.gmra.mrb[56].mxu1 %vm740_vm0, %v8691_v22 }
 0x96a   : > { %7105 = vmatprep.mubr.msk.bf16.mxu1 %vm740_vm0, %v8703_v46 }
 0x971   : > { %7106 = vmatmul.mubr.msk.bf16.gmra.mrb[60].mxu1 %vm740_vm0, %v8715_v45 }
 0x972   : > { %7109 = vmatprep.mubr.msk.bf16.mxu1 %vm740_vm0, %v8727_v16 }
 0x979   : > { %7110 = vmatmul.mubr.msk.bf16.gmra.mrb[64].mxu1 %vm740_vm0, %v4161_v3 }
 0x97a   : > { %7113 = vmatprep.mubr.msk.bf16.mxu1 %vm740_vm0, %v4162_v0 }
 0x981   : > { %7114 = vmatmul.mubr.msk.bf16.gmra.mrb[68].mxu1 %vm740_vm0, %v4163_v50 }
 0x982   : > { %7149 = vmatprep.mubr.msk.bf16.mxu1 %vm5312_vm1, %v7464_v56 }
 0x989   : > { %7150 = vmatmul.mubr.msk.bf16.vlgmr.msra.gmra.mrb[72].mxu1 %vm5312_vm1, %v7465_v21 }
 0x98a   : > { %7153 = vmatprep.mubr.msk.bf16.mxu1 %vm5312_vm1, %v7466_v44 }
 0x991   : > { %7154 = vmatmul.mubr.msk.bf16.gmra.mrb[76].mxu1 %vm5312_vm1, %v7467_v13 }
 0x992   : > { %7157 = vmatprep.mubr.msk.bf16.mxu1 %vm5312_vm1, %v7468_v53 }
 0x999   : > { %7158 = vmatmul.mubr.msk.bf16.gmra.mrb[80].mxu1 %vm5312_vm1, %v7469_v36 }
 0x99a   : > { %7161 = vmatprep.mubr.msk.bf16.mxu1 %vm5312_vm1, %v7470_v59 }
 0x9a1   : > { %7162 = vmatmul.mubr.msk.bf16.gmra.mrb[84].mxu1 %vm5312_vm1, %v7471_v28 }
 0x9dc   : > { %v7015_v60 = vpop.f32.mrb[8].mxu1  ;;  %v7051_v20 = vpop.f32.mrb[40].mxu0 }
 0x9dd   : > { %v6223_v24 = vpack.c.bf16 %v7015_v60, %v7015_v60  ;;  %v6255_v47 = vpack.c.bf16 %v7051_v20, %v7051_v20  ;;  %v4262_v9 = vpop.f32.mrb[9].mxu1  ;;  %v4600_v22 = vpop.f32.mrb[41].mxu0 }
 0x9de   : > { %v6221_v55 = vpack.c.bf16 %v4262_v9, %v4262_v9  ;;  %v6253_v6 = vpack.c.bf16 %v4600_v22, %v4600_v22  ;;  %v7016_v27 = vpop.f32.mrb[10].mxu1  ;;  %v7052_v1 = vpop.f32.mrb[42].mxu0 }
 0x9df   : > { %4520 = vst.msk [vmem:[%s8823_s21 + $0x8] sm:$0xf] %vm4517_vm2, %v6223_v24  ;;  %4857 = vst.msk [vmem:[%s8829_s3 + $0x8] sm:$0xf] %vm4517_vm2, %v6255_v47  ;;  %v6224_v31 = vpack.c.bf16 %v7016_v27, %v7016_v27  ;;  %v6256_v19 = vpack.c.bf16 %v7052_v1, %v7052_v1  ;;  %v4265_v40 = vpop.f32.mrb[11].mxu1  ;;  %v4603_v46 = vpop.f32.mrb[43].mxu0 }
 0x9e0   : > { %4518 = vst.msk [vmem:[%s8823_s21] sm:$0xf] %vm4517_vm2, %v6221_v55  ;;  %4855 = vst.msk [vmem:[%s8829_s3] sm:$0xf] %vm4517_vm2, %v6253_v6  ;;  %v6222_v62 = vpack.c.bf16 %v4265_v40, %v4265_v40  ;;  %v6254_v15 = vpack.c.bf16 %v4603_v46, %v4603_v46 }
 0x9e1   : > { %4521 = vst.msk [vmem:[%s8823_s21 + $0xc] sm:$0xf] %vm4517_vm2, %v6224_v31  ;;  %4858 = vst.msk [vmem:[%s8829_s3 + $0xc] sm:$0xf] %vm4517_vm2, %v6256_v19 }
 0x9e2   : > { %4519 = vst.msk [vmem:[%s8823_s21 + $0x4] sm:$0xf] %vm4517_vm2, %v6222_v62  ;;  %4856 = vst.msk [vmem:[%s8829_s3 + $0x4] sm:$0xf] %vm4517_vm2, %v6254_v15 }
 0x9e4   : > { %v7019_v39 = vpop.f32.mrb[12].mxu1  ;;  %v7055_v58 = vpop.f32.mrb[44].mxu0 }
 0x9e5   : > { %v6227_v11 = vpack.c.bf16 %v7019_v39, %v7019_v39  ;;  %v6259_v30 = vpack.c.bf16 %v7055_v58, %v7055_v58  ;;  %v4278_v14 = vpop.f32.mrb[13].mxu1  ;;  %v4616_v54 = vpop.f32.mrb[45].mxu0 }
 0x9e6   : > { %v6225_v37 = vpack.c.bf16 %v4278_v14, %v4278_v14  ;;  %v6257_v45 = vpack.c.bf16 %v4616_v54, %v4616_v54  ;;  %v7020_v5 = vpop.f32.mrb[14].mxu1  ;;  %v7056_v18 = vpop.f32.mrb[46].mxu0 }
 0x9e7   : > { %4524 = vst.msk [vmem:[%s8823_s21 + $0x18] sm:$0xf] %vm4517_vm2, %v6227_v11  ;;  %4861 = vst.msk [vmem:[%s8829_s3 + $0x18] sm:$0xf] %vm4517_vm2, %v6259_v30  ;;  %v6228_v17 = vpack.c.bf16 %v7020_v5, %v7020_v5  ;;  %v6260_v4 = vpack.c.bf16 %v7056_v18, %v7056_v18  ;;  %v4281_v2 = vpop.f32.mrb[15].mxu1  ;;  %v4619_v10 = vpop.f32.mrb[47].mxu0 }
 0x9e8   : > { %4522 = vst.msk [vmem:[%s8823_s21 + $0x10] sm:$0xf] %vm4517_vm2, %v6225_v37  ;;  %4859 = vst.msk [vmem:[%s8829_s3 + $0x10] sm:$0xf] %vm4517_vm2, %v6257_v45  ;;  %v6226_v12 = vpack.c.bf16 %v4281_v2, %v4281_v2  ;;  %v6258_v38 = vpack.c.bf16 %v4619_v10, %v4619_v10 }
 0x9e9   : > { %4525 = vst.msk [vmem:[%s8823_s21 + $0x1c] sm:$0xf] %vm4517_vm2, %v6228_v17  ;;  %4862 = vst.msk [vmem:[%s8829_s3 + $0x1c] sm:$0xf] %vm4517_vm2, %v6260_v4 }
 0x9ea   : > { %4523 = vst.msk [vmem:[%s8823_s21 + $0x14] sm:$0xf] %vm4517_vm2, %v6226_v12  ;;  %4860 = vst.msk [vmem:[%s8829_s3 + $0x14] sm:$0xf] %vm4517_vm2, %v6258_v38 }
 0x9ec   : > { %v7023_v16 = vpop.f32.mrb[16].mxu1  ;;  %v7059_v7 = vpop.f32.mrb[48].mxu0 }
 0x9ed   : > { %v6231_v48 = vpack.c.bf16 %v7023_v16, %v7023_v16  ;;  %v6263_v32 = vpack.c.bf16 %v7059_v7, %v7059_v7  ;;  %v4294_v42 = vpop.f32.mrb[17].mxu1  ;;  %v4632_v35 = vpop.f32.mrb[49].mxu0 }
 0x9ee   : > { %v6229_v23 = vpack.c.bf16 %v4294_v42, %v4294_v42  ;;  %v6261_v8 = vpack.c.bf16 %v4632_v35, %v4632_v35  ;;  %v7024_v61 = vpop.f32.mrb[18].mxu1  ;;  %v7060_v3 = vpop.f32.mrb[50].mxu0 }
 0x9ef   : > { %4528 = vst.msk [vmem:[%s8823_s21 + $0x28] sm:$0xf] %vm4517_vm2, %v6231_v48  ;;  %4865 = vst.msk [vmem:[%s8829_s3 + $0x28] sm:$0xf] %vm4517_vm2, %v6263_v32  ;;  %v6232_v51 = vpack.c.bf16 %v7024_v61, %v7024_v61  ;;  %v6264_v26 = vpack.c.bf16 %v7060_v3, %v7060_v3  ;;  %v4297_v49 = vpop.f32.mrb[19].mxu1  ;;  %v4635_v52 = vpop.f32.mrb[51].mxu0 }
 0x9f0   : > { %4526 = vst.msk [vmem:[%s8823_s21 + $0x20] sm:$0xf] %vm4517_vm2, %v6229_v23  ;;  %4863 = vst.msk [vmem:[%s8829_s3 + $0x20] sm:$0xf] %vm4517_vm2, %v6261_v8  ;;  %v6230_v57 = vpack.c.bf16 %v4297_v49, %v4297_v49  ;;  %v6262_v41 = vpack.c.bf16 %v4635_v52, %v4635_v52 }
 0x9f1   : > { %4529 = vst.msk [vmem:[%s8823_s21 + $0x2c] sm:$0xf] %vm4517_vm2, %v6232_v51  ;;  %4866 = vst.msk [vmem:[%s8829_s3 + $0x2c] sm:$0xf] %vm4517_vm2, %v6264_v26 }
 0x9f2   : > { %4527 = vst.msk [vmem:[%s8823_s21 + $0x24] sm:$0xf] %vm4517_vm2, %v6230_v57  ;;  %4864 = vst.msk [vmem:[%s8829_s3 + $0x24] sm:$0xf] %vm4517_vm2, %v6262_v41 }
 0x9f4   : > { %v7027_v0 = vpop.f32.mrb[20].mxu1  ;;  %v7063_v63 = vpop.f32.mrb[52].mxu0 }
 0x9f5   : > { %v6235_v29 = vpack.c.bf16 %v7027_v0, %v7027_v0  ;;  %v6267_v43 = vpack.c.bf16 %v7063_v63, %v7063_v63  ;;  %v4310_v56 = vpop.f32.mrb[21].mxu1  ;;  %v4648_v50 = vpop.f32.mrb[53].mxu0 }
 0x9f6   : > { %v6233_v21 = vpack.c.bf16 %v4310_v56, %v4310_v56  ;;  %v6265_v25 = vpack.c.bf16 %v4648_v50, %v4648_v50  ;;  %v7028_v44 = vpop.f32.mrb[22].mxu1  ;;  %v7064_v34 = vpop.f32.mrb[54].mxu0 }
 0x9f7   : > { %4532 = vst.msk [vmem:[%s8823_s21 + $0x38] sm:$0xf] %vm4517_vm2, %v6235_v29  ;;  %4869 = vst.msk [vmem:[%s8829_s3 + $0x38] sm:$0xf] %vm4517_vm2, %v6267_v43  ;;  %v6236_v13 = vpack.c.bf16 %v7028_v44, %v7028_v44  ;;  %v6268_v33 = vpack.c.bf16 %v7064_v34, %v7064_v34  ;;  %v4313_v53 = vpop.f32.mrb[23].mxu1  ;;  %v4651_v36 = vpop.f32.mrb[55].mxu0 }
 0x9f8   : > { %4530 = vst.msk [vmem:[%s8823_s21 + $0x30] sm:$0xf] %vm4517_vm2, %v6233_v21  ;;  %4867 = vst.msk [vmem:[%s8829_s3 + $0x30] sm:$0xf] %vm4517_vm2, %v6265_v25  ;;  %v6234_v59 = vpack.c.bf16 %v4313_v53, %v4313_v53  ;;  %v6266_v28 = vpack.c.bf16 %v4651_v36, %v4651_v36 }
 0x9f9   : > { %4533 = vst.msk [vmem:[%s8823_s21 + $0x3c] sm:$0xf] %vm4517_vm2, %v6236_v13  ;;  %4870 = vst.msk [vmem:[%s8829_s3 + $0x3c] sm:$0xf] %vm4517_vm2, %v6268_v33 }
 0x9fa   : > { %4531 = vst.msk [vmem:[%s8823_s21 + $0x34] sm:$0xf] %vm4517_vm2, %v6234_v59  ;;  %4868 = vst.msk [vmem:[%s8829_s3 + $0x34] sm:$0xf] %vm4517_vm2, %v6266_v28 }
 0x9fc   : > { %v7031_v60 = vpop.f32.mrb[24].mxu1  ;;  %v7067_v20 = vpop.f32.mrb[56].mxu0 }
 0x9fd   : > { %v6239_v24 = vpack.c.bf16 %v7031_v60, %v7031_v60  ;;  %v6271_v47 = vpack.c.bf16 %v7067_v20, %v7067_v20  ;;  %v4326_v9 = vpop.f32.mrb[25].mxu1  ;;  %v4664_v22 = vpop.f32.mrb[57].mxu0 }
 0x9fe   : > { %v6237_v55 = vpack.c.bf16 %v4326_v9, %v4326_v9  ;;  %v6269_v6 = vpack.c.bf16 %v4664_v22, %v4664_v22  ;;  %v7032_v27 = vpop.f32.mrb[26].mxu1  ;;  %v7068_v1 = vpop.f32.mrb[58].mxu0 }
 0x9ff   : > { %4536 = vst.msk [vmem:[%s8823_s21 + $0x48] sm:$0xf] %vm4517_vm2, %v6239_v24  ;;  %4873 = vst.msk [vmem:[%s8829_s3 + $0x48] sm:$0xf] %vm4517_vm2, %v6271_v47  ;;  %v6240_v31 = vpack.c.bf16 %v7032_v27, %v7032_v27  ;;  %v6272_v19 = vpack.c.bf16 %v7068_v1, %v7068_v1  ;;  %v4329_v40 = vpop.f32.mrb[27].mxu1  ;;  %v4667_v46 = vpop.f32.mrb[59].mxu0 }
 0xa00   : > { %4534 = vst.msk [vmem:[%s8823_s21 + $0x40] sm:$0xf] %vm4517_vm2, %v6237_v55  ;;  %4871 = vst.msk [vmem:[%s8829_s3 + $0x40] sm:$0xf] %vm4517_vm2, %v6269_v6  ;;  %v6238_v62 = vpack.c.bf16 %v4329_v40, %v4329_v40  ;;  %v6270_v15 = vpack.c.bf16 %v4667_v46, %v4667_v46 }
 0xa01   : > { %4537 = vst.msk [vmem:[%s8823_s21 + $0x4c] sm:$0xf] %vm4517_vm2, %v6240_v31  ;;  %4874 = vst.msk [vmem:[%s8829_s3 + $0x4c] sm:$0xf] %vm4517_vm2, %v6272_v19 }
 0xa02   : > { %4535 = vst.msk [vmem:[%s8823_s21 + $0x44] sm:$0xf] %vm4517_vm2, %v6238_v62  ;;  %4872 = vst.msk [vmem:[%s8829_s3 + $0x44] sm:$0xf] %vm4517_vm2, %v6270_v15 }
 0xa04   : > { %v7035_v39 = vpop.f32.mrb[28].mxu1  ;;  %v7071_v58 = vpop.f32.mrb[60].mxu0 }
 0xa05   : > { %v6243_v11 = vpack.c.bf16 %v7035_v39, %v7035_v39  ;;  %v6275_v30 = vpack.c.bf16 %v7071_v58, %v7071_v58  ;;  %v4342_v14 = vpop.f32.mrb[29].mxu1  ;;  %v4680_v54 = vpop.f32.mrb[61].mxu0 }
 0xa06   : > { %v6241_v37 = vpack.c.bf16 %v4342_v14, %v4342_v14  ;;  %v6273_v45 = vpack.c.bf16 %v4680_v54, %v4680_v54  ;;  %v7036_v5 = vpop.f32.mrb[30].mxu1  ;;  %v7072_v18 = vpop.f32.mrb[62].mxu0 }
 0xa07   : > { %4540 = vst.msk [vmem:[%s8823_s21 + $0x58] sm:$0xf] %vm4517_vm2, %v6243_v11  ;;  %4877 = vst.msk [vmem:[%s8829_s3 + $0x58] sm:$0xf] %vm4517_vm2, %v6275_v30  ;;  %v6244_v17 = vpack.c.bf16 %v7036_v5, %v7036_v5  ;;  %v6276_v4 = vpack.c.bf16 %v7072_v18, %v7072_v18  ;;  %v4345_v2 = vpop.f32.mrb[31].mxu1  ;;  %v4683_v10 = vpop.f32.mrb[63].mxu0 }
 0xa08   : > { %4538 = vst.msk [vmem:[%s8823_s21 + $0x50] sm:$0xf] %vm4517_vm2, %v6241_v37  ;;  %4875 = vst.msk [vmem:[%s8829_s3 + $0x50] sm:$0xf] %vm4517_vm2, %v6273_v45  ;;  %v6242_v12 = vpack.c.bf16 %v4345_v2, %v4345_v2  ;;  %v6274_v38 = vpack.c.bf16 %v4683_v10, %v4683_v10 }
 0xa09   : > { %4541 = vst.msk [vmem:[%s8823_s21 + $0x5c] sm:$0xf] %vm4517_vm2, %v6244_v17  ;;  %4878 = vst.msk [vmem:[%s8829_s3 + $0x5c] sm:$0xf] %vm4517_vm2, %v6276_v4 }
 0xa0a   : > { %4539 = vst.msk [vmem:[%s8823_s21 + $0x54] sm:$0xf] %vm4517_vm2, %v6242_v12  ;;  %4876 = vst.msk [vmem:[%s8829_s3 + $0x54] sm:$0xf] %vm4517_vm2, %v6274_v38 }
 0xa0c   : > { %v7039_v16 = vpop.f32.mrb[32].mxu1  ;;  %v7075_v7 = vpop.f32.mrb[64].mxu0 }
 0xa0d   : > { %v6247_v48 = vpack.c.bf16 %v7039_v16, %v7039_v16  ;;  %v6279_v32 = vpack.c.bf16 %v7075_v7, %v7075_v7  ;;  %v4358_v42 = vpop.f32.mrb[33].mxu1  ;;  %v4696_v35 = vpop.f32.mrb[65].mxu0 }
 0xa0e   : > { %v6245_v23 = vpack.c.bf16 %v4358_v42, %v4358_v42  ;;  %v6277_v8 = vpack.c.bf16 %v4696_v35, %v4696_v35  ;;  %v7040_v61 = vpop.f32.mrb[34].mxu1  ;;  %v7076_v3 = vpop.f32.mrb[66].mxu0 }
 0xa0f   : > { %4544 = vst.msk [vmem:[%s8823_s21 + $0x68] sm:$0xf] %vm4517_vm2, %v6247_v48  ;;  %4881 = vst.msk [vmem:[%s8829_s3 + $0x68] sm:$0xf] %vm4517_vm2, %v6279_v32  ;;  %v6248_v51 = vpack.c.bf16 %v7040_v61, %v7040_v61  ;;  %v6280_v26 = vpack.c.bf16 %v7076_v3, %v7076_v3  ;;  %v4361_v49 = vpop.f32.mrb[35].mxu1  ;;  %v4699_v52 = vpop.f32.mrb[67].mxu0 }
 0xa10   : > { %4542 = vst.msk [vmem:[%s8823_s21 + $0x60] sm:$0xf] %vm4517_vm2, %v6245_v23  ;;  %4879 = vst.msk [vmem:[%s8829_s3 + $0x60] sm:$0xf] %vm4517_vm2, %v6277_v8  ;;  %v6246_v57 = vpack.c.bf16 %v4361_v49, %v4361_v49  ;;  %v6278_v41 = vpack.c.bf16 %v4699_v52, %v4699_v52 }
 0xa11   : > { %4545 = vst.msk [vmem:[%s8823_s21 + $0x6c] sm:$0xf] %vm4517_vm2, %v6248_v51  ;;  %4882 = vst.msk [vmem:[%s8829_s3 + $0x6c] sm:$0xf] %vm4517_vm2, %v6280_v26 }
 0xa12   : > { %4543 = vst.msk [vmem:[%s8823_s21 + $0x64] sm:$0xf] %vm4517_vm2, %v6246_v57  ;;  %4880 = vst.msk [vmem:[%s8829_s3 + $0x64] sm:$0xf] %vm4517_vm2, %v6278_v41 }
 0xa14   : > { %v7043_v0 = vpop.f32.mrb[36].mxu1  ;;  %v7079_v63 = vpop.f32.mrb[68].mxu0 }
 0xa15   : > { %v6251_v29 = vpack.c.bf16 %v7043_v0, %v7043_v0  ;;  %v6283_v43 = vpack.c.bf16 %v7079_v63, %v7079_v63  ;;  %v4374_v56 = vpop.f32.mrb[37].mxu1  ;;  %v4712_v50 = vpop.f32.mrb[69].mxu0 }
 0xa16   : > { %v6249_v21 = vpack.c.bf16 %v4374_v56, %v4374_v56  ;;  %v6281_v25 = vpack.c.bf16 %v4712_v50, %v4712_v50  ;;  %v7044_v44 = vpop.f32.mrb[38].mxu1  ;;  %v7080_v34 = vpop.f32.mrb[70].mxu0 }
 0xa17   : > { %4548 = vst.msk [vmem:[%s8823_s21 + $0x78] sm:$0xf] %vm4517_vm2, %v6251_v29  ;;  %4885 = vst.msk [vmem:[%s8829_s3 + $0x78] sm:$0xf] %vm4517_vm2, %v6283_v43  ;;  %v6252_v13 = vpack.c.bf16 %v7044_v44, %v7044_v44  ;;  %v6284_v33 = vpack.c.bf16 %v7080_v34, %v7080_v34  ;;  %v4377_v53 = vpop.f32.mrb[39].mxu1  ;;  %v4715_v36 = vpop.f32.mrb[71].mxu0 }
 0xa18   : > { %4546 = vst.msk [vmem:[%s8823_s21 + $0x70] sm:$0xf] %vm4517_vm2, %v6249_v21  ;;  %4883 = vst.msk [vmem:[%s8829_s3 + $0x70] sm:$0xf] %vm4517_vm2, %v6281_v25  ;;  %v6250_v59 = vpack.c.bf16 %v4377_v53, %v4377_v53  ;;  %v6282_v28 = vpack.c.bf16 %v4715_v36, %v4715_v36 }
 0xa19   : > { %4549 = vst.msk [vmem:[%s8823_s21 + $0x7c] sm:$0xf] %vm4517_vm2, %v6252_v13  ;;  %4886 = vst.msk [vmem:[%s8829_s3 + $0x7c] sm:$0xf] %vm4517_vm2, %v6284_v33 }
 0xa1a   : > { %4547 = vst.msk [vmem:[%s8823_s21 + $0x74] sm:$0xf] %vm4517_vm2, %v6250_v59  ;;  %4884 = vst.msk [vmem:[%s8829_s3 + $0x74] sm:$0xf] %vm4517_vm2, %v6282_v28 }
 0xa1c   : > { %v7087_v60 = vpop.f32.mrb[40].mxu1  ;;  %v7127_v20 = vpop.f32.mrb[72].mxu0 }
 0xa1d   : > { %v6287_v24 = vpack.c.bf16 %v7087_v60, %v7087_v60  ;;  %v4937_v47 = vpop.f32.mrb[41].mxu1  ;;  %v6319_v9 = vpack.c.bf16 %v7127_v20, %v7127_v20  ;;  %v5371_v22 = vpop.f32.mrb[73].mxu0 }
 0xa1e   : > { %v6285_v55 = vpack.c.bf16 %v4937_v47, %v4937_v47  ;;  %v7088_v6 = vpop.f32.mrb[42].mxu1  ;;  %v6317_v27 = vpack.c.bf16 %v5371_v22, %v5371_v22  ;;  %v7128_v1 = vpop.f32.mrb[74].mxu0 }
 0xa1f   : > { %5194 = vst.msk [vmem:[%s8969_s24 + $0x8] sm:$0xf] %vm4517_vm2, %v6287_v24  ;;  %v6288_v31 = vpack.c.bf16 %v7088_v6, %v7088_v6  ;;  %v4940_v19 = vpop.f32.mrb[43].mxu1  ;;  %5500 = vst.msk [vmem:[%s8963_s27 + $0x8] sm:$0xf] %vm4517_vm2, %v6319_v9  ;;  %v6320_v40 = vpack.c.bf16 %v7128_v1, %v7128_v1  ;;  %v5374_v46 = vpop.f32.mrb[75].mxu0 }
 0xa20   : > { %5192 = vst.msk [vmem:[%s8969_s24] sm:$0xf] %vm4517_vm2, %v6285_v55  ;;  %v6286_v62 = vpack.c.bf16 %v4940_v19, %v4940_v19  ;;  %5498 = vst.msk [vmem:[%s8963_s27] sm:$0xf] %vm4517_vm2, %v6317_v27  ;;  %v6318_v15 = vpack.c.bf16 %v5374_v46, %v5374_v46 }
 0xa21   : > { %5195 = vst.msk [vmem:[%s8969_s24 + $0xc] sm:$0xf] %vm4517_vm2, %v6288_v31  ;;  %5501 = vst.msk [vmem:[%s8963_s27 + $0xc] sm:$0xf] %vm4517_vm2, %v6320_v40 }
 0xa22   : > { %5193 = vst.msk [vmem:[%s8969_s24 + $0x4] sm:$0xf] %vm4517_vm2, %v6286_v62  ;;  %5499 = vst.msk [vmem:[%s8963_s27 + $0x4] sm:$0xf] %vm4517_vm2, %v6318_v15 }
 0xa24   : > { %v7091_v39 = vpop.f32.mrb[44].mxu1  ;;  %v7131_v58 = vpop.f32.mrb[76].mxu0 }
 0xa25   : > { %v6291_v11 = vpack.c.bf16 %v7091_v39, %v7091_v39  ;;  %v4953_v30 = vpop.f32.mrb[45].mxu1  ;;  %v6323_v14 = vpack.c.bf16 %v7131_v58, %v7131_v58  ;;  %v5387_v54 = vpop.f32.mrb[77].mxu0 }
 0xa26   : > { %v6289_v37 = vpack.c.bf16 %v4953_v30, %v4953_v30  ;;  %v7092_v45 = vpop.f32.mrb[46].mxu1  ;;  %v6321_v5 = vpack.c.bf16 %v5387_v54, %v5387_v54  ;;  %v7132_v18 = vpop.f32.mrb[78].mxu0 }
 0xa27   : > { %5198 = vst.msk [vmem:[%s8969_s24 + $0x18] sm:$0xf] %vm4517_vm2, %v6291_v11  ;;  %v6292_v17 = vpack.c.bf16 %v7092_v45, %v7092_v45  ;;  %v4956_v4 = vpop.f32.mrb[47].mxu1  ;;  %5504 = vst.msk [vmem:[%s8963_s27 + $0x18] sm:$0xf] %vm4517_vm2, %v6323_v14  ;;  %v6324_v2 = vpack.c.bf16 %v7132_v18, %v7132_v18  ;;  %v5390_v10 = vpop.f32.mrb[79].mxu0 }
 0xa28   : > { %5196 = vst.msk [vmem:[%s8969_s24 + $0x10] sm:$0xf] %vm4517_vm2, %v6289_v37  ;;  %v6290_v12 = vpack.c.bf16 %v4956_v4, %v4956_v4  ;;  %5502 = vst.msk [vmem:[%s8963_s27 + $0x10] sm:$0xf] %vm4517_vm2, %v6321_v5  ;;  %v6322_v38 = vpack.c.bf16 %v5390_v10, %v5390_v10 }
 0xa29   : > { %5199 = vst.msk [vmem:[%s8969_s24 + $0x1c] sm:$0xf] %vm4517_vm2, %v6292_v17  ;;  %5505 = vst.msk [vmem:[%s8963_s27 + $0x1c] sm:$0xf] %vm4517_vm2, %v6324_v2 }
 0xa2a   : > { %5197 = vst.msk [vmem:[%s8969_s24 + $0x14] sm:$0xf] %vm4517_vm2, %v6290_v12  ;;  %5503 = vst.msk [vmem:[%s8963_s27 + $0x14] sm:$0xf] %vm4517_vm2, %v6322_v38 }
 0xa2c   : > { %v7095_v16 = vpop.f32.mrb[48].mxu1  ;;  %v7135_v7 = vpop.f32.mrb[80].mxu0 }
 0xa2d   : > { %v6295_v48 = vpack.c.bf16 %v7095_v16, %v7095_v16  ;;  %v4969_v32 = vpop.f32.mrb[49].mxu1  ;;  %v6327_v42 = vpack.c.bf16 %v7135_v7, %v7135_v7  ;;  %v5403_v35 = vpop.f32.mrb[81].mxu0 }
 0xa2e   : > { %v6293_v23 = vpack.c.bf16 %v4969_v32, %v4969_v32  ;;  %v7096_v8 = vpop.f32.mrb[50].mxu1  ;;  %v6325_v61 = vpack.c.bf16 %v5403_v35, %v5403_v35  ;;  %v7136_v3 = vpop.f32.mrb[82].mxu0 }
 0xa2f   : > { %5202 = vst.msk [vmem:[%s8969_s24 + $0x28] sm:$0xf] %vm4517_vm2, %v6295_v48  ;;  %v6296_v51 = vpack.c.bf16 %v7096_v8, %v7096_v8  ;;  %v4972_v26 = vpop.f32.mrb[51].mxu1  ;;  %5508 = vst.msk [vmem:[%s8963_s27 + $0x28] sm:$0xf] %vm4517_vm2, %v6327_v42  ;;  %v6328_v49 = vpack.c.bf16 %v7136_v3, %v7136_v3  ;;  %v5406_v52 = vpop.f32.mrb[83].mxu0 }
 0xa30   : > { %5200 = vst.msk [vmem:[%s8969_s24 + $0x20] sm:$0xf] %vm4517_vm2, %v6293_v23  ;;  %v6294_v57 = vpack.c.bf16 %v4972_v26, %v4972_v26  ;;  %5506 = vst.msk [vmem:[%s8963_s27 + $0x20] sm:$0xf] %vm4517_vm2, %v6325_v61  ;;  %v6326_v41 = vpack.c.bf16 %v5406_v52, %v5406_v52 }
 0xa31   : > { %5203 = vst.msk [vmem:[%s8969_s24 + $0x2c] sm:$0xf] %vm4517_vm2, %v6296_v51  ;;  %5509 = vst.msk [vmem:[%s8963_s27 + $0x2c] sm:$0xf] %vm4517_vm2, %v6328_v49 }
 0xa32   : > { %5201 = vst.msk [vmem:[%s8969_s24 + $0x24] sm:$0xf] %vm4517_vm2, %v6294_v57  ;;  %5507 = vst.msk [vmem:[%s8963_s27 + $0x24] sm:$0xf] %vm4517_vm2, %v6326_v41 }
 0xa34   : > { %v7099_v0 = vpop.f32.mrb[52].mxu1  ;;  %v7139_v63 = vpop.f32.mrb[84].mxu0 }
 0xa35   : > { %v6299_v29 = vpack.c.bf16 %v7099_v0, %v7099_v0  ;;  %v4985_v43 = vpop.f32.mrb[53].mxu1  ;;  %v6331_v56 = vpack.c.bf16 %v7139_v63, %v7139_v63  ;;  %v5419_v50 = vpop.f32.mrb[85].mxu0 }
 0xa36   : > { %v6297_v21 = vpack.c.bf16 %v4985_v43, %v4985_v43  ;;  %v7100_v25 = vpop.f32.mrb[54].mxu1  ;;  %v6329_v44 = vpack.c.bf16 %v5419_v50, %v5419_v50  ;;  %v7140_v34 = vpop.f32.mrb[86].mxu0 }
 0xa37   : > { %5206 = vst.msk [vmem:[%s8969_s24 + $0x38] sm:$0xf] %vm4517_vm2, %v6299_v29  ;;  %v6300_v13 = vpack.c.bf16 %v7100_v25, %v7100_v25  ;;  %v4988_v33 = vpop.f32.mrb[55].mxu1  ;;  %5512 = vst.msk [vmem:[%s8963_s27 + $0x38] sm:$0xf] %vm4517_vm2, %v6331_v56  ;;  %v6332_v53 = vpack.c.bf16 %v7140_v34, %v7140_v34  ;;  %v5422_v36 = vpop.f32.mrb[87].mxu0 }
 0xa38   : > { %5204 = vst.msk [vmem:[%s8969_s24 + $0x30] sm:$0xf] %vm4517_vm2, %v6297_v21  ;;  %v6298_v59 = vpack.c.bf16 %v4988_v33, %v4988_v33  ;;  %5510 = vst.msk [vmem:[%s8963_s27 + $0x30] sm:$0xf] %vm4517_vm2, %v6329_v44  ;;  %v6330_v28 = vpack.c.bf16 %v5422_v36, %v5422_v36 }
 0xa39   : > { %5207 = vst.msk [vmem:[%s8969_s24 + $0x3c] sm:$0xf] %vm4517_vm2, %v6300_v13  ;;  %5513 = vst.msk [vmem:[%s8963_s27 + $0x3c] sm:$0xf] %vm4517_vm2, %v6332_v53 }
 0xa3a   : > { %5205 = vst.msk [vmem:[%s8969_s24 + $0x34] sm:$0xf] %vm4517_vm2, %v6298_v59  ;;  %5511 = vst.msk [vmem:[%s8963_s27 + $0x34] sm:$0xf] %vm4517_vm2, %v6330_v28 }
 0xa3c   : > { %v7103_v60 = vpop.f32.mrb[56].mxu1 }
 0xa3d   : > { %v6303_v20 = vpack.c.bf16 %v7103_v60, %v7103_v60  ;;  %v5001_v24 = vpop.f32.mrb[57].mxu1 }
 0xa3e   : > { %v6301_v47 = vpack.c.bf16 %v5001_v24, %v5001_v24  ;;  %v7104_v9 = vpop.f32.mrb[58].mxu1 }
 0xa3f   : > { %5210 = vst.msk [vmem:[%s8969_s24 + $0x48] sm:$0xf] %vm4517_vm2, %v6303_v20  ;;  %v6304_v22 = vpack.c.bf16 %v7104_v9, %v7104_v9  ;;  %v5004_v55 = vpop.f32.mrb[59].mxu1 }
 0xa40   : > { %5208 = vst.msk [vmem:[%s8969_s24 + $0x40] sm:$0xf] %vm4517_vm2, %v6301_v47  ;;  %v6302_v6 = vpack.c.bf16 %v5004_v55, %v5004_v55 }
 0xa41   : > { %5211 = vst.msk [vmem:[%s8969_s24 + $0x4c] sm:$0xf] %vm4517_vm2, %v6304_v22 }
 0xa42   : > { %5209 = vst.msk [vmem:[%s8969_s24 + $0x44] sm:$0xf] %vm4517_vm2, %v6302_v6 }
 0xa44   : > { %v7107_v27 = vpop.f32.mrb[60].mxu1 }
 0xa45   : > { %v6307_v1 = vpack.c.bf16 %v7107_v27, %v7107_v27  ;;  %v5017_v31 = vpop.f32.mrb[61].mxu1 }
 0xa46   : > { %v6305_v19 = vpack.c.bf16 %v5017_v31, %v5017_v31  ;;  %v7108_v40 = vpop.f32.mrb[62].mxu1 }
 0xa47   : > { %5214 = vst.msk [vmem:[%s8969_s24 + $0x58] sm:$0xf] %vm4517_vm2, %v6307_v1  ;;  %v6308_v46 = vpack.c.bf16 %v7108_v40, %v7108_v40  ;;  %v5020_v62 = vpop.f32.mrb[63].mxu1 }
 0xa48   : > { %5212 = vst.msk [vmem:[%s8969_s24 + $0x50] sm:$0xf] %vm4517_vm2, %v6305_v19  ;;  %v6306_v15 = vpack.c.bf16 %v5020_v62, %v5020_v62 }
 0xa49   : > { %5215 = vst.msk [vmem:[%s8969_s24 + $0x5c] sm:$0xf] %vm4517_vm2, %v6308_v46 }
 0xa4a   : > { %5213 = vst.msk [vmem:[%s8969_s24 + $0x54] sm:$0xf] %vm4517_vm2, %v6306_v15 }
 0xa4c   : > { %v7111_v39 = vpop.f32.mrb[64].mxu1 }
 0xa4d   : > { %v6311_v58 = vpack.c.bf16 %v7111_v39, %v7111_v39  ;;  %v5033_v11 = vpop.f32.mrb[65].mxu1 }
 0xa4e   : > { %v6309_v30 = vpack.c.bf16 %v5033_v11, %v5033_v11  ;;  %v7112_v14 = vpop.f32.mrb[66].mxu1 }
 0xa4f   : > { %5218 = vst.msk [vmem:[%s8969_s24 + $0x68] sm:$0xf] %vm4517_vm2, %v6311_v58  ;;  %v6312_v54 = vpack.c.bf16 %v7112_v14, %v7112_v14  ;;  %v5036_v37 = vpop.f32.mrb[67].mxu1 }
 0xa50   : > { %5216 = vst.msk [vmem:[%s8969_s24 + $0x60] sm:$0xf] %vm4517_vm2, %v6309_v30  ;;  %v6310_v45 = vpack.c.bf16 %v5036_v37, %v5036_v37 }
 0xa51   : > { %5219 = vst.msk [vmem:[%s8969_s24 + $0x6c] sm:$0xf] %vm4517_vm2, %v6312_v54 }
 0xa52   : > { %5217 = vst.msk [vmem:[%s8969_s24 + $0x64] sm:$0xf] %vm4517_vm2, %v6310_v45 }
 0xa54   : > { %v7115_v5 = vpop.f32.mrb[68].mxu1 }
 0xa55   : > { %v6315_v18 = vpack.c.bf16 %v7115_v5, %v7115_v5  ;;  %v5049_v17 = vpop.f32.mrb[69].mxu1 }
 0xa56   : > { %v6313_v4 = vpack.c.bf16 %v5049_v17, %v5049_v17  ;;  %v7116_v2 = vpop.f32.mrb[70].mxu1 }
 0xa57   : > { %5222 = vst.msk [vmem:[%s8969_s24 + $0x78] sm:$0xf] %vm4517_vm2, %v6315_v18  ;;  %v6316_v10 = vpack.c.bf16 %v7116_v2, %v7116_v2  ;;  %v5052_v12 = vpop.f32.mrb[71].mxu1 }
 0xa58   : > { %5220 = vst.msk [vmem:[%s8969_s24 + $0x70] sm:$0xf] %vm4517_vm2, %v6313_v4  ;;  %v6314_v38 = vpack.c.bf16 %v5052_v12, %v5052_v12 }
 0xa59   : > { %5223 = vst.msk [vmem:[%s8969_s24 + $0x7c] sm:$0xf] %vm4517_vm2, %v6316_v10 }
 0xa5a   : > { %5221 = vst.msk [vmem:[%s8969_s24 + $0x74] sm:$0xf] %vm4517_vm2, %v6314_v38 }
 0xa5c   : > { %v7151_v16 = vpop.f32.mrb[72].mxu1 }
 0xa5d   : > { %v6335_v7 = vpack.c.bf16 %v7151_v16, %v7151_v16  ;;  %v5580_v48 = vpop.f32.mrb[73].mxu1 }
 0xa5e   : > { %v6333_v32 = vpack.c.bf16 %v5580_v48, %v5580_v48  ;;  %v7152_v42 = vpop.f32.mrb[74].mxu1 }
 0xa5f   : > { %5709 = vst.msk [vmem:[%s9071_s25 + $0x8] sm:$0xf] %vm4517_vm2, %v6335_v7  ;;  %v6336_v35 = vpack.c.bf16 %v7152_v42, %v7152_v42  ;;  %v5583_v23 = vpop.f32.mrb[75].mxu1 }
 0xa60   : > { %5707 = vst.msk [vmem:[%s9071_s25] sm:$0xf] %vm4517_vm2, %v6333_v32  ;;  %v6334_v8 = vpack.c.bf16 %v5583_v23, %v5583_v23 }
 0xa61   : > { %5710 = vst.msk [vmem:[%s9071_s25 + $0xc] sm:$0xf] %vm4517_vm2, %v6336_v35 }
 0xa62   : > { %5708 = vst.msk [vmem:[%s9071_s25 + $0x4] sm:$0xf] %vm4517_vm2, %v6334_v8 }
 0xa64   : > { %v7155_v61 = vpop.f32.mrb[76].mxu1 }
 0xa65   : > { %v6339_v3 = vpack.c.bf16 %v7155_v61, %v7155_v61  ;;  %v5596_v51 = vpop.f32.mrb[77].mxu1 }
 0xa66   : > { %v6337_v26 = vpack.c.bf16 %v5596_v51, %v5596_v51  ;;  %v7156_v49 = vpop.f32.mrb[78].mxu1 }
 0xa67   : > { %5713 = vst.msk [vmem:[%s9071_s25 + $0x18] sm:$0xf] %vm4517_vm2, %v6339_v3  ;;  %v6340_v52 = vpack.c.bf16 %v7156_v49, %v7156_v49  ;;  %v5599_v57 = vpop.f32.mrb[79].mxu1 }
 0xa68   : > { %5711 = vst.msk [vmem:[%s9071_s25 + $0x10] sm:$0xf] %vm4517_vm2, %v6337_v26  ;;  %v6338_v41 = vpack.c.bf16 %v5599_v57, %v5599_v57 }
 0xa69   : > { %5714 = vst.msk [vmem:[%s9071_s25 + $0x1c] sm:$0xf] %vm4517_vm2, %v6340_v52 }
 0xa6a   : > { %5712 = vst.msk [vmem:[%s9071_s25 + $0x14] sm:$0xf] %vm4517_vm2, %v6338_v41 }
 0xa6c   : > { %v7159_v0 = vpop.f32.mrb[80].mxu1 }
 0xa6d   : > { %v6343_v63 = vpack.c.bf16 %v7159_v0, %v7159_v0  ;;  %v5612_v29 = vpop.f32.mrb[81].mxu1 }
 0xa6e   : > { %v6341_v43 = vpack.c.bf16 %v5612_v29, %v5612_v29  ;;  %v7160_v56 = vpop.f32.mrb[82].mxu1 }
 0xa6f   : > { %5717 = vst.msk [vmem:[%s9071_s25 + $0x28] sm:$0xf] %vm4517_vm2, %v6343_v63  ;;  %v6344_v50 = vpack.c.bf16 %v7160_v56, %v7160_v56  ;;  %v5615_v21 = vpop.f32.mrb[83].mxu1 }
 0xa70   : > { %5715 = vst.msk [vmem:[%s9071_s25 + $0x20] sm:$0xf] %vm4517_vm2, %v6341_v43  ;;  %v6342_v25 = vpack.c.bf16 %v5615_v21, %v5615_v21 }
 0xa71   : > { %5718 = vst.msk [vmem:[%s9071_s25 + $0x2c] sm:$0xf] %vm4517_vm2, %v6344_v50 }
 0xa72   : > { %5716 = vst.msk [vmem:[%s9071_s25 + $0x24] sm:$0xf] %vm4517_vm2, %v6342_v25 }
 0xa74   : > { %v7163_v44 = vpop.f32.mrb[84].mxu1 }
 0xa75   : > { %v6347_v34 = vpack.c.bf16 %v7163_v44, %v7163_v44  ;;  %v5628_v13 = vpop.f32.mrb[85].mxu1 }
 0xa76   : > { %v6345_v33 = vpack.c.bf16 %v5628_v13, %v5628_v13  ;;  %v7164_v53 = vpop.f32.mrb[86].mxu1 }
 0xa77   : > { %5721 = vst.msk [vmem:[%s9071_s25 + $0x38] sm:$0xf] %vm4517_vm2, %v6347_v34  ;;  %v6348_v36 = vpack.c.bf16 %v7164_v53, %v7164_v53  ;;  %v5631_v59 = vpop.f32.mrb[87].mxu1 }
 0xa78   : > { %5719 = vst.msk [vmem:[%s9071_s25 + $0x30] sm:$0xf] %vm4517_vm2, %v6345_v33  ;;  %v6346_v28 = vpack.c.bf16 %v5631_v59, %v5631_v59 }
 0xa79   : > { %5722 = vst.msk [vmem:[%s9071_s25 + $0x3c] sm:$0xf] %vm4517_vm2, %v6348_v36 }
 0xa7a   : > { %5720 = vst.msk [vmem:[%s9071_s25 + $0x34] sm:$0xf] %vm4517_vm2, %v6346_v28 }
 0xa7b PF: > { %s31_s1 = sadd.s32 1, %s7550_s1  }
 0xa7c   : > { %p28_p4 = scmp.ge.s32.totalorder %s31_s1, 4  }
 0xa7e   :  { %30 = sbr.rel (!%p28_p4) target bundleno = 6 (0x6), region = 173 }

// kernel: tpu_custom_call.1
= control target key start
LH: loop header
LB: loop body
LE: loop exit
PB: predicated region body
PF: predicated region fallthrough
CT: control target
= control target key end

     0   :  { %s9108_s0 = inlined_call_operand.vmem [shape: f32[2,32,256], index: 0, kind: input, shape index: {}]   ;;  %s9109_s1 = inlined_call_operand.vmem [shape: bf16[2,128,64], index: 1, kind: input, shape index: {}]   ;;  %s9110_s2 = inlined_call_operand.vmem [shape: f32[32,32], index: 2, kind: input, shape index: {}]   ;;  %s9111_s3 = inlined_call_operand.vmem [shape: f32[32,32], index: 3, kind: input, shape index: {}]   ;;  %s9112_s4 = inlined_call_operand.vmem [shape: f32[32,1], index: 4, kind: input, shape index: {}]   ;;  %s9113_s5 = inlined_call_operand.vmem [shape: f32[32,1], index: 5, kind: input, shape index: {}]   ;;  %s9114_s6 = inlined_call_operand.vmem [shape: bf16[32,32], index: 6, kind: input, shape index: {}]   ;;  %s9115_s7 = inlined_call_operand.vmem [shape: f32[1,32], index: 7, kind: input, shape index: {}]   ;;  %s9116_s8 = inlined_call_operand.vmem [shape: f32[1,32], index: 8, kind: input, shape index: {}]   ;;  %s9117_s9 = inlined_call_operand.vmem [shape: f32[1,32], index: 9, kind: input, shape index: {}]   ;;  %s9118_s10 = inlined_call_operand.vmem [shape: bf16[32,32], index: 10, kind: input, shape index: {}]   ;;  %s9119_s11 = inlined_call_operand.vmem [shape: bf16[32,32], index: 11, kind: input, shape index: {}]   ;;  %s9120_s12 = inlined_call_operand.vmem [shape: bf16[32,32], index: 12, kind: input, shape index: {}]   ;;  %s9121_s13 = inlined_call_operand.vmem [shape: bf16[64,32], index: 13, kind: input, shape index: {}]   ;;  %s9122_s14 = inlined_call_operand.vmem [shape: bf16[64,32], index: 14, kind: input, shape index: {}]   ;;  %s9123_s15 = inlined_call_operand.vmem [shape: f32[2,256,32], index: 15, kind: output, shape index: {0}]   ;;  %s9124_s16 = inlined_call_operand.vmem [shape: bf16[2,256,32], index: 16, kind: output, shape index: {1}]   ;;  %s9125_s17 = inlined_call_operand.vmem [shape: bf16[2,256,32], index: 17, kind: output, shape index: {2}]   ;;  %s9126_s18 = inlined_call_operand.vmem [shape: bf16[2,256,32], index: 18, kind: output, shape index: {3}]   ;;  %s9127_s19 = inlined_call_operand.vmem [shape: bf16[2,128,32], index: 19, kind: output, shape index: {4}]   ;;  %s9128_s20 = inlined_call_operand.vmem [shape: bf16[2,128,32], index: 20, kind: output, shape index: {5}]  }
   0x1   :  { %9132 = sst [smem:[#allocation2_spill]] %s9108_s0 }
   0x2   :  { %9133 = sst [smem:[#allocation3_spill]] %s9109_s1  ;;  %s7658_s1 = smov 0  }
   0x3   :  { %9134 = sst [smem:[#allocation4_spill]] %s9110_s2 }
   0x4   :  { %9135 = sst [smem:[#allocation5_spill]] %s9111_s3 }
   0x5   :  { %9136 = sst [smem:[#allocation6_spill]] %s9112_s4 }
   0x6 LB: > { %s5955_s22 = sadd.s32 4294967295, %s7550_s1   ;;  %p5959_p0 = scmp.ge.s32.totalorder %s7550_s1, 1  ;;  %s7550_s1 = sphi %s7658_s1, %s31_s1  }
   0x7   : > { %p583_p1 = scmp.lt.s32.totalorder %s7550_s1, 3 }
   0x9   : > { %p584_p2 = pnand %p5959_p0, %p583_p1 }
   0xa   : > { %p671_p3 = scmp.lt.s32.totalorder (!%p584_p2), %s5955_s22, 1  ;;  %s9137_s25 = sld [smem:[#allocation2_spill]] (!%p584_p2)  ;;  %vm740_vm0 = vcmask (!%p584_p2), 261120   ;;  %vm5312_vm1 = vcmask (!%p584_p2), 523264   ;;  %vm4517_vm2 = vcmask (!%p584_p2), 257024  }
   0xb   : > { %587 = sbr.rel (%p584_p2) target bundleno = 2683 (0xa7b), region = 80  ;;  %s9138_s28 = sld [smem:[#allocation3_spill]] (!%p584_p2) }
   0xc   : > { %s9139_s0 = sld [smem:[#allocation5_spill]] (!%p584_p2)  ;;  %s9140_s29 = sld [smem:[#allocation4_spill]] (!%p584_p2) }
   0xd   : > { %s9141_s2 = sld [smem:[#allocation6_spill]] (!%p584_p2) }
  0x12   : > { %s9143_s22 = smov (!%p671_p3, %s5955_s22), 1  ;;  %v724_v12 = vld [vmem:[%s9139_s0] sm:$0xff]  ;;  %v725_v19 = vld [vmem:[%s9139_s0 + $0x8] sm:$0xff]  ;;  %v726_v20 = vld [vmem:[%s9139_s0 + $0x10] sm:$0xff] }
  0x13   : > { %s7669_s23 = sshll.u32 %s9143_s22, 6  ;;  %v742_v13 = vsel %vm740_vm0, %v724_v12, 0  ;;  %v745_v21 = vsel %vm740_vm0, %v725_v19, 0  ;;  %v748_v22 = vsel %vm740_vm0, %v726_v20, 0  ;;  %v727_v23 = vld [vmem:[%s9139_s0 + $0x18] sm:$0xff]  ;;  %v720_v20 = vld [vmem:[%s9140_s29] sm:$0xff] }
  0x14   : > { %s675_s3 = scalar_lea.vmem %s9137_s25, %s7669_s23  ;;  %s7703_s4 = scalar_lea.vmem %s9138_s28, %s7669_s23  ;;  %v7709_v14 = vand.u32 4294901760, %v742_v13  ;;  %v7733_v24 = vand.u32 4294901760, %v745_v21  ;;  %v7735_v25 = vand.u32 4294901760, %v748_v22  ;;  %v751_v26 = vsel %vm740_vm0, %v727_v23, 0 }
  0x15   : > { %v7675_v0 = vld [vmem:[%s675_s3 + $0x20] sm:$0xff]  ;;  %v7677_v1 = vld [vmem:[%s675_s3 + $0x28] sm:$0xff]  ;;  %v7685_v5 = vld [vmem:[%s675_s3 + $0x30] sm:$0xff]  ;;  %v7741_v32 = vand.u32 4294901760, %v751_v26  ;;  %s6215_s21 = sshll.u32 %s9143_s22, 8  ;;  %s9071_s25 = scalar_lea.vmem %s9128_s20, %s7669_s23 }
  0x16   : > { %v7679_v2 = vld [vmem:[%s675_s3] sm:$0xff]  ;;  %v734_v3 = vadd.f32 %v7677_v1, %v7675_v0  ;;  %v7683_v4 = vld [vmem:[%s675_s3 + $0x8] sm:$0xff]  ;;  %v7687_v6 = vld [vmem:[%s675_s3 + $0x38] sm:$0xff]  ;;  %v7712_v15 = vsub.f32 %v742_v13, %v7709_v14  ;;  %v7739_v30 = vsub.f32 %v745_v21, %v7733_v24  ;;  %v7744_v33 = vsub.f32 %v748_v22, %v7735_v25  ;;  %s8069_s27 = scalar_lea.vmem %s9123_s15, %s6215_s21 }
  0x17   : > { %v728_v7 = vadd.f32 %v7683_v4, %v7679_v2  ;;  %v7691_v8 = vld [vmem:[%s675_s3 + $0x10] sm:$0xff]  ;;  %v7693_v9 = vld [vmem:[%s675_s3 + $0x18] sm:$0xff]  ;;  %v737_v10 = vadd.f32 %v7687_v6, %v7685_v5  ;;  %v7752_v42 = vsub.f32 %v751_v26, %v7741_v32  ;;  %v1372_v21 = vsel %vm740_vm0, %v720_v20, 0 }
  0x18   : > { %735 = vadd.xlane.f32.xlu1 %v734_v3  ;;  %v731_v11 = vadd.f32 %v7693_v9, %v7691_v8  ;;  %v7715_v16 = vand.u32 4294901760, %v7712_v15  ;;  %v7749_v39 = vand.u32 4294901760, %v7739_v30  ;;  %v7755_v44 = vand.u32 4294901760, %v7744_v33 }
  0x19   : > { %729 = vadd.xlane.f32.xlu0 %v728_v7  ;;  %v7764_v53 = vand.u32 4294901760, %v7752_v42  ;;  %v7811_v22 = vand.u32 4294901760, %v1372_v21 }
  0x1a   : > { %v825_v17 = vsub.f32 %v7712_v15, %v7715_v16  ;;  %v835_v49 = vsub.f32 %v7739_v30, %v7749_v39  ;;  %v845_v55 = vsub.f32 %v7744_v33, %v7755_v44 }
  0x1b   : > { %v855_v62 = vsub.f32 %v7752_v42, %v7764_v53  ;;  %v7814_v23 = vsub.f32 %v1372_v21, %v7811_v22 }
  0x1c   : > { %738 = vadd.xlane.f32.xlu1 %v737_v10  ;;  %v7719_v18 = vand.u32 4294901760, %v825_v17  ;;  %v7770_v58 = vand.u32 4294901760, %v835_v49  ;;  %v7774_v63 = vand.u32 4294901760, %v845_v55 }
  0x1d   : > { %732 = vadd.xlane.f32.xlu0 %v731_v11  ;;  %v7777_v11 = vand.u32 4294901760, %v855_v62  ;;  %v7817_v26 = vand.u32 4294901760, %v7814_v23 }
  0x1e   : > { %6645 = vmatprep.mubr.f32.mxu0 %v7719_v18 }
  0xa5   : > { %v736_v27 = vpop.xlane.xlu1 %735 }
  0xa6   : > { %v760_v28 = vand.u32 4294901760, %v736_v27  ;;  %v730_v29 = vpop.xlane.xlu0 %729 }
  0xa7   : > { %v754_v31 = vand.u32 4294901760, %v730_v29 }
  0xa8   : > { %v7746_v34 = vsub.f32 %v736_v27, %v760_v28  ;;  %v1455_v27 = vsub.f32 %v7814_v23, %v7817_v26 }
  0xa9   : > { %v864_v35 = vsub.f32 %v730_v29, %v754_v31  ;;  %v739_v36 = vpop.xlane.xlu1 %738  ;;  %v721_v29 = vld [vmem:[%s9140_s29 + $0x8] sm:$0xff] }
  0xaa   : > { %v763_v37 = vand.u32 4294901760, %v739_v36  ;;  %v733_v38 = vpop.xlane.xlu0 %732  ;;  %v879_v45 = vand.u32 4294901760, %v7746_v34 }
  0xab   : > { %v865_v40 = vand.u32 4294901760, %v864_v35  ;;  %v757_v41 = vand.u32 4294901760, %v733_v38 }
  0xac   : > { %v885_v43 = vsub.f32 %v739_v36, %v763_v37  ;;  %v7169_v51 = vpack.c.bf16 %v763_v37, %v760_v28  ;;  %v880_v57 = vsub.f32 %v7746_v34, %v879_v45  ;;  %v7821_v28 = vand.u32 4294901760, %v1455_v27  ;;  %v723_v36 = vld [vmem:[%s9140_s29 + $0x18] sm:$0xff] }
  0xad   : > { %v7758_v46 = vpack.c.bf16 %v757_v41, %v754_v31  ;;  %v871_v47 = vsub.f32 %v733_v38, %v757_v41  ;;  %v866_v50 = vsub.f32 %v864_v35, %v865_v40  ;;  %v722_v31 = vld [vmem:[%s9140_s29 + $0x10] sm:$0xff] }
  0xae   : > { %v886_v48 = vand.u32 4294901760, %v885_v43  ;;  %v881_v7 = vand.u32 4294901760, %v880_v57  ;;  %v7185_v13 = vpack.c.bf16 %v885_v43, %v7746_v34  ;;  %6729 = vmatprep.mubr.f32.mxu1 %v7821_v28  ;;  %v1375_v34 = vsel %vm740_vm0, %v721_v29, 0 }
  0xaf   : > { %v872_v52 = vand.u32 4294901760, %v871_v47  ;;  %7166 = vmatprep.subr.bf16.mxu0 %v7758_v46  ;;  %v867_v59 = vand.u32 4294901760, %v866_v50  ;;  %v7181_v12 = vpack.c.bf16 %v871_v47, %v864_v35  ;;  %v1378_v35 = vsel %vm740_vm0, %v722_v31, 0 }
  0xb0   : > { %7168 = vmatpush3.bf16.msra.mxu0 %v7758_v46  ;;  %v887_v54 = vsub.f32 %v885_v43, %v886_v48  ;;  %v7201_v19 = vpack.c.bf16 %v886_v48, %v879_v45  ;;  %v7835_v37 = vand.u32 4294901760, %v1375_v34  ;;  %v7837_v38 = vand.u32 4294901760, %v1378_v35 }
  0xb1   : > { %v873_v56 = vsub.f32 %v871_v47, %v872_v52  ;;  %7170 = vmatprep.subr.bf16.mxu0 %v7169_v51  ;;  %v7197_v17 = vpack.c.bf16 %v872_v52, %v865_v40  ;;  %v1381_v40 = vsel %vm740_vm0, %v723_v36, 0 }
  0xb2   : > { %v888_v61 = vand.u32 4294901760, %v887_v54  ;;  %v7841_v41 = vsub.f32 %v1375_v34, %v7835_v37  ;;  %v7843_v45 = vand.u32 4294901760, %v1381_v40  ;;  %v7846_v48 = vsub.f32 %v1378_v35, %v7837_v38 }
  0xb3   : > { %v874_v60 = vand.u32 4294901760, %v873_v56 }
  0xb4   : > { %7172 = vmatpush3.bf16.msra.mxu0 %v7169_v51  ;;  %v7177_v10 = vpack.c.bf16 %v888_v61, %v881_v7  ;;  %v7852_v55 = vsub.f32 %v1381_v40, %v7843_v45 }
  0xb5   : > { %v7173_v3 = vpack.c.bf16 %v874_v60, %v867_v59  ;;  %v7855_v60 = vand.u32 4294901760, %v7846_v48 }
  0xb7   : > { %6646 = vmatmul.mubr.f32.vlgmr.msra.gmra.mrb[0].mxu0 %v7770_v58  ;;  %7174 = vmatprep.subr.bf16.mxu0 %v7173_v3 }
  0xb8   : > { %7176 = vmatpush3.bf16.msra.mxu0 %v7173_v3  ;;  %6648 = vmatprep.mubr.f32.mxu0 %v7774_v63 }
  0xb9   : > { %7178 = vmatprep.subr.bf16.mxu0 %v7177_v10 }
  0xbb   : > { %6649 = vmatmul.mubr.f32.gmra.mrb[2].mxu0 %v7777_v11 }
  0xbc   : > { %7180 = vmatpush3.bf16.msra.mxu0 %v7177_v10  ;;  %6659 = vmatprep.mubr.f32.mxu0 %v7709_v14 }
  0xbd   : > { %7182 = vmatprep.subr.bf16.mxu0 %v7181_v12 }
  0xbf   : > { %6660 = vmatmul.mubr.f32.vlgmr.msra.gmra.mrb[0].mxu0 %v7733_v24 }
  0xc0   : > { %7184 = vmatpush3.bf16.msra.mxu0 %v7181_v12  ;;  %6662 = vmatprep.mubr.f32.mxu0 %v7735_v25 }
  0xc1   : > { %7186 = vmatprep.subr.bf16.mxu0 %v7185_v13 }
  0xc3   : > { %6663 = vmatmul.mubr.f32.gmra.mrb[2].mxu0 %v7741_v32 }
  0xc4   : > { %7188 = vmatpush3.bf16.msra.mxu0 %v7185_v13  ;;  %6673 = vmatprep.mubr.f32.mxu0 %v7712_v15 }
  0xc5   : > { %7190 = vmatprep.subr.bf16.mxu0 %v7758_v46 }
  0xc7   : > { %6674 = vmatmul.mubr.f32.vlgmr.msra.gmra.mrb[0].mxu0 %v7739_v30 }
  0xc8   : > { %7192 = vmatpush3.bf16.msra.mxu0 %v7758_v46  ;;  %6676 = vmatprep.mubr.f32.mxu0 %v7744_v33 }
  0xc9   : > { %7194 = vmatprep.subr.bf16.mxu0 %v7169_v51 }
  0xcb   : > { %6677 = vmatmul.mubr.f32.gmra.mrb[2].mxu0 %v7752_v42 }
  0xcc   : > { %7196 = vmatpush3.bf16.msra.mxu0 %v7169_v51  ;;  %6687 = vmatprep.mubr.f32.mxu0 %v7715_v16 }
  0xcd   : > { %7198 = vmatprep.subr.bf16.mxu0 %v7197_v17 }
  0xcf   : > { %6688 = vmatmul.mubr.f32.vlgmr.msra.gmra.mrb[0].mxu0 %v7749_v39 }
  0xd0   : > { %7200 = vmatpush3.bf16.msra.mxu0 %v7197_v17  ;;  %6690 = vmatprep.mubr.f32.mxu0 %v7755_v44 }
  0xd1   : > { %7202 = vmatprep.subr.bf16.mxu0 %v7201_v19 }
  0xd3   : > { %6691 = vmatmul.mubr.f32.gmra.mrb[2].mxu0 %v7764_v53 }
  0xd4   : > { %7204 = vmatpush3.bf16.msra.mxu0 %v7201_v19  ;;  %6701 = vmatprep.mubr.f32.mxu0 %v7709_v14  ;;  %v7863_v19 = vand.u32 4294901760, %v7852_v55 }
  0xd5   : > { %7206 = vmatprep.subr.bf16.mxu0 %v7758_v46 }
  0xd7   : > { %6702 = vmatmul.mubr.f32.vlgmr.msra.gmra.mrb[0].mxu0 %v7733_v24 }
  0xd8   : > { %7208 = vmatpush3.bf16.msra.mxu0 %v7758_v46  ;;  %6704 = vmatprep.mubr.f32.mxu0 %v7735_v25 }
  0xd9   : > { %7210 = vmatprep.subr.bf16.mxu0 %v7169_v51 }
  0xdb   : > { %6705 = vmatmul.mubr.f32.gmra.mrb[2].mxu0 %v7741_v32 }
  0xdc   : > { %7212 = vmatpush3.bf16.msra.mxu0 %v7169_v51  ;;  %6715 = vmatprep.mubr.f32.mxu0 %v7709_v14  ;;  %v7849_v51 = vand.u32 4294901760, %v7841_v41 }
  0xde   : > { %v1465_v12 = vsub.f32 %v7841_v41, %v7849_v51 }
  0xdf   : > { %6716 = vmatmul.mubr.f32.vlgmr.msra.gmra.mrb[0].mxu0 %v7733_v24 }
  0xe0   : > { %6718 = vmatprep.mubr.f32.mxu0 %v7735_v25  ;;  %v7868_v40 = vand.u32 4294901760, %v1465_v12 }
  0xe3   : > { %6719 = vmatmul.mubr.f32.gmra.mrb[2].mxu0 %v7741_v32 }
  0xe4   : > { %6813 = vmatprep.mubr.f32.mxu0 %v7719_v18  ;;  %v7552_v18 = vmov 0  }
  0xe5   : > { %7447 = vset.pattern.permute.xlu1 %v7552_v18  ;;  %7446 = vset.pattern.permute.xlu0 %v7552_v18  ;;  %v1475_v18 = vsub.f32 %v7846_v48, %v7855_v60 }
 0x1b2   : > { %v6717_v43 = vpop.f32.mrb[0].mxu0 }
 0x1b3   : > { %v1368_v46 = vmul.f32 0.00390625, %v6717_v43  ;;  %v1345_v47 = vpop.f32.mrb[1].mxu0 }
 0x1b4   : > { %v1367_v49 = vmul.f32 0.00390625, %v1345_v47 }
 0x1b5   : > { %v1387_v50 = vand.u32 4294901760, %v1368_v46 }
 0x1b6   : > { %v1384_v52 = vand.u32 4294901760, %v1367_v49  ;;  %v6720_v54 = vpop.f32.mrb[2].mxu0 }
 0x1b7   : > { %v1501_v56 = vsub.f32 %v1368_v46, %v1387_v50  ;;  %v1370_v57 = vmul.f32 0.00390625, %v6720_v54  ;;  %v1357_v59 = vpop.f32.mrb[3].mxu0 }
 0x1b8   : > { %v7857_v61 = vpack.c.bf16 %v1387_v50, %v1384_v52  ;;  %v1494_v62 = vsub.f32 %v1367_v49, %v1384_v52  ;;  %v1369_v3 = vmul.f32 0.00390625, %v1357_v59  ;;  %v1485_v49 = vsub.f32 %v7852_v55, %v7863_v19 }
 0x1b9   : > { %v1502_v7 = vand.u32 4294901760, %v1501_v56  ;;  %v1393_v10 = vand.u32 4294901760, %v1370_v57  ;;  %v7872_v52 = vand.u32 4294901760, %v1475_v18 }
 0x1ba   : > { %v1495_v13 = vand.u32 4294901760, %v1494_v62  ;;  %v1390_v17 = vand.u32 4294901760, %v1369_v3  ;;  %7214 = vmatprep.subr.bf16.mxu1 %v7857_v61  ;;  %v7229_v20 = vpack.c.bf16 %v1501_v56, %v1494_v62 }
 0x1bb   : > { %v1515_v21 = vsub.f32 %v1370_v57, %v1393_v10  ;;  %7216 = vmatpush3.bf16.msra.mxu1 %v7857_v61  ;;  %v1503_v27 = vsub.f32 %v1501_v56, %v1502_v7 }
 0x1bc   : > { %v7217_v29 = vpack.c.bf16 %v1393_v10, %v1390_v17  ;;  %v1508_v31 = vsub.f32 %v1369_v3, %v1390_v17  ;;  %v1496_v34 = vsub.f32 %v1494_v62, %v1495_v13  ;;  %v7245_v35 = vpack.c.bf16 %v1502_v7, %v1495_v13 }
 0x1bd   : > { %v1516_v36 = vand.u32 4294901760, %v1515_v21  ;;  %v1504_v43 = vand.u32 4294901760, %v1503_v27  ;;  %v7875_v3 = vand.u32 4294901760, %v1485_v49 }
 0x1be   : > { %v1509_v46 = vand.u32 4294901760, %v1508_v31  ;;  %7218 = vmatprep.subr.bf16.mxu1 %v7217_v29  ;;  %v1497_v47 = vand.u32 4294901760, %v1496_v34  ;;  %v7233_v50 = vpack.c.bf16 %v1515_v21, %v1508_v31 }
 0x1bf   : > { %7220 = vmatpush3.bf16.msra.mxu1 %v7217_v29  ;;  %v1517_v54 = vsub.f32 %v1515_v21, %v1516_v36 }
 0x1c0   : > { %v7221_v56 = vpack.c.bf16 %v1504_v43, %v1497_v47  ;;  %v1510_v57 = vsub.f32 %v1508_v31, %v1509_v46  ;;  %v7249_v59 = vpack.c.bf16 %v1516_v36, %v1509_v46 }
 0x1c1   : > { %v1518_v62 = vand.u32 4294901760, %v1517_v54 }
 0x1c2   : > { %6730 = vmatmul.mubr.f32.vlgmr.msra.gmra.mrb[0].mxu1 %v7868_v40  ;;  %7222 = vmatprep.subr.bf16.mxu1 %v7221_v56  ;;  %v1511_v7 = vand.u32 4294901760, %v1510_v57 }
 0x1c3   : > { %7224 = vmatpush3.bf16.msra.mxu1 %v7221_v56  ;;  %6732 = vmatprep.mubr.f32.mxu1 %v7872_v52 }
 0x1c4   : > { %v7225_v10 = vpack.c.bf16 %v1518_v62, %v1511_v7 }
 0x1c6   : > { %6733 = vmatmul.mubr.f32.gmra.mrb[2].mxu1 %v7875_v3  ;;  %7226 = vmatprep.subr.bf16.mxu1 %v7225_v10 }
 0x1c7   : > { %7228 = vmatpush3.bf16.msra.mxu1 %v7225_v10  ;;  %6743 = vmatprep.mubr.f32.mxu1 %v7811_v22 }
 0x1c8   : > { %7230 = vmatprep.subr.bf16.mxu1 %v7229_v20 }
 0x1ca   : > { %6744 = vmatmul.mubr.f32.vlgmr.msra.gmra.mrb[0].mxu1 %v7835_v37 }
 0x1cb   : > { %7232 = vmatpush3.bf16.msra.mxu1 %v7229_v20  ;;  %6746 = vmatprep.mubr.f32.mxu1 %v7837_v38 }
 0x1cc   : > { %7234 = vmatprep.subr.bf16.mxu1 %v7233_v50 }
 0x1ce   : > { %6747 = vmatmul.mubr.f32.gmra.mrb[2].mxu1 %v7843_v45 }
 0x1cf   : > { %7236 = vmatpush3.bf16.msra.mxu1 %v7233_v50  ;;  %6757 = vmatprep.mubr.f32.mxu1 %v7814_v23 }
 0x1d0   : > { %7238 = vmatprep.subr.bf16.mxu1 %v7857_v61 }
 0x1d2   : > { %6758 = vmatmul.mubr.f32.vlgmr.msra.gmra.mrb[0].mxu1 %v7841_v41 }
 0x1d3   : > { %7240 = vmatpush3.bf16.msra.mxu1 %v7857_v61  ;;  %6760 = vmatprep.mubr.f32.mxu1 %v7846_v48 }
 0x1d4   : > { %7242 = vmatprep.subr.bf16.mxu1 %v7217_v29 }
 0x1d6   : > { %6761 = vmatmul.mubr.f32.gmra.mrb[2].mxu1 %v7852_v55 }
 0x1d7   : > { %7244 = vmatpush3.bf16.msra.mxu1 %v7217_v29  ;;  %6771 = vmatprep.mubr.f32.mxu1 %v7817_v26 }
 0x1d8   : > { %7246 = vmatprep.subr.bf16.mxu1 %v7245_v35 }
 0x1da   : > { %6772 = vmatmul.mubr.f32.vlgmr.msra.gmra.mrb[0].mxu1 %v7849_v51 }
 0x1db   : > { %7248 = vmatpush3.bf16.msra.mxu1 %v7245_v35  ;;  %6774 = vmatprep.mubr.f32.mxu1 %v7855_v60 }
 0x1dc   : > { %7250 = vmatprep.subr.bf16.mxu1 %v7249_v59 }
 0x1de   : > { %6775 = vmatmul.mubr.f32.gmra.mrb[2].mxu1 %v7863_v19 }
 0x1df   : > { %7252 = vmatpush3.bf16.msra.mxu1 %v7249_v59  ;;  %6785 = vmatprep.mubr.f32.mxu1 %v7811_v22  ;;  %v3322_v59 = vld [vmem:[%s9113_s5 + $0x8] sm:$0xff] }
 0x1e0   : > { %7254 = vmatprep.subr.bf16.mxu1 %v7857_v61 }
 0x1e2   : > { %6786 = vmatmul.mubr.f32.vlgmr.msra.gmra.mrb[0].mxu1 %v7835_v37 }
 0x1e3   : > { %7256 = vmatpush3.bf16.msra.mxu1 %v7857_v61  ;;  %6788 = vmatprep.mubr.f32.mxu1 %v7837_v38 }
 0x1e4   : > { %7258 = vmatprep.subr.bf16.mxu1 %v7217_v29 }
 0x1e6   : > { %6789 = vmatmul.mubr.f32.gmra.mrb[2].mxu1 %v7843_v45 }
 0x1e7   : > { %7260 = vmatpush3.bf16.msra.mxu1 %v7217_v29  ;;  %6799 = vmatprep.mubr.f32.mxu1 %v7811_v22 }
 0x1ea   : > { %6800 = vmatmul.mubr.f32.vlgmr.msra.gmra.mrb[0].mxu1 %v7835_v37 }
 0x1eb   : > { %6802 = vmatprep.mubr.f32.mxu1 %v7837_v38 }
 0x1ee   : > { %6803 = vmatmul.mubr.f32.gmra.mrb[2].mxu1 %v7843_v45 }
 0x1ef   : > { %6897 = vmatprep.mubr.f32.mxu1 %v7821_v28 }
 0x2bd   : > { %v6801_v12 = vpop.f32.mrb[0].mxu1 }
 0x2be   : > { %2004 = vperm.xlu1 %7447, %v6801_v12   ;;  %v1975_v13 = vpop.f32.mrb[1].mxu1 }
 0x2bf   : > { %1999 = vperm.xlu0 %7446, %v1975_v13  }
 0x2c1   : > { %v6804_v61 = vpop.f32.mrb[2].mxu1 }
 0x2c2   : > { %v1987_v17 = vpop.f32.mrb[3].mxu1 }
 0x2c3   : > { %2009 = vperm.xlu1 %7447, %v1987_v17  }
 0x2c7   : > { %2014 = vperm.xlu1 %7447, %v6804_v61  }
 0x33d   : > { %v2005_v20 = vpop.permute.xlu1 %2004 }
 0x33e   : > { %v7905_v21 = vsub.f32 %v7691_v8, %v2005_v20  ;;  %v7908_v27 = vsub.f32 %v7693_v9, %v2005_v20  ;;  %v2000_v18 = vpop.permute.xlu0 %1999 }
 0x33f   : > { %v7911_v29 = vsub.f32 %v7679_v2, %v2000_v18  ;;  %v7914_v28 = vsub.f32 %v7683_v4, %v2000_v18 }
 0x340   : > { %v2027_v31 = vmul.f32 %v7905_v21, %v7905_v21  ;;  %v2028_v34 = vmul.f32 %v7908_v27, %v7908_v27 }
 0x341   : > { %v2025_v8 = vmul.f32 %v7911_v29, %v7911_v29  ;;  %v2026_v9 = vmul.f32 %v7914_v28, %v7914_v28 }
 0x342   : > { %v2010_v35 = vpop.permute.xlu1 %2009  ;;  %v2036_v36 = vadd.f32 %v2028_v34, %v2027_v31 }
 0x343   : > { %v7925_v2 = vsub.f32 %v7675_v0, %v2010_v35  ;;  %v7928_v4 = vsub.f32 %v7677_v1, %v2010_v35  ;;  %v2033_v43 = vadd.f32 %v2026_v9, %v2025_v8 }
 0x344   : > { %2037 = vadd.xlane.f32.xlu0 %v2036_v36 }
 0x345   : > { %2034 = vadd.xlane.f32.xlu1 %v2033_v43  ;;  %v2029_v46 = vmul.f32 %v7925_v2, %v7925_v2  ;;  %v2030_v47 = vmul.f32 %v7928_v4, %v7928_v4 }
 0x346   : > { %v2015_v49 = vpop.permute.xlu1 %2014 }
 0x347   : > { %v7935_v50 = vsub.f32 %v7685_v5, %v2015_v49  ;;  %v7938_v54 = vsub.f32 %v7687_v6, %v2015_v49  ;;  %v2039_v0 = vadd.f32 %v2030_v47, %v2029_v46  ;;  %v3321_v5 = vld [vmem:[%s9113_s5] sm:$0xff] }
 0x349   : > { %2040 = vadd.xlane.f32.xlu1 %v2039_v0  ;;  %v2031_v1 = vmul.f32 %v7935_v50, %v7935_v50  ;;  %v2032_v56 = vmul.f32 %v7938_v54, %v7938_v54 }
 0x34b   : > { %v2042_v57 = vadd.f32 %v2032_v56, %v2031_v1 }
 0x34d   : > { %2043 = vadd.xlane.f32.xlu1 %v2042_v57 }
 0x35a   : > { %3332 = vperm.xlu0 %7446, %v3322_v59  }
 0x35e   : > { %3327 = vperm.xlu1 %7447, %v3321_v5  }
 0x3d1   : > { %v2038_v6 = vpop.xlane.xlu0 %2037 }
 0x3d2   : > { %v2049_v62 = vand.u32 4294901760, %v2038_v6  ;;  %v2035_v7 = vpop.xlane.xlu1 %2034 }
 0x3d3   : > { %v2046_v10 = vand.u32 4294901760, %v2035_v7 }
 0x3d4   : > { %v2163_v12 = vsub.f32 %v2038_v6, %v2049_v62 }
 0x3d5   : > { %v7950_v13 = vpack.c.bf16 %v2049_v62, %v2046_v10  ;;  %v2156_v61 = vsub.f32 %v2035_v7, %v2046_v10 }
 0x3d6   : > { %v2164_v17 = vand.u32 4294901760, %v2163_v12  ;;  %v2041_v20 = vpop.xlane.xlu1 %2040 }
 0x3d7   : > { %v2157_v18 = vand.u32 4294901760, %v2156_v61  ;;  %v2052_v31 = vand.u32 4294901760, %v2041_v20  ;;  %7262 = vmatprep.subr.bf16.mxu0 %v7950_v13  ;;  %v7277_v7 = vpack.c.bf16 %v2163_v12, %v2156_v61 }
 0x3d8   : > { %v2165_v34 = vsub.f32 %v2163_v12, %v2164_v17  ;;  %7264 = vmatpush3.bf16.msra.mxu0 %v7950_v13 }
 0x3d9   : > { %v2158_v8 = vsub.f32 %v2156_v61, %v2157_v18  ;;  %v2170_v9 = vsub.f32 %v2041_v20, %v2052_v31 }
 0x3da   : > { %v2044_v35 = vpop.xlane.xlu1 %2043  ;;  %v2166_v47 = vand.u32 4294901760, %v2165_v34 }
 0x3db   : > { %v2171_v36 = vand.u32 4294901760, %v2170_v9  ;;  %v2055_v43 = vand.u32 4294901760, %v2044_v35  ;;  %v2159_v46 = vand.u32 4294901760, %v2158_v8 }
 0x3dd   : > { %v7265_v49 = vpack.c.bf16 %v2055_v43, %v2052_v31  ;;  %v2177_v0 = vsub.f32 %v2044_v35, %v2055_v43  ;;  %v2172_v1 = vsub.f32 %v2170_v9, %v2171_v36  ;;  %v7269_v57 = vpack.c.bf16 %v2166_v47, %v2159_v46 }
 0x3df   : > { %v2178_v56 = vand.u32 4294901760, %v2177_v0  ;;  %7266 = vmatprep.subr.bf16.mxu0 %v7265_v49  ;;  %v2173_v5 = vand.u32 4294901760, %v2172_v1  ;;  %v7281_v10 = vpack.c.bf16 %v2177_v0, %v2170_v9 }
 0x3e0   : > { %7268 = vmatpush3.bf16.msra.mxu0 %v7265_v49 }
 0x3e1   : > { %v2179_v59 = vsub.f32 %v2177_v0, %v2178_v56  ;;  %7270 = vmatprep.subr.bf16.mxu0 %v7269_v57 }
 0x3e3   : > { %6814 = vmatmul.mubr.f32.vlgmr.msra.gmra.mrb[4].mxu0 %v7770_v58  ;;  %v2180_v6 = vand.u32 4294901760, %v2179_v59  ;;  %v7293_v58 = vpack.c.bf16 %v2164_v17, %v2157_v18 }
 0x3e4   : > { %7272 = vmatpush3.bf16.msra.mxu0 %v7269_v57  ;;  %6816 = vmatprep.mubr.f32.mxu0 %v7774_v63  ;;  %v7297_v63 = vpack.c.bf16 %v2178_v56, %v2171_v36 }
 0x3e5   : > { %v7273_v62 = vpack.c.bf16 %v2180_v6, %v2173_v5 }
 0x3e7   : > { %6817 = vmatmul.mubr.f32.gmra.mrb[6].mxu0 %v7777_v11  ;;  %7274 = vmatprep.subr.bf16.mxu0 %v7273_v62 }
 0x3e8   : > { %7276 = vmatpush3.bf16.msra.mxu0 %v7273_v62  ;;  %6827 = vmatprep.mubr.f32.mxu0 %v7709_v14 }
 0x3e9   : > { %7278 = vmatprep.subr.bf16.mxu0 %v7277_v7 }
 0x3eb   : > { %6828 = vmatmul.mubr.f32.vlgmr.msra.gmra.mrb[4].mxu0 %v7733_v24 }
 0x3ec   : > { %7280 = vmatpush3.bf16.msra.mxu0 %v7277_v7  ;;  %6830 = vmatprep.mubr.f32.mxu0 %v7735_v25 }
 0x3ed   : > { %7282 = vmatprep.subr.bf16.mxu0 %v7281_v10 }
 0x3ef   : > { %6831 = vmatmul.mubr.f32.gmra.mrb[6].mxu0 %v7741_v32 }
 0x3f0   : > { %7284 = vmatpush3.bf16.msra.mxu0 %v7281_v10  ;;  %6841 = vmatprep.mubr.f32.mxu0 %v7712_v15 }
 0x3f1   : > { %7286 = vmatprep.subr.bf16.mxu0 %v7950_v13 }
 0x3f3   : > { %6842 = vmatmul.mubr.f32.vlgmr.msra.gmra.mrb[4].mxu0 %v7739_v30 }
 0x3f4   : > { %7288 = vmatpush3.bf16.msra.mxu0 %v7950_v13  ;;  %6844 = vmatprep.mubr.f32.mxu0 %v7744_v33 }
 0x3f5   : > { %7290 = vmatprep.subr.bf16.mxu0 %v7265_v49 }
 0x3f7   : > { %6845 = vmatmul.mubr.f32.gmra.mrb[6].mxu0 %v7752_v42 }
 0x3f8   : > { %7292 = vmatpush3.bf16.msra.mxu0 %v7265_v49  ;;  %6855 = vmatprep.mubr.f32.mxu0 %v7715_v16 }
 0x3f9   : > { %7294 = vmatprep.subr.bf16.mxu0 %v7293_v58 }
 0x3fb   : > { %6856 = vmatmul.mubr.f32.vlgmr.msra.gmra.mrb[4].mxu0 %v7749_v39 }
 0x3fc   : > { %7296 = vmatpush3.bf16.msra.mxu0 %v7293_v58  ;;  %6858 = vmatprep.mubr.f32.mxu0 %v7755_v44 }
 0x3fd   : > { %7298 = vmatprep.subr.bf16.mxu0 %v7297_v63 }
 0x3ff   : > { %6859 = vmatmul.mubr.f32.gmra.mrb[6].mxu0 %v7764_v53 }
 0x400   : > { %7300 = vmatpush3.bf16.msra.mxu0 %v7297_v63  ;;  %6869 = vmatprep.mubr.f32.mxu0 %v7709_v14 }
 0x401   : > { %7302 = vmatprep.subr.bf16.mxu0 %v7950_v13 }
 0x403   : > { %6870 = vmatmul.mubr.f32.vlgmr.msra.gmra.mrb[4].mxu0 %v7733_v24 }
 0x404   : > { %7304 = vmatpush3.bf16.msra.mxu0 %v7950_v13  ;;  %6872 = vmatprep.mubr.f32.mxu0 %v7735_v25 }
 0x405   : > { %7306 = vmatprep.subr.bf16.mxu0 %v7265_v49 }
 0x407   : > { %6873 = vmatmul.mubr.f32.gmra.mrb[6].mxu0 %v7741_v32 }
 0x408   : > { %7308 = vmatpush3.bf16.msra.mxu0 %v7265_v49  ;;  %6883 = vmatprep.mubr.f32.mxu0 %v7709_v14 }
 0x40b   : > { %6884 = vmatmul.mubr.f32.vlgmr.msra.gmra.mrb[4].mxu0 %v7733_v24 }
 0x40c   : > { %6886 = vmatprep.mubr.f32.mxu0 %v7735_v25 }
 0x40f   : > { %6887 = vmatmul.mubr.f32.gmra.mrb[6].mxu0 %v7741_v32 }
 0x4de   : > { %v6885_v15 = vpop.f32.mrb[4].mxu0 }
 0x4df   : > { %v2660_v16 = vmul.f32 0.00390625, %v6885_v15  ;;  %v2637_v30 = vpop.f32.mrb[5].mxu0 }
 0x4e0   : > { %v2659_v33 = vmul.f32 0.00390625, %v2637_v30 }
 0x4e1   : > { %v2664_v39 = vadd.f32 1e-06, %v2660_v16 }
 0x4e2   : > { %v2663_v42 = vadd.f32 1e-06, %v2659_v33  ;;  %v6888_v44 = vpop.f32.mrb[6].mxu0  ;;  %v7449_v33 = vld [vmem:[%s9114_s6 + $0x8] sm:$0xff]  }
 0x4e3   : > { %7472 = vrsqrt.f32 %v2664_v39  ;;  %v2662_v53 = vmul.f32 0.00390625, %v6888_v44  ;;  %v2649_v11 = vpop.f32.mrb[7].mxu0  ;;  %v3333_v39 = vpop.permute.xlu0 %3332 }
 0x4e4   : > { %7474 = vrsqrt.f32 %v2663_v42  ;;  %v2661_v12 = vmul.f32 0.00390625, %v2649_v11  ;;  %v3328_v42 = vpop.permute.xlu1 %3327 }
 0x4e5   : > { %v2666_v13 = vadd.f32 1e-06, %v2662_v53 }
 0x4e6   : > { %v2665_v14 = vadd.f32 1e-06, %v2661_v12 }
 0x4e7   : > { %7476 = vrsqrt.f32 %v2666_v13 }
 0x4e8   : > { %7478 = vrsqrt.f32 %v2665_v14 }
 0x4ed   : > { %v7473_v24 = vpop.eup %7472 }
 0x4ee   : > { %v7475_v25 = vpop.eup %7474  ;;  %v2675_v61 = vand.u32 4294901760, %v7473_v24 }
 0x4ef   : > { %v2672_v32 = vand.u32 4294901760, %v7475_v25 }
 0x4f0   : > { %v2789_v17 = vsub.f32 %v7473_v24, %v2675_v61 }
 0x4f1   : > { %v7477_v20 = vpop.eup %7476  ;;  %v7981_v18 = vpack.c.bf16 %v2675_v61, %v2672_v32  ;;  %v2782_v31 = vsub.f32 %v7475_v25, %v2672_v32 }
 0x4f2   : > { %v7479_v34 = vpop.eup %7478  ;;  %v2681_v8 = vand.u32 4294901760, %v7477_v20  ;;  %v2790_v9 = vand.u32 4294901760, %v2789_v17 }
 0x4f3   : > { %v2678_v35 = vand.u32 4294901760, %v7479_v34  ;;  %7310 = vmatprep.subr.bf16.mxu1 %v7981_v18  ;;  %v2783_v36 = vand.u32 4294901760, %v2782_v31  ;;  %v7325_v43 = vpack.c.bf16 %v2789_v17, %v2782_v31 }
 0x4f4   : > { %7312 = vmatpush3.bf16.msra.mxu1 %v7981_v18  ;;  %v2791_v46 = vsub.f32 %v2789_v17, %v2790_v9  ;;  %v2803_v47 = vsub.f32 %v7477_v20, %v2681_v8 }
 0x4f5   : > { %v7313_v49 = vpack.c.bf16 %v2681_v8, %v2678_v35  ;;  %v2784_v0 = vsub.f32 %v2782_v31, %v2783_v36  ;;  %v2796_v1 = vsub.f32 %v7479_v34, %v2678_v35  ;;  %v7341_v56 = vpack.c.bf16 %v2790_v9, %v2783_v36 }
 0x4f6   : > { %v2792_v57 = vand.u32 4294901760, %v2791_v46  ;;  %v2804_v59 = vand.u32 4294901760, %v2803_v47 }
 0x4f7   : > { %7314 = vmatprep.subr.bf16.mxu1 %v7313_v49  ;;  %v2785_v5 = vand.u32 4294901760, %v2784_v0  ;;  %v2797_v6 = vand.u32 4294901760, %v2796_v1  ;;  %v7329_v62 = vpack.c.bf16 %v2803_v47, %v2796_v1 }
 0x4f8   : > { %7316 = vmatpush3.bf16.msra.mxu1 %v7313_v49  ;;  %v2805_v7 = vsub.f32 %v2803_v47, %v2804_v59 }
 0x4f9   : > { %v7317_v10 = vpack.c.bf16 %v2792_v57, %v2785_v5  ;;  %v2798_v58 = vsub.f32 %v2796_v1, %v2797_v6  ;;  %v7345_v63 = vpack.c.bf16 %v2804_v59, %v2797_v6 }
 0x4fa   : > { %v2806_v15 = vand.u32 4294901760, %v2805_v7 }
 0x4fb   : > { %6898 = vmatmul.mubr.f32.vlgmr.msra.gmra.mrb[4].mxu1 %v7868_v40  ;;  %7318 = vmatprep.subr.bf16.mxu1 %v7317_v10  ;;  %v2799_v16 = vand.u32 4294901760, %v2798_v58 }
 0x4fc   : > { %7320 = vmatpush3.bf16.msra.mxu1 %v7317_v10  ;;  %6900 = vmatprep.mubr.f32.mxu1 %v7872_v52  ;;  %v3323_v52 = vld [vmem:[%s9113_s5 + $0x10] sm:$0xff] }
 0x4fd   : > { %v7321_v30 = vpack.c.bf16 %v2806_v15, %v2799_v16 }
 0x4ff   : > { %6901 = vmatmul.mubr.f32.gmra.mrb[6].mxu1 %v7875_v3  ;;  %7322 = vmatprep.subr.bf16.mxu1 %v7321_v30  ;;  %v7448_v3 = vld [vmem:[%s9114_s6] sm:$0xff]  }
 0x500   : > { %7324 = vmatpush3.bf16.msra.mxu1 %v7321_v30  ;;  %6911 = vmatprep.mubr.f32.mxu1 %v7811_v22 }
 0x501   : > { %7326 = vmatprep.subr.bf16.mxu1 %v7325_v43  ;;  %6973 = vmatprep.subr.bf16.mxu0 %v7448_v3 }
 0x502   : > { %6974 = vmatpush3.bf16.msra.mxu0 %v7448_v3 }
 0x503   : > { %6912 = vmatmul.mubr.f32.vlgmr.msra.gmra.mrb[4].mxu1 %v7835_v37  ;;  %6975 = vmatprep.subr.bf16.mxu0 %v7449_v33 }
 0x504   : > { %7328 = vmatpush3.bf16.msra.mxu1 %v7325_v43  ;;  %6914 = vmatprep.mubr.f32.mxu1 %v7837_v38 }
 0x505   : > { %7330 = vmatprep.subr.bf16.mxu1 %v7329_v62 }
 0x506   : > { %6976 = vmatpush3.bf16.msra.mxu0 %v7449_v33 }
 0x507   : > { %6915 = vmatmul.mubr.f32.gmra.mrb[6].mxu1 %v7843_v45 }
 0x508   : > { %7332 = vmatpush3.bf16.msra.mxu1 %v7329_v62  ;;  %6925 = vmatprep.mubr.f32.mxu1 %v7814_v23  ;;  %v3286_v23 = vld [vmem:[%s9141_s2 + $0x8] sm:$0xff] }
 0x509   : > { %7334 = vmatprep.subr.bf16.mxu1 %v7981_v18 }
 0x50b   : > { %6926 = vmatmul.mubr.f32.vlgmr.msra.gmra.mrb[4].mxu1 %v7841_v41 }
 0x50c   : > { %7336 = vmatpush3.bf16.msra.mxu1 %v7981_v18  ;;  %6928 = vmatprep.mubr.f32.mxu1 %v7846_v48 }
 0x50d   : > { %7338 = vmatprep.subr.bf16.mxu1 %v7313_v49 }
 0x50f   : > { %6929 = vmatmul.mubr.f32.gmra.mrb[6].mxu1 %v7852_v55 }
 0x510   : > { %7340 = vmatpush3.bf16.msra.mxu1 %v7313_v49  ;;  %6939 = vmatprep.mubr.f32.mxu1 %v7817_v26  ;;  %v3285_v26 = vld [vmem:[%s9141_s2] sm:$0xff] }
 0x511   : > { %7342 = vmatprep.subr.bf16.mxu1 %v7341_v56 }
 0x513   : > { %6940 = vmatmul.mubr.f32.vlgmr.msra.gmra.mrb[4].mxu1 %v7849_v51 }
 0x514   : > { %7344 = vmatpush3.bf16.msra.mxu1 %v7341_v56  ;;  %6942 = vmatprep.mubr.f32.mxu1 %v7855_v60 }
 0x515   : > { %7346 = vmatprep.subr.bf16.mxu1 %v7345_v63 }
 0x517   : > { %6943 = vmatmul.mubr.f32.gmra.mrb[6].mxu1 %v7863_v19  ;;  %v3287_v19 = vld [vmem:[%s9141_s2 + $0x10] sm:$0xff] }
 0x518   : > { %7348 = vmatpush3.bf16.msra.mxu1 %v7345_v63  ;;  %6953 = vmatprep.mubr.f32.mxu1 %v7811_v22  ;;  %v8064_v63 = vld [vmem:[%s9115_s7] ss:$0 sm:$0xff] }
 0x519   : > { %7350 = vmatprep.subr.bf16.mxu1 %v7981_v18 }
 0x51b   : > { %6954 = vmatmul.mubr.f32.vlgmr.msra.gmra.mrb[4].mxu1 %v7835_v37 }
 0x51c   : > { %7352 = vmatpush3.bf16.msra.mxu1 %v7981_v18  ;;  %6956 = vmatprep.mubr.f32.mxu1 %v7837_v38 }
 0x51d   : > { %7354 = vmatprep.subr.bf16.mxu1 %v7313_v49 }
 0x51f   : > { %6957 = vmatmul.mubr.f32.gmra.mrb[6].mxu1 %v7843_v45 }
 0x520   : > { %7356 = vmatpush3.bf16.msra.mxu1 %v7313_v49  ;;  %6967 = vmatprep.mubr.f32.mxu1 %v7811_v22  ;;  %v3288_v22 = vld [vmem:[%s9141_s2 + $0x18] sm:$0xff] }
 0x523   : > { %6968 = vmatmul.mubr.f32.vlgmr.msra.gmra.mrb[4].mxu1 %v7835_v37 }
 0x524   : > { %6970 = vmatprep.mubr.f32.mxu1 %v7837_v38  ;;  %v3324_v38 = vld [vmem:[%s9113_s5 + $0x18] sm:$0xff] }
 0x527   : > { %6971 = vmatmul.mubr.f32.gmra.mrb[6].mxu1 %v7843_v45 }
 0x5f6   : > { %v6969_v41 = vpop.f32.mrb[4].mxu1 }
 0x5f7   : > { %v3290_v48 = vmul.f32 %v6969_v41, %v3286_v23  ;;  %v3263_v51 = vpop.f32.mrb[5].mxu1 }
 0x5f8   : > { %v3289_v55 = vmul.f32 %v3285_v26, %v3263_v51 }
 0x5f9   : > { %3300 = vperm.xlu0 %7446, %v3290_v48  }
 0x5fa   : > { %3295 = vperm.xlu1 %7447, %v3289_v55   ;;  %v6972_v37 = vpop.f32.mrb[6].mxu1 }
 0x5fb   : > { %v3292_v45 = vmul.f32 %v6972_v37, %v3288_v22  ;;  %v3275_v60 = vpop.f32.mrb[7].mxu1 }
 0x5fc   : > { %v3291_v40 = vmul.f32 %v3287_v19, %v3275_v60 }
 0x5fd   : > { %3342 = vperm.xlu0 %7446, %v3324_v38  }
 0x5fe   : > { %3310 = vperm.xlu1 %7447, %v3292_v45  }
 0x602   : > { %3305 = vperm.xlu1 %7447, %v3291_v40  }
 0x606   : > { %3337 = vperm.xlu1 %7447, %v3323_v52  }
 0x678   : > { %v3301_v44 = vpop.permute.xlu0 %3300 }
 0x679   : > { %v3315_v53 = vmul.f32 %v3301_v44, %v7905_v21  ;;  %v3316_v11 = vmul.f32 %v3301_v44, %v7908_v27  ;;  %v3296_v12 = vpop.permute.xlu1 %3295 }
 0x67a   : > { %v3313_v13 = vmul.f32 %v3296_v12, %v7911_v29  ;;  %v3314_v14 = vmul.f32 %v3296_v12, %v7914_v28 }
 0x67b   : > { %v3347_v24 = vadd.f32 %v3333_v39, %v3315_v53  ;;  %v3348_v25 = vadd.f32 %v3333_v39, %v3316_v11 }
 0x67c   : > { %v3345_v61 = vadd.f32 %v3328_v42, %v3313_v13  ;;  %v3346_v32 = vadd.f32 %v3328_v42, %v3314_v14  ;;  %v3343_v8 = vpop.permute.xlu0 %3342 }
 0x67d   : > { %v3311_v17 = vpop.permute.xlu1 %3310 }
 0x67e   : > { %v3354_v20 = vpack.c.bf16 %v3348_v25, %v3346_v32  ;;  %v3353_v18 = vpack.c.bf16 %v3347_v24, %v3345_v61  ;;  %v3319_v34 = vmul.f32 %v3311_v17, %v7935_v50  ;;  %v3320_v21 = vmul.f32 %v3311_v17, %v7938_v54 }
 0x680   : > { %3384 = vxpose.xlu0.c.b16.start [1/2] (short) %v3354_v20, 128  ;;  %3368 = vxpose.xlu1.c.b16.start [1/2] (short) %v3353_v18, 128  ;;  %v3351_v9 = vadd.f32 %v3343_v8, %v3319_v34  ;;  %v3352_v35 = vadd.f32 %v3343_v8, %v3320_v21 }
 0x681   : > { %v3306_v31 = vpop.permute.xlu1 %3305 }
 0x682   : > { %v3317_v27 = vmul.f32 %v3306_v31, %v7925_v2  ;;  %v3318_v29 = vmul.f32 %v3306_v31, %v7928_v4 }
 0x685   : > { %v3338_v28 = vpop.permute.xlu1 %3337 }
 0x686   : > { %v3349_v36 = vadd.f32 %v3338_v28, %v3317_v27  ;;  %v3350_v43 = vadd.f32 %v3338_v28, %v3318_v29 }
 0x688   : > { %v3355_v46 = vpack.c.bf16 %v3351_v9, %v3349_v36  ;;  %v3356_v47 = vpack.c.bf16 %v3352_v35, %v3350_v43 }
 0x68a   : > { %3385 = vxpose.xlu0.c.b16.end [2/2] (short) %v3356_v47, 128  ;;  %3369 = vxpose.xlu1.c.b16.end [2/2] (short) %v3355_v46, 128 }
 0x6ec   : > { %v3376_v49 = vpop.trf.xlu1  ;;  %v3392_v4 = vpop.trf.xlu0 }
 0x6ed   : > { %6977 = vmatprep.mubr.msk.bf16.mxu0 %vm740_vm0, %v3376_v49 }
 0x6f0   : > { %v3377_v50 = vpop.trf.xlu1  ;;  %v3393_v56 = vpop.trf.xlu0 }
 0x6f1   : > { %6978 = vmatmul.mubr.msk.bf16.vlgmr.msra.gmra.mrb[8].mxu0 %vm740_vm0, %v3377_v50 }
 0x6f4   : > { %v3378_v54 = vpop.trf.xlu1  ;;  %v3394_v59 = vpop.trf.xlu0 }
 0x6f5   : > { %6981 = vmatprep.mubr.msk.bf16.mxu0 %vm740_vm0, %v3378_v54 }
 0x6f8   : > { %v3379_v2 = vpop.trf.xlu1  ;;  %v3395_v6 = vpop.trf.xlu0 }
 0x6f9   : > { %6982 = vmatmul.mubr.msk.bf16.gmra.mrb[12].mxu0 %vm740_vm0, %v3379_v2 }
 0x6fc   : > { %v3380_v0 = vpop.trf.xlu1  ;;  %v3396_v62 = vpop.trf.xlu0 }
 0x6fd   : > { %6985 = vmatprep.mubr.msk.bf16.mxu0 %vm740_vm0, %v3380_v0 }
 0x700   : > { %v3381_v1 = vpop.trf.xlu1  ;;  %v3397_v7 = vpop.trf.xlu0 }
 0x701   : > { %6986 = vmatmul.mubr.msk.bf16.gmra.mrb[16].mxu0 %vm740_vm0, %v3381_v1 }
 0x704   : > { %v3382_v57 = vpop.trf.xlu1  ;;  %v3398_v10 = vpop.trf.xlu0 }
 0x705   : > { %6989 = vmatprep.mubr.msk.bf16.mxu0 %vm740_vm0, %v3382_v57 }
 0x708   : > { %v3383_v5 = vpop.trf.xlu1  ;;  %v3399_v58 = vpop.trf.xlu0 }
 0x709   : > { %6990 = vmatmul.mubr.msk.bf16.gmra.mrb[20].mxu0 %vm740_vm0, %v3383_v5 }
 0x70a   : > { %6993 = vmatprep.mubr.msk.bf16.mxu0 %vm740_vm0, %v3392_v4 }
 0x711   : > { %6994 = vmatmul.mubr.msk.bf16.gmra.mrb[24].mxu0 %vm740_vm0, %v3393_v56 }
 0x712   : > { %6997 = vmatprep.mubr.msk.bf16.mxu0 %vm740_vm0, %v3394_v59 }
 0x719   : > { %6998 = vmatmul.mubr.msk.bf16.gmra.mrb[28].mxu0 %vm740_vm0, %v3395_v6 }
 0x71a   : > { %7001 = vmatprep.mubr.msk.bf16.mxu0 %vm740_vm0, %v3396_v62 }
 0x721   : > { %7002 = vmatmul.mubr.msk.bf16.gmra.mrb[32].mxu0 %vm740_vm0, %v3397_v7 }
 0x722   : > { %7005 = vmatprep.mubr.msk.bf16.mxu0 %vm740_vm0, %v3398_v10 }
 0x729   : > { %7006 = vmatmul.mubr.msk.bf16.gmra.mrb[36].mxu0 %vm740_vm0, %v3399_v58 }
 0x7c4   : > { %v6979_v15 = vpop.f32.mrb[8].mxu0 }
 0x7c5   : > { %v8072_v16 = vadd.f32 %v6979_v15, %v8064_v63  ;;  %v3494_v30 = vpop.f32.mrb[9].mxu0 }
 0x7c6   : > { %v8075_v23 = vadd.f32 %v8064_v63, %v3494_v30  ;;  %v6980_v26 = vpop.f32.mrb[10].mxu0 }
 0x7c7   : > { %3623 = vst.msk [vmem:[%s8069_s27 + $0x10] sm:$0xff] %vm740_vm0, %v8072_v16  ;;  %v8081_v41 = vadd.f32 %v6980_v26, %v8064_v63  ;;  %v3497_v48 = vpop.f32.mrb[11].mxu0  ;;  %v3659_v38 = vsel %vm740_vm0, %v8072_v16, 0.0 }
 0x7c8   : > { %3621 = vst.msk [vmem:[%s8069_s27] sm:$0xff] %vm740_vm0, %v8075_v23  ;;  %v8087_v51 = vadd.f32 %v8064_v63, %v3497_v48  ;;  %v3653_v55 = vsel %vm740_vm0, %v8075_v23, 0.0 }
 0x7c9   : > { %3624 = vst.msk [vmem:[%s8069_s27 + $0x18] sm:$0xff] %vm740_vm0, %v8081_v41  ;;  %3654 = vadd.xlane.f32.xlu0 %v3653_v55  ;;  %v3662_v52 = vsel %vm740_vm0, %v8081_v41, 0.0 }
 0x7ca   : > { %3622 = vst.msk [vmem:[%s8069_s27 + $0x8] sm:$0xff] %vm740_vm0, %v8087_v51  ;;  %v3656_v22 = vsel %vm740_vm0, %v8087_v51, 0.0 }
 0x7cb   : > { %3657 = vadd.xlane.f32.xlu1 %v3656_v22 }
 0x7cc   : > { %v6983_v37 = vpop.f32.mrb[12].mxu0 }
 0x7cd   : > { %v8102_v45 = vadd.f32 %v6983_v37, %v8064_v63  ;;  %3660 = vadd.xlane.f32.xlu0 %v3659_v38  ;;  %v3510_v60 = vpop.f32.mrb[13].mxu0 }
 0x7ce   : > { %v8105_v19 = vadd.f32 %v8064_v63, %v3510_v60  ;;  %v6984_v40 = vpop.f32.mrb[14].mxu0 }
 0x7cf   : > { %3627 = vst.msk [vmem:[%s8069_s27 + $0x30] sm:$0xff] %vm740_vm0, %v8102_v45  ;;  %v8113_v3 = vadd.f32 %v6984_v40, %v8064_v63  ;;  %3663 = vadd.xlane.f32.xlu1 %v3662_v52  ;;  %v3513_v33 = vpop.f32.mrb[15].mxu0  ;;  %v3671_v11 = vsel %vm740_vm0, %v8102_v45, 0.0 }
 0x7d0   : > { %3625 = vst.msk [vmem:[%s8069_s27 + $0x20] sm:$0xff] %vm740_vm0, %v8105_v19  ;;  %v8119_v39 = vadd.f32 %v8064_v63, %v3513_v33  ;;  %v3665_v42 = vsel %vm740_vm0, %v8105_v19, 0.0 }
 0x7d1   : > { %3628 = vst.msk [vmem:[%s8069_s27 + $0x38] sm:$0xff] %vm740_vm0, %v8113_v3  ;;  %3666 = vadd.xlane.f32.xlu0 %v3665_v42  ;;  %v3674_v25 = vsel %vm740_vm0, %v8113_v3, 0.0 }
 0x7d2   : > { %3626 = vst.msk [vmem:[%s8069_s27 + $0x28] sm:$0xff] %vm740_vm0, %v8119_v39  ;;  %v3668_v44 = vsel %vm740_vm0, %v8119_v39, 0.0 }
 0x7d3   : > { %3669 = vadd.xlane.f32.xlu1 %v3668_v44 }
 0x7d4   : > { %v6987_v53 = vpop.f32.mrb[16].mxu0 }
 0x7d5   : > { %v8134_v12 = vadd.f32 %v6987_v53, %v8064_v63  ;;  %3672 = vadd.xlane.f32.xlu0 %v3671_v11  ;;  %v3526_v13 = vpop.f32.mrb[17].mxu0 }
 0x7d6   : > { %v8137_v14 = vadd.f32 %v8064_v63, %v3526_v13  ;;  %v6988_v24 = vpop.f32.mrb[18].mxu0 }
 0x7d7   : > { %3631 = vst.msk [vmem:[%s8069_s27 + $0x50] sm:$0xff] %vm740_vm0, %v8134_v12  ;;  %v8145_v61 = vadd.f32 %v6988_v24, %v8064_v63  ;;  %3675 = vadd.xlane.f32.xlu1 %v3674_v25  ;;  %v3529_v32 = vpop.f32.mrb[19].mxu0  ;;  %v3683_v34 = vsel %vm740_vm0, %v8134_v12, 0.0 }
 0x7d8   : > { %3629 = vst.msk [vmem:[%s8069_s27 + $0x40] sm:$0xff] %vm740_vm0, %v8137_v14  ;;  %v8151_v17 = vadd.f32 %v8064_v63, %v3529_v32  ;;  %v3677_v20 = vsel %vm740_vm0, %v8137_v14, 0.0 }
 0x7d9   : > { %3632 = vst.msk [vmem:[%s8069_s27 + $0x58] sm:$0xff] %vm740_vm0, %v8145_v61  ;;  %3678 = vadd.xlane.f32.xlu0 %v3677_v20  ;;  %v3686_v28 = vsel %vm740_vm0, %v8145_v61, 0.0 }
 0x7da   : > { %3630 = vst.msk [vmem:[%s8069_s27 + $0x48] sm:$0xff] %vm740_vm0, %v8151_v17  ;;  %v3680_v18 = vsel %vm740_vm0, %v8151_v17, 0.0 }
 0x7db   : > { %3681 = vadd.xlane.f32.xlu1 %v3680_v18 }
 0x7dc   : > { %v6991_v31 = vpop.f32.mrb[20].mxu0 }
 0x7dd   : > { %v8166_v21 = vadd.f32 %v6991_v31, %v8064_v63  ;;  %3684 = vadd.xlane.f32.xlu0 %v3683_v34  ;;  %v3542_v27 = vpop.f32.mrb[21].mxu0 }
 0x7de   : > { %v8169_v29 = vadd.f32 %v8064_v63, %v3542_v27  ;;  %v6992_v8 = vpop.f32.mrb[22].mxu0 }
 0x7df   : > { %3635 = vst.msk [vmem:[%s8069_s27 + $0x70] sm:$0xff] %vm740_vm0, %v8166_v21  ;;  %v8177_v9 = vadd.f32 %v6992_v8, %v8064_v63  ;;  %3687 = vadd.xlane.f32.xlu1 %v3686_v28  ;;  %v3545_v35 = vpop.f32.mrb[23].mxu0  ;;  %v3695_v49 = vsel %vm740_vm0, %v8166_v21, 0.0 }
 0x7e0   : > { %3633 = vst.msk [vmem:[%s8069_s27 + $0x60] sm:$0xff] %vm740_vm0, %v8169_v29  ;;  %v8183_v36 = vadd.f32 %v8064_v63, %v3545_v35  ;;  %v3689_v43 = vsel %vm740_vm0, %v8169_v29, 0.0 }
 0x7e1   : > { %3636 = vst.msk [vmem:[%s8069_s27 + $0x78] sm:$0xff] %vm740_vm0, %v8177_v9  ;;  %3690 = vadd.xlane.f32.xlu0 %v3689_v43  ;;  %v3698_v0 = vsel %vm740_vm0, %v8177_v9, 0.0 }
 0x7e2   : > { %3634 = vst.msk [vmem:[%s8069_s27 + $0x68] sm:$0xff] %vm740_vm0, %v8183_v36  ;;  %v3692_v46 = vsel %vm740_vm0, %v8183_v36, 0.0 }
 0x7e3   : > { %3693 = vadd.xlane.f32.xlu1 %v3692_v46 }
 0x7e4   : > { %v6995_v47 = vpop.f32.mrb[24].mxu0 }
 0x7e5   : > { %v8198_v50 = vadd.f32 %v6995_v47, %v8064_v63  ;;  %v3558_v54 = vpop.f32.mrb[25].mxu0  ;;  %3696 = vadd.xlane.f32.xlu0 %v3695_v49 }
 0x7e6   : > { %v8201_v2 = vadd.f32 %v8064_v63, %v3558_v54  ;;  %v6996_v4 = vpop.f32.mrb[26].mxu0 }
 0x7e7   : > { %3639 = vst.msk [vmem:[%s8069_s27 + $0x90] sm:$0xff] %vm740_vm0, %v8198_v50  ;;  %v8209_v1 = vadd.f32 %v6996_v4, %v8064_v63  ;;  %v3561_v56 = vpop.f32.mrb[27].mxu0  ;;  %3699 = vadd.xlane.f32.xlu1 %v3698_v0  ;;  %v3707_v62 = vsel %vm740_vm0, %v8198_v50, 0.0 }
 0x7e8   : > { %3637 = vst.msk [vmem:[%s8069_s27 + $0x80] sm:$0xff] %vm740_vm0, %v8201_v2  ;;  %v8215_v57 = vadd.f32 %v8064_v63, %v3561_v56  ;;  %v3701_v59 = vsel %vm740_vm0, %v8201_v2, 0.0 }
 0x7e9   : > { %3640 = vst.msk [vmem:[%s8069_s27 + $0x98] sm:$0xff] %vm740_vm0, %v8209_v1  ;;  %3702 = vadd.xlane.f32.xlu0 %v3701_v59  ;;  %v3710_v30 = vsel %vm740_vm0, %v8209_v1, 0.0 }
 0x7ea   : > { %3638 = vst.msk [vmem:[%s8069_s27 + $0x88] sm:$0xff] %vm740_vm0, %v8215_v57  ;;  %v3704_v5 = vsel %vm740_vm0, %v8215_v57, 0.0 }
 0x7eb   : > { %3705 = vadd.xlane.f32.xlu1 %v3704_v5 }
 0x7ec   : > { %v6999_v6 = vpop.f32.mrb[28].mxu0 }
 0x7ed   : > { %v8230_v7 = vadd.f32 %v6999_v6, %v8064_v63  ;;  %v3574_v10 = vpop.f32.mrb[29].mxu0  ;;  %3708 = vadd.xlane.f32.xlu0 %v3707_v62 }
 0x7ee   : > { %v8233_v58 = vadd.f32 %v8064_v63, %v3574_v10  ;;  %v7000_v15 = vpop.f32.mrb[30].mxu0 }
 0x7ef   : > { %3643 = vst.msk [vmem:[%s8069_s27 + $0xb0] sm:$0xff] %vm740_vm0, %v8230_v7  ;;  %v8241_v26 = vadd.f32 %v7000_v15, %v8064_v63  ;;  %v3577_v48 = vpop.f32.mrb[31].mxu0  ;;  %3711 = vadd.xlane.f32.xlu1 %v3710_v30  ;;  %v3719_v60 = vsel %vm740_vm0, %v8230_v7, 0.0 }
 0x7f0   : > { %3641 = vst.msk [vmem:[%s8069_s27 + $0xa0] sm:$0xff] %vm740_vm0, %v8233_v58  ;;  %v8247_v55 = vadd.f32 %v8064_v63, %v3577_v48  ;;  %v3713_v22 = vsel %vm740_vm0, %v8233_v58, 0.0 }
 0x7f1   : > { %3644 = vst.msk [vmem:[%s8069_s27 + $0xb8] sm:$0xff] %vm740_vm0, %v8241_v26  ;;  %3714 = vadd.xlane.f32.xlu0 %v3713_v22  ;;  %v3722_v44 = vsel %vm740_vm0, %v8241_v26, 0.0 }
 0x7f2   : > { %3642 = vst.msk [vmem:[%s8069_s27 + $0xa8] sm:$0xff] %vm740_vm0, %v8247_v55  ;;  %v3716_v37 = vsel %vm740_vm0, %v8247_v55, 0.0 }
 0x7f3   : > { %3717 = vadd.xlane.f32.xlu1 %v3716_v37 }
 0x7f4   : > { %v7003_v38 = vpop.f32.mrb[32].mxu0 }
 0x7f5   : > { %v8262_v40 = vadd.f32 %v7003_v38, %v8064_v63  ;;  %v3590_v52 = vpop.f32.mrb[33].mxu0  ;;  %3720 = vadd.xlane.f32.xlu0 %v3719_v60 }
 0x7f6   : > { %v8265_v33 = vadd.f32 %v8064_v63, %v3590_v52  ;;  %v7004_v42 = vpop.f32.mrb[34].mxu0 }
 0x7f7   : > { %3647 = vst.msk [vmem:[%s8069_s27 + $0xd0] sm:$0xff] %vm740_vm0, %v8262_v40  ;;  %v8273_v53 = vadd.f32 %v7004_v42, %v8064_v63  ;;  %v3593_v11 = vpop.f32.mrb[35].mxu0  ;;  %3723 = vadd.xlane.f32.xlu1 %v3722_v44  ;;  %v3731_v20 = vsel %vm740_vm0, %v8262_v40, 0.0 }
 0x7f8   : > { %3645 = vst.msk [vmem:[%s8069_s27 + $0xc0] sm:$0xff] %vm740_vm0, %v8265_v33  ;;  %v8279_v13 = vadd.f32 %v8064_v63, %v3593_v11  ;;  %v3725_v24 = vsel %vm740_vm0, %v8265_v33, 0.0 }
 0x7f9   : > { %3648 = vst.msk [vmem:[%s8069_s27 + $0xd8] sm:$0xff] %vm740_vm0, %v8273_v53  ;;  %3726 = vadd.xlane.f32.xlu0 %v3725_v24  ;;  %v3734_v8 = vsel %vm740_vm0, %v8273_v53, 0.0 }
 0x7fa   : > { %3646 = vst.msk [vmem:[%s8069_s27 + $0xc8] sm:$0xff] %vm740_vm0, %v8279_v13  ;;  %v3728_v25 = vsel %vm740_vm0, %v8279_v13, 0.0 }
 0x7fb   : > { %3729 = vadd.xlane.f32.xlu1 %v3728_v25 }
 0x7fc   : > { %v7007_v32 = vpop.f32.mrb[36].mxu0 }
 0x7fd   : > { %v8294_v18 = vadd.f32 %v7007_v32, %v8064_v63  ;;  %v3606_v31 = vpop.f32.mrb[37].mxu0  ;;  %3732 = vadd.xlane.f32.xlu0 %v3731_v20 }
 0x7fe   : > { %v8297_v34 = vadd.f32 %v8064_v63, %v3606_v31  ;;  %v7008_v27 = vpop.f32.mrb[38].mxu0 }
 0x7ff   : > { %3651 = vst.msk [vmem:[%s8069_s27 + $0xf0] sm:$0xff] %vm740_vm0, %v8294_v18  ;;  %v8305_v28 = vadd.f32 %v7008_v27, %v8064_v63  ;;  %v3609_v35 = vpop.f32.mrb[39].mxu0  ;;  %3735 = vadd.xlane.f32.xlu1 %v3734_v8  ;;  %v3743_v49 = vsel %vm740_vm0, %v8294_v18, 0.0 }
 0x800   : > { %3649 = vst.msk [vmem:[%s8069_s27 + $0xe0] sm:$0xff] %vm740_vm0, %v8297_v34  ;;  %v8311_v43 = vadd.f32 %v8064_v63, %v3609_v35  ;;  %v3737_v46 = vsel %vm740_vm0, %v8297_v34, 0.0 }
 0x801   : > { %3652 = vst.msk [vmem:[%s8069_s27 + $0xf8] sm:$0xff] %vm740_vm0, %v8305_v28  ;;  %3738 = vadd.xlane.f32.xlu0 %v3737_v46  ;;  %v3746_v63 = vsel %vm740_vm0, %v8305_v28, 0.0 }
 0x802   : > { %3650 = vst.msk [vmem:[%s8069_s27 + $0xe8] sm:$0xff] %vm740_vm0, %v8311_v43  ;;  %v3740_v47 = vsel %vm740_vm0, %v8311_v43, 0.0  ;;  %s8963_s27 = scalar_lea.vmem %s9127_s19, %s7669_s23 }
 0x803   : > { %3741 = vadd.xlane.f32.xlu1 %v3740_v47 }
 0x805   : > { %3744 = vadd.xlane.f32.xlu0 %v3743_v49 }
 0x807   : > { %3747 = vadd.xlane.f32.xlu1 %v3746_v63 }
 0x856   : > { %v3655_v54 = vpop.xlane.xlu0 %3654 }
 0x857   : > { %v3750_v4 = vmul.f32 0.03125, %v3655_v54 }
 0x858   : > { %v3658_v0 = vpop.xlane.xlu1 %3657 }
 0x859   : > { %v8328_v56 = vsub.f32 %v8075_v23, %v3750_v4  ;;  %v3751_v59 = vmul.f32 0.03125, %v3658_v0 }
 0x85a   : > { %v3661_v5 = vpop.xlane.xlu0 %3660 }
 0x85b   : > { %v8331_v6 = vsub.f32 %v8087_v51, %v3751_v59  ;;  %v3752_v62 = vmul.f32 0.03125, %v3661_v5  ;;  %v3814_v10 = vmul.f32 %v8328_v56, %v8328_v56 }
 0x85c   : > { %v3664_v15 = vpop.xlane.xlu1 %3663 }
 0x85d   : > { %v8336_v30 = vsub.f32 %v8072_v16, %v3752_v62  ;;  %v3753_v48 = vmul.f32 0.03125, %v3664_v15  ;;  %v3846_v22 = vsel %vm740_vm0, %v3814_v10, 0.0  ;;  %v3815_v23 = vmul.f32 %v8331_v6, %v8331_v6 }
 0x85e   : > { %v3667_v37 = vpop.xlane.xlu0 %3666  ;;  %3847 = vadd.xlane.f32.xlu0 %v3846_v22 }
 0x85f   : > { %v8342_v38 = vsub.f32 %v8081_v41, %v3753_v48  ;;  %v3754_v51 = vmul.f32 0.03125, %v3667_v37  ;;  %v3849_v60 = vsel %vm740_vm0, %v3815_v23, 0.0  ;;  %v3816_v52 = vmul.f32 %v8336_v30, %v8336_v30 }
 0x860   : > { %3850 = vadd.xlane.f32.xlu1 %v3849_v60  ;;  %v3670_v16 = vpop.xlane.xlu1 %3669 }
 0x861   : > { %v8348_v42 = vsub.f32 %v8105_v19, %v3754_v51  ;;  %v3755_v44 = vmul.f32 0.03125, %v3670_v16  ;;  %v3852_v11 = vsel %vm740_vm0, %v3816_v52, 0.0  ;;  %v3817_v24 = vmul.f32 %v8342_v38, %v8342_v38 }
 0x862   : > { %v3673_v25 = vpop.xlane.xlu0 %3672  ;;  %3853 = vadd.xlane.f32.xlu0 %v3852_v11 }
 0x863   : > { %v8354_v41 = vsub.f32 %v8119_v39, %v3755_v44  ;;  %v3756_v32 = vmul.f32 0.03125, %v3673_v25  ;;  %v3855_v20 = vsel %vm740_vm0, %v3817_v24, 0.0  ;;  %v3818_v31 = vmul.f32 %v8348_v42, %v8348_v42 }
 0x864   : > { %3856 = vadd.xlane.f32.xlu1 %v3855_v20  ;;  %v3676_v19 = vpop.xlane.xlu1 %3675 }
 0x865   : > { %v8360_v27 = vsub.f32 %v8102_v45, %v3756_v32  ;;  %v3757_v8 = vmul.f32 0.03125, %v3676_v19  ;;  %v3858_v35 = vsel %vm740_vm0, %v3818_v31, 0.0  ;;  %v3819_v46 = vmul.f32 %v8354_v41, %v8354_v41 }
 0x866   : > { %v3679_v47 = vpop.xlane.xlu0 %3678  ;;  %3859 = vadd.xlane.f32.xlu0 %v3858_v35 }
 0x867   : > { %v8366_v39 = vsub.f32 %v8113_v3, %v3757_v8  ;;  %v3758_v49 = vmul.f32 0.03125, %v3679_v47  ;;  %v3861_v63 = vsel %vm740_vm0, %v3819_v46, 0.0  ;;  %v3820_v54 = vmul.f32 %v8360_v27, %v8360_v27 }
 0x868   : > { %3862 = vadd.xlane.f32.xlu1 %v3861_v63  ;;  %v3682_v45 = vpop.xlane.xlu1 %3681 }
 0x869   : > { %v8372_v4 = vsub.f32 %v8137_v14, %v3758_v49  ;;  %v3759_v0 = vmul.f32 0.03125, %v3682_v45  ;;  %v3864_v59 = vsel %vm740_vm0, %v3820_v54, 0.0  ;;  %v3821_v5 = vmul.f32 %v8366_v39, %v8366_v39 }
 0x86a   : > { %v3685_v62 = vpop.xlane.xlu0 %3684  ;;  %3865 = vadd.xlane.f32.xlu0 %v3864_v59 }
 0x86b   : > { %v8378_v3 = vsub.f32 %v8151_v17, %v3759_v0  ;;  %v3760_v10 = vmul.f32 0.03125, %v3685_v62  ;;  %v3867_v15 = vsel %vm740_vm0, %v3821_v5, 0.0  ;;  %v3822_v48 = vmul.f32 %v8372_v4, %v8372_v4 }
 0x86c   : > { %3868 = vadd.xlane.f32.xlu1 %v3867_v15  ;;  %v3688_v14 = vpop.xlane.xlu1 %3687 }
 0x86d   : > { %v8384_v22 = vsub.f32 %v8134_v12, %v3760_v10  ;;  %v3761_v23 = vmul.f32 0.03125, %v3688_v14  ;;  %v3870_v37 = vsel %vm740_vm0, %v3822_v48, 0.0  ;;  %v3823_v51 = vmul.f32 %v8378_v3, %v8378_v3 }
 0x86e   : > { %3871 = vadd.xlane.f32.xlu0 %v3870_v37  ;;  %v3691_v17 = vpop.xlane.xlu0 %3690 }
 0x86f   : > { %v8390_v60 = vsub.f32 %v8145_v61, %v3761_v23  ;;  %v3762_v52 = vmul.f32 0.03125, %v3691_v17  ;;  %v3873_v16 = vsel %vm740_vm0, %v3823_v51, 0.0  ;;  %v3824_v44 = vmul.f32 %v8384_v22, %v8384_v22 }
 0x870   : > { %3874 = vadd.xlane.f32.xlu1 %v3873_v16  ;;  %v3694_v12 = vpop.xlane.xlu1 %3693 }
 0x871   : > { %v8396_v11 = vsub.f32 %v8169_v29, %v3762_v52  ;;  %v3763_v24 = vmul.f32 0.03125, %v3694_v12  ;;  %v3876_v25 = vsel %vm740_vm0, %v3824_v44, 0.0  ;;  %v3825_v32 = vmul.f32 %v8390_v60, %v8390_v60 }
 0x872   : > { %3877 = vadd.xlane.f32.xlu0 %v3876_v25  ;;  %v3697_v61 = vpop.xlane.xlu0 %3696  ;;  %v7451_v25 = vld [vmem:[%s9119_s11] sm:$0xff]  }
 0x873   : > { %v8402_v20 = vsub.f32 %v8183_v36, %v3763_v24  ;;  %v3764_v31 = vmul.f32 0.03125, %v3697_v61  ;;  %v3879_v19 = vsel %vm740_vm0, %v3825_v32, 0.0  ;;  %v3826_v8 = vmul.f32 %v8396_v11, %v8396_v11  ;;  %7045 = vmatprep.subr.bf16.mxu0 %v7451_v25 }
 0x874   : > { %3880 = vadd.xlane.f32.xlu1 %v3879_v19  ;;  %v3700_v29 = vpop.xlane.xlu1 %3699  ;;  %7046 = vmatpush3.bf16.msra.mxu0 %v7451_v25 }
 0x875   : > { %v8408_v35 = vsub.f32 %v8166_v21, %v3764_v31  ;;  %v3765_v46 = vmul.f32 0.03125, %v3700_v29  ;;  %v3882_v47 = vsel %vm740_vm0, %v3826_v8, 0.0  ;;  %v3827_v49 = vmul.f32 %v8402_v20, %v8402_v20 }
 0x876   : > { %3883 = vadd.xlane.f32.xlu0 %v3882_v47  ;;  %v3703_v36 = vpop.xlane.xlu0 %3702 }
 0x877   : > { %v8414_v63 = vsub.f32 %v8177_v9, %v3765_v46  ;;  %v3766_v54 = vmul.f32 0.03125, %v3703_v36  ;;  %v3885_v45 = vsel %vm740_vm0, %v3827_v49, 0.0  ;;  %v3828_v0 = vmul.f32 %v8408_v35, %v8408_v35  ;;  %v7452_v49 = vld [vmem:[%s9118_s10 + $0x8] sm:$0xff]  }
 0x878   : > { %3886 = vadd.xlane.f32.xlu1 %v3885_v45  ;;  %v3706_v21 = vpop.xlane.xlu1 %3705  ;;  %v7453_v36 = vld [vmem:[%s9119_s11 + $0x8] sm:$0xff]  }
 0x879   : > { %v8420_v59 = vsub.f32 %v8201_v2, %v3766_v54  ;;  %v3767_v5 = vmul.f32 0.03125, %v3706_v21  ;;  %v3888_v62 = vsel %vm740_vm0, %v3828_v0, 0.0  ;;  %v3829_v10 = vmul.f32 %v8414_v63, %v8414_v63  ;;  %7047 = vmatprep.subr.bf16.mxu0 %v7453_v36 }
 0x87a   : > { %3889 = vadd.xlane.f32.xlu0 %v3888_v62  ;;  %v3709_v9 = vpop.xlane.xlu0 %3708  ;;  %7048 = vmatpush3.bf16.msra.mxu0 %v7453_v36 }
 0x87b   : > { %v8426_v15 = vsub.f32 %v8215_v57, %v3767_v5  ;;  %v3768_v48 = vmul.f32 0.03125, %v3709_v9  ;;  %v3891_v14 = vsel %vm740_vm0, %v3829_v10, 0.0  ;;  %v3830_v23 = vmul.f32 %v8420_v59, %v8420_v59 }
 0x87c   : > { %3892 = vadd.xlane.f32.xlu1 %v3891_v14  ;;  %v3712_v2 = vpop.xlane.xlu1 %3711 }
 0x87d   : > { %v8432_v37 = vsub.f32 %v8198_v50, %v3768_v48  ;;  %v3769_v51 = vmul.f32 0.03125, %v3712_v2  ;;  %v3894_v17 = vsel %vm740_vm0, %v3830_v23, 0.0  ;;  %v3831_v52 = vmul.f32 %v8426_v15, %v8426_v15  ;;  %v7450_v50 = vld [vmem:[%s9118_s10] sm:$0xff]  }
 0x87e   : > { %3895 = vadd.xlane.f32.xlu0 %v3894_v17  ;;  %v3715_v57 = vpop.xlane.xlu0 %3714  ;;  %7009 = vmatprep.subr.bf16.mxu1 %v7450_v50 }
 0x87f   : > { %v8438_v16 = vsub.f32 %v8209_v1, %v3769_v51  ;;  %v3770_v44 = vmul.f32 0.03125, %v3715_v57  ;;  %v3897_v12 = vsel %vm740_vm0, %v3831_v52, 0.0  ;;  %v3832_v24 = vmul.f32 %v8432_v37, %v8432_v37  ;;  %7010 = vmatpush3.bf16.msra.mxu1 %v7450_v50 }
 0x880   : > { %3898 = vadd.xlane.f32.xlu1 %v3897_v12  ;;  %v3718_v32 = vpop.xlane.xlu1 %3717  ;;  %7011 = vmatprep.subr.bf16.mxu1 %v7452_v49 }
 0x881   : > { %v8450_v61 = vsub.f32 %v8233_v58, %v3770_v44  ;;  %v3771_v1 = vmul.f32 0.03125, %v3718_v32  ;;  %v3900_v31 = vsel %vm740_vm0, %v3832_v24, 0.0  ;;  %v3833_v19 = vmul.f32 %v8438_v16, %v8438_v16 }
 0x882   : > { %3901 = vadd.xlane.f32.xlu0 %v3900_v31  ;;  %v3721_v8 = vpop.xlane.xlu0 %3720 }
 0x883   : > { %v8456_v29 = vsub.f32 %v8247_v55, %v3771_v1  ;;  %v3772_v46 = vmul.f32 0.03125, %v3721_v8  ;;  %v3903_v47 = vsel %vm740_vm0, %v3833_v19, 0.0  ;;  %v3834_v58 = vmul.f32 %v8450_v61, %v8450_v61  ;;  %7012 = vmatpush3.bf16.msra.mxu1 %v7452_v49 }
 0x884   : > { %3904 = vadd.xlane.f32.xlu1 %v3903_v47  ;;  %v3724_v54 = vpop.xlane.xlu1 %3723 }
 0x885   : > { %v8468_v55 = vsub.f32 %v8230_v7, %v3772_v46  ;;  %v3773_v45 = vmul.f32 0.03125, %v3724_v54  ;;  %v3906_v0 = vsel %vm740_vm0, %v3834_v58, 0.0  ;;  %v3835_v21 = vmul.f32 %v8456_v29, %v8456_v29 }
 0x886   : > { %3907 = vadd.xlane.f32.xlu0 %v3906_v0  ;;  %v3727_v5 = vpop.xlane.xlu0 %3726 }
 0x887   : > { %v8474_v62 = vsub.f32 %v8241_v26, %v3773_v45  ;;  %v3774_v10 = vmul.f32 0.03125, %v3727_v5  ;;  %v3909_v9 = vsel %vm740_vm0, %v3835_v21, 0.0  ;;  %v3836_v7 = vmul.f32 %v8468_v55, %v8468_v55 }
 0x888   : > { %3910 = vadd.xlane.f32.xlu1 %v3909_v9  ;;  %v3730_v48 = vpop.xlane.xlu1 %3729 }
 0x889   : > { %v8480_v14 = vsub.f32 %v8265_v33, %v3774_v10  ;;  %v3775_v23 = vmul.f32 0.03125, %v3730_v48  ;;  %v3912_v2 = vsel %vm740_vm0, %v3836_v7, 0.0  ;;  %v3837_v51 = vmul.f32 %v8474_v62, %v8474_v62 }
 0x88a   : > { %3913 = vadd.xlane.f32.xlu0 %v3912_v2  ;;  %v3733_v26 = vpop.xlane.xlu0 %3732  ;;  %v8540_v2 = vld [vmem:[%s9121_s13] sm:$0xff]  }
 0x88b   : > { %v8486_v17 = vsub.f32 %v8279_v13, %v3775_v23  ;;  %v3776_v52 = vmul.f32 0.03125, %v3733_v26  ;;  %v3915_v57 = vsel %vm740_vm0, %v3837_v51, 0.0  ;;  %v3838_v44 = vmul.f32 %v8480_v14, %v8480_v14  ;;  %7117 = vmatprep.subr.bf16.mxu0 %v8540_v2 }
 0x88c   : > { %3916 = vadd.xlane.f32.xlu1 %v3915_v57  ;;  %v3736_v33 = vpop.xlane.xlu1 %3735 }
 0x88d   : > { %v8492_v12 = vsub.f32 %v8262_v40, %v3776_v52  ;;  %v3777_v24 = vmul.f32 0.03125, %v3736_v33  ;;  %v3918_v50 = vsel %vm740_vm0, %v3838_v44, 0.0  ;;  %v3839_v25 = vmul.f32 %v8486_v17, %v8486_v17 }
 0x88e   : > { %3919 = vadd.xlane.f32.xlu0 %v3918_v50  ;;  %v3739_v13 = vpop.xlane.xlu0 %3738 }
 0x88f   : > { %v8498_v32 = vsub.f32 %v8273_v53, %v3777_v24  ;;  %v3778_v1 = vmul.f32 0.03125, %v3739_v13  ;;  %v3921_v31 = vsel %vm740_vm0, %v3839_v25, 0.0  ;;  %v3840_v19 = vmul.f32 %v8492_v12, %v8492_v12 }
 0x890   : > { %3922 = vadd.xlane.f32.xlu1 %v3921_v31  ;;  %v3742_v40 = vpop.xlane.xlu1 %3741 }
 0x891   : > { %v8504_v8 = vsub.f32 %v8297_v34, %v3778_v1  ;;  %v3779_v46 = vmul.f32 0.03125, %v3742_v40  ;;  %v3924_v47 = vsel %vm740_vm0, %v3840_v19, 0.0  ;;  %v3841_v58 = vmul.f32 %v8498_v32, %v8498_v32 }
 0x892   : > { %3925 = vadd.xlane.f32.xlu0 %v3924_v47  ;;  %v3745_v53 = vpop.xlane.xlu0 %3744 }
 0x893   : > { %v8510_v49 = vsub.f32 %v8311_v43, %v3779_v46  ;;  %v3780_v36 = vmul.f32 0.03125, %v3745_v53  ;;  %v3927_v54 = vsel %vm740_vm0, %v3841_v58, 0.0  ;;  %v3842_v45 = vmul.f32 %v8504_v8, %v8504_v8 }
 0x894   : > { %3928 = vadd.xlane.f32.xlu1 %v3927_v54  ;;  %v3748_v34 = vpop.xlane.xlu1 %3747 }
 0x895   : > { %v8516_v0 = vsub.f32 %v8294_v18, %v3780_v36  ;;  %v3781_v21 = vmul.f32 0.03125, %v3748_v34  ;;  %v3930_v5 = vsel %vm740_vm0, %v3842_v45, 0.0  ;;  %v3843_v10 = vmul.f32 %v8510_v49, %v8510_v49  ;;  %v8530_v18 = vld [vmem:[%s9120_s12] sm:$0xff]  }
 0x896   : > { %3931 = vadd.xlane.f32.xlu0 %v3930_v5  ;;  %7081 = vmatprep.subr.bf16.mxu1 %v8530_v18 }
 0x897   : > { %v8522_v43 = vsub.f32 %v8305_v28, %v3781_v21  ;;  %v3933_v9 = vsel %vm740_vm0, %v3843_v10, 0.0  ;;  %v3844_v7 = vmul.f32 %v8516_v0, %v8516_v0  ;;  %v8546_v21 = vld [vmem:[%s9116_s8] ss:$0 sm:$0xff] }
 0x898   : > { %3934 = vadd.xlane.f32.xlu1 %v3933_v9 }
 0x899   : > { %v3936_v48 = vsel %vm740_vm0, %v3844_v7, 0.0  ;;  %v3845_v23 = vmul.f32 %v8522_v43, %v8522_v43 }
 0x89a   : > { %3937 = vadd.xlane.f32.xlu0 %v3936_v48 }
 0x89b   : > { %v3939_v28 = vsel %vm740_vm0, %v3845_v23, 0.0 }
 0x89c   : > { %3940 = vadd.xlane.f32.xlu1 %v3939_v28 }
 0x8eb   : > { %v3848_v51 = vpop.xlane.xlu0 %3847 }
 0x8ec   : > { %v3942_v26 = vmul.f32 0.03125, %v3848_v51 }
 0x8ed   : > { %v3851_v52 = vpop.xlane.xlu1 %3850 }
 0x8ee   : > { %v3974_v57 = vadd.f32 1e-05, %v3942_v26  ;;  %v3943_v44 = vmul.f32 0.03125, %v3851_v52 }
 0x8ef   : > { %v3854_v33 = vpop.xlane.xlu0 %3853 }
 0x8f0   : > { %7480 = vrsqrt.f32 %v3974_v57  ;;  %v3975_v24 = vadd.f32 1e-05, %v3943_v44  ;;  %v3944_v50 = vmul.f32 0.03125, %v3854_v33  ;;  %v8554_v44 = vld [vmem:[%s9117_s9] ss:$0 sm:$0xff] }
 0x8f1   : > { %v3857_v25 = vpop.xlane.xlu1 %3856 }
 0x8f2   : > { %7482 = vrsqrt.f32 %v3975_v24  ;;  %v3976_v13 = vadd.f32 1e-05, %v3944_v50  ;;  %v3945_v1 = vmul.f32 0.03125, %v3857_v25 }
 0x8f3   : > { %v3860_v31 = vpop.xlane.xlu0 %3859 }
 0x8f4   : > { %7484 = vrsqrt.f32 %v3976_v13  ;;  %v3977_v19 = vadd.f32 1e-05, %v3945_v1  ;;  %v3946_v40 = vmul.f32 0.03125, %v3860_v31 }
 0x8f5   : > { %v3863_v46 = vpop.xlane.xlu1 %3862 }
 0x8f6   : > { %7486 = vrsqrt.f32 %v3977_v19  ;;  %v3978_v47 = vadd.f32 1e-05, %v3946_v40  ;;  %v3947_v58 = vmul.f32 0.03125, %v3863_v46 }
 0x8f7   : > { %v3866_v53 = vpop.xlane.xlu0 %3865 }
 0x8f8   : > { %7488 = vrsqrt.f32 %v3978_v47  ;;  %v3979_v36 = vadd.f32 1e-05, %v3947_v58  ;;  %v3948_v54 = vmul.f32 0.03125, %v3866_v53 }
 0x8f9   : > { %v3869_v45 = vpop.xlane.xlu1 %3868 }
 0x8fa   : > { %v7481_v34 = vpop.eup %7480  ;;  %7490 = vrsqrt.f32 %v3979_v36  ;;  %v3980_v5 = vadd.f32 1e-05, %v3948_v54  ;;  %v3949_v10 = vmul.f32 0.03125, %v3869_v45 }
 0x8fb   : > { %v4038_v9 = vmul.f32 %v7481_v34, %v8328_v56  ;;  %v3872_v7 = vpop.xlane.xlu0 %3871 }
 0x8fc   : > { %v7483_v48 = vpop.eup %7482  ;;  %7492 = vrsqrt.f32 %v3980_v5  ;;  %v3981_v23 = vadd.f32 1e-05, %v3949_v10  ;;  %v3950_v28 = vmul.f32 0.03125, %v3872_v7 }
 0x8fd   : > { %v4039_v51 = vmul.f32 %v7483_v48, %v8331_v6  ;;  %v3875_v26 = vpop.xlane.xlu1 %3874  ;;  %v4077_v52 = vmul.f32 %v8546_v21, %v4038_v9 }
 0x8fe   : > { %v7485_v57 = vpop.eup %7484  ;;  %7494 = vrsqrt.f32 %v3981_v23  ;;  %v3982_v33 = vadd.f32 1e-05, %v3950_v28  ;;  %v3951_v24 = vmul.f32 0.03125, %v3875_v26 }
 0x8ff   : > { %v4040_v56 = vmul.f32 %v7485_v57, %v8336_v30  ;;  %v3878_v50 = vpop.xlane.xlu0 %3877  ;;  %v4078_v25 = vmul.f32 %v8546_v21, %v4039_v51  ;;  %v4116_v46 = vadd.f32 %v8554_v44, %v4077_v52 }
 0x900   : > { %v7487_v13 = vpop.eup %7486  ;;  %7496 = vrsqrt.f32 %v3982_v33  ;;  %v3983_v6 = vadd.f32 1e-05, %v3951_v24  ;;  %v3952_v1 = vmul.f32 0.03125, %v3878_v50  ;;  %v7455_v24 = vld [vmem:[%s9120_s12 + $0x8] sm:$0xff]  }
 0x901   : > { %v4079_v31 = vmul.f32 %v8546_v21, %v4040_v56  ;;  %v4041_v19 = vmul.f32 %v7487_v13, %v8342_v38  ;;  %v3881_v40 = vpop.xlane.xlu1 %3880  ;;  %v4117_v47 = vadd.f32 %v8554_v44, %v4078_v25 }
 0x902   : > { %v7489_v58 = vpop.eup %7488  ;;  %7498 = vrsqrt.f32 %v3983_v6  ;;  %v3984_v53 = vadd.f32 1e-05, %v3952_v1  ;;  %v3953_v30 = vmul.f32 0.03125, %v3881_v40  ;;  %v7458_v6 = vld [vmem:[%s9121_s13 + $0x8] sm:$0xff]  }
 0x903   : > { %v4080_v36 = vmul.f32 %v8546_v21, %v4041_v19  ;;  %v4042_v54 = vmul.f32 %v7489_v58, %v8348_v42  ;;  %v3884_v45 = vpop.xlane.xlu0 %3883  ;;  %v8564_v34 = vpack.c.bf16 %v4117_v47, %v4116_v46  ;;  %v4118_v10 = vadd.f32 %v8554_v44, %v4079_v31 }
 0x904   : > { %v7491_v5 = vpop.eup %7490  ;;  %7500 = vrsqrt.f32 %v3984_v53  ;;  %v3985_v38 = vadd.f32 1e-05, %v3953_v30  ;;  %v3954_v9 = vmul.f32 0.03125, %v3884_v45 }
 0x905   : > { %v4119_v7 = vadd.f32 %v8554_v44, %v4080_v36  ;;  %v4043_v48 = vmul.f32 %v7491_v5, %v8354_v41  ;;  %7013 = vmatprep.mubr.msk.bf16.mxu1 %vm740_vm0, %v8564_v34  ;;  %7049 = vmatprep.mubr.msk.bf16.mxu0 %vm740_vm0, %v8564_v34  ;;  %v3887_v42 = vpop.xlane.xlu1 %3886  ;;  %v4081_v23 = vmul.f32 %v8546_v21, %v4042_v54  ;;  %v8601_v36 = vld [vmem:[%s9122_s14] sm:$0xff]  }
 0x906   : > { %v7493_v28 = vpop.eup %7492  ;;  %7502 = vrsqrt.f32 %v3985_v38  ;;  %v3986_v51 = vadd.f32 1e-05, %v3954_v9  ;;  %v3955_v26 = vmul.f32 0.03125, %v3887_v42 }
 0x907   : > { %v4044_v52 = vmul.f32 %v7493_v28, %v8360_v27  ;;  %v3890_v57 = vpop.xlane.xlu0 %3889  ;;  %v8575_v33 = vpack.c.bf16 %v4119_v7, %v4118_v10  ;;  %v4082_v41 = vmul.f32 %v8546_v21, %v4043_v48  ;;  %v4120_v13 = vadd.f32 %v8554_v44, %v4081_v23 }
 0x908   : > { %v7495_v56 = vpop.eup %7494  ;;  %7504 = vrsqrt.f32 %v3986_v51  ;;  %v3987_v50 = vadd.f32 1e-05, %v3955_v26  ;;  %v3956_v25 = vmul.f32 0.03125, %v3890_v57  ;;  %v7462_v26 = vld [vmem:[%s9121_s13 + $0x18] sm:$0xff]  }
 0x909   : > { %v4045_v27 = vmul.f32 %v7495_v56, %v8366_v39  ;;  %7014 = vmatmul.mubr.msk.bf16.vlgmr.msra.gmra.mrb[8].mxu1 %vm740_vm0, %v8575_v33  ;;  %7050 = vmatmul.mubr.msk.bf16.vlgmr.msra.gmra.mrb[40].mxu0 %vm740_vm0, %v8575_v33  ;;  %v3893_v1 = vpop.xlane.xlu1 %3892  ;;  %v4121_v31 = vadd.f32 %v8554_v44, %v4082_v41  ;;  %v4083_v19 = vmul.f32 %v8546_v21, %v4044_v52 }
 0x90a   : > { %v7497_v40 = vpop.eup %7496  ;;  %7506 = vrsqrt.f32 %v3987_v50  ;;  %v3988_v46 = vadd.f32 1e-05, %v3956_v25  ;;  %v3957_v47 = vmul.f32 0.03125, %v3893_v1  ;;  %7082 = vmatpush3.bf16.msra.mxu1 %v8530_v18  ;;  %7118 = vmatpush3.bf16.msra.mxu0 %v8540_v2 }
 0x90b   : > { %v4046_v39 = vmul.f32 %v7497_v40, %v8372_v4  ;;  %v3896_v58 = vpop.xlane.xlu0 %3895  ;;  %v8595_v53 = vpack.c.bf16 %v4121_v31, %v4120_v13  ;;  %v4084_v30 = vmul.f32 %v8546_v21, %v4045_v27  ;;  %7083 = vmatprep.subr.bf16.mxu1 %v7455_v24  ;;  %v4122_v18 = vadd.f32 %v8554_v44, %v4083_v19  ;;  %v7460_v4 = vld [vmem:[%s9121_s13 + $0x10] sm:$0xff]  }
 0x90c   : > { %v7499_v54 = vpop.eup %7498  ;;  %7508 = vrsqrt.f32 %v3988_v46  ;;  %v3989_v45 = vadd.f32 1e-05, %v3957_v47  ;;  %v3958_v5 = vmul.f32 0.03125, %v3896_v58  ;;  %7119 = vmatprep.subr.bf16.mxu0 %v7458_v6 }
 0x90d   : > { %v4047_v2 = vmul.f32 %v7499_v54, %v8378_v3  ;;  %7017 = vmatprep.mubr.msk.bf16.mxu1 %vm740_vm0, %v8595_v53  ;;  %7053 = vmatprep.mubr.msk.bf16.mxu0 %vm740_vm0, %v8595_v53  ;;  %v3899_v10 = vpop.xlane.xlu1 %3898  ;;  %v4123_v38 = vadd.f32 %v8554_v44, %v4084_v30  ;;  %v4085_v9 = vmul.f32 %v8546_v21, %v4046_v39 }
 0x90e   : > { %v7501_v7 = vpop.eup %7500  ;;  %7510 = vrsqrt.f32 %v3989_v45  ;;  %v3990_v48 = vadd.f32 1e-05, %v3958_v5  ;;  %v3959_v42 = vmul.f32 0.03125, %v3899_v10  ;;  %7084 = vmatpush3.bf16.msra.mxu1 %v7455_v24  ;;  %7120 = vmatpush3.bf16.msra.mxu0 %v7458_v6 }
 0x90f   : > { %v4048_v23 = vmul.f32 %v7501_v7, %v8384_v22  ;;  %v3902_v3 = vpop.xlane.xlu0 %3901  ;;  %v8615_v28 = vpack.c.bf16 %v4123_v38, %v4122_v18  ;;  %v4086_v51 = vmul.f32 %v8546_v21, %v4047_v2  ;;  %7141 = vmatprep.subr.bf16.mxu1 %v8601_v36  ;;  %v4124_v24 = vadd.f32 %v8554_v44, %v4085_v9 }
 0x910   : > { %v7503_v52 = vpop.eup %7502  ;;  %7512 = vrsqrt.f32 %v3990_v48  ;;  %v3991_v57 = vadd.f32 1e-05, %v3959_v42  ;;  %v3960_v41 = vmul.f32 0.03125, %v3902_v3  ;;  %7121 = vmatprep.subr.bf16.mxu0 %v7460_v4 }
 0x911   : > { %v4049_v22 = vmul.f32 %v7503_v52, %v8390_v60  ;;  %7018 = vmatmul.mubr.msk.bf16.gmra.mrb[12].mxu1 %vm740_vm0, %v8615_v28  ;;  %7054 = vmatmul.mubr.msk.bf16.gmra.mrb[44].mxu0 %vm740_vm0, %v8615_v28  ;;  %v3905_v56 = vpop.xlane.xlu1 %3904  ;;  %v4125_v50 = vadd.f32 %v8554_v44, %v4086_v51  ;;  %v4087_v25 = vmul.f32 %v8546_v21, %v4048_v23 }
 0x912   : > { %v7505_v13 = vpop.eup %7504  ;;  %7514 = vrsqrt.f32 %v3991_v57  ;;  %v3992_v6 = vadd.f32 1e-05, %v3960_v41  ;;  %v3961_v27 = vmul.f32 0.03125, %v3905_v56  ;;  %7122 = vmatpush3.bf16.msra.mxu0 %v7460_v4 }
 0x913   : > { %v4050_v1 = vmul.f32 %v7505_v13, %v8396_v11  ;;  %v3908_v31 = vpop.xlane.xlu0 %3907  ;;  %v8631_v60 = vpack.c.bf16 %v4125_v50, %v4124_v24  ;;  %v4088_v19 = vmul.f32 %v8546_v21, %v4049_v22  ;;  %7123 = vmatprep.subr.bf16.mxu0 %v7462_v26  ;;  %v4126_v39 = vadd.f32 %v8554_v44, %v4087_v25 }
 0x914   : > { %v7507_v40 = vpop.eup %7506  ;;  %7516 = vrsqrt.f32 %v3992_v6  ;;  %v3993_v46 = vadd.f32 1e-05, %v3961_v27  ;;  %v3962_v47 = vmul.f32 0.03125, %v3908_v31 }
 0x915   : > { %v4051_v58 = vmul.f32 %v7507_v40, %v8402_v20  ;;  %7021 = vmatprep.mubr.msk.bf16.mxu1 %vm740_vm0, %v8631_v60  ;;  %7057 = vmatprep.mubr.msk.bf16.mxu0 %vm740_vm0, %v8631_v60  ;;  %v3911_v11 = vpop.xlane.xlu1 %3910  ;;  %v4127_v30 = vadd.f32 %v8554_v44, %v4088_v19  ;;  %v4089_v54 = vmul.f32 %v8546_v21, %v4050_v1 }
 0x916   : > { %v7509_v45 = vpop.eup %7508  ;;  %7518 = vrsqrt.f32 %v3993_v46  ;;  %v3994_v5 = vadd.f32 1e-05, %v3962_v47  ;;  %v3963_v18 = vmul.f32 0.03125, %v3911_v11  ;;  %7124 = vmatpush3.bf16.msra.mxu0 %v7462_v26 }
 0x917   : > { %v4052_v4 = vmul.f32 %v7509_v45, %v8408_v35  ;;  %v3914_v2 = vpop.xlane.xlu0 %3913  ;;  %v8643_v20 = vpack.c.bf16 %v4127_v30, %v4126_v39  ;;  %v4090_v10 = vmul.f32 %v8546_v21, %v4051_v58  ;;  %v4128_v48 = vadd.f32 %v8554_v44, %v4089_v54 }
 0x918   : > { %v7511_v38 = vpop.eup %7510  ;;  %7520 = vrsqrt.f32 %v3994_v5  ;;  %v3995_v9 = vadd.f32 1e-05, %v3963_v18  ;;  %v3964_v7 = vmul.f32 0.03125, %v3914_v2 }
 0x919   : > { %v4053_v42 = vmul.f32 %v7511_v38, %v8414_v63  ;;  %7022 = vmatmul.mubr.msk.bf16.gmra.mrb[16].mxu1 %vm740_vm0, %v8643_v20  ;;  %7058 = vmatmul.mubr.msk.bf16.gmra.mrb[48].mxu0 %vm740_vm0, %v8643_v20  ;;  %v3917_v35 = vpop.xlane.xlu1 %3916  ;;  %v4129_v23 = vadd.f32 %v8554_v44, %v4090_v10  ;;  %v4091_v3 = vmul.f32 %v8546_v21, %v4052_v4 }
 0x91a   : > { %v7513_v51 = vpop.eup %7512  ;;  %7522 = vrsqrt.f32 %v3995_v9  ;;  %v3996_v26 = vadd.f32 1e-05, %v3964_v7  ;;  %v3965_v52 = vmul.f32 0.03125, %v3917_v35 }
 0x91b   : > { %v4054_v57 = vmul.f32 %v7513_v51, %v8420_v59  ;;  %v3920_v41 = vpop.xlane.xlu0 %3919  ;;  %v8655_v24 = vpack.c.bf16 %v4129_v23, %v4128_v48  ;;  %v4092_v63 = vmul.f32 %v8546_v21, %v4053_v42  ;;  %v4130_v25 = vadd.f32 %v8554_v44, %v4091_v3 }
 0x91c   : > { %v7515_v22 = vpop.eup %7514  ;;  %7524 = vrsqrt.f32 %v3996_v26  ;;  %v3997_v56 = vadd.f32 1e-05, %v3965_v52  ;;  %v3966_v50 = vmul.f32 0.03125, %v3920_v41 }
 0x91d   : > { %v4055_v13 = vmul.f32 %v7515_v22, %v8426_v15  ;;  %7025 = vmatprep.mubr.msk.bf16.mxu1 %vm740_vm0, %v8655_v24  ;;  %7061 = vmatprep.mubr.msk.bf16.mxu0 %vm740_vm0, %v8655_v24  ;;  %v3923_v59 = vpop.xlane.xlu1 %3922  ;;  %v4131_v6 = vadd.f32 %v8554_v44, %v4092_v63  ;;  %v4093_v27 = vmul.f32 %v8546_v21, %v4054_v57 }
 0x91e   : > { %v7517_v1 = vpop.eup %7516  ;;  %7526 = vrsqrt.f32 %v3997_v56  ;;  %v3998_v31 = vadd.f32 1e-05, %v3966_v50  ;;  %v3967_v19 = vmul.f32 0.03125, %v3923_v59 }
 0x91f   : > { %v4056_v40 = vmul.f32 %v7517_v1, %v8432_v37  ;;  %v3926_v46 = vpop.xlane.xlu0 %3925  ;;  %v8667_v47 = vpack.c.bf16 %v4131_v6, %v4130_v25  ;;  %v4094_v15 = vmul.f32 %v8546_v21, %v4055_v13  ;;  %v4132_v30 = vadd.f32 %v8554_v44, %v4093_v27 }
 0x920   : > { %v7519_v39 = vpop.eup %7518  ;;  %7528 = vrsqrt.f32 %v3998_v31  ;;  %v3999_v58 = vadd.f32 1e-05, %v3967_v19  ;;  %v3968_v11 = vmul.f32 0.03125, %v3926_v46 }
 0x921   : > { %v4057_v54 = vmul.f32 %v7519_v39, %v8438_v16  ;;  %7026 = vmatmul.mubr.msk.bf16.gmra.mrb[20].mxu1 %vm740_vm0, %v8667_v47  ;;  %7062 = vmatmul.mubr.msk.bf16.gmra.mrb[52].mxu0 %vm740_vm0, %v8667_v47  ;;  %v3929_v37 = vpop.xlane.xlu1 %3928  ;;  %v4133_v45 = vadd.f32 %v8554_v44, %v4094_v15  ;;  %v4095_v5 = vmul.f32 %v8546_v21, %v4056_v40 }
 0x922   : > { %v7521_v18 = vpop.eup %7520  ;;  %7530 = vrsqrt.f32 %v3999_v58  ;;  %v4000_v4 = vadd.f32 1e-05, %v3968_v11  ;;  %v3969_v2 = vmul.f32 0.03125, %v3929_v37 }
 0x923   : > { %v4058_v10 = vmul.f32 %v7521_v18, %v8450_v61  ;;  %v3932_v38 = vpop.xlane.xlu0 %3931  ;;  %v8679_v9 = vpack.c.bf16 %v4133_v45, %v4132_v30  ;;  %v4096_v16 = vmul.f32 %v8546_v21, %v4057_v54  ;;  %v4134_v35 = vadd.f32 %v8554_v44, %v4095_v5 }
 0x924   : > { %v7523_v7 = vpop.eup %7522  ;;  %7532 = vrsqrt.f32 %v4000_v4  ;;  %v4001_v48 = vadd.f32 1e-05, %v3969_v2  ;;  %v3970_v42 = vmul.f32 0.03125, %v3932_v38 }
 0x925   : > { %v4059_v23 = vmul.f32 %v7523_v7, %v8456_v29  ;;  %7029 = vmatprep.mubr.msk.bf16.mxu1 %vm740_vm0, %v8679_v9  ;;  %7065 = vmatprep.mubr.msk.bf16.mxu0 %vm740_vm0, %v8679_v9  ;;  %v3935_v61 = vpop.xlane.xlu1 %3934  ;;  %v4135_v3 = vadd.f32 %v8554_v44, %v4096_v16  ;;  %v4097_v51 = vmul.f32 %v8546_v21, %v4058_v10 }
 0x926   : > { %v7525_v26 = vpop.eup %7524  ;;  %7534 = vrsqrt.f32 %v4001_v48  ;;  %v4002_v52 = vadd.f32 1e-05, %v3970_v42  ;;  %v3971_v57 = vmul.f32 0.03125, %v3935_v61 }
 0x927   : > { %v4060_v41 = vmul.f32 %v7525_v26, %v8468_v55  ;;  %v3938_v63 = vpop.xlane.xlu0 %3937  ;;  %v8691_v22 = vpack.c.bf16 %v4135_v3, %v4134_v35  ;;  %v4098_v29 = vmul.f32 %v8546_v21, %v4059_v23  ;;  %v4136_v13 = vadd.f32 %v8554_v44, %v4097_v51 }
 0x928   : > { %v7527_v56 = vpop.eup %7526  ;;  %7536 = vrsqrt.f32 %v4002_v52  ;;  %v4003_v50 = vadd.f32 1e-05, %v3971_v57  ;;  %v3972_v25 = vmul.f32 0.03125, %v3938_v63 }
 0x929   : > { %v4061_v59 = vmul.f32 %v7527_v56, %v8474_v62  ;;  %7030 = vmatmul.mubr.msk.bf16.gmra.mrb[24].mxu1 %vm740_vm0, %v8691_v22  ;;  %7066 = vmatmul.mubr.msk.bf16.gmra.mrb[56].mxu0 %vm740_vm0, %v8691_v22  ;;  %v3941_v55 = vpop.xlane.xlu1 %3940  ;;  %v4137_v6 = vadd.f32 %v8554_v44, %v4098_v29  ;;  %v4099_v27 = vmul.f32 %v8546_v21, %v4060_v41  ;;  %v7464_v56 = vld [vmem:[%s7703_s4] sm:$0xff]  }
 0x92a   : > { %v7529_v1 = vpop.eup %7528  ;;  %7538 = vrsqrt.f32 %v4003_v50  ;;  %v4004_v31 = vadd.f32 1e-05, %v3972_v25  ;;  %v3973_v19 = vmul.f32 0.03125, %v3941_v55  ;;  %v7459_v25 = vld [vmem:[%s9122_s14 + $0x8] sm:$0xff]  }
 0x92b   : > { %v4062_v40 = vmul.f32 %v7529_v1, %v8480_v14  ;;  %v8703_v46 = vpack.c.bf16 %v4137_v6, %v4136_v13  ;;  %v4100_v62 = vmul.f32 %v8546_v21, %v4061_v59  ;;  %v4138_v58 = vadd.f32 %v8554_v44, %v4099_v27  ;;  %v7467_v13 = vld [vmem:[%s7703_s4 + $0x18] sm:$0xff]   ;;  %v7470_v59 = vld [vmem:[%s7703_s4 + $0x30] sm:$0xff]  }
 0x92c   : > { %v7531_v15 = vpop.eup %7530  ;;  %7540 = vrsqrt.f32 %v4004_v31  ;;  %v4005_v39 = vadd.f32 1e-05, %v3973_v19 }
 0x92d   : > { %v4063_v11 = vmul.f32 %v7531_v15, %v8486_v17  ;;  %7033 = vmatprep.mubr.msk.bf16.mxu1 %vm740_vm0, %v8703_v46  ;;  %7069 = vmatprep.mubr.msk.bf16.mxu0 %vm740_vm0, %v8703_v46  ;;  %v4139_v30 = vadd.f32 %v8554_v44, %v4100_v62  ;;  %v4101_v14 = vmul.f32 %v8546_v21, %v4062_v40 }
 0x92e   : > { %v7533_v54 = vpop.eup %7532  ;;  %7542 = vrsqrt.f32 %v4005_v39 }
 0x92f   : > { %v4064_v37 = vmul.f32 %v7533_v54, %v8492_v12  ;;  %v8715_v45 = vpack.c.bf16 %v4139_v30, %v4138_v58  ;;  %v4102_v5 = vmul.f32 %v8546_v21, %v4063_v11  ;;  %v4140_v17 = vadd.f32 %v8554_v44, %v4101_v14 }
 0x930   : > { %v7535_v18 = vpop.eup %7534 }
 0x931   : > { %v4065_v4 = vmul.f32 %v7535_v18, %v8498_v32  ;;  %7034 = vmatmul.mubr.msk.bf16.gmra.mrb[28].mxu1 %vm740_vm0, %v8715_v45  ;;  %7070 = vmatmul.mubr.msk.bf16.gmra.mrb[60].mxu0 %vm740_vm0, %v8715_v45  ;;  %v4141_v2 = vadd.f32 %v8554_v44, %v4102_v5  ;;  %v4103_v10 = vmul.f32 %v8546_v21, %v4064_v37 }
 0x932   : > { %v7537_v12 = vpop.eup %7536 }
 0x933   : > { %v4066_v38 = vmul.f32 %v7537_v12, %v8504_v8  ;;  %v8727_v16 = vpack.c.bf16 %v4141_v2, %v4140_v17  ;;  %v4104_v7 = vmul.f32 %v8546_v21, %v4065_v4  ;;  %v4142_v32 = vadd.f32 %v8554_v44, %v4103_v10 }
 0x934   : > { %v7539_v48 = vpop.eup %7538 }
 0x935   : > { %v4067_v42 = vmul.f32 %v7539_v48, %v8510_v49  ;;  %7037 = vmatprep.mubr.msk.bf16.mxu1 %vm740_vm0, %v8727_v16  ;;  %7073 = vmatprep.mubr.msk.bf16.mxu0 %vm740_vm0, %v8727_v16  ;;  %v4143_v35 = vadd.f32 %v8554_v44, %v4104_v7  ;;  %v4105_v23 = vmul.f32 %v8546_v21, %v4066_v38 }
 0x936   : > { %v7541_v8 = vpop.eup %7540 }
 0x937   : > { %v4068_v61 = vmul.f32 %v7541_v8, %v8516_v0  ;;  %v4161_v3 = vpack.c.bf16 %v4143_v35, %v4142_v32  ;;  %v4106_v51 = vmul.f32 %v8546_v21, %v4067_v42  ;;  %v4144_v49 = vadd.f32 %v8554_v44, %v4105_v23 }
 0x938   : > { %v7543_v26 = vpop.eup %7542 }
 0x939   : > { %v4069_v52 = vmul.f32 %v7543_v26, %v8522_v43  ;;  %7038 = vmatmul.mubr.msk.bf16.gmra.mrb[32].mxu1 %vm740_vm0, %v4161_v3  ;;  %7074 = vmatmul.mubr.msk.bf16.gmra.mrb[64].mxu0 %vm740_vm0, %v4161_v3  ;;  %v4145_v57 = vadd.f32 %v8554_v44, %v4106_v51  ;;  %v4107_v41 = vmul.f32 %v8546_v21, %v4068_v61 }
 0x93b   : > { %v4162_v0 = vpack.c.bf16 %v4145_v57, %v4144_v49  ;;  %v4108_v63 = vmul.f32 %v8546_v21, %v4069_v52  ;;  %v4146_v29 = vadd.f32 %v8554_v44, %v4107_v41  ;;  %v7465_v21 = vld [vmem:[%s7703_s4 + $0x8] sm:$0xff]  }
 0x93d   : > { %7041 = vmatprep.mubr.msk.bf16.mxu1 %vm740_vm0, %v4162_v0  ;;  %7077 = vmatprep.mubr.msk.bf16.mxu0 %vm740_vm0, %v4162_v0  ;;  %v4147_v43 = vadd.f32 %v8554_v44, %v4108_v63  ;;  %v7466_v44 = vld [vmem:[%s7703_s4 + $0x10] sm:$0xff]  }
 0x93f   : > { %v4163_v50 = vpack.c.bf16 %v4147_v43, %v4146_v29 }
 0x941   : > { %7042 = vmatmul.mubr.msk.bf16.gmra.mrb[36].mxu1 %vm740_vm0, %v4163_v50  ;;  %7078 = vmatmul.mubr.msk.bf16.gmra.mrb[68].mxu0 %vm740_vm0, %v4163_v50 }
 0x942   : > { %7085 = vmatprep.mubr.msk.bf16.mxu1 %vm740_vm0, %v8564_v34  ;;  %7125 = vmatprep.mubr.msk.bf16.mxu0 %vm5312_vm1, %v7464_v56  ;;  %v7461_v34 = vld [vmem:[%s9122_s14 + $0x10] sm:$0xff]  }
 0x949   : > { %7086 = vmatmul.mubr.msk.bf16.vlgmr.msra.gmra.mrb[40].mxu1 %vm740_vm0, %v8575_v33  ;;  %7126 = vmatmul.mubr.msk.bf16.vlgmr.msra.gmra.mrb[72].mxu0 %vm5312_vm1, %v7465_v21  ;;  %v7463_v33 = vld [vmem:[%s9122_s14 + $0x18] sm:$0xff]  }
 0x94a   : > { %7089 = vmatprep.mubr.msk.bf16.mxu1 %vm740_vm0, %v8595_v53  ;;  %7142 = vmatpush3.bf16.msra.mxu1 %v8601_v36  ;;  %v7468_v53 = vld [vmem:[%s7703_s4 + $0x20] sm:$0xff]   ;;  %v7469_v36 = vld [vmem:[%s7703_s4 + $0x28] sm:$0xff]  }
 0x94b   : > { %7143 = vmatprep.subr.bf16.mxu1 %v7459_v25  ;;  %7129 = vmatprep.mubr.msk.bf16.mxu0 %vm5312_vm1, %v7466_v44 }
 0x94e   : > { %7144 = vmatpush3.bf16.msra.mxu1 %v7459_v25 }
 0x94f   : > { %7145 = vmatprep.subr.bf16.mxu1 %v7461_v34 }
 0x951   : > { %7090 = vmatmul.mubr.msk.bf16.gmra.mrb[44].mxu1 %vm740_vm0, %v8615_v28  ;;  %7130 = vmatmul.mubr.msk.bf16.gmra.mrb[76].mxu0 %vm5312_vm1, %v7467_v13  ;;  %v7471_v28 = vld [vmem:[%s7703_s4 + $0x38] sm:$0xff]   ;;  %s8817_s4 = sshll.u32 %s9143_s22, 7 }
 0x952   : > { %7093 = vmatprep.mubr.msk.bf16.mxu1 %vm740_vm0, %v8631_v60  ;;  %7146 = vmatpush3.bf16.msra.mxu1 %v7461_v34  ;;  %s8823_s21 = scalar_lea.vmem %s9124_s16, %s8817_s4  ;;  %s8829_s3 = scalar_lea.vmem %s9125_s17, %s8817_s4 }
 0x953   : > { %7147 = vmatprep.subr.bf16.mxu1 %v7463_v33  ;;  %7133 = vmatprep.mubr.msk.bf16.mxu0 %vm5312_vm1, %v7468_v53  ;;  %s8969_s24 = scalar_lea.vmem %s9126_s18, %s8817_s4 }
 0x956   : > { %7148 = vmatpush3.bf16.msra.mxu1 %v7463_v33 }
 0x959   : > { %7094 = vmatmul.mubr.msk.bf16.gmra.mrb[48].mxu1 %vm740_vm0, %v8643_v20  ;;  %7134 = vmatmul.mubr.msk.bf16.gmra.mrb[80].mxu0 %vm5312_vm1, %v7469_v36 }
 0x95a   : > { %7097 = vmatprep.mubr.msk.bf16.mxu1 %vm740_vm0, %v8655_v24  ;;  %7137 = vmatprep.mubr.msk.bf16.mxu0 %vm5312_vm1, %v7470_v59 }
 0x961   : > { %7098 = vmatmul.mubr.msk.bf16.gmra.mrb[52].mxu1 %vm740_vm0, %v8667_v47  ;;  %7138 = vmatmul.mubr.msk.bf16.gmra.mrb[84].mxu0 %vm5312_vm1, %v7471_v28 }
 0x962   : > { %7101 = vmatprep.mubr.msk.bf16.mxu1 %vm740_vm0, %v8679_v9 }
 0x969   : > { %7102 = vmatmul.mubr.msk.bf16.gmra.mrb[56].mxu1 %vm740_vm0, %v8691_v22 }
 0x96a   : > { %7105 = vmatprep.mubr.msk.bf16.mxu1 %vm740_vm0, %v8703_v46 }
 0x971   : > { %7106 = vmatmul.mubr.msk.bf16.gmra.mrb[60].mxu1 %vm740_vm0, %v8715_v45 }
 0x972   : > { %7109 = vmatprep.mubr.msk.bf16.mxu1 %vm740_vm0, %v8727_v16 }
 0x979   : > { %7110 = vmatmul.mubr.msk.bf16.gmra.mrb[64].mxu1 %vm740_vm0, %v4161_v3 }
 0x97a   : > { %7113 = vmatprep.mubr.msk.bf16.mxu1 %vm740_vm0, %v4162_v0 }
 0x981   : > { %7114 = vmatmul.mubr.msk.bf16.gmra.mrb[68].mxu1 %vm740_vm0, %v4163_v50 }
 0x982   : > { %7149 = vmatprep.mubr.msk.bf16.mxu1 %vm5312_vm1, %v7464_v56 }
 0x989   : > { %7150 = vmatmul.mubr.msk.bf16.vlgmr.msra.gmra.mrb[72].mxu1 %vm5312_vm1, %v7465_v21 }
 0x98a   : > { %7153 = vmatprep.mubr.msk.bf16.mxu1 %vm5312_vm1, %v7466_v44 }
 0x991   : > { %7154 = vmatmul.mubr.msk.bf16.gmra.mrb[76].mxu1 %vm5312_vm1, %v7467_v13 }
 0x992   : > { %7157 = vmatprep.mubr.msk.bf16.mxu1 %vm5312_vm1, %v7468_v53 }
 0x999   : > { %7158 = vmatmul.mubr.msk.bf16.gmra.mrb[80].mxu1 %vm5312_vm1, %v7469_v36 }
 0x99a   : > { %7161 = vmatprep.mubr.msk.bf16.mxu1 %vm5312_vm1, %v7470_v59 }
 0x9a1   : > { %7162 = vmatmul.mubr.msk.bf16.gmra.mrb[84].mxu1 %vm5312_vm1, %v7471_v28 }
 0x9dc   : > { %v7015_v60 = vpop.f32.mrb[8].mxu1  ;;  %v7051_v20 = vpop.f32.mrb[40].mxu0 }
 0x9dd   : > { %v6223_v24 = vpack.c.bf16 %v7015_v60, %v7015_v60  ;;  %v6255_v47 = vpack.c.bf16 %v7051_v20, %v7051_v20  ;;  %v4262_v9 = vpop.f32.mrb[9].mxu1  ;;  %v4600_v22 = vpop.f32.mrb[41].mxu0 }
 0x9de   : > { %v6221_v55 = vpack.c.bf16 %v4262_v9, %v4262_v9  ;;  %v6253_v6 = vpack.c.bf16 %v4600_v22, %v4600_v22  ;;  %v7016_v27 = vpop.f32.mrb[10].mxu1  ;;  %v7052_v1 = vpop.f32.mrb[42].mxu0 }
 0x9df   : > { %4520 = vst.msk [vmem:[%s8823_s21 + $0x8] sm:$0xf] %vm4517_vm2, %v6223_v24  ;;  %4857 = vst.msk [vmem:[%s8829_s3 + $0x8] sm:$0xf] %vm4517_vm2, %v6255_v47  ;;  %v6224_v31 = vpack.c.bf16 %v7016_v27, %v7016_v27  ;;  %v6256_v19 = vpack.c.bf16 %v7052_v1, %v7052_v1  ;;  %v4265_v40 = vpop.f32.mrb[11].mxu1  ;;  %v4603_v46 = vpop.f32.mrb[43].mxu0 }
 0x9e0   : > { %4518 = vst.msk [vmem:[%s8823_s21] sm:$0xf] %vm4517_vm2, %v6221_v55  ;;  %4855 = vst.msk [vmem:[%s8829_s3] sm:$0xf] %vm4517_vm2, %v6253_v6  ;;  %v6222_v62 = vpack.c.bf16 %v4265_v40, %v4265_v40  ;;  %v6254_v15 = vpack.c.bf16 %v4603_v46, %v4603_v46 }
 0x9e1   : > { %4521 = vst.msk [vmem:[%s8823_s21 + $0xc] sm:$0xf] %vm4517_vm2, %v6224_v31  ;;  %4858 = vst.msk [vmem:[%s8829_s3 + $0xc] sm:$0xf] %vm4517_vm2, %v6256_v19 }
 0x9e2   : > { %4519 = vst.msk [vmem:[%s8823_s21 + $0x4] sm:$0xf] %vm4517_vm2, %v6222_v62  ;;  %4856 = vst.msk [vmem:[%s8829_s3 + $0x4] sm:$0xf] %vm4517_vm2, %v6254_v15 }
 0x9e4   : > { %v7019_v39 = vpop.f32.mrb[12].mxu1  ;;  %v7055_v58 = vpop.f32.mrb[44].mxu0 }
 0x9e5   : > { %v6227_v11 = vpack.c.bf16 %v7019_v39, %v7019_v39  ;;  %v6259_v30 = vpack.c.bf16 %v7055_v58, %v7055_v58  ;;  %v4278_v14 = vpop.f32.mrb[13].mxu1  ;;  %v4616_v54 = vpop.f32.mrb[45].mxu0 }
 0x9e6   : > { %v6225_v37 = vpack.c.bf16 %v4278_v14, %v4278_v14  ;;  %v6257_v45 = vpack.c.bf16 %v4616_v54, %v4616_v54  ;;  %v7020_v5 = vpop.f32.mrb[14].mxu1  ;;  %v7056_v18 = vpop.f32.mrb[46].mxu0 }
 0x9e7   : > { %4524 = vst.msk [vmem:[%s8823_s21 + $0x18] sm:$0xf] %vm4517_vm2, %v6227_v11  ;;  %4861 = vst.msk [vmem:[%s8829_s3 + $0x18] sm:$0xf] %vm4517_vm2, %v6259_v30  ;;  %v6228_v17 = vpack.c.bf16 %v7020_v5, %v7020_v5  ;;  %v6260_v4 = vpack.c.bf16 %v7056_v18, %v7056_v18  ;;  %v4281_v2 = vpop.f32.mrb[15].mxu1  ;;  %v4619_v10 = vpop.f32.mrb[47].mxu0 }
 0x9e8   : > { %4522 = vst.msk [vmem:[%s8823_s21 + $0x10] sm:$0xf] %vm4517_vm2, %v6225_v37  ;;  %4859 = vst.msk [vmem:[%s8829_s3 + $0x10] sm:$0xf] %vm4517_vm2, %v6257_v45  ;;  %v6226_v12 = vpack.c.bf16 %v4281_v2, %v4281_v2  ;;  %v6258_v38 = vpack.c.bf16 %v4619_v10, %v4619_v10 }
 0x9e9   : > { %4525 = vst.msk [vmem:[%s8823_s21 + $0x1c] sm:$0xf] %vm4517_vm2, %v6228_v17  ;;  %4862 = vst.msk [vmem:[%s8829_s3 + $0x1c] sm:$0xf] %vm4517_vm2, %v6260_v4 }
 0x9ea   : > { %4523 = vst.msk [vmem:[%s8823_s21 + $0x14] sm:$0xf] %vm4517_vm2, %v6226_v12  ;;  %4860 = vst.msk [vmem:[%s8829_s3 + $0x14] sm:$0xf] %vm4517_vm2, %v6258_v38 }
 0x9ec   : > { %v7023_v16 = vpop.f32.mrb[16].mxu1  ;;  %v7059_v7 = vpop.f32.mrb[48].mxu0 }
 0x9ed   : > { %v6231_v48 = vpack.c.bf16 %v7023_v16, %v7023_v16  ;;  %v6263_v32 = vpack.c.bf16 %v7059_v7, %v7059_v7  ;;  %v4294_v42 = vpop.f32.mrb[17].mxu1  ;;  %v4632_v35 = vpop.f32.mrb[49].mxu0 }
 0x9ee   : > { %v6229_v23 = vpack.c.bf16 %v4294_v42, %v4294_v42  ;;  %v6261_v8 = vpack.c.bf16 %v4632_v35, %v4632_v35  ;;  %v7024_v61 = vpop.f32.mrb[18].mxu1  ;;  %v7060_v3 = vpop.f32.mrb[50].mxu0 }
 0x9ef   : > { %4528 = vst.msk [vmem:[%s8823_s21 + $0x28] sm:$0xf] %vm4517_vm2, %v6231_v48  ;;  %4865 = vst.msk [vmem:[%s8829_s3 + $0x28] sm:$0xf] %vm4517_vm2, %v6263_v32  ;;  %v6232_v51 = vpack.c.bf16 %v7024_v61, %v7024_v61  ;;  %v6264_v26 = vpack.c.bf16 %v7060_v3, %v7060_v3  ;;  %v4297_v49 = vpop.f32.mrb[19].mxu1  ;;  %v4635_v52 = vpop.f32.mrb[51].mxu0 }
 0x9f0   : > { %4526 = vst.msk [vmem:[%s8823_s21 + $0x20] sm:$0xf] %vm4517_vm2, %v6229_v23  ;;  %4863 = vst.msk [vmem:[%s8829_s3 + $0x20] sm:$0xf] %vm4517_vm2, %v6261_v8  ;;  %v6230_v57 = vpack.c.bf16 %v4297_v49, %v4297_v49  ;;  %v6262_v41 = vpack.c.bf16 %v4635_v52, %v4635_v52 }
 0x9f1   : > { %4529 = vst.msk [vmem:[%s8823_s21 + $0x2c] sm:$0xf] %vm4517_vm2, %v6232_v51  ;;  %4866 = vst.msk [vmem:[%s8829_s3 + $0x2c] sm:$0xf] %vm4517_vm2, %v6264_v26 }
 0x9f2   : > { %4527 = vst.msk [vmem:[%s8823_s21 + $0x24] sm:$0xf] %vm4517_vm2, %v6230_v57  ;;  %4864 = vst.msk [vmem:[%s8829_s3 + $0x24] sm:$0xf] %vm4517_vm2, %v6262_v41 }
 0x9f4   : > { %v7027_v0 = vpop.f32.mrb[20].mxu1  ;;  %v7063_v63 = vpop.f32.mrb[52].mxu0 }
 0x9f5   : > { %v6235_v29 = vpack.c.bf16 %v7027_v0, %v7027_v0  ;;  %v6267_v43 = vpack.c.bf16 %v7063_v63, %v7063_v63  ;;  %v4310_v56 = vpop.f32.mrb[21].mxu1  ;;  %v4648_v50 = vpop.f32.mrb[53].mxu0 }
 0x9f6   : > { %v6233_v21 = vpack.c.bf16 %v4310_v56, %v4310_v56  ;;  %v6265_v25 = vpack.c.bf16 %v4648_v50, %v4648_v50  ;;  %v7028_v44 = vpop.f32.mrb[22].mxu1  ;;  %v7064_v34 = vpop.f32.mrb[54].mxu0 }
 0x9f7   : > { %4532 = vst.msk [vmem:[%s8823_s21 + $0x38] sm:$0xf] %vm4517_vm2, %v6235_v29  ;;  %4869 = vst.msk [vmem:[%s8829_s3 + $0x38] sm:$0xf] %vm4517_vm2, %v6267_v43  ;;  %v6236_v13 = vpack.c.bf16 %v7028_v44, %v7028_v44  ;;  %v6268_v33 = vpack.c.bf16 %v7064_v34, %v7064_v34  ;;  %v4313_v53 = vpop.f32.mrb[23].mxu1  ;;  %v4651_v36 = vpop.f32.mrb[55].mxu0 }
 0x9f8   : > { %4530 = vst.msk [vmem:[%s8823_s21 + $0x30] sm:$0xf] %vm4517_vm2, %v6233_v21  ;;  %4867 = vst.msk [vmem:[%s8829_s3 + $0x30] sm:$0xf] %vm4517_vm2, %v6265_v25  ;;  %v6234_v59 = vpack.c.bf16 %v4313_v53, %v4313_v53  ;;  %v6266_v28 = vpack.c.bf16 %v4651_v36, %v4651_v36 }
 0x9f9   : > { %4533 = vst.msk [vmem:[%s8823_s21 + $0x3c] sm:$0xf] %vm4517_vm2, %v6236_v13  ;;  %4870 = vst.msk [vmem:[%s8829_s3 + $0x3c] sm:$0xf] %vm4517_vm2, %v6268_v33 }
 0x9fa   : > { %4531 = vst.msk [vmem:[%s8823_s21 + $0x34] sm:$0xf] %vm4517_vm2, %v6234_v59  ;;  %4868 = vst.msk [vmem:[%s8829_s3 + $0x34] sm:$0xf] %vm4517_vm2, %v6266_v28 }
 0x9fc   : > { %v7031_v60 = vpop.f32.mrb[24].mxu1  ;;  %v7067_v20 = vpop.f32.mrb[56].mxu0 }
 0x9fd   : > { %v6239_v24 = vpack.c.bf16 %v7031_v60, %v7031_v60  ;;  %v6271_v47 = vpack.c.bf16 %v7067_v20, %v7067_v20  ;;  %v4326_v9 = vpop.f32.mrb[25].mxu1  ;;  %v4664_v22 = vpop.f32.mrb[57].mxu0 }
 0x9fe   : > { %v6237_v55 = vpack.c.bf16 %v4326_v9, %v4326_v9  ;;  %v6269_v6 = vpack.c.bf16 %v4664_v22, %v4664_v22  ;;  %v7032_v27 = vpop.f32.mrb[26].mxu1  ;;  %v7068_v1 = vpop.f32.mrb[58].mxu0 }
 0x9ff   : > { %4536 = vst.msk [vmem:[%s8823_s21 + $0x48] sm:$0xf] %vm4517_vm2, %v6239_v24  ;;  %4873 = vst.msk [vmem:[%s8829_s3 + $0x48] sm:$0xf] %vm4517_vm2, %v6271_v47  ;;  %v6240_v31 = vpack.c.bf16 %v7032_v27, %v7032_v27  ;;  %v6272_v19 = vpack.c.bf16 %v7068_v1, %v7068_v1  ;;  %v4329_v40 = vpop.f32.mrb[27].mxu1  ;;  %v4667_v46 = vpop.f32.mrb[59].mxu0 }
 0xa00   : > { %4534 = vst.msk [vmem:[%s8823_s21 + $0x40] sm:$0xf] %vm4517_vm2, %v6237_v55  ;;  %4871 = vst.msk [vmem:[%s8829_s3 + $0x40] sm:$0xf] %vm4517_vm2, %v6269_v6  ;;  %v6238_v62 = vpack.c.bf16 %v4329_v40, %v4329_v40  ;;  %v6270_v15 = vpack.c.bf16 %v4667_v46, %v4667_v46 }
 0xa01   : > { %4537 = vst.msk [vmem:[%s8823_s21 + $0x4c] sm:$0xf] %vm4517_vm2, %v6240_v31  ;;  %4874 = vst.msk [vmem:[%s8829_s3 + $0x4c] sm:$0xf] %vm4517_vm2, %v6272_v19 }
 0xa02   : > { %4535 = vst.msk [vmem:[%s8823_s21 + $0x44] sm:$0xf] %vm4517_vm2, %v6238_v62  ;;  %4872 = vst.msk [vmem:[%s8829_s3 + $0x44] sm:$0xf] %vm4517_vm2, %v6270_v15 }
 0xa04   : > { %v7035_v39 = vpop.f32.mrb[28].mxu1  ;;  %v7071_v58 = vpop.f32.mrb[60].mxu0 }
 0xa05   : > { %v6243_v11 = vpack.c.bf16 %v7035_v39, %v7035_v39  ;;  %v6275_v30 = vpack.c.bf16 %v7071_v58, %v7071_v58  ;;  %v4342_v14 = vpop.f32.mrb[29].mxu1  ;;  %v4680_v54 = vpop.f32.mrb[61].mxu0 }
 0xa06   : > { %v6241_v37 = vpack.c.bf16 %v4342_v14, %v4342_v14  ;;  %v6273_v45 = vpack.c.bf16 %v4680_v54, %v4680_v54  ;;  %v7036_v5 = vpop.f32.mrb[30].mxu1  ;;  %v7072_v18 = vpop.f32.mrb[62].mxu0 }
 0xa07   : > { %4540 = vst.msk [vmem:[%s8823_s21 + $0x58] sm:$0xf] %vm4517_vm2, %v6243_v11  ;;  %4877 = vst.msk [vmem:[%s8829_s3 + $0x58] sm:$0xf] %vm4517_vm2, %v6275_v30  ;;  %v6244_v17 = vpack.c.bf16 %v7036_v5, %v7036_v5  ;;  %v6276_v4 = vpack.c.bf16 %v7072_v18, %v7072_v18  ;;  %v4345_v2 = vpop.f32.mrb[31].mxu1  ;;  %v4683_v10 = vpop.f32.mrb[63].mxu0 }
 0xa08   : > { %4538 = vst.msk [vmem:[%s8823_s21 + $0x50] sm:$0xf] %vm4517_vm2, %v6241_v37  ;;  %4875 = vst.msk [vmem:[%s8829_s3 + $0x50] sm:$0xf] %vm4517_vm2, %v6273_v45  ;;  %v6242_v12 = vpack.c.bf16 %v4345_v2, %v4345_v2  ;;  %v6274_v38 = vpack.c.bf16 %v4683_v10, %v4683_v10 }
 0xa09   : > { %4541 = vst.msk [vmem:[%s8823_s21 + $0x5c] sm:$0xf] %vm4517_vm2, %v6244_v17  ;;  %4878 = vst.msk [vmem:[%s8829_s3 + $0x5c] sm:$0xf] %vm4517_vm2, %v6276_v4 }
 0xa0a   : > { %4539 = vst.msk [vmem:[%s8823_s21 + $0x54] sm:$0xf] %vm4517_vm2, %v6242_v12  ;;  %4876 = vst.msk [vmem:[%s8829_s3 + $0x54] sm:$0xf] %vm4517_vm2, %v6274_v38 }
 0xa0c   : > { %v7039_v16 = vpop.f32.mrb[32].mxu1  ;;  %v7075_v7 = vpop.f32.mrb[64].mxu0 }
 0xa0d   : > { %v6247_v48 = vpack.c.bf16 %v7039_v16, %v7039_v16  ;;  %v6279_v32 = vpack.c.bf16 %v7075_v7, %v7075_v7  ;;  %v4358_v42 = vpop.f32.mrb[33].mxu1  ;;  %v4696_v35 = vpop.f32.mrb[65].mxu0 }
 0xa0e   : > { %v6245_v23 = vpack.c.bf16 %v4358_v42, %v4358_v42  ;;  %v6277_v8 = vpack.c.bf16 %v4696_v35, %v4696_v35  ;;  %v7040_v61 = vpop.f32.mrb[34].mxu1  ;;  %v7076_v3 = vpop.f32.mrb[66].mxu0 }
 0xa0f   : > { %4544 = vst.msk [vmem:[%s8823_s21 + $0x68] sm:$0xf] %vm4517_vm2, %v6247_v48  ;;  %4881 = vst.msk [vmem:[%s8829_s3 + $0x68] sm:$0xf] %vm4517_vm2, %v6279_v32  ;;  %v6248_v51 = vpack.c.bf16 %v7040_v61, %v7040_v61  ;;  %v6280_v26 = vpack.c.bf16 %v7076_v3, %v7076_v3  ;;  %v4361_v49 = vpop.f32.mrb[35].mxu1  ;;  %v4699_v52 = vpop.f32.mrb[67].mxu0 }
 0xa10   : > { %4542 = vst.msk [vmem:[%s8823_s21 + $0x60] sm:$0xf] %vm4517_vm2, %v6245_v23  ;;  %4879 = vst.msk [vmem:[%s8829_s3 + $0x60] sm:$0xf] %vm4517_vm2, %v6277_v8  ;;  %v6246_v57 = vpack.c.bf16 %v4361_v49, %v4361_v49  ;;  %v6278_v41 = vpack.c.bf16 %v4699_v52, %v4699_v52 }
 0xa11   : > { %4545 = vst.msk [vmem:[%s8823_s21 + $0x6c] sm:$0xf] %vm4517_vm2, %v6248_v51  ;;  %4882 = vst.msk [vmem:[%s8829_s3 + $0x6c] sm:$0xf] %vm4517_vm2, %v6280_v26 }
 0xa12   : > { %4543 = vst.msk [vmem:[%s8823_s21 + $0x64] sm:$0xf] %vm4517_vm2, %v6246_v57  ;;  %4880 = vst.msk [vmem:[%s8829_s3 + $0x64] sm:$0xf] %vm4517_vm2, %v6278_v41 }
 0xa14   : > { %v7043_v0 = vpop.f32.mrb[36].mxu1  ;;  %v7079_v63 = vpop.f32.mrb[68].mxu0 }
 0xa15   : > { %v6251_v29 = vpack.c.bf16 %v7043_v0, %v7043_v0  ;;  %v6283_v43 = vpack.c.bf16 %v7079_v63, %v7079_v63  ;;  %v4374_v56 = vpop.f32.mrb[37].mxu1  ;;  %v4712_v50 = vpop.f32.mrb[69].mxu0 }
 0xa16   : > { %v6249_v21 = vpack.c.bf16 %v4374_v56, %v4374_v56  ;;  %v6281_v25 = vpack.c.bf16 %v4712_v50, %v4712_v50  ;;  %v7044_v44 = vpop.f32.mrb[38].mxu1  ;;  %v7080_v34 = vpop.f32.mrb[70].mxu0 }
 0xa17   : > { %4548 = vst.msk [vmem:[%s8823_s21 + $0x78] sm:$0xf] %vm4517_vm2, %v6251_v29  ;;  %4885 = vst.msk [vmem:[%s8829_s3 + $0x78] sm:$0xf] %vm4517_vm2, %v6283_v43  ;;  %v6252_v13 = vpack.c.bf16 %v7044_v44, %v7044_v44  ;;  %v6284_v33 = vpack.c.bf16 %v7080_v34, %v7080_v34  ;;  %v4377_v53 = vpop.f32.mrb[39].mxu1  ;;  %v4715_v36 = vpop.f32.mrb[71].mxu0 }
 0xa18   : > { %4546 = vst.msk [vmem:[%s8823_s21 + $0x70] sm:$0xf] %vm4517_vm2, %v6249_v21  ;;  %4883 = vst.msk [vmem:[%s8829_s3 + $0x70] sm:$0xf] %vm4517_vm2, %v6281_v25  ;;  %v6250_v59 = vpack.c.bf16 %v4377_v53, %v4377_v53  ;;  %v6282_v28 = vpack.c.bf16 %v4715_v36, %v4715_v36 }
 0xa19   : > { %4549 = vst.msk [vmem:[%s8823_s21 + $0x7c] sm:$0xf] %vm4517_vm2, %v6252_v13  ;;  %4886 = vst.msk [vmem:[%s8829_s3 + $0x7c] sm:$0xf] %vm4517_vm2, %v6284_v33 }
 0xa1a   : > { %4547 = vst.msk [vmem:[%s8823_s21 + $0x74] sm:$0xf] %vm4517_vm2, %v6250_v59  ;;  %4884 = vst.msk [vmem:[%s8829_s3 + $0x74] sm:$0xf] %vm4517_vm2, %v6282_v28 }
 0xa1c   : > { %v7087_v60 = vpop.f32.mrb[40].mxu1  ;;  %v7127_v20 = vpop.f32.mrb[72].mxu0 }
 0xa1d   : > { %v6287_v24 = vpack.c.bf16 %v7087_v60, %v7087_v60  ;;  %v4937_v47 = vpop.f32.mrb[41].mxu1  ;;  %v6319_v9 = vpack.c.bf16 %v7127_v20, %v7127_v20  ;;  %v5371_v22 = vpop.f32.mrb[73].mxu0 }
 0xa1e   : > { %v6285_v55 = vpack.c.bf16 %v4937_v47, %v4937_v47  ;;  %v7088_v6 = vpop.f32.mrb[42].mxu1  ;;  %v6317_v27 = vpack.c.bf16 %v5371_v22, %v5371_v22  ;;  %v7128_v1 = vpop.f32.mrb[74].mxu0 }
 0xa1f   : > { %5194 = vst.msk [vmem:[%s8969_s24 + $0x8] sm:$0xf] %vm4517_vm2, %v6287_v24  ;;  %v6288_v31 = vpack.c.bf16 %v7088_v6, %v7088_v6  ;;  %v4940_v19 = vpop.f32.mrb[43].mxu1  ;;  %5500 = vst.msk [vmem:[%s8963_s27 + $0x8] sm:$0xf] %vm4517_vm2, %v6319_v9  ;;  %v6320_v40 = vpack.c.bf16 %v7128_v1, %v7128_v1  ;;  %v5374_v46 = vpop.f32.mrb[75].mxu0 }
 0xa20   : > { %5192 = vst.msk [vmem:[%s8969_s24] sm:$0xf] %vm4517_vm2, %v6285_v55  ;;  %v6286_v62 = vpack.c.bf16 %v4940_v19, %v4940_v19  ;;  %5498 = vst.msk [vmem:[%s8963_s27] sm:$0xf] %vm4517_vm2, %v6317_v27  ;;  %v6318_v15 = vpack.c.bf16 %v5374_v46, %v5374_v46 }
 0xa21   : > { %5195 = vst.msk [vmem:[%s8969_s24 + $0xc] sm:$0xf] %vm4517_vm2, %v6288_v31  ;;  %5501 = vst.msk [vmem:[%s8963_s27 + $0xc] sm:$0xf] %vm4517_vm2, %v6320_v40 }
 0xa22   : > { %5193 = vst.msk [vmem:[%s8969_s24 + $0x4] sm:$0xf] %vm4517_vm2, %v6286_v62  ;;  %5499 = vst.msk [vmem:[%s8963_s27 + $0x4] sm:$0xf] %vm4517_vm2, %v6318_v15 }
 0xa24   : > { %v7091_v39 = vpop.f32.mrb[44].mxu1  ;;  %v7131_v58 = vpop.f32.mrb[76].mxu0 }
 0xa25   : > { %v6291_v11 = vpack.c.bf16 %v7091_v39, %v7091_v39  ;;  %v4953_v30 = vpop.f32.mrb[45].mxu1  ;;  %v6323_v14 = vpack.c.bf16 %v7131_v58, %v7131_v58  ;;  %v5387_v54 = vpop.f32.mrb[77].mxu0 }
 0xa26   : > { %v6289_v37 = vpack.c.bf16 %v4953_v30, %v4953_v30  ;;  %v7092_v45 = vpop.f32.mrb[46].mxu1  ;;  %v6321_v5 = vpack.c.bf16 %v5387_v54, %v5387_v54  ;;  %v7132_v18 = vpop.f32.mrb[78].mxu0 }
 0xa27   : > { %5198 = vst.msk [vmem:[%s8969_s24 + $0x18] sm:$0xf] %vm4517_vm2, %v6291_v11  ;;  %v6292_v17 = vpack.c.bf16 %v7092_v45, %v7092_v45  ;;  %v4956_v4 = vpop.f32.mrb[47].mxu1  ;;  %5504 = vst.msk [vmem:[%s8963_s27 + $0x18] sm:$0xf] %vm4517_vm2, %v6323_v14  ;;  %v6324_v2 = vpack.c.bf16 %v7132_v18, %v7132_v18  ;;  %v5390_v10 = vpop.f32.mrb[79].mxu0 }
 0xa28   : > { %5196 = vst.msk [vmem:[%s8969_s24 + $0x10] sm:$0xf] %vm4517_vm2, %v6289_v37  ;;  %v6290_v12 = vpack.c.bf16 %v4956_v4, %v4956_v4  ;;  %5502 = vst.msk [vmem:[%s8963_s27 + $0x10] sm:$0xf] %vm4517_vm2, %v6321_v5  ;;  %v6322_v38 = vpack.c.bf16 %v5390_v10, %v5390_v10 }
 0xa29   : > { %5199 = vst.msk [vmem:[%s8969_s24 + $0x1c] sm:$0xf] %vm4517_vm2, %v6292_v17  ;;  %5505 = vst.msk [vmem:[%s8963_s27 + $0x1c] sm:$0xf] %vm4517_vm2, %v6324_v2 }
 0xa2a   : > { %5197 = vst.msk [vmem:[%s8969_s24 + $0x14] sm:$0xf] %vm4517_vm2, %v6290_v12  ;;  %5503 = vst.msk [vmem:[%s8963_s27 + $0x14] sm:$0xf] %vm4517_vm2, %v6322_v38 }
 0xa2c   : > { %v7095_v16 = vpop.f32.mrb[48].mxu1  ;;  %v7135_v7 = vpop.f32.mrb[80].mxu0 }
 0xa2d   : > { %v6295_v48 = vpack.c.bf16 %v7095_v16, %v7095_v16  ;;  %v4969_v32 = vpop.f32.mrb[49].mxu1  ;;  %v6327_v42 = vpack.c.bf16 %v7135_v7, %v7135_v7  ;;  %v5403_v35 = vpop.f32.mrb[81].mxu0 }
 0xa2e   : > { %v6293_v23 = vpack.c.bf16 %v4969_v32, %v4969_v32  ;;  %v7096_v8 = vpop.f32.mrb[50].mxu1  ;;  %v6325_v61 = vpack.c.bf16 %v5403_v35, %v5403_v35  ;;  %v7136_v3 = vpop.f32.mrb[82].mxu0 }
 0xa2f   : > { %5202 = vst.msk [vmem:[%s8969_s24 + $0x28] sm:$0xf] %vm4517_vm2, %v6295_v48  ;;  %v6296_v51 = vpack.c.bf16 %v7096_v8, %v7096_v8  ;;  %v4972_v26 = vpop.f32.mrb[51].mxu1  ;;  %5508 = vst.msk [vmem:[%s8963_s27 + $0x28] sm:$0xf] %vm4517_vm2, %v6327_v42  ;;  %v6328_v49 = vpack.c.bf16 %v7136_v3, %v7136_v3  ;;  %v5406_v52 = vpop.f32.mrb[83].mxu0 }
 0xa30   : > { %5200 = vst.msk [vmem:[%s8969_s24 + $0x20] sm:$0xf] %vm4517_vm2, %v6293_v23  ;;  %v6294_v57 = vpack.c.bf16 %v4972_v26, %v4972_v26  ;;  %5506 = vst.msk [vmem:[%s8963_s27 + $0x20] sm:$0xf] %vm4517_vm2, %v6325_v61  ;;  %v6326_v41 = vpack.c.bf16 %v5406_v52, %v5406_v52 }
 0xa31   : > { %5203 = vst.msk [vmem:[%s8969_s24 + $0x2c] sm:$0xf] %vm4517_vm2, %v6296_v51  ;;  %5509 = vst.msk [vmem:[%s8963_s27 + $0x2c] sm:$0xf] %vm4517_vm2, %v6328_v49 }
 0xa32   : > { %5201 = vst.msk [vmem:[%s8969_s24 + $0x24] sm:$0xf] %vm4517_vm2, %v6294_v57  ;;  %5507 = vst.msk [vmem:[%s8963_s27 + $0x24] sm:$0xf] %vm4517_vm2, %v6326_v41 }
 0xa34   : > { %v7099_v0 = vpop.f32.mrb[52].mxu1  ;;  %v7139_v63 = vpop.f32.mrb[84].mxu0 }
 0xa35   : > { %v6299_v29 = vpack.c.bf16 %v7099_v0, %v7099_v0  ;;  %v4985_v43 = vpop.f32.mrb[53].mxu1  ;;  %v6331_v56 = vpack.c.bf16 %v7139_v63, %v7139_v63  ;;  %v5419_v50 = vpop.f32.mrb[85].mxu0 }
 0xa36   : > { %v6297_v21 = vpack.c.bf16 %v4985_v43, %v4985_v43  ;;  %v7100_v25 = vpop.f32.mrb[54].mxu1  ;;  %v6329_v44 = vpack.c.bf16 %v5419_v50, %v5419_v50  ;;  %v7140_v34 = vpop.f32.mrb[86].mxu0 }
 0xa37   : > { %5206 = vst.msk [vmem:[%s8969_s24 + $0x38] sm:$0xf] %vm4517_vm2, %v6299_v29  ;;  %v6300_v13 = vpack.c.bf16 %v7100_v25, %v7100_v25  ;;  %v4988_v33 = vpop.f32.mrb[55].mxu1  ;;  %5512 = vst.msk [vmem:[%s8963_s27 + $0x38] sm:$0xf] %vm4517_vm2, %v6331_v56  ;;  %v6332_v53 = vpack.c.bf16 %v7140_v34, %v7140_v34  ;;  %v5422_v36 = vpop.f32.mrb[87].mxu0 }
 0xa38   : > { %5204 = vst.msk [vmem:[%s8969_s24 + $0x30] sm:$0xf] %vm4517_vm2, %v6297_v21  ;;  %v6298_v59 = vpack.c.bf16 %v4988_v33, %v4988_v33  ;;  %5510 = vst.msk [vmem:[%s8963_s27 + $0x30] sm:$0xf] %vm4517_vm2, %v6329_v44  ;;  %v6330_v28 = vpack.c.bf16 %v5422_v36, %v5422_v36 }
 0xa39   : > { %5207 = vst.msk [vmem:[%s8969_s24 + $0x3c] sm:$0xf] %vm4517_vm2, %v6300_v13  ;;  %5513 = vst.msk [vmem:[%s8963_s27 + $0x3c] sm:$0xf] %vm4517_vm2, %v6332_v53 }
 0xa3a   : > { %5205 = vst.msk [vmem:[%s8969_s24 + $0x34] sm:$0xf] %vm4517_vm2, %v6298_v59  ;;  %5511 = vst.msk [vmem:[%s8963_s27 + $0x34] sm:$0xf] %vm4517_vm2, %v6330_v28 }
 0xa3c   : > { %v7103_v60 = vpop.f32.mrb[56].mxu1 }
 0xa3d   : > { %v6303_v20 = vpack.c.bf16 %v7103_v60, %v7103_v60  ;;  %v5001_v24 = vpop.f32.mrb[57].mxu1 }
 0xa3e   : > { %v6301_v47 = vpack.c.bf16 %v5001_v24, %v5001_v24  ;;  %v7104_v9 = vpop.f32.mrb[58].mxu1 }
 0xa3f   : > { %5210 = vst.msk [vmem:[%s8969_s24 + $0x48] sm:$0xf] %vm4517_vm2, %v6303_v20  ;;  %v6304_v22 = vpack.c.bf16 %v7104_v9, %v7104_v9  ;;  %v5004_v55 = vpop.f32.mrb[59].mxu1 }
 0xa40   : > { %5208 = vst.msk [vmem:[%s8969_s24 + $0x40] sm:$0xf] %vm4517_vm2, %v6301_v47  ;;  %v6302_v6 = vpack.c.bf16 %v5004_v55, %v5004_v55 }
 0xa41   : > { %5211 = vst.msk [vmem:[%s8969_s24 + $0x4c] sm:$0xf] %vm4517_vm2, %v6304_v22 }
 0xa42   : > { %5209 = vst.msk [vmem:[%s8969_s24 + $0x44] sm:$0xf] %vm4517_vm2, %v6302_v6 }
 0xa44   : > { %v7107_v27 = vpop.f32.mrb[60].mxu1 }
 0xa45   : > { %v6307_v1 = vpack.c.bf16 %v7107_v27, %v7107_v27  ;;  %v5017_v31 = vpop.f32.mrb[61].mxu1 }
 0xa46   : > { %v6305_v19 = vpack.c.bf16 %v5017_v31, %v5017_v31  ;;  %v7108_v40 = vpop.f32.mrb[62].mxu1 }
 0xa47   : > { %5214 = vst.msk [vmem:[%s8969_s24 + $0x58] sm:$0xf] %vm4517_vm2, %v6307_v1  ;;  %v6308_v46 = vpack.c.bf16 %v7108_v40, %v7108_v40  ;;  %v5020_v62 = vpop.f32.mrb[63].mxu1 }
 0xa48   : > { %5212 = vst.msk [vmem:[%s8969_s24 + $0x50] sm:$0xf] %vm4517_vm2, %v6305_v19  ;;  %v6306_v15 = vpack.c.bf16 %v5020_v62, %v5020_v62 }
 0xa49   : > { %5215 = vst.msk [vmem:[%s8969_s24 + $0x5c] sm:$0xf] %vm4517_vm2, %v6308_v46 }
 0xa4a   : > { %5213 = vst.msk [vmem:[%s8969_s24 + $0x54] sm:$0xf] %vm4517_vm2, %v6306_v15 }
 0xa4c   : > { %v7111_v39 = vpop.f32.mrb[64].mxu1 }
 0xa4d   : > { %v6311_v58 = vpack.c.bf16 %v7111_v39, %v7111_v39  ;;  %v5033_v11 = vpop.f32.mrb[65].mxu1 }
 0xa4e   : > { %v6309_v30 = vpack.c.bf16 %v5033_v11, %v5033_v11  ;;  %v7112_v14 = vpop.f32.mrb[66].mxu1 }
 0xa4f   : > { %5218 = vst.msk [vmem:[%s8969_s24 + $0x68] sm:$0xf] %vm4517_vm2, %v6311_v58  ;;  %v6312_v54 = vpack.c.bf16 %v7112_v14, %v7112_v14  ;;  %v5036_v37 = vpop.f32.mrb[67].mxu1 }
 0xa50   : > { %5216 = vst.msk [vmem:[%s8969_s24 + $0x60] sm:$0xf] %vm4517_vm2, %v6309_v30  ;;  %v6310_v45 = vpack.c.bf16 %v5036_v37, %v5036_v37 }
 0xa51   : > { %5219 = vst.msk [vmem:[%s8969_s24 + $0x6c] sm:$0xf] %vm4517_vm2, %v6312_v54 }
 0xa52   : > { %5217 = vst.msk [vmem:[%s8969_s24 + $0x64] sm:$0xf] %vm4517_vm2, %v6310_v45 }
 0xa54   : > { %v7115_v5 = vpop.f32.mrb[68].mxu1 }
 0xa55   : > { %v6315_v18 = vpack.c.bf16 %v7115_v5, %v7115_v5  ;;  %v5049_v17 = vpop.f32.mrb[69].mxu1 }
 0xa56   : > { %v6313_v4 = vpack.c.bf16 %v5049_v17, %v5049_v17  ;;  %v7116_v2 = vpop.f32.mrb[70].mxu1 }
 0xa57   : > { %5222 = vst.msk [vmem:[%s8969_s24 + $0x78] sm:$0xf] %vm4517_vm2, %v6315_v18  ;;  %v6316_v10 = vpack.c.bf16 %v7116_v2, %v7116_v2  ;;  %v5052_v12 = vpop.f32.mrb[71].mxu1 }
 0xa58   : > { %5220 = vst.msk [vmem:[%s8969_s24 + $0x70] sm:$0xf] %vm4517_vm2, %v6313_v4  ;;  %v6314_v38 = vpack.c.bf16 %v5052_v12, %v5052_v12 }
 0xa59   : > { %5223 = vst.msk [vmem:[%s8969_s24 + $0x7c] sm:$0xf] %vm4517_vm2, %v6316_v10 }
 0xa5a   : > { %5221 = vst.msk [vmem:[%s8969_s24 + $0x74] sm:$0xf] %vm4517_vm2, %v6314_v38 }
 0xa5c   : > { %v7151_v16 = vpop.f32.mrb[72].mxu1 }
 0xa5d   : > { %v6335_v7 = vpack.c.bf16 %v7151_v16, %v7151_v16  ;;  %v5580_v48 = vpop.f32.mrb[73].mxu1 }
 0xa5e   : > { %v6333_v32 = vpack.c.bf16 %v5580_v48, %v5580_v48  ;;  %v7152_v42 = vpop.f32.mrb[74].mxu1 }
 0xa5f   : > { %5709 = vst.msk [vmem:[%s9071_s25 + $0x8] sm:$0xf] %vm4517_vm2, %v6335_v7  ;;  %v6336_v35 = vpack.c.bf16 %v7152_v42, %v7152_v42  ;;  %v5583_v23 = vpop.f32.mrb[75].mxu1 }
 0xa60   : > { %5707 = vst.msk [vmem:[%s9071_s25] sm:$0xf] %vm4517_vm2, %v6333_v32  ;;  %v6334_v8 = vpack.c.bf16 %v5583_v23, %v5583_v23 }
 0xa61   : > { %5710 = vst.msk [vmem:[%s9071_s25 + $0xc] sm:$0xf] %vm4517_vm2, %v6336_v35 }
 0xa62   : > { %5708 = vst.msk [vmem:[%s9071_s25 + $0x4] sm:$0xf] %vm4517_vm2, %v6334_v8 }
 0xa64   : > { %v7155_v61 = vpop.f32.mrb[76].mxu1 }
 0xa65   : > { %v6339_v3 = vpack.c.bf16 %v7155_v61, %v7155_v61  ;;  %v5596_v51 = vpop.f32.mrb[77].mxu1 }
 0xa66   : > { %v6337_v26 = vpack.c.bf16 %v5596_v51, %v5596_v51  ;;  %v7156_v49 = vpop.f32.mrb[78].mxu1 }
 0xa67   : > { %5713 = vst.msk [vmem:[%s9071_s25 + $0x18] sm:$0xf] %vm4517_vm2, %v6339_v3  ;;  %v6340_v52 = vpack.c.bf16 %v7156_v49, %v7156_v49  ;;  %v5599_v57 = vpop.f32.mrb[79].mxu1 }
 0xa68   : > { %5711 = vst.msk [vmem:[%s9071_s25 + $0x10] sm:$0xf] %vm4517_vm2, %v6337_v26  ;;  %v6338_v41 = vpack.c.bf16 %v5599_v57, %v5599_v57 }
 0xa69   : > { %5714 = vst.msk [vmem:[%s9071_s25 + $0x1c] sm:$0xf] %vm4517_vm2, %v6340_v52 }
 0xa6a   : > { %5712 = vst.msk [vmem:[%s9071_s25 + $0x14] sm:$0xf] %vm4517_vm2, %v6338_v41 }
 0xa6c   : > { %v7159_v0 = vpop.f32.mrb[80].mxu1 }
 0xa6d   : > { %v6343_v63 = vpack.c.bf16 %v7159_v0, %v7159_v0  ;;  %v5612_v29 = vpop.f32.mrb[81].mxu1 }
 0xa6e   : > { %v6341_v43 = vpack.c.bf16 %v5612_v29, %v5612_v29  ;;  %v7160_v56 = vpop.f32.mrb[82].mxu1 }
 0xa6f   : > { %5717 = vst.msk [vmem:[%s9071_s25 + $0x28] sm:$0xf] %vm4517_vm2, %v6343_v63  ;;  %v6344_v50 = vpack.c.bf16 %v7160_v56, %v7160_v56  ;;  %v5615_v21 = vpop.f32.mrb[83].mxu1 }
 0xa70   : > { %5715 = vst.msk [vmem:[%s9071_s25 + $0x20] sm:$0xf] %vm4517_vm2, %v6341_v43  ;;  %v6342_v25 = vpack.c.bf16 %v5615_v21, %v5615_v21 }
 0xa71   : > { %5718 = vst.msk [vmem:[%s9071_s25 + $0x2c] sm:$0xf] %vm4517_vm2, %v6344_v50 }
 0xa72   : > { %5716 = vst.msk [vmem:[%s9071_s25 + $0x24] sm:$0xf] %vm4517_vm2, %v6342_v25 }
 0xa74   : > { %v7163_v44 = vpop.f32.mrb[84].mxu1 }
 0xa75   : > { %v6347_v34 = vpack.c.bf16 %v7163_v44, %v7163_v44  ;;  %v5628_v13 = vpop.f32.mrb[85].mxu1 }
 0xa76   : > { %v6345_v33 = vpack.c.bf16 %v5628_v13, %v5628_v13  ;;  %v7164_v53 = vpop.f32.mrb[86].mxu1 }
 0xa77   : > { %5721 = vst.msk [vmem:[%s9071_s25 + $0x38] sm:$0xf] %vm4517_vm2, %v6347_v34  ;;  %v6348_v36 = vpack.c.bf16 %v7164_v53, %v7164_v53  ;;  %v5631_v59 = vpop.f32.mrb[87].mxu1 }
 0xa78   : > { %5719 = vst.msk [vmem:[%s9071_s25 + $0x30] sm:$0xf] %vm4517_vm2, %v6345_v33  ;;  %v6346_v28 = vpack.c.bf16 %v5631_v59, %v5631_v59 }
 0xa79   : > { %5722 = vst.msk [vmem:[%s9071_s25 + $0x3c] sm:$0xf] %vm4517_vm2, %v6348_v36 }
 0xa7a   : > { %5720 = vst.msk [vmem:[%s9071_s25 + $0x34] sm:$0xf] %vm4517_vm2, %v6346_v28 }
 0xa7b PF: > { %s31_s1 = sadd.s32 1, %s7550_s1  }
 0xa7c   : > { %p28_p4 = scmp.ge.s32.totalorder %s31_s1, 4  }
 0xa7e   :  { %30 = sbr.rel (!%p28_p4) target bundleno = 6 (0x6), region = 173 }

</bundles_post_ra>
